<compile_context>
chip_gen: v6e
topology: v6e:2x2x1
jax: 0.10.0
libtpu: 0.0.40
codegen_flags: <defaults>
</compile_context>

<pallas_src>
import math

import jax
import jax.numpy as jnp
from jax import lax
from jax.experimental import pallas as pl
from jax.experimental.pallas import tpu as pltpu

EPS = 1e-5  # PyTorch LayerNorm default


def _layer_norm(h, gamma, beta):
    mu = jnp.mean(h, axis=-1, keepdims=True)
    var = jnp.mean((h - mu) ** 2, axis=-1, keepdims=True)
    return (h - mu) * jax.lax.rsqrt(var + EPS) * gamma + beta


def _vmem_limit_bytes():
    try:
        cap = int(pltpu.get_tpu_info().vmem_capacity_bytes)
    except Exception:
        cap = 64 * 1024 * 1024  # conservative (v7x per-core physical VMEM)
    return max(32 * 1024 * 1024, min(100 * 1024 * 1024, (cap * 3) // 4))


# ----------------------------------------------------------------------------
# Fused encoder-layer kernel (both branches via the leading grid axis)
# ----------------------------------------------------------------------------
def _make_encoder_layer_kernel(tq, d_model, apply_final_norm):
    D = d_model

    def kernel(x_ref, wqkv_ref, wo_ref, w1_ref, b1_ref, w2_ref, b2_ref,
               ln1_g_ref, ln1_b_ref, ln2_g_ref, ln2_b_ref, *rest):
        if apply_final_norm:
            (fin_g_ref, fin_b_ref, x_out_ref, series_ref, q_s, k_s, v_s) = rest
        else:
            (x_out_ref, series_ref, q_s, k_s, v_s) = rest
            fin_g_ref = fin_b_ref = None

        qi = pl.program_id(2)
        scale = 1.0 / math.sqrt(D)

        # Fused QKV projection for the whole sequence, once per (branch, batch)
        # element; staged in bf16 VMEM scratch and reused by every query tile.
        @pl.when(qi == 0)
        def _():
            x_full = x_ref[0, 0].astype(jnp.bfloat16)                 # (L, D)
            qkv = jnp.dot(x_full, wqkv_ref[0],
                          preferred_element_type=jnp.float32)          # (L, 3D)
            qkv = qkv.astype(jnp.bfloat16)
            q_s[...] = qkv[:, :D]
            k_s[...] = qkv[:, D:2 * D]
            v_s[...] = qkv[:, 2 * D:]

        row0 = pl.multiple_of(qi * tq, tq)
        x_rows = x_ref[0, 0, pl.ds(row0, tq), :]                       # (TQ, D) f32
        q = q_s[pl.ds(row0, tq), :]                                    # (TQ, D) bf16

        # q @ k^T without materializing a transpose of K.
        scores = lax.dot_general(
            q, k_s[...], (((1,), (1,)), ((), ())),
            preferred_element_type=jnp.float32) * scale                # (TQ, L)
        scores = scores - jnp.max(scores, axis=-1, keepdims=True)
        p = jnp.exp(scores)
        series = p * pl.reciprocal(jnp.sum(p, axis=-1, keepdims=True),
                                   approx=True)                        # (TQ, L)

        attn = jnp.dot(series.astype(jnp.bfloat16), v_s[...],
                       preferred_element_type=jnp.float32)             # (TQ, D)
        o = jnp.dot(attn.astype(jnp.bfloat16), wo_ref[0],
                    preferred_element_type=jnp.float32)

        y = _layer_norm(x_rows + o, ln1_g_ref[0], ln1_b_ref[0])

        h = jnp.dot(y.astype(jnp.bfloat16), w1_ref[0],
                    preferred_element_type=jnp.float32) + b1_ref[0]
        h = jnp.maximum(h, 0.0)
        ffn = jnp.dot(h.astype(jnp.bfloat16), w2_ref[0],
                      preferred_element_type=jnp.float32) + b2_ref[0]

        z = _layer_norm(y + ffn, ln2_g_ref[0], ln2_b_ref[0])
        if apply_final_norm:
            z = _layer_norm(z, fin_g_ref[0], fin_b_ref[0])

        x_out_ref[0, 0] = z.astype(x_out_ref.dtype)
        series_ref[0, 0] = series.astype(series_ref.dtype)

    return kernel


def encoder_layer_pair(xs, p, final_norm=None, tq=None):
    """Run one attn_layer (local + global branch) over grid (2, B, L//TQ).

    xs: (2, B, L, D) stacked [local x, global x].
    p : per-layer params, each stacked on a leading axis of size 2.
    final_norm: optional {'gamma','beta'} of shape (2, 1, D) fused into this
                layer (used for the last layer = Encoder.norm / global_norm).
    """
    S, B, L, D = xs.shape
    Dff = p["w1"].shape[-1]
    if tq is None:
        tq = L if L <= 128 else 128
    if L % tq != 0:
        tq = L
    nq = L // tq
    apply_final = final_norm is not None

    kernel = _make_encoder_layer_kernel(tq, D, apply_final)

    def wmap(s, b, q):  # weights: constant across (b, q), selected by branch s
        return (s, 0, 0)

    in_specs = [
        pl.BlockSpec((1, 1, L, D), lambda s, b, q: (s, b, 0, 0)),  # xs (full seq)
        pl.BlockSpec((1, D, 3 * D), wmap),                         # wqkv
        pl.BlockSpec((1, D, D), wmap),                             # wo
        pl.BlockSpec((1, D, Dff), wmap),                           # w1
        pl.BlockSpec((1, 1, Dff), wmap),                           # b1
        pl.BlockSpec((1, Dff, D), wmap),                           # w2
        pl.BlockSpec((1, 1, D), wmap),                             # b2
        pl.BlockSpec((1, 1, D), wmap),                             # ln1_g
        pl.BlockSpec((1, 1, D), wmap),                             # ln1_b
        pl.BlockSpec((1, 1, D), wmap),                             # ln2_g
        pl.BlockSpec((1, 1, D), wmap),                             # ln2_b
    ]
    args = [xs, p["wqkv"], p["wo"], p["w1"], p["b1"], p["w2"], p["b2"],
            p["ln1_g"], p["ln1_b"], p["ln2_g"], p["ln2_b"]]
    if apply_final:
        in_specs += [pl.BlockSpec((1, 1, D), wmap),                # final gamma
                     pl.BlockSpec((1, 1, D), wmap)]                # final beta
        args += [final_norm["gamma"], final_norm["beta"]]

    out_specs = [
        pl.BlockSpec((1, 1, tq, D), lambda s, b, q: (s, b, q, 0)),
        pl.BlockSpec((1, 1, tq, L), lambda s, b, q: (s, b, q, 0)),
    ]
    out_shape = [
        jax.ShapeDtypeStruct((S, B, L, D), xs.dtype),
        jax.ShapeDtypeStruct((S, B, L, L), jnp.float32),
    ]

    flops = int(S * B * 2 * L * (4 * D * D + 2 * L * D + 2 * D * Dff))
    transcendentals = int(S * B * L * L)
    bytes_accessed = int(
        sum(int(a.size) * a.dtype.itemsize for a in args)
        + S * B * L * D * 4          # x_out writeback
        + S * B * L * L * 4)         # series writeback
    cost = pl.CostEstimate(flops=flops, transcendentals=transcendentals,
                           bytes_accessed=bytes_accessed)

    x_out, series = pl.pallas_call(
        kernel,
        grid=(S, B, nq),
        in_specs=in_specs,
        out_specs=out_specs,
        out_shape=out_shape,
        scratch_shapes=[pltpu.VMEM((L, D), jnp.bfloat16),   # q
                        pltpu.VMEM((L, D), jnp.bfloat16),   # k
                        pltpu.VMEM((L, D), jnp.bfloat16)],  # v
        compiler_params=pltpu.CompilerParams(
            dimension_semantics=("parallel", "parallel", "arbitrary"),
            vmem_limit_bytes=_vmem_limit_bytes()),
        cost_estimate=cost,
    )(*args)
    return x_out, series


# ----------------------------------------------------------------------------
# Standalone LayerNorm kernel (only needed when there are no attn_layers)
# ----------------------------------------------------------------------------
def _layernorm_kernel(x_ref, g_ref, b_ref, o_ref):
    o_ref[0] = _layer_norm(x_ref[0], g_ref[...], b_ref[...])


def layer_norm_call(x, p):
    B, L, D = x.shape
    return pl.pallas_call(
        _layernorm_kernel,
        grid=(B,),
        in_specs=[pl.BlockSpec((1, L, D), lambda b: (b, 0, 0)),
                  pl.BlockSpec((1, D), lambda b: (0, 0)),
                  pl.BlockSpec((1, D), lambda b: (0, 0))],
        out_specs=pl.BlockSpec((1, L, D), lambda b: (b, 0, 0)),
        out_shape=jax.ShapeDtypeStruct((B, L, D), x.dtype),
        compiler_params=pltpu.CompilerParams(
            dimension_semantics=("parallel",),
            vmem_limit_bytes=_vmem_limit_bytes()),
    )(x, p["gamma"], p["beta"])


# ----------------------------------------------------------------------------
# Encoder.forward
# ----------------------------------------------------------------------------
def encoder_forward(x, layer_params, norm_params, global_norm_params,
                    attn_mask=None):
    # TODO(synk): attn_mask — only the attn_mask=None path is implemented.
    xs = jnp.stack([x, x], axis=0)              # globalx starts equal to x
    local_series_list, global_series_list = [], []
    n = len(layer_params)

    final_norm = None
    if norm_params is not None:
        final_norm = {
            "gamma": jnp.stack([norm_params["gamma"],
                                global_norm_params["gamma"]], axis=0),
            "beta": jnp.stack([norm_params["beta"],
                               global_norm_params["beta"]], axis=0),
        }

    for i, lp in enumerate(layer_params):
        fuse = final_norm if (i == n - 1) else None   # fuse norm into last layer
        xs, series = encoder_layer_pair(xs, lp, final_norm=fuse)
        local_series_list.append(series[0])
        global_series_list.append(series[1])

    if n == 0 and norm_params is not None:
        return (layer_norm_call(xs[0], norm_params), [],
                layer_norm_call(xs[1], global_norm_params), [])

    return xs[0], local_series_list, xs[1], global_series_list


# ----------------------------------------------------------------------------
# Deterministic parameter initialisation (weights in bf16, stats params in f32)
# ----------------------------------------------------------------------------
def init_branch_params(key, d_model, d_ff):
    ks = jax.random.split(key, 4)
    s = 0.02
    f32, bf16 = jnp.float32, jnp.bfloat16
    return {
        "wqkv": (s * jax.random.normal(ks[0], (d_model, 3 * d_model), f32)).astype(bf16),
        "wo":   (s * jax.random.normal(ks[1], (d_model, d_model), f32)).astype(bf16),
        "w1":   (s * jax.random.normal(ks[2], (d_model, d_ff), f32)).astype(bf16),
        "b1":   jnp.zeros((1, d_ff), f32),
        "w2":   (s * jax.random.normal(ks[3], (d_ff, d_model), f32)).astype(bf16),
        "b2":   jnp.zeros((1, d_model), f32),
        "ln1_g": jnp.ones((1, d_model), f32),
        "ln1_b": jnp.zeros((1, d_model), f32),
        "ln2_g": jnp.ones((1, d_model), f32),
        "ln2_b": jnp.zeros((1, d_model), f32),
    }


def init_encoder_params(key, n_layers, d_model, d_ff):
    layers = []
    for i in range(n_layers):
        k_local, k_global = jax.random.split(jax.random.fold_in(key, i))
        loc = init_branch_params(k_local, d_model, d_ff)
        glb = init_branch_params(k_global, d_model, d_ff)
        layers.append({k: jnp.stack([loc[k], glb[k]], axis=0) for k in loc})
    norm = {"gamma": jnp.ones((1, d_model), jnp.float32),
            "beta": jnp.zeros((1, d_model), jnp.float32)}
    global_norm = {"gamma": jnp.ones((1, d_model), jnp.float32),
                   "beta": jnp.zeros((1, d_model), jnp.float32)}
    return layers, norm, global_norm


if __name__ == "__main__":
    # Small but lane-dense shapes (multiples of 128 on the last dims so stores
    # are unmasked and the query-tiling path (L // TQ = 2) is exercised).
    B, L, D, Dff = 2, 256, 128, 256
    n_layers = 2

    key = jax.random.PRNGKey(0)
    k_x, k_p = jax.random.split(key)
    x = jax.random.normal(k_x, (B, L, D), jnp.float32)

    layer_params, norm_params, global_norm_params = init_encoder_params(
        k_p, n_layers, D, Dff)

    fwd = jax.jit(encoder_forward)
    x_out, local_list, globalx_out, global_list = fwd(
        x, layer_params, norm_params, global_norm_params)

    jax.block_until_ready(x_out)
    jax.block_until_ready(globalx_out)
    for s in local_list + global_list:
        jax.block_until_ready(s)

    assert x_out.shape == (B, L, D)
    assert globalx_out.shape == (B, L, D)
    assert len(local_list) == n_layers and len(global_list) == n_layers
    assert all(s.shape == (B, L, L) for s in local_list + global_list)
    assert bool(jnp.all(jnp.isfinite(x_out)))
    assert bool(jnp.all(jnp.isfinite(globalx_out)))

    print("KERNEL_OK")
</pallas_src>

<mosaic_0001>
module attributes {stable_mosaic.version = 11 : i64} {
  func.func @kernel(%arg0: i32, %arg1: i32, %arg2: i32, %arg3: memref<1x1x256x128xf32, #tpu.memory_space<vmem>>, %arg4: memref<1x128x384xbf16, #tpu.memory_space<vmem>>, %arg5: memref<1x128x128xbf16, #tpu.memory_space<vmem>>, %arg6: memref<1x128x256xbf16, #tpu.memory_space<vmem>>, %arg7: memref<1x1x256xf32, #tpu.memory_space<vmem>>, %arg8: memref<1x256x128xbf16, #tpu.memory_space<vmem>>, %arg9: memref<1x1x128xf32, #tpu.memory_space<vmem>>, %arg10: memref<1x1x128xf32, #tpu.memory_space<vmem>>, %arg11: memref<1x1x128xf32, #tpu.memory_space<vmem>>, %arg12: memref<1x1x128xf32, #tpu.memory_space<vmem>>, %arg13: memref<1x1x128xf32, #tpu.memory_space<vmem>>, %arg14: memref<1x1x128xf32, #tpu.memory_space<vmem>>, %arg15: memref<1x1x128xf32, #tpu.memory_space<vmem>>, %arg16: memref<1x1x128x128xf32, #tpu.memory_space<vmem>>, %arg17: memref<1x1x128x256xf32, #tpu.memory_space<vmem>>, %arg18: memref<256x128xbf16, #tpu.memory_space<vmem>>, %arg19: memref<256x128xbf16, #tpu.memory_space<vmem>>, %arg20: memref<256x128xbf16, #tpu.memory_space<vmem>>) attributes {dimension_semantics = [#tpu.dimension_semantics<parallel>, #tpu.dimension_semantics<parallel>, #tpu.dimension_semantics<arbitrary>], iteration_bounds = array<i64: 2, 2, 2>, scalar_prefetch = 0 : i64, scratch_operands = 3 : i64, tpu.core_type = #tpu.core_type<tc>, window_params = [{transform_indices = @transform_0, window_bounds = array<i64: 1, 1, 256, 128>}, {transform_indices = @transform_1, window_bounds = array<i64: 1, 128, 384>}, {transform_indices = @transform_2, window_bounds = array<i64: 1, 128, 128>}, {transform_indices = @transform_3, window_bounds = array<i64: 1, 128, 256>}, {transform_indices = @transform_4, window_bounds = array<i64: 1, 1, 256>}, {transform_indices = @transform_5, window_bounds = array<i64: 1, 256, 128>}, {transform_indices = @transform_6, window_bounds = array<i64: 1, 1, 128>}, {transform_indices = @transform_7, window_bounds = array<i64: 1, 1, 128>}, {transform_indices = @transform_8, window_bounds = array<i64: 1, 1, 128>}, {transform_indices = @transform_9, window_bounds = array<i64: 1, 1, 128>}, {transform_indices = @transform_10, window_bounds = array<i64: 1, 1, 128>}, {transform_indices = @transform_11, window_bounds = array<i64: 1, 1, 128>}, {transform_indices = @transform_12, window_bounds = array<i64: 1, 1, 128>}, {transform_indices = @transform_13, window_bounds = array<i64: 1, 1, 128, 128>}, {transform_indices = @transform_14, window_bounds = array<i64: 1, 1, 128, 256>}]} {
    %c0_i32 = arith.constant 0 : i32
    %0 = arith.cmpi eq, %arg2, %c0_i32 : i32
    %1 = arith.extui %0 : i1 to i32
    %c0_i32_0 = arith.constant 0 : i32
    %2 = arith.cmpi ne, %1, %c0_i32_0 : i32
    scf.if %2 {
      %c0_72 = arith.constant 0 : index
      %c0_73 = arith.constant 0 : index
      %c0_74 = arith.constant 0 : index
      %c0_75 = arith.constant 0 : index
      %135 = vector.load %arg3[%c0_72, %c0_73, %c0_74, %c0_75] : memref<1x1x256x128xf32, #tpu.memory_space<vmem>>, vector<1x1x256x128xf32>
      %136 = vector.shape_cast %135 : vector<1x1x256x128xf32> to vector<256x128xf32>
      %137 = arith.truncf %136 : vector<256x128xf32> to vector<256x128xbf16>
      %c0_76 = arith.constant 0 : index
      %c0_77 = arith.constant 0 : index
      %c0_78 = arith.constant 0 : index
      %138 = vector.load %arg4[%c0_76, %c0_77, %c0_78] : memref<1x128x384xbf16, #tpu.memory_space<vmem>>, vector<1x128x384xbf16>
      %139 = vector.shape_cast %138 : vector<1x128x384xbf16> to vector<128x384xbf16>
      %cst_79 = arith.constant dense<0.000000e+00> : vector<256x384xf32>
      %140 = tpu.matmul %137, %139, %cst_79 {dimension_numbers = #tpu.dot_dimension_numbers<[1], [0], [0], [1], [0, 0, 1, 1], [], []>} : vector<256x128xbf16>, vector<128x384xbf16>, vector<256x384xf32> -> vector<256x384xf32>
      %141 = arith.truncf %140 : vector<256x384xf32> to vector<256x384xbf16>
      %142 = vector.extract_strided_slice %141 {offsets = [0, 0], sizes = [256, 128], strides = [1, 1]} : vector<256x384xbf16> to vector<256x128xbf16>
      %c0_80 = arith.constant 0 : index
      %c0_81 = arith.constant 0 : index
      %143 = vector.load %arg18[%c0_80, %c0_81] : memref<256x128xbf16, #tpu.memory_space<vmem>>, vector<256x128xbf16>
      tpu.vector_store %arg18[%c0_80, %c0_81], %142 {strides = array<i32>} : memref<256x128xbf16, #tpu.memory_space<vmem>>, vector<256x128xbf16>,
      %144 = vector.extract_strided_slice %141 {offsets = [0, 128], sizes = [256, 128], strides = [1, 1]} : vector<256x384xbf16> to vector<256x128xbf16>
      %c0_82 = arith.constant 0 : index
      %c0_83 = arith.constant 0 : index
      %145 = vector.load %arg19[%c0_82, %c0_83] : memref<256x128xbf16, #tpu.memory_space<vmem>>, vector<256x128xbf16>
      tpu.vector_store %arg19[%c0_82, %c0_83], %144 {strides = array<i32>} : memref<256x128xbf16, #tpu.memory_space<vmem>>, vector<256x128xbf16>,
      %146 = vector.extract_strided_slice %141 {offsets = [0, 256], sizes = [256, 128], strides = [1, 1]} : vector<256x384xbf16> to vector<256x128xbf16>
      %c0_84 = arith.constant 0 : index
      %c0_85 = arith.constant 0 : index
      %147 = vector.load %arg20[%c0_84, %c0_85] : memref<256x128xbf16, #tpu.memory_space<vmem>>, vector<256x128xbf16>
      tpu.vector_store %arg20[%c0_84, %c0_85], %146 {strides = array<i32>} : memref<256x128xbf16, #tpu.memory_space<vmem>>, vector<256x128xbf16>,
    } else {
    }
    %c128_i32 = arith.constant 128 : i32
    %3 = arith.muli %arg2, %c128_i32 : i32
    %4 = tpu.assume_multiple %3, 128 : i32
    %c0 = arith.constant 0 : index
    %c0_1 = arith.constant 0 : index
    %5 = arith.index_cast %4 : i32 to index
    %c0_2 = arith.constant 0 : index
    %6 = vector.load %arg3[%c0, %c0_1, %5, %c0_2] : memref<1x1x256x128xf32, #tpu.memory_space<vmem>>, vector<1x1x128x128xf32>
    %7 = vector.shape_cast %6 : vector<1x1x128x128xf32> to vector<128x128xf32>
    %8 = arith.index_cast %4 : i32 to index
    %c0_3 = arith.constant 0 : index
    %9 = vector.load %arg18[%8, %c0_3] : memref<256x128xbf16, #tpu.memory_space<vmem>>, vector<128x128xbf16>
    %c0_4 = arith.constant 0 : index
    %c0_5 = arith.constant 0 : index
    %10 = vector.load %arg19[%c0_4, %c0_5] : memref<256x128xbf16, #tpu.memory_space<vmem>>, vector<256x128xbf16>
    %cst = arith.constant dense<0.000000e+00> : vector<128x256xf32>
    %11 = tpu.matmul %9, %10, %cst {dimension_numbers = #tpu.dot_dimension_numbers<[1], [1], [0], [0], [0, 0, 1, 0], [], []>} : vector<128x128xbf16>, vector<256x128xbf16>, vector<128x256xf32> -> vector<128x256xf32>
    %cst_6 = arith.constant 0.0883883461 : f32
    %12 = vector.broadcast %cst_6 : f32 to vector<128x256xf32>
    %13 = arith.mulf %11, %12 : vector<128x256xf32>
    %cst_7 = arith.constant dense<0xFF800000> : vector<128xf32>
    %14 = vector.multi_reduction <maximumf>, %13, %cst_7 [1] : vector<128x256xf32> to vector<128xf32>
    %15 = vector.shape_cast %14 : vector<128xf32> to vector<128x1xf32>
    %16 = vector.broadcast %15 : vector<128x1xf32> to vector<128x256xf32>
    %17 = arith.subf %13, %16 : vector<128x256xf32>
    %18 = math.exp %17 : vector<128x256xf32>
    %cst_8 = arith.constant dense<0.000000e+00> : vector<128xf32>
    %19 = vector.multi_reduction <add>, %18, %cst_8 [1] : vector<128x256xf32> to vector<128xf32>
    %20 = vector.shape_cast %19 : vector<128xf32> to vector<128x1xf32>
    %21 = tpu.reciprocal %20 {approx = true} : vector<128x1xf32> -> vector<128x1xf32>
    %22 = vector.broadcast %21 : vector<128x1xf32> to vector<128x256xf32>
    %23 = arith.mulf %18, %22 : vector<128x256xf32>
    %24 = arith.truncf %23 : vector<128x256xf32> to vector<128x256xbf16>
    %c0_9 = arith.constant 0 : index
    %c0_10 = arith.constant 0 : index
    %25 = vector.load %arg20[%c0_9, %c0_10] : memref<256x128xbf16, #tpu.memory_space<vmem>>, vector<256x128xbf16>
    %cst_11 = arith.constant dense<0.000000e+00> : vector<128x128xf32>
    %26 = tpu.matmul %24, %25, %cst_11 {dimension_numbers = #tpu.dot_dimension_numbers<[1], [0], [0], [1], [0, 0, 1, 1], [], []>} : vector<128x256xbf16>, vector<256x128xbf16>, vector<128x128xf32> -> vector<128x128xf32>
    %27 = arith.truncf %26 : vector<128x128xf32> to vector<128x128xbf16>
    %c0_12 = arith.constant 0 : index
    %c0_13 = arith.constant 0 : index
    %c0_14 = arith.constant 0 : index
    %28 = vector.load %arg5[%c0_12, %c0_13, %c0_14] : memref<1x128x128xbf16, #tpu.memory_space<vmem>>, vector<1x128x128xbf16>
    %29 = vector.shape_cast %28 : vector<1x128x128xbf16> to vector<128x128xbf16>
    %cst_15 = arith.constant dense<0.000000e+00> : vector<128x128xf32>
    %30 = tpu.matmul %27, %29, %cst_15 {dimension_numbers = #tpu.dot_dimension_numbers<[1], [0], [0], [1], [0, 0, 1, 1], [], []>} : vector<128x128xbf16>, vector<128x128xbf16>, vector<128x128xf32> -> vector<128x128xf32>
    %31 = arith.addf %7, %30 : vector<128x128xf32>
    %c0_16 = arith.constant 0 : index
    %c0_17 = arith.constant 0 : index
    %c0_18 = arith.constant 0 : index
    %32 = vector.load %arg10[%c0_16, %c0_17, %c0_18] : memref<1x1x128xf32, #tpu.memory_space<vmem>>, vector<1x1x128xf32>
    %33 = vector.shape_cast %32 : vector<1x1x128xf32> to vector<1x128xf32>
    %c0_19 = arith.constant 0 : index
    %c0_20 = arith.constant 0 : index
    %c0_21 = arith.constant 0 : index
    %34 = vector.load %arg11[%c0_19, %c0_20, %c0_21] : memref<1x1x128xf32, #tpu.memory_space<vmem>>, vector<1x1x128xf32>
    %35 = vector.shape_cast %34 : vector<1x1x128xf32> to vector<1x128xf32>
    %cst_22 = arith.constant dense<0.000000e+00> : vector<128xf32>
    %36 = vector.multi_reduction <add>, %31, %cst_22 [1] : vector<128x128xf32> to vector<128xf32>
    %37 = vector.shape_cast %36 : vector<128xf32> to vector<128x1xf32>
    %cst_23 = arith.constant 1.280000e+02 : f32
    %38 = vector.broadcast %cst_23 : f32 to vector<128x1xf32>
    %39 = arith.divf %37, %38 : vector<128x1xf32>
    %40 = vector.broadcast %39 : vector<128x1xf32> to vector<128x128xf32>
    %41 = arith.subf %31, %40 : vector<128x128xf32>
    %42 = arith.mulf %41, %41 : vector<128x128xf32>
    %cst_24 = arith.constant dense<0.000000e+00> : vector<128xf32>
    %43 = vector.multi_reduction <add>, %42, %cst_24 [1] : vector<128x128xf32> to vector<128xf32>
    %44 = vector.shape_cast %43 : vector<128xf32> to vector<128x1xf32>
    %cst_25 = arith.constant 1.280000e+02 : f32
    %45 = vector.broadcast %cst_25 : f32 to vector<128x1xf32>
    %46 = arith.divf %44, %45 : vector<128x1xf32>
    %47 = vector.broadcast %39 : vector<128x1xf32> to vector<128x128xf32>
    %48 = arith.subf %31, %47 : vector<128x128xf32>
    %cst_26 = arith.constant 9.99999974E-6 : f32
    %49 = vector.broadcast %cst_26 : f32 to vector<128x1xf32>
    %50 = arith.addf %46, %49 : vector<128x1xf32>
    %51 = math.rsqrt %50 : vector<128x1xf32>
    %52 = vector.broadcast %51 : vector<128x1xf32> to vector<128x128xf32>
    %53 = arith.mulf %48, %52 : vector<128x128xf32>
    %54 = vector.broadcast %33 : vector<1x128xf32> to vector<128x128xf32>
    %55 = arith.mulf %53, %54 : vector<128x128xf32>
    %56 = vector.broadcast %35 : vector<1x128xf32> to vector<128x128xf32>
    %57 = arith.addf %55, %56 : vector<128x128xf32>
    %58 = arith.truncf %57 : vector<128x128xf32> to vector<128x128xbf16>
    %c0_27 = arith.constant 0 : index
    %c0_28 = arith.constant 0 : index
    %c0_29 = arith.constant 0 : index
    %59 = vector.load %arg6[%c0_27, %c0_28, %c0_29] : memref<1x128x256xbf16, #tpu.memory_space<vmem>>, vector<1x128x256xbf16>
    %60 = vector.shape_cast %59 : vector<1x128x256xbf16> to vector<128x256xbf16>
    %cst_30 = arith.constant dense<0.000000e+00> : vector<128x256xf32>
    %61 = tpu.matmul %58, %60, %cst_30 {dimension_numbers = #tpu.dot_dimension_numbers<[1], [0], [0], [1], [0, 0, 1, 1], [], []>} : vector<128x128xbf16>, vector<128x256xbf16>, vector<128x256xf32> -> vector<128x256xf32>
    %c0_31 = arith.constant 0 : index
    %c0_32 = arith.constant 0 : index
    %c0_33 = arith.constant 0 : index
    %62 = vector.load %arg7[%c0_31, %c0_32, %c0_33] : memref<1x1x256xf32, #tpu.memory_space<vmem>>, vector<1x1x256xf32>
    %63 = vector.shape_cast %62 : vector<1x1x256xf32> to vector<1x256xf32>
    %64 = vector.broadcast %63 : vector<1x256xf32> to vector<128x256xf32>
    %65 = arith.addf %61, %64 : vector<128x256xf32>
    %cst_34 = arith.constant 0.000000e+00 : f32
    %66 = vector.broadcast %cst_34 : f32 to vector<128x256xf32>
    %67 = arith.maximumf %65, %66 : vector<128x256xf32>
    %68 = arith.truncf %67 : vector<128x256xf32> to vector<128x256xbf16>
    %c0_35 = arith.constant 0 : index
    %c0_36 = arith.constant 0 : index
    %c0_37 = arith.constant 0 : index
    %69 = vector.load %arg8[%c0_35, %c0_36, %c0_37] : memref<1x256x128xbf16, #tpu.memory_space<vmem>>, vector<1x256x128xbf16>
    %70 = vector.shape_cast %69 : vector<1x256x128xbf16> to vector<256x128xbf16>
    %cst_38 = arith.constant dense<0.000000e+00> : vector<128x128xf32>
    %71 = tpu.matmul %68, %70, %cst_38 {dimension_numbers = #tpu.dot_dimension_numbers<[1], [0], [0], [1], [0, 0, 1, 1], [], []>} : vector<128x256xbf16>, vector<256x128xbf16>, vector<128x128xf32> -> vector<128x128xf32>
    %c0_39 = arith.constant 0 : index
    %c0_40 = arith.constant 0 : index
    %c0_41 = arith.constant 0 : index
    %72 = vector.load %arg9[%c0_39, %c0_40, %c0_41] : memref<1x1x128xf32, #tpu.memory_space<vmem>>, vector<1x1x128xf32>
    %73 = vector.shape_cast %72 : vector<1x1x128xf32> to vector<1x128xf32>
    %74 = vector.broadcast %73 : vector<1x128xf32> to vector<128x128xf32>
    %75 = arith.addf %71, %74 : vector<128x128xf32>
    %76 = arith.addf %57, %75 : vector<128x128xf32>
    %c0_42 = arith.constant 0 : index
    %c0_43 = arith.constant 0 : index
    %c0_44 = arith.constant 0 : index
    %77 = vector.load %arg12[%c0_42, %c0_43, %c0_44] : memref<1x1x128xf32, #tpu.memory_space<vmem>>, vector<1x1x128xf32>
    %78 = vector.shape_cast %77 : vector<1x1x128xf32> to vector<1x128xf32>
    %c0_45 = arith.constant 0 : index
    %c0_46 = arith.constant 0 : index
    %c0_47 = arith.constant 0 : index
    %79 = vector.load %arg13[%c0_45, %c0_46, %c0_47] : memref<1x1x128xf32, #tpu.memory_space<vmem>>, vector<1x1x128xf32>
    %80 = vector.shape_cast %79 : vector<1x1x128xf32> to vector<1x128xf32>
    %cst_48 = arith.constant dense<0.000000e+00> : vector<128xf32>
    %81 = vector.multi_reduction <add>, %76, %cst_48 [1] : vector<128x128xf32> to vector<128xf32>
    %82 = vector.shape_cast %81 : vector<128xf32> to vector<128x1xf32>
    %cst_49 = arith.constant 1.280000e+02 : f32
    %83 = vector.broadcast %cst_49 : f32 to vector<128x1xf32>
    %84 = arith.divf %82, %83 : vector<128x1xf32>
    %85 = vector.broadcast %84 : vector<128x1xf32> to vector<128x128xf32>
    %86 = arith.subf %76, %85 : vector<128x128xf32>
    %87 = arith.mulf %86, %86 : vector<128x128xf32>
    %cst_50 = arith.constant dense<0.000000e+00> : vector<128xf32>
    %88 = vector.multi_reduction <add>, %87, %cst_50 [1] : vector<128x128xf32> to vector<128xf32>
    %89 = vector.shape_cast %88 : vector<128xf32> to vector<128x1xf32>
    %cst_51 = arith.constant 1.280000e+02 : f32
    %90 = vector.broadcast %cst_51 : f32 to vector<128x1xf32>
    %91 = arith.divf %89, %90 : vector<128x1xf32>
    %92 = vector.broadcast %84 : vector<128x1xf32> to vector<128x128xf32>
    %93 = arith.subf %76, %92 : vector<128x128xf32>
    %cst_52 = arith.constant 9.99999974E-6 : f32
    %94 = vector.broadcast %cst_52 : f32 to vector<128x1xf32>
    %95 = arith.addf %91, %94 : vector<128x1xf32>
    %96 = math.rsqrt %95 : vector<128x1xf32>
    %97 = vector.broadcast %96 : vector<128x1xf32> to vector<128x128xf32>
    %98 = arith.mulf %93, %97 : vector<128x128xf32>
    %99 = vector.broadcast %78 : vector<1x128xf32> to vector<128x128xf32>
    %100 = arith.mulf %98, %99 : vector<128x128xf32>
    %101 = vector.broadcast %80 : vector<1x128xf32> to vector<128x128xf32>
    %102 = arith.addf %100, %101 : vector<128x128xf32>
    %c0_53 = arith.constant 0 : index
    %c0_54 = arith.constant 0 : index
    %c0_55 = arith.constant 0 : index
    %103 = vector.load %arg14[%c0_53, %c0_54, %c0_55] : memref<1x1x128xf32, #tpu.memory_space<vmem>>, vector<1x1x128xf32>
    %104 = vector.shape_cast %103 : vector<1x1x128xf32> to vector<1x128xf32>
    %c0_56 = arith.constant 0 : index
    %c0_57 = arith.constant 0 : index
    %c0_58 = arith.constant 0 : index
    %105 = vector.load %arg15[%c0_56, %c0_57, %c0_58] : memref<1x1x128xf32, #tpu.memory_space<vmem>>, vector<1x1x128xf32>
    %106 = vector.shape_cast %105 : vector<1x1x128xf32> to vector<1x128xf32>
    %cst_59 = arith.constant dense<0.000000e+00> : vector<128xf32>
    %107 = vector.multi_reduction <add>, %102, %cst_59 [1] : vector<128x128xf32> to vector<128xf32>
    %108 = vector.shape_cast %107 : vector<128xf32> to vector<128x1xf32>
    %cst_60 = arith.constant 1.280000e+02 : f32
    %109 = vector.broadcast %cst_60 : f32 to vector<128x1xf32>
    %110 = arith.divf %108, %109 : vector<128x1xf32>
    %111 = vector.broadcast %110 : vector<128x1xf32> to vector<128x128xf32>
    %112 = arith.subf %102, %111 : vector<128x128xf32>
    %113 = arith.mulf %112, %112 : vector<128x128xf32>
    %cst_61 = arith.constant dense<0.000000e+00> : vector<128xf32>
    %114 = vector.multi_reduction <add>, %113, %cst_61 [1] : vector<128x128xf32> to vector<128xf32>
    %115 = vector.shape_cast %114 : vector<128xf32> to vector<128x1xf32>
    %cst_62 = arith.constant 1.280000e+02 : f32
    %116 = vector.broadcast %cst_62 : f32 to vector<128x1xf32>
    %117 = arith.divf %115, %116 : vector<128x1xf32>
    %118 = vector.broadcast %110 : vector<128x1xf32> to vector<128x128xf32>
    %119 = arith.subf %102, %118 : vector<128x128xf32>
    %cst_63 = arith.constant 9.99999974E-6 : f32
    %120 = vector.broadcast %cst_63 : f32 to vector<128x1xf32>
    %121 = arith.addf %117, %120 : vector<128x1xf32>
    %122 = math.rsqrt %121 : vector<128x1xf32>
    %123 = vector.broadcast %122 : vector<128x1xf32> to vector<128x128xf32>
    %124 = arith.mulf %119, %123 : vector<128x128xf32>
    %125 = vector.broadcast %104 : vector<1x128xf32> to vector<128x128xf32>
    %126 = arith.mulf %124, %125 : vector<128x128xf32>
    %127 = vector.broadcast %106 : vector<1x128xf32> to vector<128x128xf32>
    %128 = arith.addf %126, %127 : vector<128x128xf32>
    %c0_64 = arith.constant 0 : index
    %c0_65 = arith.constant 0 : index
    %c0_66 = arith.constant 0 : index
    %c0_67 = arith.constant 0 : index
    %129 = vector.load %arg16[%c0_64, %c0_65, %c0_66, %c0_67] : memref<1x1x128x128xf32, #tpu.memory_space<vmem>>, vector<1x1x128x128xf32>
    %130 = vector.shape_cast %129 : vector<1x1x128x128xf32> to vector<128x128xf32>
    %131 = vector.shape_cast %128 : vector<128x128xf32> to vector<1x1x128x128xf32>
    tpu.vector_store %arg16[%c0_64, %c0_65, %c0_66, %c0_67], %131 {strides = array<i32>} : memref<1x1x128x128xf32, #tpu.memory_space<vmem>>, vector<1x1x128x128xf32>,
    %c0_68 = arith.constant 0 : index
    %c0_69 = arith.constant 0 : index
    %c0_70 = arith.constant 0 : index
    %c0_71 = arith.constant 0 : index
    %132 = vector.load %arg17[%c0_68, %c0_69, %c0_70, %c0_71] : memref<1x1x128x256xf32, #tpu.memory_space<vmem>>, vector<1x1x128x256xf32>
    %133 = vector.shape_cast %132 : vector<1x1x128x256xf32> to vector<128x256xf32>
    %134 = vector.shape_cast %23 : vector<128x256xf32> to vector<1x1x128x256xf32>
    tpu.vector_store %arg17[%c0_68, %c0_69, %c0_70, %c0_71], %134 {strides = array<i32>} : memref<1x1x128x256xf32, #tpu.memory_space<vmem>>, vector<1x1x128x256xf32>,
    return
  }
  func.func @transform_0(%arg0: i32, %arg1: i32, %arg2: i32) -> (i32, i32, i32, i32) {
    %c0_i32 = arith.constant 0 : i32
    %c0_i32_0 = arith.constant 0 : i32
    %c0_i32_1 = arith.constant 0 : i32
    return %arg0, %arg1, %c0_i32, %c0_i32_0 : i32, i32, i32, i32
  }
  func.func @transform_1(%arg0: i32, %arg1: i32, %arg2: i32) -> (i32, i32, i32) {
    %c0_i32 = arith.constant 0 : i32
    %c0_i32_0 = arith.constant 0 : i32
    %c0_i32_1 = arith.constant 0 : i32
    return %arg0, %c0_i32, %c0_i32_0 : i32, i32, i32
  }
  func.func @transform_2(%arg0: i32, %arg1: i32, %arg2: i32) -> (i32, i32, i32) {
    %c0_i32 = arith.constant 0 : i32
    %c0_i32_0 = arith.constant 0 : i32
    %c0_i32_1 = arith.constant 0 : i32
    return %arg0, %c0_i32, %c0_i32_0 : i32, i32, i32
  }
  func.func @transform_3(%arg0: i32, %arg1: i32, %arg2: i32) -> (i32, i32, i32) {
    %c0_i32 = arith.constant 0 : i32
    %c0_i32_0 = arith.constant 0 : i32
    %c0_i32_1 = arith.constant 0 : i32
    return %arg0, %c0_i32, %c0_i32_0 : i32, i32, i32
  }
  func.func @transform_4(%arg0: i32, %arg1: i32, %arg2: i32) -> (i32, i32, i32) {
    %c0_i32 = arith.constant 0 : i32
    %c0_i32_0 = arith.constant 0 : i32
    %c0_i32_1 = arith.constant 0 : i32
    return %arg0, %c0_i32, %c0_i32_0 : i32, i32, i32
  }
  func.func @transform_5(%arg0: i32, %arg1: i32, %arg2: i32) -> (i32, i32, i32) {
    %c0_i32 = arith.constant 0 : i32
    %c0_i32_0 = arith.constant 0 : i32
    %c0_i32_1 = arith.constant 0 : i32
    return %arg0, %c0_i32, %c0_i32_0 : i32, i32, i32
  }
  func.func @transform_6(%arg0: i32, %arg1: i32, %arg2: i32) -> (i32, i32, i32) {
    %c0_i32 = arith.constant 0 : i32
    %c0_i32_0 = arith.constant 0 : i32
    %c0_i32_1 = arith.constant 0 : i32
    return %arg0, %c0_i32, %c0_i32_0 : i32, i32, i32
  }
  func.func @transform_7(%arg0: i32, %arg1: i32, %arg2: i32) -> (i32, i32, i32) {
    %c0_i32 = arith.constant 0 : i32
    %c0_i32_0 = arith.constant 0 : i32
    %c0_i32_1 = arith.constant 0 : i32
    return %arg0, %c0_i32, %c0_i32_0 : i32, i32, i32
  }
  func.func @transform_8(%arg0: i32, %arg1: i32, %arg2: i32) -> (i32, i32, i32) {
    %c0_i32 = arith.constant 0 : i32
    %c0_i32_0 = arith.constant 0 : i32
    %c0_i32_1 = arith.constant 0 : i32
    return %arg0, %c0_i32, %c0_i32_0 : i32, i32, i32
  }
  func.func @transform_9(%arg0: i32, %arg1: i32, %arg2: i32) -> (i32, i32, i32) {
    %c0_i32 = arith.constant 0 : i32
    %c0_i32_0 = arith.constant 0 : i32
    %c0_i32_1 = arith.constant 0 : i32
    return %arg0, %c0_i32, %c0_i32_0 : i32, i32, i32
  }
  func.func @transform_10(%arg0: i32, %arg1: i32, %arg2: i32) -> (i32, i32, i32) {
    %c0_i32 = arith.constant 0 : i32
    %c0_i32_0 = arith.constant 0 : i32
    %c0_i32_1 = arith.constant 0 : i32
    return %arg0, %c0_i32, %c0_i32_0 : i32, i32, i32
  }
  func.func @transform_11(%arg0: i32, %arg1: i32, %arg2: i32) -> (i32, i32, i32) {
    %c0_i32 = arith.constant 0 : i32
    %c0_i32_0 = arith.constant 0 : i32
    %c0_i32_1 = arith.constant 0 : i32
    return %arg0, %c0_i32, %c0_i32_0 : i32, i32, i32
  }
  func.func @transform_12(%arg0: i32, %arg1: i32, %arg2: i32) -> (i32, i32, i32) {
    %c0_i32 = arith.constant 0 : i32
    %c0_i32_0 = arith.constant 0 : i32
    %c0_i32_1 = arith.constant 0 : i32
    return %arg0, %c0_i32, %c0_i32_0 : i32, i32, i32
  }
  func.func @transform_13(%arg0: i32, %arg1: i32, %arg2: i32) -> (i32, i32, i32, i32) {
    %c0_i32 = arith.constant 0 : i32
    %c0_i32_0 = arith.constant 0 : i32
    return %arg0, %arg1, %arg2, %c0_i32 : i32, i32, i32, i32
  }
  func.func @transform_14(%arg0: i32, %arg1: i32, %arg2: i32) -> (i32, i32, i32, i32) {
    %c0_i32 = arith.constant 0 : i32
    %c0_i32_0 = arith.constant 0 : i32
    return %arg0, %arg1, %arg2, %c0_i32 : i32, i32, i32, i32
  }
}

module attributes {stable_mosaic.version = 11 : i64} {
  func.func @kernel(%arg0: i32, %arg1: i32, %arg2: i32, %arg3: memref<1x1x256x128xf32, #tpu.memory_space<vmem>>, %arg4: memref<1x128x384xbf16, #tpu.memory_space<vmem>>, %arg5: memref<1x128x128xbf16, #tpu.memory_space<vmem>>, %arg6: memref<1x128x256xbf16, #tpu.memory_space<vmem>>, %arg7: memref<1x1x256xf32, #tpu.memory_space<vmem>>, %arg8: memref<1x256x128xbf16, #tpu.memory_space<vmem>>, %arg9: memref<1x1x128xf32, #tpu.memory_space<vmem>>, %arg10: memref<1x1x128xf32, #tpu.memory_space<vmem>>, %arg11: memref<1x1x128xf32, #tpu.memory_space<vmem>>, %arg12: memref<1x1x128xf32, #tpu.memory_space<vmem>>, %arg13: memref<1x1x128xf32, #tpu.memory_space<vmem>>, %arg14: memref<1x1x128x128xf32, #tpu.memory_space<vmem>>, %arg15: memref<1x1x128x256xf32, #tpu.memory_space<vmem>>, %arg16: memref<256x128xbf16, #tpu.memory_space<vmem>>, %arg17: memref<256x128xbf16, #tpu.memory_space<vmem>>, %arg18: memref<256x128xbf16, #tpu.memory_space<vmem>>) attributes {dimension_semantics = [#tpu.dimension_semantics<parallel>, #tpu.dimension_semantics<parallel>, #tpu.dimension_semantics<arbitrary>], iteration_bounds = array<i64: 2, 2, 2>, scalar_prefetch = 0 : i64, scratch_operands = 3 : i64, tpu.core_type = #tpu.core_type<tc>, window_params = [{transform_indices = @transform_0, window_bounds = array<i64: 1, 1, 256, 128>}, {transform_indices = @transform_1, window_bounds = array<i64: 1, 128, 384>}, {transform_indices = @transform_2, window_bounds = array<i64: 1, 128, 128>}, {transform_indices = @transform_3, window_bounds = array<i64: 1, 128, 256>}, {transform_indices = @transform_4, window_bounds = array<i64: 1, 1, 256>}, {transform_indices = @transform_5, window_bounds = array<i64: 1, 256, 128>}, {transform_indices = @transform_6, window_bounds = array<i64: 1, 1, 128>}, {transform_indices = @transform_7, window_bounds = array<i64: 1, 1, 128>}, {transform_indices = @transform_8, window_bounds = array<i64: 1, 1, 128>}, {transform_indices = @transform_9, window_bounds = array<i64: 1, 1, 128>}, {transform_indices = @transform_10, window_bounds = array<i64: 1, 1, 128>}, {transform_indices = @transform_11, window_bounds = array<i64: 1, 1, 128, 128>}, {transform_indices = @transform_12, window_bounds = array<i64: 1, 1, 128, 256>}]} {
    %c0_i32 = arith.constant 0 : i32
    %0 = arith.cmpi eq, %arg2, %c0_i32 : i32
    %1 = arith.extui %0 : i1 to i32
    %c0_i32_0 = arith.constant 0 : i32
    %2 = arith.cmpi ne, %1, %c0_i32_0 : i32
    scf.if %2 {
      %c0_61 = arith.constant 0 : index
      %c0_62 = arith.constant 0 : index
      %c0_63 = arith.constant 0 : index
      %c0_64 = arith.constant 0 : index
      %109 = vector.load %arg3[%c0_61, %c0_62, %c0_63, %c0_64] : memref<1x1x256x128xf32, #tpu.memory_space<vmem>>, vector<1x1x256x128xf32>
      %110 = vector.shape_cast %109 : vector<1x1x256x128xf32> to vector<256x128xf32>
      %111 = arith.truncf %110 : vector<256x128xf32> to vector<256x128xbf16>
      %c0_65 = arith.constant 0 : index
      %c0_66 = arith.constant 0 : index
      %c0_67 = arith.constant 0 : index
      %112 = vector.load %arg4[%c0_65, %c0_66, %c0_67] : memref<1x128x384xbf16, #tpu.memory_space<vmem>>, vector<1x128x384xbf16>
      %113 = vector.shape_cast %112 : vector<1x128x384xbf16> to vector<128x384xbf16>
      %cst_68 = arith.constant dense<0.000000e+00> : vector<256x384xf32>
      %114 = tpu.matmul %111, %113, %cst_68 {dimension_numbers = #tpu.dot_dimension_numbers<[1], [0], [0], [1], [0, 0, 1, 1], [], []>} : vector<256x128xbf16>, vector<128x384xbf16>, vector<256x384xf32> -> vector<256x384xf32>
      %115 = arith.truncf %114 : vector<256x384xf32> to vector<256x384xbf16>
      %116 = vector.extract_strided_slice %115 {offsets = [0, 0], sizes = [256, 128], strides = [1, 1]} : vector<256x384xbf16> to vector<256x128xbf16>
      %c0_69 = arith.constant 0 : index
      %c0_70 = arith.constant 0 : index
      %117 = vector.load %arg16[%c0_69, %c0_70] : memref<256x128xbf16, #tpu.memory_space<vmem>>, vector<256x128xbf16>
      tpu.vector_store %arg16[%c0_69, %c0_70], %116 {strides = array<i32>} : memref<256x128xbf16, #tpu.memory_space<vmem>>, vector<256x128xbf16>,
      %118 = vector.extract_strided_slice %115 {offsets = [0, 128], sizes = [256, 128], strides = [1, 1]} : vector<256x384xbf16> to vector<256x128xbf16>
      %c0_71 = arith.constant 0 : index
      %c0_72 = arith.constant 0 : index
      %119 = vector.load %arg17[%c0_71, %c0_72] : memref<256x128xbf16, #tpu.memory_space<vmem>>, vector<256x128xbf16>
      tpu.vector_store %arg17[%c0_71, %c0_72], %118 {strides = array<i32>} : memref<256x128xbf16, #tpu.memory_space<vmem>>, vector<256x128xbf16>,
      %120 = vector.extract_strided_slice %115 {offsets = [0, 256], sizes = [256, 128], strides = [1, 1]} : vector<256x384xbf16> to vector<256x128xbf16>
      %c0_73 = arith.constant 0 : index
      %c0_74 = arith.constant 0 : index
      %121 = vector.load %arg18[%c0_73, %c0_74] : memref<256x128xbf16, #tpu.memory_space<vmem>>, vector<256x128xbf16>
      tpu.vector_store %arg18[%c0_73, %c0_74], %120 {strides = array<i32>} : memref<256x128xbf16, #tpu.memory_space<vmem>>, vector<256x128xbf16>,
    } else {
    }
    %c128_i32 = arith.constant 128 : i32
    %3 = arith.muli %arg2, %c128_i32 : i32
    %4 = tpu.assume_multiple %3, 128 : i32
    %c0 = arith.constant 0 : index
    %c0_1 = arith.constant 0 : index
    %5 = arith.index_cast %4 : i32 to index
    %c0_2 = arith.constant 0 : index
    %6 = vector.load %arg3[%c0, %c0_1, %5, %c0_2] : memref<1x1x256x128xf32, #tpu.memory_space<vmem>>, vector<1x1x128x128xf32>
    %7 = vector.shape_cast %6 : vector<1x1x128x128xf32> to vector<128x128xf32>
    %8 = arith.index_cast %4 : i32 to index
    %c0_3 = arith.constant 0 : index
    %9 = vector.load %arg16[%8, %c0_3] : memref<256x128xbf16, #tpu.memory_space<vmem>>, vector<128x128xbf16>
    %c0_4 = arith.constant 0 : index
    %c0_5 = arith.constant 0 : index
    %10 = vector.load %arg17[%c0_4, %c0_5] : memref<256x128xbf16, #tpu.memory_space<vmem>>, vector<256x128xbf16>
    %cst = arith.constant dense<0.000000e+00> : vector<128x256xf32>
    %11 = tpu.matmul %9, %10, %cst {dimension_numbers = #tpu.dot_dimension_numbers<[1], [1], [0], [0], [0, 0, 1, 0], [], []>} : vector<128x128xbf16>, vector<256x128xbf16>, vector<128x256xf32> -> vector<128x256xf32>
    %cst_6 = arith.constant 0.0883883461 : f32
    %12 = vector.broadcast %cst_6 : f32 to vector<128x256xf32>
    %13 = arith.mulf %11, %12 : vector<128x256xf32>
    %cst_7 = arith.constant dense<0xFF800000> : vector<128xf32>
    %14 = vector.multi_reduction <maximumf>, %13, %cst_7 [1] : vector<128x256xf32> to vector<128xf32>
    %15 = vector.shape_cast %14 : vector<128xf32> to vector<128x1xf32>
    %16 = vector.broadcast %15 : vector<128x1xf32> to vector<128x256xf32>
    %17 = arith.subf %13, %16 : vector<128x256xf32>
    %18 = math.exp %17 : vector<128x256xf32>
    %cst_8 = arith.constant dense<0.000000e+00> : vector<128xf32>
    %19 = vector.multi_reduction <add>, %18, %cst_8 [1] : vector<128x256xf32> to vector<128xf32>
    %20 = vector.shape_cast %19 : vector<128xf32> to vector<128x1xf32>
    %21 = tpu.reciprocal %20 {approx = true} : vector<128x1xf32> -> vector<128x1xf32>
    %22 = vector.broadcast %21 : vector<128x1xf32> to vector<128x256xf32>
    %23 = arith.mulf %18, %22 : vector<128x256xf32>
    %24 = arith.truncf %23 : vector<128x256xf32> to vector<128x256xbf16>
    %c0_9 = arith.constant 0 : index
    %c0_10 = arith.constant 0 : index
    %25 = vector.load %arg18[%c0_9, %c0_10] : memref<256x128xbf16, #tpu.memory_space<vmem>>, vector<256x128xbf16>
    %cst_11 = arith.constant dense<0.000000e+00> : vector<128x128xf32>
    %26 = tpu.matmul %24, %25, %cst_11 {dimension_numbers = #tpu.dot_dimension_numbers<[1], [0], [0], [1], [0, 0, 1, 1], [], []>} : vector<128x256xbf16>, vector<256x128xbf16>, vector<128x128xf32> -> vector<128x128xf32>
    %27 = arith.truncf %26 : vector<128x128xf32> to vector<128x128xbf16>
    %c0_12 = arith.constant 0 : index
    %c0_13 = arith.constant 0 : index
    %c0_14 = arith.constant 0 : index
    %28 = vector.load %arg5[%c0_12, %c0_13, %c0_14] : memref<1x128x128xbf16, #tpu.memory_space<vmem>>, vector<1x128x128xbf16>
    %29 = vector.shape_cast %28 : vector<1x128x128xbf16> to vector<128x128xbf16>
    %cst_15 = arith.constant dense<0.000000e+00> : vector<128x128xf32>
    %30 = tpu.matmul %27, %29, %cst_15 {dimension_numbers = #tpu.dot_dimension_numbers<[1], [0], [0], [1], [0, 0, 1, 1], [], []>} : vector<128x128xbf16>, vector<128x128xbf16>, vector<128x128xf32> -> vector<128x128xf32>
    %31 = arith.addf %7, %30 : vector<128x128xf32>
    %c0_16 = arith.constant 0 : index
    %c0_17 = arith.constant 0 : index
    %c0_18 = arith.constant 0 : index
    %32 = vector.load %arg10[%c0_16, %c0_17, %c0_18] : memref<1x1x128xf32, #tpu.memory_space<vmem>>, vector<1x1x128xf32>
    %33 = vector.shape_cast %32 : vector<1x1x128xf32> to vector<1x128xf32>
    %c0_19 = arith.constant 0 : index
    %c0_20 = arith.constant 0 : index
    %c0_21 = arith.constant 0 : index
    %34 = vector.load %arg11[%c0_19, %c0_20, %c0_21] : memref<1x1x128xf32, #tpu.memory_space<vmem>>, vector<1x1x128xf32>
    %35 = vector.shape_cast %34 : vector<1x1x128xf32> to vector<1x128xf32>
    %cst_22 = arith.constant dense<0.000000e+00> : vector<128xf32>
    %36 = vector.multi_reduction <add>, %31, %cst_22 [1] : vector<128x128xf32> to vector<128xf32>
    %37 = vector.shape_cast %36 : vector<128xf32> to vector<128x1xf32>
    %cst_23 = arith.constant 1.280000e+02 : f32
    %38 = vector.broadcast %cst_23 : f32 to vector<128x1xf32>
    %39 = arith.divf %37, %38 : vector<128x1xf32>
    %40 = vector.broadcast %39 : vector<128x1xf32> to vector<128x128xf32>
    %41 = arith.subf %31, %40 : vector<128x128xf32>
    %42 = arith.mulf %41, %41 : vector<128x128xf32>
    %cst_24 = arith.constant dense<0.000000e+00> : vector<128xf32>
    %43 = vector.multi_reduction <add>, %42, %cst_24 [1] : vector<128x128xf32> to vector<128xf32>
    %44 = vector.shape_cast %43 : vector<128xf32> to vector<128x1xf32>
    %cst_25 = arith.constant 1.280000e+02 : f32
    %45 = vector.broadcast %cst_25 : f32 to vector<128x1xf32>
    %46 = arith.divf %44, %45 : vector<128x1xf32>
    %47 = vector.broadcast %39 : vector<128x1xf32> to vector<128x128xf32>
    %48 = arith.subf %31, %47 : vector<128x128xf32>
    %cst_26 = arith.constant 9.99999974E-6 : f32
    %49 = vector.broadcast %cst_26 : f32 to vector<128x1xf32>
    %50 = arith.addf %46, %49 : vector<128x1xf32>
    %51 = math.rsqrt %50 : vector<128x1xf32>
    %52 = vector.broadcast %51 : vector<128x1xf32> to vector<128x128xf32>
    %53 = arith.mulf %48, %52 : vector<128x128xf32>
    %54 = vector.broadcast %33 : vector<1x128xf32> to vector<128x128xf32>
    %55 = arith.mulf %53, %54 : vector<128x128xf32>
    %56 = vector.broadcast %35 : vector<1x128xf32> to vector<128x128xf32>
    %57 = arith.addf %55, %56 : vector<128x128xf32>
    %58 = arith.truncf %57 : vector<128x128xf32> to vector<128x128xbf16>
    %c0_27 = arith.constant 0 : index
    %c0_28 = arith.constant 0 : index
    %c0_29 = arith.constant 0 : index
    %59 = vector.load %arg6[%c0_27, %c0_28, %c0_29] : memref<1x128x256xbf16, #tpu.memory_space<vmem>>, vector<1x128x256xbf16>
    %60 = vector.shape_cast %59 : vector<1x128x256xbf16> to vector<128x256xbf16>
    %cst_30 = arith.constant dense<0.000000e+00> : vector<128x256xf32>
    %61 = tpu.matmul %58, %60, %cst_30 {dimension_numbers = #tpu.dot_dimension_numbers<[1], [0], [0], [1], [0, 0, 1, 1], [], []>} : vector<128x128xbf16>, vector<128x256xbf16>, vector<128x256xf32> -> vector<128x256xf32>
    %c0_31 = arith.constant 0 : index
    %c0_32 = arith.constant 0 : index
    %c0_33 = arith.constant 0 : index
    %62 = vector.load %arg7[%c0_31, %c0_32, %c0_33] : memref<1x1x256xf32, #tpu.memory_space<vmem>>, vector<1x1x256xf32>
    %63 = vector.shape_cast %62 : vector<1x1x256xf32> to vector<1x256xf32>
    %64 = vector.broadcast %63 : vector<1x256xf32> to vector<128x256xf32>
    %65 = arith.addf %61, %64 : vector<128x256xf32>
    %cst_34 = arith.constant 0.000000e+00 : f32
    %66 = vector.broadcast %cst_34 : f32 to vector<128x256xf32>
    %67 = arith.maximumf %65, %66 : vector<128x256xf32>
    %68 = arith.truncf %67 : vector<128x256xf32> to vector<128x256xbf16>
    %c0_35 = arith.constant 0 : index
    %c0_36 = arith.constant 0 : index
    %c0_37 = arith.constant 0 : index
    %69 = vector.load %arg8[%c0_35, %c0_36, %c0_37] : memref<1x256x128xbf16, #tpu.memory_space<vmem>>, vector<1x256x128xbf16>
    %70 = vector.shape_cast %69 : vector<1x256x128xbf16> to vector<256x128xbf16>
    %cst_38 = arith.constant dense<0.000000e+00> : vector<128x128xf32>
    %71 = tpu.matmul %68, %70, %cst_38 {dimension_numbers = #tpu.dot_dimension_numbers<[1], [0], [0], [1], [0, 0, 1, 1], [], []>} : vector<128x256xbf16>, vector<256x128xbf16>, vector<128x128xf32> -> vector<128x128xf32>
    %c0_39 = arith.constant 0 : index
    %c0_40 = arith.constant 0 : index
    %c0_41 = arith.constant 0 : index
    %72 = vector.load %arg9[%c0_39, %c0_40, %c0_41] : memref<1x1x128xf32, #tpu.memory_space<vmem>>, vector<1x1x128xf32>
    %73 = vector.shape_cast %72 : vector<1x1x128xf32> to vector<1x128xf32>
    %74 = vector.broadcast %73 : vector<1x128xf32> to vector<128x128xf32>
    %75 = arith.addf %71, %74 : vector<128x128xf32>
    %76 = arith.addf %57, %75 : vector<128x128xf32>
    %c0_42 = arith.constant 0 : index
    %c0_43 = arith.constant 0 : index
    %c0_44 = arith.constant 0 : index
    %77 = vector.load %arg12[%c0_42, %c0_43, %c0_44] : memref<1x1x128xf32, #tpu.memory_space<vmem>>, vector<1x1x128xf32>
    %78 = vector.shape_cast %77 : vector<1x1x128xf32> to vector<1x128xf32>
    %c0_45 = arith.constant 0 : index
    %c0_46 = arith.constant 0 : index
    %c0_47 = arith.constant 0 : index
    %79 = vector.load %arg13[%c0_45, %c0_46, %c0_47] : memref<1x1x128xf32, #tpu.memory_space<vmem>>, vector<1x1x128xf32>
    %80 = vector.shape_cast %79 : vector<1x1x128xf32> to vector<1x128xf32>
    %cst_48 = arith.constant dense<0.000000e+00> : vector<128xf32>
    %81 = vector.multi_reduction <add>, %76, %cst_48 [1] : vector<128x128xf32> to vector<128xf32>
    %82 = vector.shape_cast %81 : vector<128xf32> to vector<128x1xf32>
    %cst_49 = arith.constant 1.280000e+02 : f32
    %83 = vector.broadcast %cst_49 : f32 to vector<128x1xf32>
    %84 = arith.divf %82, %83 : vector<128x1xf32>
    %85 = vector.broadcast %84 : vector<128x1xf32> to vector<128x128xf32>
    %86 = arith.subf %76, %85 : vector<128x128xf32>
    %87 = arith.mulf %86, %86 : vector<128x128xf32>
    %cst_50 = arith.constant dense<0.000000e+00> : vector<128xf32>
    %88 = vector.multi_reduction <add>, %87, %cst_50 [1] : vector<128x128xf32> to vector<128xf32>
    %89 = vector.shape_cast %88 : vector<128xf32> to vector<128x1xf32>
    %cst_51 = arith.constant 1.280000e+02 : f32
    %90 = vector.broadcast %cst_51 : f32 to vector<128x1xf32>
    %91 = arith.divf %89, %90 : vector<128x1xf32>
    %92 = vector.broadcast %84 : vector<128x1xf32> to vector<128x128xf32>
    %93 = arith.subf %76, %92 : vector<128x128xf32>
    %cst_52 = arith.constant 9.99999974E-6 : f32
    %94 = vector.broadcast %cst_52 : f32 to vector<128x1xf32>
    %95 = arith.addf %91, %94 : vector<128x1xf32>
    %96 = math.rsqrt %95 : vector<128x1xf32>
    %97 = vector.broadcast %96 : vector<128x1xf32> to vector<128x128xf32>
    %98 = arith.mulf %93, %97 : vector<128x128xf32>
    %99 = vector.broadcast %78 : vector<1x128xf32> to vector<128x128xf32>
    %100 = arith.mulf %98, %99 : vector<128x128xf32>
    %101 = vector.broadcast %80 : vector<1x128xf32> to vector<128x128xf32>
    %102 = arith.addf %100, %101 : vector<128x128xf32>
    %c0_53 = arith.constant 0 : index
    %c0_54 = arith.constant 0 : index
    %c0_55 = arith.constant 0 : index
    %c0_56 = arith.constant 0 : index
    %103 = vector.load %arg14[%c0_53, %c0_54, %c0_55, %c0_56] : memref<1x1x128x128xf32, #tpu.memory_space<vmem>>, vector<1x1x128x128xf32>
    %104 = vector.shape_cast %103 : vector<1x1x128x128xf32> to vector<128x128xf32>
    %105 = vector.shape_cast %102 : vector<128x128xf32> to vector<1x1x128x128xf32>
    tpu.vector_store %arg14[%c0_53, %c0_54, %c0_55, %c0_56], %105 {strides = array<i32>} : memref<1x1x128x128xf32, #tpu.memory_space<vmem>>, vector<1x1x128x128xf32>,
    %c0_57 = arith.constant 0 : index
    %c0_58 = arith.constant 0 : index
    %c0_59 = arith.constant 0 : index
    %c0_60 = arith.constant 0 : index
    %106 = vector.load %arg15[%c0_57, %c0_58, %c0_59, %c0_60] : memref<1x1x128x256xf32, #tpu.memory_space<vmem>>, vector<1x1x128x256xf32>
    %107 = vector.shape_cast %106 : vector<1x1x128x256xf32> to vector<128x256xf32>
    %108 = vector.shape_cast %23 : vector<128x256xf32> to vector<1x1x128x256xf32>
    tpu.vector_store %arg15[%c0_57, %c0_58, %c0_59, %c0_60], %108 {strides = array<i32>} : memref<1x1x128x256xf32, #tpu.memory_space<vmem>>, vector<1x1x128x256xf32>,
    return
  }
  func.func @transform_0(%arg0: i32, %arg1: i32, %arg2: i32) -> (i32, i32, i32, i32) {
    %c0_i32 = arith.constant 0 : i32
    %c0_i32_0 = arith.constant 0 : i32
    %c0_i32_1 = arith.constant 0 : i32
    return %arg0, %arg1, %c0_i32, %c0_i32_0 : i32, i32, i32, i32
  }
  func.func @transform_1(%arg0: i32, %arg1: i32, %arg2: i32) -> (i32, i32, i32) {
    %c0_i32 = arith.constant 0 : i32
    %c0_i32_0 = arith.constant 0 : i32
    %c0_i32_1 = arith.constant 0 : i32
    return %arg0, %c0_i32, %c0_i32_0 : i32, i32, i32
  }
  func.func @transform_2(%arg0: i32, %arg1: i32, %arg2: i32) -> (i32, i32, i32) {
    %c0_i32 = arith.constant 0 : i32
    %c0_i32_0 = arith.constant 0 : i32
    %c0_i32_1 = arith.constant 0 : i32
    return %arg0, %c0_i32, %c0_i32_0 : i32, i32, i32
  }
  func.func @transform_3(%arg0: i32, %arg1: i32, %arg2: i32) -> (i32, i32, i32) {
    %c0_i32 = arith.constant 0 : i32
    %c0_i32_0 = arith.constant 0 : i32
    %c0_i32_1 = arith.constant 0 : i32
    return %arg0, %c0_i32, %c0_i32_0 : i32, i32, i32
  }
  func.func @transform_4(%arg0: i32, %arg1: i32, %arg2: i32) -> (i32, i32, i32) {
    %c0_i32 = arith.constant 0 : i32
    %c0_i32_0 = arith.constant 0 : i32
    %c0_i32_1 = arith.constant 0 : i32
    return %arg0, %c0_i32, %c0_i32_0 : i32, i32, i32
  }
  func.func @transform_5(%arg0: i32, %arg1: i32, %arg2: i32) -> (i32, i32, i32) {
    %c0_i32 = arith.constant 0 : i32
    %c0_i32_0 = arith.constant 0 : i32
    %c0_i32_1 = arith.constant 0 : i32
    return %arg0, %c0_i32, %c0_i32_0 : i32, i32, i32
  }
  func.func @transform_6(%arg0: i32, %arg1: i32, %arg2: i32) -> (i32, i32, i32) {
    %c0_i32 = arith.constant 0 : i32
    %c0_i32_0 = arith.constant 0 : i32
    %c0_i32_1 = arith.constant 0 : i32
    return %arg0, %c0_i32, %c0_i32_0 : i32, i32, i32
  }
  func.func @transform_7(%arg0: i32, %arg1: i32, %arg2: i32) -> (i32, i32, i32) {
    %c0_i32 = arith.constant 0 : i32
    %c0_i32_0 = arith.constant 0 : i32
    %c0_i32_1 = arith.constant 0 : i32
    return %arg0, %c0_i32, %c0_i32_0 : i32, i32, i32
  }
  func.func @transform_8(%arg0: i32, %arg1: i32, %arg2: i32) -> (i32, i32, i32) {
    %c0_i32 = arith.constant 0 : i32
    %c0_i32_0 = arith.constant 0 : i32
    %c0_i32_1 = arith.constant 0 : i32
    return %arg0, %c0_i32, %c0_i32_0 : i32, i32, i32
  }
  func.func @transform_9(%arg0: i32, %arg1: i32, %arg2: i32) -> (i32, i32, i32) {
    %c0_i32 = arith.constant 0 : i32
    %c0_i32_0 = arith.constant 0 : i32
    %c0_i32_1 = arith.constant 0 : i32
    return %arg0, %c0_i32, %c0_i32_0 : i32, i32, i32
  }
  func.func @transform_10(%arg0: i32, %arg1: i32, %arg2: i32) -> (i32, i32, i32) {
    %c0_i32 = arith.constant 0 : i32
    %c0_i32_0 = arith.constant 0 : i32
    %c0_i32_1 = arith.constant 0 : i32
    return %arg0, %c0_i32, %c0_i32_0 : i32, i32, i32
  }
  func.func @transform_11(%arg0: i32, %arg1: i32, %arg2: i32) -> (i32, i32, i32, i32) {
    %c0_i32 = arith.constant 0 : i32
    %c0_i32_0 = arith.constant 0 : i32
    return %arg0, %arg1, %arg2, %c0_i32 : i32, i32, i32, i32
  }
  func.func @transform_12(%arg0: i32, %arg1: i32, %arg2: i32) -> (i32, i32, i32, i32) {
    %c0_i32 = arith.constant 0 : i32
    %c0_i32_0 = arith.constant 0 : i32
    return %arg0, %arg1, %arg2, %c0_i32 : i32, i32, i32, i32
  }
}

</mosaic_0001>

<bundles_post_ra>
// kernel: encoder_forward.2
= control target key start
LH: loop header
LB: loop body
LE: loop exit
PB: predicated region body
PF: predicated region fallthrough
CT: control target
= control target key end

     0   :  { %s5434_s21 = smov 0   ;;  %s5436_s22 = smov 0   ;;  %s6545_s0 = inlined_call_operand.vmem [shape: f32[2,2,256,128], index: 0, kind: input, shape index: {}]   ;;  %s6546_s1 = inlined_call_operand.vmem [shape: bf16[2,128,384], index: 1, kind: input, shape index: {}]   ;;  %s6547_s2 = inlined_call_operand.vmem [shape: bf16[2,128,128], index: 2, kind: input, shape index: {}]   ;;  %s6548_s3 = inlined_call_operand.vmem [shape: bf16[2,128,256], index: 3, kind: input, shape index: {}]   ;;  %s6549_s4 = inlined_call_operand.vmem [shape: f32[2,1,256], index: 4, kind: input, shape index: {}]   ;;  %s6550_s5 = inlined_call_operand.vmem [shape: bf16[2,256,128], index: 5, kind: input, shape index: {}]   ;;  %s6551_s6 = inlined_call_operand.vmem [shape: f32[2,1,128], index: 6, kind: input, shape index: {}]   ;;  %s6552_s7 = inlined_call_operand.vmem [shape: f32[2,1,128], index: 7, kind: input, shape index: {}]   ;;  %s6553_s8 = inlined_call_operand.vmem [shape: f32[2,1,128], index: 8, kind: input, shape index: {}]   ;;  %s6554_s9 = inlined_call_operand.vmem [shape: f32[2,1,128], index: 9, kind: input, shape index: {}]   ;;  %s6555_s10 = inlined_call_operand.vmem [shape: f32[2,1,128], index: 10, kind: input, shape index: {}]   ;;  %s6556_s11 = inlined_call_operand.vmem [shape: f32[2,2,256,128], index: 11, kind: output, shape index: {0}]   ;;  %s6557_s12 = inlined_call_operand.vmem [shape: f32[2,2,256,256], index: 12, kind: output, shape index: {1}]  }
   0x1   :  { %6566 = sst [smem:[#allocation15_spill]] %s6545_s0  ;;  %s5438_s23 = smov 0  }
   0x2   :  { %6567 = sst [smem:[#allocation16_spill]] %s6546_s1  ;;  %s5440_s24 = smov 0  }
   0x3   :  { %6568 = sst [smem:[#allocation17_spill]] %s6547_s2  ;;  %s5442_s25 = smov 0  }
   0x4   :  { %6569 = sst [smem:[#allocation18_spill]] %s6548_s3  ;;  %s5444_s26 = smov 0  }
   0x5   :  { %6570 = sst [smem:[#allocation19_spill]] %s6549_s4  ;;  %s5446_s27 = smov 0  }
   0x6   :  { %6571 = sst [smem:[#allocation20_spill]] %s6550_s5 }
   0x7   :  { %6572 = sst [smem:[#allocation21_spill]] %s6551_s6 }
   0x8   :  { %6573 = sst [smem:[#allocation22_spill]] %s6554_s9 }
   0x9   :  { %6574 = sst [smem:[#allocation23_spill]] %s6555_s10 }
   0xa   :  { %6575 = sst [smem:[#allocation24_spill]] %s6556_s11 }
   0xb   :  { %6576 = sst [smem:[#allocation25_spill]] %s6557_s12 }
   0xc LB: > { %6577 = sst [smem:[#allocation5_spill]] %s5341_s21  ;;  %s35_s28 = sadd.s32 1, %s5353_s24  ;;  %s5365_s27 = sphi %s5446_s27, %s23_s27   ;;  %s5361_s26 = sphi %s5444_s26, %s6615_s26   ;;  %s5357_s25 = sphi %s5442_s25, %s6614_s25   ;;  %s5353_s24 = sphi %s5440_s24, %s6613_s24   ;;  %s5349_s23 = sphi %s5438_s23, %s6612_s23   ;;  %s5345_s22 = sphi %s5436_s22, %s6611_s22   ;;  %s5341_s21 = sphi %s5434_s21, %s6610_s21  }
   0xd   : > { %6578 = sst [smem:[#allocation6_spill]] %s5353_s24  ;;  %p36_p0 = scmp.ge.s32.totalorder %s35_s28, 2 }
   0xe   : > { %6579 = sst [smem:[#allocation7_spill]] %s5357_s25  ;;  %s38_s29 = sadd.s32 1, %s5357_s25 }
   0xf   : > { %6580 = sst [smem:[#allocation8_spill]] %s5361_s26  ;;  %p4061_p1 = scmp.ge.s32.totalorder %s5365_s27, 1 }
  0x10   : > { %6581 = sst [smem:[#allocation9_spill]] %s5365_s27  ;;  %p487_p2 = scmp.lt.s32.totalorder %s5365_s27, 9 }
  0x11   : > { %s6617_s28 = smov (%p36_p0, %s35_s28), 0  ;;  %s6619_s29 = smov (!%p36_p0, %s38_s29), %s5357_s25 }
  0x12   : > { %6582 = sst [smem:[#allocation10_spill]] %s6617_s28  ;;  %p488_p3 = pnand %p4061_p1, %p487_p2 }
  0x13   : > { %p40_p4 = scmp.ge.s32.totalorder %s6619_s29, 2  ;;  %s42_s30 = sadd.s32 1, %s5361_s26 }
  0x15   : > { %s6621_s29 = smov (%p40_p4, %s6619_s29), 0  ;;  %s6623_s30 = smov (!%p40_p4, %s42_s30), %s5361_s26 }
  0x16   : > { %6583 = sst [smem:[#allocation11_spill]] %s6621_s29  ;;  %p44_p5 = scmp.ge.s32.totalorder %s6623_s30, 2 }
  0x17   : > { %491 = sbr.rel (%p488_p3) target bundleno = 2462 (0x99e), region = 64 }
  0x18   : > { %s6625_s30 = smov (%p44_p5, %s6623_s30), 0 }
  0x19   : > { %6584 = sst [smem:[#allocation12_spill]] %s6625_s30 }
  0x1c   : > { %p594_p6 = scmp.lt.s32.totalorder %s5349_s23, 1  ;;  %p596_p7 = scmp.lt.s32.totalorder %s5345_s22, 1 }
  0x1d   : > { %s4073_s13 = sshll.u32 %s5341_s21, 4  ;;  %s6585_s2 = sld [smem:[#allocation17_spill]] }
  0x1e   : > { %s6627_s23 = smov (!%p594_p6, %s5349_s23), 1  ;;  %s6629_s22 = smov (!%p596_p7, %s5345_s22), 1 }
  0x1f   : > { %s4063_s14 = sshll.u32 %s6627_s23, 6  ;;  %s4972_s15 = smul.u32 192, %s6627_s23 }
  0x20   : > { %s4062_s16 = sshll.u32 %s6629_s22, 5  ;;  %s6587_s1 = sld [smem:[#allocation16_spill]] }
  0x21   : > { %s600_s20 = sadd.s32 %s4063_s14, %s4062_s16  ;;  %s4293_s25 = sshll.u32 %s6627_s23, 7 }
  0x22   : > { %s4064_s26 = sshll.u32 %s600_s20, 3  ;;  %s6588_s0 = sld [smem:[#allocation15_spill]] }
  0x23   : > { %s5486_s19 = scalar_lea.vmem %s6585_s2, %s4063_s14  ;;  %s6589_s3 = sld [smem:[#allocation18_spill]] }
  0x24   : > { %6586 = sst [smem:[#allocation13_spill]] %s5486_s19  ;;  %s4070_s17 = sshll.u32 %s6627_s23, 1 }
  0x25   : > { %s6590_s5 = sld [smem:[#allocation20_spill]]  ;;  %p647_p8 = scmp.lt.s32.totalorder %s4073_s13, 31 }
  0x26   : > { %s5491_s28 = scalar_lea.vmem %s6587_s1, %s4972_s15  ;;  %s6592_s4 = sld [smem:[#allocation19_spill]] }
  0x27   : > { %s6631_s13 = smov (!%p647_p8, %s4073_s13), 31  ;;  %s6596_s12 = sld [smem:[#allocation24_spill]] }
  0x28   : > { %s5497_s21 = scalar_lea.vmem %s6588_s0, %s4064_s26  ;;  %s650_s20 = sadd.s32 %s4062_s16, %s6631_s13 }
  0x29   : > { %s5502_s10 = scalar_lea.vmem %s6589_s3, %s4293_s25  ;;  %s4078_s24 = sshll.u32 %s6631_s13, 1 }
  0x2a   : > { %s652_s26 = sadd.s32 %s4063_s14, %s650_s20  ;;  %s6597_s9 = sld [smem:[#allocation25_spill]] }
  0x2b   : > { %s5508_s19 = scalar_lea.vmem %s6590_s5, %s4293_s25  ;;  %s4076_s27 = sshll.u32 %s652_s26, 3 }
  0x2c   : > { %6591 = sst [smem:[#allocation14_spill]] %s5508_s19  ;;  %s5513_s15 = scalar_lea.vmem %s6592_s4, %s4070_s17 }
  0x2d   : > { %s6595_s17 = sld [smem:[#allocation23_spill]]  ;;  %s4079_s4 = sshll.u32 %s6629_s22, 6 }
  0x2e   : > { %s665_s0 = sadd.s32 %s4079_s4, %s4078_s24  ;;  %s5538_s3 = scalar_lea.vmem %s6596_s12, %s4076_s27 }
  0x2f   : > { %s667_s11 = sadd.s32 %s4293_s25, %s665_s0  ;;  %s6598_s29 = sld [smem:[#allocation5_spill]] }
  0x30   : > { %s4081_s2 = sshll.u32 %s667_s11, 3 }
  0x31   : > { %s5543_s19 = scalar_lea.vmem %s6597_s9, %s4081_s2 }
  0x33   : > { %s641_s30 = scalar_lea.vmem %s6595_s17, %s6627_s23 }
  0x35   : > { %p4082_p9 = scmp.ne.s32.totalorder %s6598_s29, 0 }
  0x37   : > { %675 = sbr.rel (%p4082_p9) target bundleno = 384 (0x180), region = 68 }
  0x3c   : > { %v5031_v0 = vld [vmem:[%s5491_s28 + $0xac] ss:$12 sps:$4 sm:$0xff]   ;;  %v5033_v1 = vld [vmem:[%s5491_s28 + $0xa8] ss:$12 sps:$4 sm:$0xff]   ;;  %v5367_v2 = vmov 0   ;;  %v676_v17 = vld [vmem:[%s5497_s21] sm:$0xff] }
  0x3d   : > { %916 = vmatprep.mubr.bf16.mxu0 %v5367_v2  ;;  %1036 = vmatprep.mubr.bf16.mxu1 %v5367_v2  ;;  %v5034_v3 = vld [vmem:[%s5491_s28 + $0x94] ss:$12 sps:$4 sm:$0xff]   ;;  %v5036_v4 = vld [vmem:[%s5491_s28 + $0x90] ss:$12 sps:$4 sm:$0xff]   ;;  %v5039_v6 = vld [vmem:[%s5491_s28 + $0x78] ss:$12 sps:$4 sm:$0xff]  }
  0x3e   : > { %884 = vmatprep.subr.bf16.mxu0 %v5031_v0  ;;  %4956 = vmatprep.subr.bf16.mxu1 %v5031_v0  ;;  %v5037_v5 = vld [vmem:[%s5491_s28 + $0x7c] ss:$12 sps:$4 sm:$0xff]   ;;  %v5040_v7 = vld [vmem:[%s5491_s28 + $0x64] ss:$12 sps:$4 sm:$0xff]   ;;  %v5042_v8 = vld [vmem:[%s5491_s28 + $0x60] ss:$12 sps:$4 sm:$0xff]  }
  0x3f   : > { %885 = vmatpush1.bf16.msra.mxu0 %v5033_v1  ;;  %4964 = vmatpush1.bf16.msra.mxu1 %v5033_v1  ;;  %v5043_v9 = vld [vmem:[%s5491_s28 + $0x4c] ss:$12 sps:$4 sm:$0xff]   ;;  %v5045_v10 = vld [vmem:[%s5491_s28 + $0x48] ss:$12 sps:$4 sm:$0xff]   ;;  %v5048_v12 = vld [vmem:[%s5491_s28 + $0x30] ss:$12 sps:$4 sm:$0xff]  }
  0x40   : > { %886 = vmatprep.subr.bf16.mxu0 %v5034_v3  ;;  %4957 = vmatprep.subr.bf16.mxu1 %v5034_v3  ;;  %v5046_v11 = vld [vmem:[%s5491_s28 + $0x34] ss:$12 sps:$4 sm:$0xff]   ;;  %v5049_v13 = vld [vmem:[%s5491_s28 + $0x1c] ss:$12 sps:$4 sm:$0xff]   ;;  %v5051_v14 = vld [vmem:[%s5491_s28 + $0x18] ss:$12 sps:$4 sm:$0xff]  }
  0x41   : > { %v5052_v15 = vld [vmem:[%s5491_s28 + $0x4] ss:$12 sps:$4 sm:$0xff]   ;;  %v5054_v16 = vld [vmem:[%s5491_s28] ss:$12 sps:$4 sm:$0xff]   ;;  %v679_v26 = vld [vmem:[%s5497_s21 + $0x18] sm:$0xff] }
  0x42   : > { %v677_v18 = vld [vmem:[%s5497_s21 + $0x8] sm:$0xff]  ;;  %v700_v19 = vld [vmem:[%s5497_s21 + $0xc0] sm:$0xff]  ;;  %v5055_v21 = vld [vmem:[%s5491_s28 + $0xb0] ss:$12 sps:$4 sm:$0xff]  }
  0x43   : > { %887 = vmatpush1.bf16.msra.mxu0 %v5036_v4  ;;  %4965 = vmatpush1.bf16.msra.mxu1 %v5036_v4  ;;  %v701_v20 = vld [vmem:[%s5497_s21 + $0xc8] sm:$0xff]  ;;  %v708_v22 = vpack.c.bf16 %v677_v18, %v676_v17  ;;  %v5056_v24 = vld [vmem:[%s5491_s28 + $0x98] ss:$12 sps:$4 sm:$0xff]   ;;  %v678_v25 = vld [vmem:[%s5497_s21 + $0x10] sm:$0xff] }
  0x44   : > { %888 = vmatprep.subr.bf16.mxu0 %v5037_v5  ;;  %4958 = vmatprep.subr.bf16.mxu1 %v5037_v5  ;;  %v5569_v23 = vpack.c.bf16 %v701_v20, %v700_v19  ;;  %v702_v27 = vld [vmem:[%s5497_s21 + $0xd0] sm:$0xff]  ;;  %v703_v28 = vld [vmem:[%s5497_s21 + $0xd8] sm:$0xff]  ;;  %v5057_v29 = vld [vmem:[%s5491_s28 + $0x80] ss:$12 sps:$4 sm:$0xff]   ;;  %v709_v30 = vpack.c.bf16 %v679_v26, %v678_v25 }
  0x45   : > { %v5580_v31 = vpack.c.bf16 %v703_v28, %v702_v27  ;;  %v5058_v32 = vld [vmem:[%s5491_s28 + $0x68] ss:$12 sps:$4 sm:$0xff]   ;;  %v680_v33 = vld [vmem:[%s5497_s21 + $0x20] sm:$0xff]  ;;  %v5059_v37 = vld [vmem:[%s5491_s28 + $0x50] ss:$12 sps:$4 sm:$0xff]  }
  0x46   : > { %v681_v34 = vld [vmem:[%s5497_s21 + $0x28] sm:$0xff]  ;;  %v704_v35 = vld [vmem:[%s5497_s21 + $0xe0] sm:$0xff]  ;;  %v682_v41 = vld [vmem:[%s5497_s21 + $0x30] sm:$0xff] }
  0x47   : > { %889 = vmatpush1.bf16.msra.mxu0 %v5039_v6  ;;  %4966 = vmatpush1.bf16.msra.mxu1 %v5039_v6  ;;  %v705_v36 = vld [vmem:[%s5497_s21 + $0xe8] sm:$0xff]  ;;  %v710_v38 = vpack.c.bf16 %v681_v34, %v680_v33  ;;  %v5060_v40 = vld [vmem:[%s5491_s28 + $0x38] ss:$12 sps:$4 sm:$0xff]   ;;  %v706_v43 = vld [vmem:[%s5497_s21 + $0xf0] sm:$0xff] }
  0x48   : > { %890 = vmatprep.subr.bf16.mxu0 %v5040_v7  ;;  %4959 = vmatprep.subr.bf16.mxu1 %v5040_v7  ;;  %v5591_v39 = vpack.c.bf16 %v705_v36, %v704_v35  ;;  %v683_v42 = vld [vmem:[%s5497_s21 + $0x38] sm:$0xff]  ;;  %v5061_v45 = vld [vmem:[%s5491_s28 + $0x20] ss:$12 sps:$4 sm:$0xff]   ;;  %v5062_v48 = vld [vmem:[%s5491_s28 + $0x8] ss:$12 sps:$4 sm:$0xff]  }
  0x49   : > { %v707_v44 = vld [vmem:[%s5497_s21 + $0xf8] sm:$0xff]  ;;  %v711_v46 = vpack.c.bf16 %v683_v42, %v682_v41  ;;  %v684_v49 = vld [vmem:[%s5497_s21 + $0x40] sm:$0xff]  ;;  %v685_v50 = vld [vmem:[%s5497_s21 + $0x48] sm:$0xff] }
  0x4a   : > { %v5602_v47 = vpack.c.bf16 %v707_v44, %v706_v43  ;;  %v712_v51 = vpack.c.bf16 %v685_v50, %v684_v49  ;;  %v686_v52 = vld [vmem:[%s5497_s21 + $0x50] sm:$0xff]  ;;  %v687_v53 = vld [vmem:[%s5497_s21 + $0x58] sm:$0xff]  ;;  %v688_v55 = vld [vmem:[%s5497_s21 + $0x60] sm:$0xff] }
  0x4b   : > { %891 = vmatpush1.bf16.msra.mxu0 %v5042_v8  ;;  %4967 = vmatpush1.bf16.msra.mxu1 %v5042_v8  ;;  %v713_v54 = vpack.c.bf16 %v687_v53, %v686_v52  ;;  %v689_v56 = vld [vmem:[%s5497_s21 + $0x68] sm:$0xff]  ;;  %v690_v58 = vld [vmem:[%s5497_s21 + $0x70] sm:$0xff]  ;;  %v691_v59 = vld [vmem:[%s5497_s21 + $0x78] sm:$0xff] }
  0x4c   : > { %892 = vmatprep.subr.bf16.mxu0 %v5043_v9  ;;  %4960 = vmatprep.subr.bf16.mxu1 %v5043_v9  ;;  %v714_v57 = vpack.c.bf16 %v689_v56, %v688_v55  ;;  %v692_v60 = vld [vmem:[%s5497_s21 + $0x80] sm:$0xff]  ;;  %v693_v61 = vld [vmem:[%s5497_s21 + $0x88] sm:$0xff]  ;;  %v715_v62 = vpack.c.bf16 %v691_v59, %v690_v58  ;;  %v694_v0 = vld [vmem:[%s5497_s21 + $0x90] sm:$0xff] }
  0x4d   : > { %v716_v63 = vpack.c.bf16 %v693_v61, %v692_v60  ;;  %v695_v1 = vld [vmem:[%s5497_s21 + $0x98] sm:$0xff]  ;;  %v696_v3 = vld [vmem:[%s5497_s21 + $0xa0] sm:$0xff]  ;;  %v697_v4 = vld [vmem:[%s5497_s21 + $0xa8] sm:$0xff] }
  0x4e   : > { %v717_v5 = vpack.c.bf16 %v695_v1, %v694_v0  ;;  %v718_v6 = vpack.c.bf16 %v697_v4, %v696_v3  ;;  %v698_v7 = vld [vmem:[%s5497_s21 + $0xb0] sm:$0xff]  ;;  %v699_v8 = vld [vmem:[%s5497_s21 + $0xb8] sm:$0xff] }
  0x4f   : > { %893 = vmatpush1.bf16.msra.mxu0 %v5045_v10  ;;  %4968 = vmatpush1.bf16.msra.mxu1 %v5045_v10  ;;  %v719_v9 = vpack.c.bf16 %v699_v8, %v698_v7 }
  0x50   : > { %894 = vmatprep.subr.bf16.mxu0 %v5046_v11  ;;  %4961 = vmatprep.subr.bf16.mxu1 %v5046_v11 }
  0x53   : > { %895 = vmatpush1.bf16.msra.mxu0 %v5048_v12  ;;  %4969 = vmatpush1.bf16.msra.mxu1 %v5048_v12 }
  0x54   : > { %896 = vmatprep.subr.bf16.mxu0 %v5049_v13  ;;  %4962 = vmatprep.subr.bf16.mxu1 %v5049_v13 }
  0x57   : > { %897 = vmatpush1.bf16.msra.mxu0 %v5051_v14  ;;  %4970 = vmatpush1.bf16.msra.mxu1 %v5051_v14 }
  0x58   : > { %898 = vmatprep.subr.bf16.mxu0 %v5052_v15  ;;  %4963 = vmatprep.subr.bf16.mxu1 %v5052_v15 }
  0x5b   : > { %899 = vmatpush1.bf16.msra.mxu0 %v5054_v16  ;;  %4971 = vmatpush1.bf16.msra.mxu1 %v5054_v16 }
  0x5c   : > { %4876 = vmatprep.subr.bf16.mxu1 %v5055_v21 }
  0x5e   : > { %917 = vmatmul.mubr.bf16.vlgmr.msra.gmra.mxu0 %v708_v22  ;;  %1037 = vmatmul.mubr.bf16.vlgmr.msra.gmra.mxu1 %v5569_v23 }
  0x5f   : > { %4877 = vmatpush3.bf16.msra.mxu1 %v5055_v21  ;;  %926 = vmatprep.mubr.bf16.mxu0 %v5367_v2 }
  0x60   : > { %4878 = vmatprep.subr.bf16.mxu1 %v5056_v24  ;;  %1046 = vmatprep.mubr.bf16.mxu1 %v5367_v2 }
  0x63   : > { %4879 = vmatpush3.bf16.msra.mxu1 %v5056_v24 }
  0x64   : > { %4880 = vmatprep.subr.bf16.mxu1 %v5057_v29 }
  0x66   : > { %927 = vmatmul.mubr.bf16.gmra.mxu0 %v709_v30  ;;  %1047 = vmatmul.mubr.bf16.gmra.mxu1 %v5580_v31 }
  0x67   : > { %4881 = vmatpush3.bf16.msra.mxu1 %v5057_v29  ;;  %936 = vmatprep.mubr.bf16.mxu0 %v5367_v2 }
  0x68   : > { %4882 = vmatprep.subr.bf16.mxu1 %v5058_v32  ;;  %1056 = vmatprep.mubr.bf16.mxu1 %v5367_v2 }
  0x6b   : > { %4883 = vmatpush3.bf16.msra.mxu1 %v5058_v32 }
  0x6c   : > { %4884 = vmatprep.subr.bf16.mxu1 %v5059_v37 }
  0x6e   : > { %937 = vmatmul.mubr.bf16.gmra.mxu0 %v710_v38  ;;  %1057 = vmatmul.mubr.bf16.gmra.mxu1 %v5591_v39 }
  0x6f   : > { %4885 = vmatpush3.bf16.msra.mxu1 %v5059_v37  ;;  %946 = vmatprep.mubr.bf16.mxu0 %v5367_v2 }
  0x70   : > { %4886 = vmatprep.subr.bf16.mxu1 %v5060_v40  ;;  %1066 = vmatprep.mubr.bf16.mxu1 %v5367_v2 }
  0x73   : > { %4887 = vmatpush3.bf16.msra.mxu1 %v5060_v40 }
  0x74   : > { %4888 = vmatprep.subr.bf16.mxu1 %v5061_v45 }
  0x76   : > { %947 = vmatmul.mubr.bf16.gmra.mxu0 %v711_v46  ;;  %1067 = vmatmul.mubr.bf16.gmra.mxu1 %v5602_v47 }
  0x77   : > { %4889 = vmatpush3.bf16.msra.mxu1 %v5061_v45  ;;  %956 = vmatprep.mubr.bf16.mxu0 %v5367_v2 }
  0x78   : > { %4890 = vmatprep.subr.bf16.mxu1 %v5062_v48  ;;  %4892 = vmatprep.mubr.bf16.mxu1 %v708_v22 }
  0x7b   : > { %4891 = vmatpush3.bf16.msra.mxu1 %v5062_v48 }
  0x7e   : > { %957 = vmatmul.mubr.bf16.gmra.mxu0 %v712_v51  ;;  %4893 = vmatmul.mubr.bf16.vlgmr.msra.gmra.mxu1 %v709_v30 }
  0x7f   : > { %966 = vmatprep.mubr.bf16.mxu0 %v5367_v2  ;;  %4896 = vmatprep.mubr.bf16.mxu1 %v710_v38 }
  0x86   : > { %967 = vmatmul.mubr.bf16.gmra.mxu0 %v713_v54  ;;  %4897 = vmatmul.mubr.bf16.gmra.mxu1 %v711_v46 }
  0x87   : > { %976 = vmatprep.mubr.bf16.mxu0 %v5367_v2  ;;  %4900 = vmatprep.mubr.bf16.mxu1 %v712_v51 }
  0x8e   : > { %977 = vmatmul.mubr.bf16.gmra.mxu0 %v714_v57  ;;  %4901 = vmatmul.mubr.bf16.gmra.mxu1 %v713_v54 }
  0x8f   : > { %986 = vmatprep.mubr.bf16.mxu0 %v5367_v2  ;;  %4904 = vmatprep.mubr.bf16.mxu1 %v714_v57 }
  0x96   : > { %987 = vmatmul.mubr.bf16.gmra.mxu0 %v715_v62  ;;  %4905 = vmatmul.mubr.bf16.gmra.mxu1 %v715_v62 }
  0x97   : > { %996 = vmatprep.mubr.bf16.mxu0 %v5367_v2  ;;  %4908 = vmatprep.mubr.bf16.mxu1 %v716_v63 }
  0x9e   : > { %997 = vmatmul.mubr.bf16.gmra.mxu0 %v716_v63  ;;  %4909 = vmatmul.mubr.bf16.gmra.mxu1 %v717_v5 }
  0x9f   : > { %1006 = vmatprep.mubr.bf16.mxu0 %v5367_v2  ;;  %4912 = vmatprep.mubr.bf16.mxu1 %v718_v6 }
  0xa6   : > { %1007 = vmatmul.mubr.bf16.gmra.mxu0 %v717_v5  ;;  %4913 = vmatmul.mubr.bf16.gmra.mxu1 %v719_v9 }
  0xa7   : > { %1016 = vmatprep.mubr.bf16.mxu0 %v5367_v2  ;;  %4916 = vmatprep.mubr.bf16.mxu1 %v5569_v23 }
  0xae   : > { %1017 = vmatmul.mubr.bf16.gmra.mxu0 %v718_v6  ;;  %4917 = vmatmul.mubr.bf16.gmra.mxu1 %v5580_v31 }
  0xaf   : > { %1026 = vmatprep.mubr.bf16.mxu0 %v5367_v2  ;;  %4920 = vmatprep.mubr.bf16.mxu1 %v5591_v39 }
  0xb6   : > { %1027 = vmatmul.mubr.bf16.gmra.mxu0 %v719_v9  ;;  %4921 = vmatmul.mubr.bf16.gmra.mxu1 %v5602_v47 }
 0x11e   : > { %v918_v10 = vpop.f32.mrf.mxu0  ;;  %v1038_v11 = vpop.f32.mrf.mxu1 }
 0x120   : > { %v920_v12 = vpop.f32.mrf.mxu0  ;;  %v1040_v13 = vpop.f32.mrf.mxu1 }
 0x122   : > { %v922_v14 = vpop.f32.mrf.mxu0  ;;  %v1042_v15 = vpop.f32.mrf.mxu1 }
 0x123   : > { %v4394_v16 = vpack.c.bf16 %v922_v14, %v918_v10  ;;  %v4454_v17 = vpack.c.bf16 %v1042_v15, %v1038_v11 }
 0x124   : > { %v924_v18 = vpop.f32.mrf.mxu0  ;;  %v1044_v19 = vpop.f32.mrf.mxu1 }
 0x125   : > { %4395 = vst [vmem:[#allocation2] sm:$0xff] %v4394_v16   ;;  %4642 = vst [vmem:[#allocation2 + $0x60] sm:$0xff] %v4454_v17   ;;  %v4474_v20 = vpack.c.bf16 %v924_v18, %v920_v12  ;;  %v4534_v21 = vpack.c.bf16 %v1044_v19, %v1040_v13 }
 0x126   : > { %v928_v2 = vpop.f32.mrf.mxu0  ;;  %v1048_v22 = vpop.f32.mrf.mxu1 }
 0x127   : > { %4475 = vst [vmem:[#allocation3] sm:$0xff] %v4474_v20   ;;  %4657 = vst [vmem:[#allocation3 + $0x60] sm:$0xff] %v4534_v21  }
 0x128   : > { %v930_v23 = vpop.f32.mrf.mxu0  ;;  %v1050_v24 = vpop.f32.mrf.mxu1 }
 0x12a   : > { %v932_v25 = vpop.f32.mrf.mxu0  ;;  %v1052_v26 = vpop.f32.mrf.mxu1 }
 0x12b   : > { %v4399_v27 = vpack.c.bf16 %v932_v25, %v928_v2  ;;  %v4459_v28 = vpack.c.bf16 %v1052_v26, %v1048_v22 }
 0x12c   : > { %v934_v29 = vpop.f32.mrf.mxu0  ;;  %v1054_v30 = vpop.f32.mrf.mxu1 }
 0x12d   : > { %4631 = vst [vmem:[#allocation2 + $0x8] sm:$0xff] %v4399_v27   ;;  %4643 = vst [vmem:[#allocation2 + $0x68] sm:$0xff] %v4459_v28   ;;  %v4479_v31 = vpack.c.bf16 %v934_v29, %v930_v23  ;;  %v4539_v32 = vpack.c.bf16 %v1054_v30, %v1050_v24 }
 0x12e   : > { %v938_v33 = vpop.f32.mrf.mxu0  ;;  %v1058_v34 = vpop.f32.mrf.mxu1 }
 0x12f   : > { %4646 = vst [vmem:[#allocation3 + $0x8] sm:$0xff] %v4479_v31   ;;  %4658 = vst [vmem:[#allocation3 + $0x68] sm:$0xff] %v4539_v32  }
 0x130   : > { %v940_v35 = vpop.f32.mrf.mxu0  ;;  %v1060_v36 = vpop.f32.mrf.mxu1 }
 0x132   : > { %v942_v37 = vpop.f32.mrf.mxu0  ;;  %v1062_v38 = vpop.f32.mrf.mxu1 }
 0x133   : > { %v4404_v39 = vpack.c.bf16 %v942_v37, %v938_v33  ;;  %v4464_v40 = vpack.c.bf16 %v1062_v38, %v1058_v34 }
 0x134   : > { %v944_v41 = vpop.f32.mrf.mxu0  ;;  %v1064_v42 = vpop.f32.mrf.mxu1 }
 0x135   : > { %4632 = vst [vmem:[#allocation2 + $0x10] sm:$0xff] %v4404_v39   ;;  %4644 = vst [vmem:[#allocation2 + $0x70] sm:$0xff] %v4464_v40   ;;  %v4484_v43 = vpack.c.bf16 %v944_v41, %v940_v35  ;;  %v4544_v44 = vpack.c.bf16 %v1064_v42, %v1060_v36 }
 0x136   : > { %v948_v45 = vpop.f32.mrf.mxu0  ;;  %v1068_v46 = vpop.f32.mrf.mxu1 }
 0x137   : > { %4647 = vst [vmem:[#allocation3 + $0x10] sm:$0xff] %v4484_v43   ;;  %4659 = vst [vmem:[#allocation3 + $0x70] sm:$0xff] %v4544_v44  }
 0x138   : > { %v950_v47 = vpop.f32.mrf.mxu0  ;;  %v1070_v48 = vpop.f32.mrf.mxu1 }
 0x13a   : > { %v952_v49 = vpop.f32.mrf.mxu0  ;;  %v1072_v50 = vpop.f32.mrf.mxu1 }
 0x13b   : > { %v4409_v51 = vpack.c.bf16 %v952_v49, %v948_v45  ;;  %v4469_v52 = vpack.c.bf16 %v1072_v50, %v1068_v46 }
 0x13c   : > { %v954_v53 = vpop.f32.mrf.mxu0  ;;  %v1074_v54 = vpop.f32.mrf.mxu1 }
 0x13d   : > { %4633 = vst [vmem:[#allocation2 + $0x18] sm:$0xff] %v4409_v51   ;;  %4645 = vst [vmem:[#allocation2 + $0x78] sm:$0xff] %v4469_v52   ;;  %v4489_v55 = vpack.c.bf16 %v954_v53, %v950_v47  ;;  %v4549_v56 = vpack.c.bf16 %v1074_v54, %v1070_v48 }
 0x13e   : > { %v958_v57 = vpop.f32.mrf.mxu0  ;;  %v4894_v58 = vpop.f32.mrf.mxu1 }
 0x13f   : > { %4648 = vst [vmem:[#allocation3 + $0x18] sm:$0xff] %v4489_v55   ;;  %4660 = vst [vmem:[#allocation3 + $0x78] sm:$0xff] %v4549_v56  }
 0x140   : > { %v960_v59 = vpop.f32.mrf.mxu0  ;;  %v1111_v60 = vpop.f32.mrf.mxu1 }
 0x142   : > { %v962_v61 = vpop.f32.mrf.mxu0  ;;  %v4895_v62 = vpop.f32.mrf.mxu1 }
 0x143   : > { %v4414_v63 = vpack.c.bf16 %v962_v61, %v958_v57  ;;  %v4559_v0 = vpack.c.bf16 %v4895_v62, %v4894_v58 }
 0x144   : > { %v964_v1 = vpop.f32.mrf.mxu0  ;;  %v1114_v3 = vpop.f32.mrf.mxu1 }
 0x145   : > { %4634 = vst [vmem:[#allocation2 + $0x20] sm:$0xff] %v4414_v63   ;;  %4661 = vst [vmem:[#allocation4 + $0x8] sm:$0xff] %v4559_v0   ;;  %v4494_v4 = vpack.c.bf16 %v964_v1, %v960_v59  ;;  %v4554_v5 = vpack.c.bf16 %v1114_v3, %v1111_v60 }
 0x146   : > { %v968_v6 = vpop.f32.mrf.mxu0  ;;  %v4898_v7 = vpop.f32.mrf.mxu1 }
 0x147   : > { %4649 = vst [vmem:[#allocation3 + $0x20] sm:$0xff] %v4494_v4   ;;  %4555 = vst [vmem:[#allocation4] sm:$0xff] %v4554_v5  }
 0x148   : > { %v970_v8 = vpop.f32.mrf.mxu0  ;;  %v1127_v9 = vpop.f32.mrf.mxu1 }
 0x14a   : > { %v972_v10 = vpop.f32.mrf.mxu0  ;;  %v4899_v11 = vpop.f32.mrf.mxu1 }
 0x14b   : > { %v4419_v12 = vpack.c.bf16 %v972_v10, %v968_v6  ;;  %v4569_v13 = vpack.c.bf16 %v4899_v11, %v4898_v7 }
 0x14c   : > { %v974_v14 = vpop.f32.mrf.mxu0  ;;  %v1130_v15 = vpop.f32.mrf.mxu1 }
 0x14d   : > { %4635 = vst [vmem:[#allocation2 + $0x28] sm:$0xff] %v4419_v12   ;;  %4663 = vst [vmem:[#allocation4 + $0x18] sm:$0xff] %v4569_v13   ;;  %v4499_v16 = vpack.c.bf16 %v974_v14, %v970_v8  ;;  %v4564_v17 = vpack.c.bf16 %v1130_v15, %v1127_v9 }
 0x14e   : > { %v978_v18 = vpop.f32.mrf.mxu0  ;;  %v4902_v19 = vpop.f32.mrf.mxu1 }
 0x14f   : > { %4650 = vst [vmem:[#allocation3 + $0x28] sm:$0xff] %v4499_v16   ;;  %4662 = vst [vmem:[#allocation4 + $0x10] sm:$0xff] %v4564_v17  }
 0x150   : > { %v980_v20 = vpop.f32.mrf.mxu0  ;;  %v1143_v21 = vpop.f32.mrf.mxu1 }
 0x152   : > { %v982_v2 = vpop.f32.mrf.mxu0  ;;  %v4903_v22 = vpop.f32.mrf.mxu1 }
 0x153   : > { %v4424_v23 = vpack.c.bf16 %v982_v2, %v978_v18  ;;  %v4579_v24 = vpack.c.bf16 %v4903_v22, %v4902_v19 }
 0x154   : > { %v984_v25 = vpop.f32.mrf.mxu0  ;;  %v1146_v26 = vpop.f32.mrf.mxu1 }
 0x155   : > { %4636 = vst [vmem:[#allocation2 + $0x30] sm:$0xff] %v4424_v23   ;;  %4665 = vst [vmem:[#allocation4 + $0x28] sm:$0xff] %v4579_v24   ;;  %v4504_v27 = vpack.c.bf16 %v984_v25, %v980_v20  ;;  %v4574_v28 = vpack.c.bf16 %v1146_v26, %v1143_v21 }
 0x156   : > { %v988_v29 = vpop.f32.mrf.mxu0  ;;  %v4906_v30 = vpop.f32.mrf.mxu1 }
 0x157   : > { %4651 = vst [vmem:[#allocation3 + $0x30] sm:$0xff] %v4504_v27   ;;  %4664 = vst [vmem:[#allocation4 + $0x20] sm:$0xff] %v4574_v28  }
 0x158   : > { %v990_v31 = vpop.f32.mrf.mxu0  ;;  %v1159_v32 = vpop.f32.mrf.mxu1 }
 0x15a   : > { %v992_v33 = vpop.f32.mrf.mxu0  ;;  %v4907_v34 = vpop.f32.mrf.mxu1 }
 0x15b   : > { %v4429_v35 = vpack.c.bf16 %v992_v33, %v988_v29  ;;  %v4589_v36 = vpack.c.bf16 %v4907_v34, %v4906_v30 }
 0x15c   : > { %v994_v37 = vpop.f32.mrf.mxu0  ;;  %v1162_v38 = vpop.f32.mrf.mxu1 }
 0x15d   : > { %4637 = vst [vmem:[#allocation2 + $0x38] sm:$0xff] %v4429_v35   ;;  %4667 = vst [vmem:[#allocation4 + $0x38] sm:$0xff] %v4589_v36   ;;  %v4509_v39 = vpack.c.bf16 %v994_v37, %v990_v31  ;;  %v4584_v40 = vpack.c.bf16 %v1162_v38, %v1159_v32 }
 0x15e   : > { %v998_v41 = vpop.f32.mrf.mxu0  ;;  %v4910_v42 = vpop.f32.mrf.mxu1 }
 0x15f   : > { %4652 = vst [vmem:[#allocation3 + $0x38] sm:$0xff] %v4509_v39   ;;  %4666 = vst [vmem:[#allocation4 + $0x30] sm:$0xff] %v4584_v40  }
 0x160   : > { %v1000_v43 = vpop.f32.mrf.mxu0  ;;  %v1175_v44 = vpop.f32.mrf.mxu1 }
 0x162   : > { %v1002_v45 = vpop.f32.mrf.mxu0  ;;  %v4911_v46 = vpop.f32.mrf.mxu1 }
 0x163   : > { %v4434_v47 = vpack.c.bf16 %v1002_v45, %v998_v41  ;;  %v4599_v48 = vpack.c.bf16 %v4911_v46, %v4910_v42 }
 0x164   : > { %v1004_v49 = vpop.f32.mrf.mxu0  ;;  %v1178_v50 = vpop.f32.mrf.mxu1 }
 0x165   : > { %4638 = vst [vmem:[#allocation2 + $0x40] sm:$0xff] %v4434_v47   ;;  %4669 = vst [vmem:[#allocation4 + $0x48] sm:$0xff] %v4599_v48   ;;  %v4514_v51 = vpack.c.bf16 %v1004_v49, %v1000_v43  ;;  %v4594_v52 = vpack.c.bf16 %v1178_v50, %v1175_v44 }
 0x166   : > { %v1008_v53 = vpop.f32.mrf.mxu0  ;;  %v4914_v54 = vpop.f32.mrf.mxu1 }
 0x167   : > { %4653 = vst [vmem:[#allocation3 + $0x40] sm:$0xff] %v4514_v51   ;;  %4668 = vst [vmem:[#allocation4 + $0x40] sm:$0xff] %v4594_v52  }
 0x168   : > { %v1010_v55 = vpop.f32.mrf.mxu0  ;;  %v1191_v56 = vpop.f32.mrf.mxu1 }
 0x16a   : > { %v1012_v57 = vpop.f32.mrf.mxu0  ;;  %v4915_v58 = vpop.f32.mrf.mxu1 }
 0x16b   : > { %v4439_v59 = vpack.c.bf16 %v1012_v57, %v1008_v53  ;;  %v4609_v60 = vpack.c.bf16 %v4915_v58, %v4914_v54 }
 0x16c   : > { %v1014_v61 = vpop.f32.mrf.mxu0  ;;  %v1194_v62 = vpop.f32.mrf.mxu1 }
 0x16d   : > { %4639 = vst [vmem:[#allocation2 + $0x48] sm:$0xff] %v4439_v59   ;;  %4671 = vst [vmem:[#allocation4 + $0x58] sm:$0xff] %v4609_v60   ;;  %v4519_v63 = vpack.c.bf16 %v1014_v61, %v1010_v55  ;;  %v4604_v0 = vpack.c.bf16 %v1194_v62, %v1191_v56 }
 0x16e   : > { %v1018_v1 = vpop.f32.mrf.mxu0  ;;  %v4918_v3 = vpop.f32.mrf.mxu1 }
 0x16f   : > { %4654 = vst [vmem:[#allocation3 + $0x48] sm:$0xff] %v4519_v63   ;;  %4670 = vst [vmem:[#allocation4 + $0x50] sm:$0xff] %v4604_v0  }
 0x170   : > { %v1020_v4 = vpop.f32.mrf.mxu0  ;;  %v1207_v5 = vpop.f32.mrf.mxu1 }
 0x172   : > { %v1022_v6 = vpop.f32.mrf.mxu0  ;;  %v4919_v7 = vpop.f32.mrf.mxu1 }
 0x173   : > { %v4444_v8 = vpack.c.bf16 %v1022_v6, %v1018_v1  ;;  %v4619_v9 = vpack.c.bf16 %v4919_v7, %v4918_v3 }
 0x174   : > { %v1024_v10 = vpop.f32.mrf.mxu0  ;;  %v1210_v11 = vpop.f32.mrf.mxu1 }
 0x175   : > { %4640 = vst [vmem:[#allocation2 + $0x50] sm:$0xff] %v4444_v8   ;;  %4673 = vst [vmem:[#allocation4 + $0x68] sm:$0xff] %v4619_v9   ;;  %v4524_v12 = vpack.c.bf16 %v1024_v10, %v1020_v4  ;;  %v4614_v13 = vpack.c.bf16 %v1210_v11, %v1207_v5 }
 0x176   : > { %v1028_v14 = vpop.f32.mrf.mxu0  ;;  %v4922_v15 = vpop.f32.mrf.mxu1 }
 0x177   : > { %4655 = vst [vmem:[#allocation3 + $0x50] sm:$0xff] %v4524_v12   ;;  %4672 = vst [vmem:[#allocation4 + $0x60] sm:$0xff] %v4614_v13  }
 0x178   : > { %v1030_v16 = vpop.f32.mrf.mxu0  ;;  %v1223_v17 = vpop.f32.mrf.mxu1 }
 0x17a   : > { %v1032_v18 = vpop.f32.mrf.mxu0  ;;  %v4923_v19 = vpop.f32.mrf.mxu1 }
 0x17b   : > { %v4449_v20 = vpack.c.bf16 %v1032_v18, %v1028_v14  ;;  %v4629_v21 = vpack.c.bf16 %v4923_v19, %v4922_v15 }
 0x17c   : > { %v1034_v2 = vpop.f32.mrf.mxu0  ;;  %v1226_v22 = vpop.f32.mrf.mxu1 }
 0x17d   : > { %4641 = vst [vmem:[#allocation2 + $0x58] sm:$0xff] %v4449_v20   ;;  %4675 = vst [vmem:[#allocation4 + $0x78] sm:$0xff] %v4629_v21   ;;  %v4529_v23 = vpack.c.bf16 %v1034_v2, %v1030_v16  ;;  %v4624_v24 = vpack.c.bf16 %v1226_v22, %v1223_v17 }
 0x17f   : > { %4656 = vst [vmem:[#allocation3 + $0x58] sm:$0xff] %v4529_v23   ;;  %4674 = vst [vmem:[#allocation4 + $0x70] sm:$0xff] %v4624_v24  }
 0x180 PF: > { %v5063_v25 = vld [vmem:[#allocation3 + $0x78] sm:$0xff]   ;;  %s6599_s4 = sld [smem:[#allocation5_spill]]  ;;  %v5065_v27 = vld [vmem:[#allocation3 + $0x70] sm:$0xff]   ;;  %v5067_v29 = vld [vmem:[#allocation3 + $0x68] sm:$0xff]   ;;  %s6602_s14 = scalar_lea.vmem %s6552_s7, %s6627_s23 }
 0x181   : > { %v5064_v26 = vld [vmem:[#allocation3 + $0x38] sm:$0xff]   ;;  %4700 = vmatprep.subr.bf16.mxu0 %v5063_v25  ;;  %v5066_v28 = vld [vmem:[#allocation3 + $0x30] sm:$0xff]   ;;  %v5068_v30 = vld [vmem:[#allocation3 + $0x28] sm:$0xff]   ;;  %s6600_s25 = sld [smem:[#allocation13_spill]]  ;;  %s6603_s11 = scalar_lea.vmem %s6553_s8, %s6627_s23 }
 0x182   : > { %4701 = vmatpush3.bf16.xpose.msra.mxu0 %v5064_v26  ;;  %v5069_v31 = vld [vmem:[#allocation3 + $0x60] sm:$0xff]   ;;  %v5072_v35 = vld [vmem:[#allocation3 + $0x18] sm:$0xff]   ;;  %v5073_v36 = vld [vmem:[#allocation3 + $0x50] sm:$0xff]   ;;  %s6604_s20 = sld [smem:[#allocation21_spill]] }
 0x183   : > { %4702 = vmatprep.subr.bf16.mxu0 %v5065_v27  ;;  %v5070_v33 = vld [vmem:[#allocation3 + $0x20] sm:$0xff]   ;;  %v5074_v37 = vld [vmem:[#allocation3 + $0x10] sm:$0xff]   ;;  %v5075_v38 = vld [vmem:[#allocation3 + $0x48] sm:$0xff]   ;;  %s6606_s1 = sld [smem:[#allocation22_spill]] }
 0x184   : > { %v5076_v39 = vld [vmem:[#allocation3 + $0x8] sm:$0xff]   ;;  %v5077_v40 = vld [vmem:[#allocation3 + $0x40] sm:$0xff]  }
 0x185   : > { %v5078_v41 = vld [vmem:[#allocation3] sm:$0xff]  }
 0x186   : > { %s4203_s5 = sshll.u32 %s6599_s4, 7  ;;  %v5071_v34 = vld [vmem:[#allocation3 + $0x58] sm:$0xff]  }
 0x187   : > { %s1736_s6 = sshra.s32 %s4203_s5, 3  ;;  %s5946_s28 = scalar_lea.vmem %s5497_s21, %s4203_s5 }
 0x188   : > { %s4204_s9 = sshll.u32 %s1736_s6, 2  ;;  %s6605_s24 = scalar_lea.vmem %s6604_s20, %s6627_s23 }
 0x189   : > { %s5637_s22 = scalar_lea.vmem [#allocation2], %s4204_s9  ;;  %s6607_s12 = scalar_lea.vmem %s6606_s1, %s6627_s23 }
 0x18a   : > { %4703 = vmatpush3.bf16.xpose.msra.mxu0 %v5066_v28  ;;  %v5079_v32 = vld [vmem:[%s5637_s22] sm:$0xff]   ;;  %v5080_v42 = vld [vmem:[%s5637_s22 + $0x8] sm:$0xff]   ;;  %v5081_v43 = vld [vmem:[%s5637_s22 + $0x10] sm:$0xff]  }
 0x18b   : > { %4704 = vmatprep.subr.bf16.mxu0 %v5067_v29  ;;  %4716 = vmatprep.mubr.bf16.mxu0 %v5079_v32  ;;  %v5082_v44 = vld [vmem:[%s5637_s22 + $0x18] sm:$0xff]   ;;  %v5083_v45 = vld [vmem:[%s5637_s22 + $0x20] sm:$0xff]   ;;  %v5084_v46 = vld [vmem:[%s5637_s22 + $0x28] sm:$0xff]  }
 0x18c   : > { %v5085_v47 = vld [vmem:[%s5637_s22 + $0x30] sm:$0xff]   ;;  %v5086_v48 = vld [vmem:[%s5637_s22 + $0x38] sm:$0xff]  }
 0x192   : > { %4705 = vmatpush3.bf16.xpose.msra.mxu0 %v5068_v30 }
 0x193   : > { %4706 = vmatprep.subr.bf16.mxu0 %v5069_v31 }
 0x19a   : > { %4707 = vmatpush3.bf16.xpose.msra.mxu0 %v5070_v33 }
 0x19b   : > { %4708 = vmatprep.subr.bf16.mxu0 %v5071_v34 }
 0x1a2   : > { %4709 = vmatpush3.bf16.xpose.msra.mxu0 %v5072_v35 }
 0x1a3   : > { %4710 = vmatprep.subr.bf16.mxu0 %v5073_v36 }
 0x1aa   : > { %4711 = vmatpush3.bf16.xpose.msra.mxu0 %v5074_v37 }
 0x1ab   : > { %4712 = vmatprep.subr.bf16.mxu0 %v5075_v38 }
 0x1b2   : > { %4713 = vmatpush3.bf16.xpose.msra.mxu0 %v5076_v39 }
 0x1b3   : > { %4714 = vmatprep.subr.bf16.mxu0 %v5077_v40 }
 0x1ba   : > { %4715 = vmatpush3.bf16.xpose.msra.mxu0 %v5078_v41 }
 0x1c1   : > { %4717 = vmatmul.mubr.bf16.vlgmr.msra.gmra.mxu0 %v5079_v32 }
 0x1c2   : > { %4718 = vmatprep.mubr.bf16.mxu0 %v5080_v42 }
 0x1c9   : > { %4719 = vmatmul.mubr.bf16.gmra.mxu0 %v5080_v42 }
 0x1ca   : > { %4720 = vmatprep.mubr.bf16.mxu0 %v5081_v43 }
 0x1d1   : > { %4721 = vmatmul.mubr.bf16.gmra.mxu0 %v5081_v43 }
 0x1d2   : > { %4722 = vmatprep.mubr.bf16.mxu0 %v5082_v44 }
 0x1d9   : > { %4723 = vmatmul.mubr.bf16.gmra.mxu0 %v5082_v44 }
 0x1da   : > { %4724 = vmatprep.mubr.bf16.mxu0 %v5083_v45 }
 0x1e1   : > { %4725 = vmatmul.mubr.bf16.gmra.mxu0 %v5083_v45 }
 0x1e2   : > { %4726 = vmatprep.mubr.bf16.mxu0 %v5084_v46 }
 0x1e9   : > { %4727 = vmatmul.mubr.bf16.gmra.mxu0 %v5084_v46 }
 0x1ea   : > { %4728 = vmatprep.mubr.bf16.mxu0 %v5085_v47 }
 0x1f1   : > { %4729 = vmatmul.mubr.bf16.gmra.mxu0 %v5085_v47 }
 0x1f2   : > { %4730 = vmatprep.mubr.bf16.mxu0 %v5086_v48 }
 0x1f9   : > { %4731 = vmatmul.mubr.bf16.gmra.mxu0 %v5086_v48 }
 0x281   : > { %v1966_v49 = vpop.f32.mrf.mxu0 }
 0x282   : > { %v5647_v51 = vmul.f32 0.088388346, %v1966_v49 }
 0x283   : > { %v1968_v50 = vpop.f32.mrf.mxu0 }
 0x284   : > { %v5649_v52 = vmul.f32 0.088388346, %v1968_v50 }
 0x285   : > { %v1970_v53 = vpop.f32.mrf.mxu0 }
 0x286   : > { %v2077_v54 = vmax.f32 %v5647_v51, %v5649_v52  ;;  %v5653_v56 = vmul.f32 0.088388346, %v1970_v53 }
 0x287   : > { %v1972_v55 = vpop.f32.mrf.mxu0 }
 0x288   : > { %v5655_v57 = vmul.f32 0.088388346, %v1972_v55  ;;  %2078 = vmax.xlane.f32.xlu0 %v2077_v54 }
 0x289   : > { %v1976_v58 = vpop.f32.mrf.mxu0 }
 0x28a   : > { %v2080_v59 = vmax.f32 %v5653_v56, %v5655_v57  ;;  %v5659_v61 = vmul.f32 0.088388346, %v1976_v58 }
 0x28b   : > { %v1978_v60 = vpop.f32.mrf.mxu0 }
 0x28c   : > { %v5661_v62 = vmul.f32 0.088388346, %v1978_v60  ;;  %2081 = vmax.xlane.f32.xlu0 %v2080_v59 }
 0x28d   : > { %v1980_v63 = vpop.f32.mrf.mxu0 }
 0x28e   : > { %v2083_v0 = vmax.f32 %v5659_v61, %v5661_v62  ;;  %v5665_v3 = vmul.f32 0.088388346, %v1980_v63 }
 0x28f   : > { %v1982_v1 = vpop.f32.mrf.mxu0 }
 0x290   : > { %v5667_v4 = vmul.f32 0.088388346, %v1982_v1  ;;  %2084 = vmax.xlane.f32.xlu1 %v2083_v0 }
 0x291   : > { %v1986_v5 = vpop.f32.mrf.mxu0 }
 0x292   : > { %v2086_v6 = vmax.f32 %v5665_v3, %v5667_v4  ;;  %v5671_v8 = vmul.f32 0.088388346, %v1986_v5 }
 0x293   : > { %v1988_v7 = vpop.f32.mrf.mxu0 }
 0x294   : > { %v5673_v9 = vmul.f32 0.088388346, %v1988_v7  ;;  %2087 = vmax.xlane.f32.xlu1 %v2086_v6 }
 0x295   : > { %v1990_v10 = vpop.f32.mrf.mxu0 }
 0x296   : > { %v2089_v11 = vmax.f32 %v5671_v8, %v5673_v9  ;;  %v5677_v13 = vmul.f32 0.088388346, %v1990_v10 }
 0x297   : > { %v1992_v12 = vpop.f32.mrf.mxu0 }
 0x298   : > { %v5679_v14 = vmul.f32 0.088388346, %v1992_v12  ;;  %2090 = vmax.xlane.f32.xlu0 %v2089_v11  ;;  %v5087_v12 = vld [vmem:[#allocation4 + $0x78] sm:$0xff]  }
 0x299   : > { %v1996_v15 = vpop.f32.mrf.mxu0  ;;  %4732 = vmatprep.subr.bf16.mxu1 %v5087_v12 }
 0x29a   : > { %v2092_v16 = vmax.f32 %v5677_v13, %v5679_v14  ;;  %v5683_v18 = vmul.f32 0.088388346, %v1996_v15  ;;  %v5088_v15 = vld [vmem:[#allocation4 + $0x38] sm:$0xff]  }
 0x29b   : > { %v1998_v17 = vpop.f32.mrf.mxu0  ;;  %4733 = vmatpush3.bf16.msra.mxu1 %v5088_v15 }
 0x29c   : > { %v5685_v19 = vmul.f32 0.088388346, %v1998_v17  ;;  %2093 = vmax.xlane.f32.xlu1 %v2092_v16  ;;  %v5089_v16 = vld [vmem:[#allocation4 + $0x70] sm:$0xff]  }
 0x29d   : > { %v2000_v20 = vpop.f32.mrf.mxu0  ;;  %v5090_v17 = vld [vmem:[#allocation4 + $0x30] sm:$0xff]   ;;  %4734 = vmatprep.subr.bf16.mxu1 %v5089_v16 }
 0x29e   : > { %v2095_v21 = vmax.f32 %v5683_v18, %v5685_v19  ;;  %v5689_v22 = vmul.f32 0.088388346, %v2000_v20  ;;  %v5091_v20 = vld [vmem:[#allocation4 + $0x68] sm:$0xff]  }
 0x29f   : > { %v2002_v2 = vpop.f32.mrf.mxu0  ;;  %4735 = vmatpush3.bf16.msra.mxu1 %v5090_v17 }
 0x2a0   : > { %v5691_v23 = vmul.f32 0.088388346, %v2002_v2  ;;  %2096 = vmax.xlane.f32.xlu0 %v2095_v21  ;;  %4736 = vmatprep.subr.bf16.mxu1 %v5091_v20 }
 0x2a1   : > { %v2006_v24 = vpop.f32.mrf.mxu0 }
 0x2a2   : > { %v2098_v25 = vmax.f32 %v5689_v22, %v5691_v23  ;;  %v5695_v27 = vmul.f32 0.088388346, %v2006_v24 }
 0x2a3   : > { %v2008_v26 = vpop.f32.mrf.mxu0 }
 0x2a4   : > { %v5697_v28 = vmul.f32 0.088388346, %v2008_v26  ;;  %2099 = vmax.xlane.f32.xlu1 %v2098_v25 }
 0x2a5   : > { %v2010_v29 = vpop.f32.mrf.mxu0 }
 0x2a6   : > { %v2101_v30 = vmax.f32 %v5695_v27, %v5697_v28  ;;  %v5701_v32 = vmul.f32 0.088388346, %v2010_v29 }
 0x2a7   : > { %v2012_v31 = vpop.f32.mrf.mxu0 }
 0x2a8   : > { %v5703_v33 = vmul.f32 0.088388346, %v2012_v31  ;;  %2102 = vmax.xlane.f32.xlu0 %v2101_v30 }
 0x2a9   : > { %v2016_v34 = vpop.f32.mrf.mxu0 }
 0x2aa   : > { %v2104_v35 = vmax.f32 %v5701_v32, %v5703_v33  ;;  %v5707_v37 = vmul.f32 0.088388346, %v2016_v34 }
 0x2ab   : > { %v2018_v36 = vpop.f32.mrf.mxu0 }
 0x2ac   : > { %v5709_v38 = vmul.f32 0.088388346, %v2018_v36  ;;  %2105 = vmax.xlane.f32.xlu1 %v2104_v35 }
 0x2ad   : > { %v2020_v39 = vpop.f32.mrf.mxu0 }
 0x2ae   : > { %v2107_v40 = vmax.f32 %v5707_v37, %v5709_v38  ;;  %v5713_v42 = vmul.f32 0.088388346, %v2020_v39 }
 0x2af   : > { %v2022_v41 = vpop.f32.mrf.mxu0 }
 0x2b0   : > { %v5715_v43 = vmul.f32 0.088388346, %v2022_v41  ;;  %2108 = vmax.xlane.f32.xlu0 %v2107_v40 }
 0x2b1   : > { %v2026_v44 = vpop.f32.mrf.mxu0 }
 0x2b2   : > { %v2110_v45 = vmax.f32 %v5713_v42, %v5715_v43  ;;  %v5719_v47 = vmul.f32 0.088388346, %v2026_v44 }
 0x2b3   : > { %v2028_v46 = vpop.f32.mrf.mxu0 }
 0x2b4   : > { %v5721_v48 = vmul.f32 0.088388346, %v2028_v46  ;;  %2111 = vmax.xlane.f32.xlu1 %v2110_v45 }
 0x2b5   : > { %v2030_v49 = vpop.f32.mrf.mxu0 }
 0x2b6   : > { %v2113_v50 = vmax.f32 %v5719_v47, %v5721_v48  ;;  %v5725_v54 = vmul.f32 0.088388346, %v2030_v49 }
 0x2b7   : > { %v2032_v53 = vpop.f32.mrf.mxu0 }
 0x2b8   : > { %v5727_v55 = vmul.f32 0.088388346, %v2032_v53  ;;  %2114 = vmax.xlane.f32.xlu0 %v2113_v50 }
 0x2b9   : > { %v2036_v58 = vpop.f32.mrf.mxu0 }
 0x2ba   : > { %v2116_v59 = vmax.f32 %v5725_v54, %v5727_v55  ;;  %v5731_v63 = vmul.f32 0.088388346, %v2036_v58 }
 0x2bb   : > { %v2038_v60 = vpop.f32.mrf.mxu0 }
 0x2bc   : > { %v5733_v0 = vmul.f32 0.088388346, %v2038_v60  ;;  %2117 = vmax.xlane.f32.xlu1 %v2116_v59 }
 0x2bd   : > { %v2040_v1 = vpop.f32.mrf.mxu0 }
 0x2be   : > { %v2119_v5 = vmax.f32 %v5731_v63, %v5733_v0  ;;  %v5737_v7 = vmul.f32 0.088388346, %v2040_v1 }
 0x2bf   : > { %v2042_v6 = vpop.f32.mrf.mxu0 }
 0x2c0   : > { %v5739_v10 = vmul.f32 0.088388346, %v2042_v6  ;;  %2120 = vmax.xlane.f32.xlu0 %v2119_v5 }
 0x2c2   : > { %v2122_v11 = vmax.f32 %v5737_v7, %v5739_v10 }
 0x2c4   : > { %2123 = vmax.xlane.f32.xlu1 %v2122_v11 }
 0x311   : > { %v2079_v21 = vpop.xlane.xlu0 %2078 }
 0x312   : > { %v2125_v2 = vsub.f32 %v5647_v51, %v2079_v21  ;;  %v2126_v24 = vsub.f32 %v5649_v52, %v2079_v21 }
 0x314   : > { %v2157_v25 = vmul.f32 1.442695, %v2125_v2  ;;  %v2159_v26 = vmul.f32 1.442695, %v2126_v24 }
 0x315   : > { %v2082_v29 = vpop.xlane.xlu0 %2081 }
 0x316   : > { %5151 = vpow2.f32 %v2157_v25  ;;  %v2127_v30 = vsub.f32 %v5653_v56, %v2082_v29  ;;  %v2128_v31 = vsub.f32 %v5655_v57, %v2082_v29 }
 0x317   : > { %5153 = vpow2.f32 %v2159_v26 }
 0x318   : > { %v2161_v34 = vmul.f32 1.442695, %v2127_v30  ;;  %v2163_v35 = vmul.f32 1.442695, %v2128_v31 }
 0x319   : > { %v2085_v36 = vpop.xlane.xlu1 %2084 }
 0x31a   : > { %5155 = vpow2.f32 %v2161_v34  ;;  %v2129_v39 = vsub.f32 %v5659_v61, %v2085_v36  ;;  %v2130_v40 = vsub.f32 %v5661_v62, %v2085_v36  ;;  %v5093_v34 = vld [vmem:[#allocation4 + $0x60] sm:$0xff]  }
 0x31b   : > { %5157 = vpow2.f32 %v2163_v35  ;;  %v5094_v36 = vld [vmem:[#allocation4 + $0x20] sm:$0xff]  }
 0x31c   : > { %v2165_v51 = vmul.f32 1.442695, %v2129_v39  ;;  %v2167_v52 = vmul.f32 1.442695, %v2130_v40 }
 0x31d   : > { %v2088_v41 = vpop.xlane.xlu1 %2087 }
 0x31e   : > { %5159 = vpow2.f32 %v2165_v51  ;;  %v2131_v44 = vsub.f32 %v5665_v3, %v2088_v41  ;;  %v2132_v56 = vsub.f32 %v5667_v4, %v2088_v41 }
 0x31f   : > { %5161 = vpow2.f32 %v2167_v52 }
 0x320   : > { %v2169_v57 = vmul.f32 1.442695, %v2131_v44  ;;  %v2171_v45 = vmul.f32 1.442695, %v2132_v56  ;;  %v5095_v44 = vld [vmem:[#allocation4 + $0x58] sm:$0xff]  }
 0x321   : > { %v2091_v46 = vpop.xlane.xlu0 %2090 }
 0x322   : > { %5163 = vpow2.f32 %v2169_v57  ;;  %v2133_v49 = vsub.f32 %v5671_v8, %v2091_v46  ;;  %v2134_v61 = vsub.f32 %v5673_v9, %v2091_v46  ;;  %v5096_v57 = vld [vmem:[#allocation4 + $0x18] sm:$0xff]  }
 0x323   : > { %v5753_v50 = vpop.eup %5151  ;;  %5165 = vpow2.f32 %v2171_v45 }
 0x324   : > { %v5755_v62 = vpop.eup %5153  ;;  %v2173_v53 = vmul.f32 1.442695, %v2133_v49  ;;  %v2175_v58 = vmul.f32 1.442695, %v2134_v61 }
 0x325   : > { %v2094_v59 = vpop.xlane.xlu1 %2093  ;;  %v2221_v3 = vadd.f32 %v5755_v62, %v5753_v50 }
 0x326   : > { %5167 = vpow2.f32 %v2173_v53  ;;  %v2135_v4 = vsub.f32 %v5677_v13, %v2094_v59  ;;  %v2136_v60 = vsub.f32 %v5679_v14, %v2094_v59 }
 0x327   : > { %v5761_v1 = vpop.eup %5155  ;;  %5169 = vpow2.f32 %v2175_v58  ;;  %2222 = vadd.xlane.f32.xlu0 %v2221_v3  ;;  %v5097_v58 = vld [vmem:[#allocation4 + $0x50] sm:$0xff]  }
 0x328   : > { %v5763_v8 = vpop.eup %5157  ;;  %v2177_v9 = vmul.f32 1.442695, %v2135_v4  ;;  %v2179_v5 = vmul.f32 1.442695, %v2136_v60  ;;  %v5098_v3 = vld [vmem:[#allocation4 + $0x10] sm:$0xff]  }
 0x329   : > { %v2097_v6 = vpop.xlane.xlu0 %2096  ;;  %v2224_v11 = vadd.f32 %v5763_v8, %v5761_v1 }
 0x32a   : > { %5171 = vpow2.f32 %v2177_v9  ;;  %v2137_v12 = vsub.f32 %v5683_v18, %v2097_v6  ;;  %v2138_v15 = vsub.f32 %v5685_v19, %v2097_v6  ;;  %v5092_v19 = vld [vmem:[#allocation4 + $0x28] sm:$0xff]  }
 0x32b   : > { %v5769_v13 = vpop.eup %5159  ;;  %5173 = vpow2.f32 %v2179_v5  ;;  %2225 = vadd.xlane.f32.xlu1 %v2224_v11  ;;  %4737 = vmatpush3.bf16.msra.mxu1 %v5092_v19  ;;  %v5099_v11 = vld [vmem:[#allocation4 + $0x48] sm:$0xff]  }
 0x32c   : > { %v5771_v14 = vpop.eup %5161  ;;  %v2181_v16 = vmul.f32 1.442695, %v2137_v12  ;;  %v2183_v17 = vmul.f32 1.442695, %v2138_v15  ;;  %4738 = vmatprep.subr.bf16.mxu1 %v5093_v34  ;;  %v5100_v15 = vld [vmem:[#allocation4 + $0x8] sm:$0xff]  }
 0x32d   : > { %v2100_v20 = vpop.xlane.xlu1 %2099  ;;  %v2227_v21 = vadd.f32 %v5771_v14, %v5769_v13 }
 0x32e   : > { %5175 = vpow2.f32 %v2181_v16  ;;  %v2139_v2 = vsub.f32 %v5689_v22, %v2100_v20  ;;  %v2140_v24 = vsub.f32 %v5691_v23, %v2100_v20 }
 0x32f   : > { %v5777_v18 = vpop.eup %5163  ;;  %5177 = vpow2.f32 %v2183_v17  ;;  %2228 = vadd.xlane.f32.xlu0 %v2227_v21  ;;  %4739 = vmatpush3.bf16.msra.mxu1 %v5094_v36 }
 0x330   : > { %v5779_v25 = vpop.eup %5165  ;;  %v2185_v26 = vmul.f32 1.442695, %v2139_v2  ;;  %v2187_v29 = vmul.f32 1.442695, %v2140_v24  ;;  %4740 = vmatprep.subr.bf16.mxu1 %v5095_v44  ;;  %v5101_v24 = vld [vmem:[#allocation4 + $0x40] sm:$0xff]  }
 0x331   : > { %v2103_v30 = vpop.xlane.xlu0 %2102  ;;  %v2230_v31 = vadd.f32 %v5779_v25, %v5777_v18 }
 0x332   : > { %5179 = vpow2.f32 %v2185_v26  ;;  %v2141_v22 = vsub.f32 %v5695_v27, %v2103_v30  ;;  %v2142_v23 = vsub.f32 %v5697_v28, %v2103_v30  ;;  %v5102_v26 = vld [vmem:[#allocation4] sm:$0xff]  }
 0x333   : > { %v5785_v35 = vpop.eup %5167  ;;  %5181 = vpow2.f32 %v2187_v29  ;;  %2231 = vadd.xlane.f32.xlu1 %v2230_v31  ;;  %4741 = vmatpush3.bf16.msra.mxu1 %v5096_v57 }
 0x334   : > { %v5787_v39 = vpop.eup %5169  ;;  %v2189_v40 = vmul.f32 1.442695, %v2141_v22  ;;  %v2191_v51 = vmul.f32 1.442695, %v2142_v23  ;;  %4742 = vmatprep.subr.bf16.mxu1 %v5097_v58 }
 0x335   : > { %v2106_v52 = vpop.xlane.xlu1 %2105  ;;  %v2233_v41 = vadd.f32 %v5787_v39, %v5785_v35 }
 0x336   : > { %5183 = vpow2.f32 %v2189_v40  ;;  %v2143_v27 = vsub.f32 %v5701_v32, %v2106_v52  ;;  %v2144_v28 = vsub.f32 %v5703_v33, %v2106_v52 }
 0x337   : > { %v5793_v56 = vpop.eup %5171  ;;  %5185 = vpow2.f32 %v2191_v51  ;;  %2234 = vadd.xlane.f32.xlu0 %v2233_v41  ;;  %4743 = vmatpush3.bf16.msra.mxu1 %v5098_v3 }
 0x338   : > { %v5795_v45 = vpop.eup %5173  ;;  %v2193_v46 = vmul.f32 1.442695, %v2143_v27  ;;  %v2195_v49 = vmul.f32 1.442695, %v2144_v28  ;;  %4744 = vmatprep.subr.bf16.mxu1 %v5099_v11 }
 0x339   : > { %v2109_v61 = vpop.xlane.xlu0 %2108  ;;  %v2236_v53 = vadd.f32 %v5795_v45, %v5793_v56 }
 0x33a   : > { %5187 = vpow2.f32 %v2193_v46  ;;  %v2145_v32 = vsub.f32 %v5707_v37, %v2109_v61  ;;  %v2146_v33 = vsub.f32 %v5709_v38, %v2109_v61 }
 0x33b   : > { %v5801_v59 = vpop.eup %5175  ;;  %5189 = vpow2.f32 %v2195_v49  ;;  %2237 = vadd.xlane.f32.xlu1 %v2236_v53  ;;  %4745 = vmatpush3.bf16.msra.mxu1 %v5100_v15 }
 0x33c   : > { %v5803_v4 = vpop.eup %5177  ;;  %v2197_v60 = vmul.f32 1.442695, %v2145_v32  ;;  %v2199_v9 = vmul.f32 1.442695, %v2146_v33  ;;  %4746 = vmatprep.subr.bf16.mxu1 %v5101_v24 }
 0x33d   : > { %v2112_v5 = vpop.xlane.xlu1 %2111  ;;  %v2239_v6 = vadd.f32 %v5803_v4, %v5801_v59 }
 0x33e   : > { %5191 = vpow2.f32 %v2197_v60  ;;  %v2147_v37 = vsub.f32 %v5713_v42, %v2112_v5  ;;  %v2148_v38 = vsub.f32 %v5715_v43, %v2112_v5 }
 0x33f   : > { %v5809_v12 = vpop.eup %5179  ;;  %5193 = vpow2.f32 %v2199_v9  ;;  %2240 = vadd.xlane.f32.xlu0 %v2239_v6  ;;  %4747 = vmatpush3.bf16.msra.mxu1 %v5102_v26 }
 0x340   : > { %v5811_v16 = vpop.eup %5181  ;;  %v2201_v17 = vmul.f32 1.442695, %v2147_v37  ;;  %v2203_v20 = vmul.f32 1.442695, %v2148_v38 }
 0x341   : > { %v2115_v21 = vpop.xlane.xlu0 %2114  ;;  %v2242_v2 = vadd.f32 %v5811_v16, %v5809_v12 }
 0x342   : > { %5195 = vpow2.f32 %v2201_v17  ;;  %v2149_v42 = vsub.f32 %v5719_v47, %v2115_v21  ;;  %v2150_v43 = vsub.f32 %v5721_v48, %v2115_v21 }
 0x343   : > { %v5817_v19 = vpop.eup %5183  ;;  %5197 = vpow2.f32 %v2203_v20  ;;  %2243 = vadd.xlane.f32.xlu1 %v2242_v2  ;;  %v5103_v20 = vld [vmem:[%s6600_s25 + $0x38] sm:$0xff]  }
 0x344   : > { %v5819_v29 = vpop.eup %5185  ;;  %v2205_v30 = vmul.f32 1.442695, %v2149_v42  ;;  %v2207_v31 = vmul.f32 1.442695, %v2150_v43  ;;  %4924 = vmatprep.subr.bf16.mxu1 %v5103_v20 }
 0x345   : > { %v2118_v34 = vpop.xlane.xlu1 %2117  ;;  %v2245_v22 = vadd.f32 %v5819_v29, %v5817_v19 }
 0x346   : > { %5199 = vpow2.f32 %v2205_v30  ;;  %v2151_v47 = vsub.f32 %v5725_v54, %v2118_v34  ;;  %v2152_v48 = vsub.f32 %v5727_v55, %v2118_v34 }
 0x347   : > { %v5825_v23 = vpop.eup %5187  ;;  %5201 = vpow2.f32 %v2207_v31  ;;  %2246 = vadd.xlane.f32.xlu0 %v2245_v22 }
 0x348   : > { %v5827_v36 = vpop.eup %5189  ;;  %v2209_v40 = vmul.f32 1.442695, %v2151_v47  ;;  %v2211_v51 = vmul.f32 1.442695, %v2152_v48 }
 0x349   : > { %v2121_v52 = vpop.xlane.xlu0 %2120  ;;  %v2248_v41 = vadd.f32 %v5827_v36, %v5825_v23 }
 0x34a   : > { %5203 = vpow2.f32 %v2209_v40  ;;  %v2153_v44 = vsub.f32 %v5731_v63, %v2121_v52  ;;  %v2154_v27 = vsub.f32 %v5733_v0, %v2121_v52 }
 0x34b   : > { %v5833_v54 = vpop.eup %5191  ;;  %5205 = vpow2.f32 %v2211_v51  ;;  %2249 = vadd.xlane.f32.xlu1 %v2248_v41 }
 0x34c   : > { %v5835_v55 = vpop.eup %5193  ;;  %v2213_v28 = vmul.f32 1.442695, %v2153_v44  ;;  %v2215_v57 = vmul.f32 1.442695, %v2154_v27  ;;  %v5105_v44 = vld [vmem:[%s6600_s25 + $0x28] sm:$0xff]  }
 0x34d   : > { %v2124_v46 = vpop.xlane.xlu1 %2123  ;;  %v2251_v49 = vadd.f32 %v5835_v55, %v5833_v54 }
 0x34e   : > { %5207 = vpow2.f32 %v2213_v28  ;;  %v2155_v61 = vsub.f32 %v5737_v7, %v2124_v46  ;;  %v2156_v53 = vsub.f32 %v5739_v10, %v2124_v46 }
 0x34f   : > { %v5841_v63 = vpop.eup %5195  ;;  %5209 = vpow2.f32 %v2215_v57  ;;  %2252 = vadd.xlane.f32.xlu0 %v2251_v49  ;;  %v5106_v49 = vld [vmem:[%s6600_s25 + $0x20] sm:$0xff]  }
 0x350   : > { %v5843_v0 = vpop.eup %5197  ;;  %v2217_v58 = vmul.f32 1.442695, %v2155_v61  ;;  %v2219_v32 = vmul.f32 1.442695, %v2156_v53 }
 0x351   : > { %v2254_v33 = vadd.f32 %v5843_v0, %v5841_v63 }
 0x352   : > { %5211 = vpow2.f32 %v2217_v58  ;;  %v5107_v58 = vld [vmem:[%s6600_s25 + $0x18] sm:$0xff]  }
 0x353   : > { %v5847_v3 = vpop.eup %5199  ;;  %5213 = vpow2.f32 %v2219_v32  ;;  %2255 = vadd.xlane.f32.xlu1 %v2254_v33 }
 0x354   : > { %v5849_v7 = vpop.eup %5201 }
 0x355   : > { %v2257_v10 = vadd.f32 %v5849_v7, %v5847_v3 }
 0x357   : > { %v5853_v60 = vpop.eup %5203  ;;  %2258 = vadd.xlane.f32.xlu0 %v2257_v10 }
 0x358   : > { %v5855_v9 = vpop.eup %5205 }
 0x359   : > { %v2260_v5 = vadd.f32 %v5855_v9, %v5853_v60 }
 0x35b   : > { %v5859_v6 = vpop.eup %5207  ;;  %2261 = vadd.xlane.f32.xlu1 %v2260_v5 }
 0x35c   : > { %v5861_v11 = vpop.eup %5209 }
 0x35d   : > { %v2263_v37 = vadd.f32 %v5861_v11, %v5859_v6 }
 0x35f   : > { %v5865_v38 = vpop.eup %5211  ;;  %2264 = vadd.xlane.f32.xlu0 %v2263_v37  ;;  %v5108_v37 = vld [vmem:[%s6600_s25 + $0x10] sm:$0xff]  }
 0x360   : > { %v5867_v15 = vpop.eup %5213 }
 0x361   : > { %v2266_v17 = vadd.f32 %v5867_v15, %v5865_v38 }
 0x363   : > { %2267 = vadd.xlane.f32.xlu1 %v2266_v17 }
 0x3b0   : > { %v2223_v21 = vpop.xlane.xlu0 %2222 }
 0x3b1   : > { %5215 = vrcp.f32 %v2223_v21 }
 0x3b4   : > { %v2226_v2 = vpop.xlane.xlu1 %2225 }
 0x3b5   : > { %5217 = vrcp.f32 %v2226_v2 }
 0x3b8   : > { %v2229_v24 = vpop.xlane.xlu0 %2228 }
 0x3b9   : > { %5219 = vrcp.f32 %v2229_v24 }
 0x3bc   : > { %v2232_v42 = vpop.xlane.xlu1 %2231 }
 0x3bd   : > { %5221 = vrcp.f32 %v2232_v42 }
 0x3be   : > { %v5216_v43 = vpop.eup %5215 }
 0x3bf   : > { %v2286_v26 = vmul.f32 %v5216_v43, %v5755_v62  ;;  %v2285_v30 = vmul.f32 %v5216_v43, %v5753_v50  ;;  %v5104_v50 = vld [vmem:[%s6600_s25 + $0x30] sm:$0xff]  }
 0x3c0   : > { %v2235_v31 = vpop.xlane.xlu0 %2234 }
 0x3c1   : > { %5223 = vrcp.f32 %v2235_v31  ;;  %3730 = vst [vmem:[%s5543_s19 + $0x8] sm:$0xff] %v2286_v26  ;;  %3729 = vst [vmem:[%s5543_s19] sm:$0xff] %v2285_v30 }
 0x3c2   : > { %v5218_v34 = vpop.eup %5217 }
 0x3c3   : > { %v2288_v22 = vmul.f32 %v5218_v34, %v5763_v8  ;;  %v2287_v47 = vmul.f32 %v5218_v34, %v5761_v1 }
 0x3c4   : > { %v2238_v48 = vpop.xlane.xlu1 %2237 }
 0x3c5   : > { %5225 = vrcp.f32 %v2238_v48  ;;  %v2318_v40 = vpack.c.bf16 %v2288_v22, %v2286_v26  ;;  %3732 = vst [vmem:[%s5543_s19 + $0x18] sm:$0xff] %v2288_v22  ;;  %v2317_v62 = vpack.c.bf16 %v2287_v47, %v2285_v30  ;;  %3731 = vst [vmem:[%s5543_s19 + $0x10] sm:$0xff] %v2287_v47 }
 0x3c6   : > { %v5220_v51 = vpop.eup %5219 }
 0x3c7   : > { %2493 = vmatprep.mubr.bf16.mxu1 %v2318_v40  ;;  %v2290_v52 = vmul.f32 %v5220_v51, %v5771_v14  ;;  %v2289_v41 = vmul.f32 %v5220_v51, %v5769_v13 }
 0x3c8   : > { %v2241_v8 = vpop.xlane.xlu0 %2240  ;;  %2494 = vmatmul.mubr.bf16.vlgmr.msra.gmra.mxu1 %v2317_v62 }
 0x3c9   : > { %5227 = vrcp.f32 %v2241_v8  ;;  %3734 = vst [vmem:[%s5543_s19 + $0x28] sm:$0xff] %v2290_v52  ;;  %3733 = vst [vmem:[%s5543_s19 + $0x20] sm:$0xff] %v2289_v41  ;;  %4925 = vmatpush3.bf16.msra.mxu1 %v5103_v20 }
 0x3ca   : > { %v5222_v1 = vpop.eup %5221  ;;  %4926 = vmatprep.subr.bf16.mxu1 %v5104_v50 }
 0x3cb   : > { %v2292_v27 = vmul.f32 %v5222_v1, %v5779_v25  ;;  %v2291_v28 = vmul.f32 %v5222_v1, %v5777_v18 }
 0x3cc   : > { %v2244_v57 = vpop.xlane.xlu1 %2243 }
 0x3cd   : > { %5229 = vrcp.f32 %v2244_v57  ;;  %v2320_v13 = vpack.c.bf16 %v2292_v27, %v2290_v52  ;;  %3736 = vst [vmem:[%s5543_s19 + $0x38] sm:$0xff] %v2292_v27  ;;  %v2319_v14 = vpack.c.bf16 %v2291_v28, %v2289_v41  ;;  %3735 = vst [vmem:[%s5543_s19 + $0x30] sm:$0xff] %v2291_v28  ;;  %4927 = vmatpush3.bf16.msra.mxu1 %v5104_v50 }
 0x3ce   : > { %v5224_v46 = vpop.eup %5223  ;;  %4928 = vmatprep.subr.bf16.mxu1 %v5105_v44 }
 0x3cf   : > { %2501 = vmatprep.mubr.bf16.mxu1 %v2320_v13  ;;  %v2294_v61 = vmul.f32 %v5224_v46, %v5787_v39  ;;  %v2293_v25 = vmul.f32 %v5224_v46, %v5785_v35 }
 0x3d0   : > { %v2247_v18 = vpop.xlane.xlu0 %2246  ;;  %2502 = vmatmul.mubr.bf16.gmra.mxu1 %v2319_v14  ;;  %v5109_v14 = vld [vmem:[%s6600_s25 + $0x8] sm:$0xff]  }
 0x3d1   : > { %5231 = vrcp.f32 %v2247_v18  ;;  %3738 = vst [vmem:[%s5543_s19 + $0x48] sm:$0xff] %v2294_v61  ;;  %3737 = vst [vmem:[%s5543_s19 + $0x40] sm:$0xff] %v2293_v25  ;;  %4929 = vmatpush3.bf16.msra.mxu1 %v5105_v44 }
 0x3d2   : > { %v5226_v53 = vpop.eup %5225  ;;  %4930 = vmatprep.subr.bf16.mxu1 %v5106_v49 }
 0x3d3   : > { %v2296_v32 = vmul.f32 %v5226_v53, %v5795_v45  ;;  %v2295_v33 = vmul.f32 %v5226_v53, %v5793_v56 }
 0x3d4   : > { %v2250_v10 = vpop.xlane.xlu1 %2249 }
 0x3d5   : > { %5233 = vrcp.f32 %v2250_v10  ;;  %v2322_v35 = vpack.c.bf16 %v2296_v32, %v2294_v61  ;;  %3740 = vst [vmem:[%s5543_s19 + $0x58] sm:$0xff] %v2296_v32  ;;  %v2321_v39 = vpack.c.bf16 %v2295_v33, %v2293_v25  ;;  %3739 = vst [vmem:[%s5543_s19 + $0x50] sm:$0xff] %v2295_v33  ;;  %4931 = vmatpush3.bf16.msra.mxu1 %v5106_v49 }
 0x3d6   : > { %v5228_v5 = vpop.eup %5227  ;;  %4932 = vmatprep.subr.bf16.mxu1 %v5107_v58 }
 0x3d7   : > { %2509 = vmatprep.mubr.bf16.mxu1 %v2322_v35  ;;  %v2298_v17 = vmul.f32 %v5228_v5, %v5803_v4  ;;  %v2297_v45 = vmul.f32 %v5228_v5, %v5801_v59 }
 0x3d8   : > { %v2253_v56 = vpop.xlane.xlu0 %2252  ;;  %2510 = vmatmul.mubr.bf16.gmra.mxu1 %v2321_v39 }
 0x3d9   : > { %5235 = vrcp.f32 %v2253_v56  ;;  %3742 = vst [vmem:[%s5543_s19 + $0x68] sm:$0xff] %v2298_v17  ;;  %3741 = vst [vmem:[%s5543_s19 + $0x60] sm:$0xff] %v2297_v45  ;;  %4933 = vmatpush3.bf16.msra.mxu1 %v5107_v58 }
 0x3da   : > { %v5230_v20 = vpop.eup %5229  ;;  %4934 = vmatprep.subr.bf16.mxu1 %v5108_v37 }
 0x3db   : > { %v2300_v21 = vmul.f32 %v5230_v20, %v5811_v16  ;;  %v2299_v2 = vmul.f32 %v5230_v20, %v5809_v12 }
 0x3dc   : > { %v2256_v24 = vpop.xlane.xlu1 %2255 }
 0x3dd   : > { %5237 = vrcp.f32 %v2256_v24  ;;  %v2324_v4 = vpack.c.bf16 %v2300_v21, %v2298_v17  ;;  %3744 = vst [vmem:[%s5543_s19 + $0x78] sm:$0xff] %v2300_v21  ;;  %v2323_v59 = vpack.c.bf16 %v2299_v2, %v2297_v45  ;;  %3743 = vst [vmem:[%s5543_s19 + $0x70] sm:$0xff] %v2299_v2  ;;  %4935 = vmatpush3.bf16.msra.mxu1 %v5108_v37 }
 0x3de   : > { %v5232_v42 = vpop.eup %5231  ;;  %4936 = vmatprep.subr.bf16.mxu1 %v5109_v14 }
 0x3df   : > { %2517 = vmatprep.mubr.bf16.mxu1 %v2324_v4  ;;  %v2302_v43 = vmul.f32 %v5232_v42, %v5819_v29  ;;  %v2301_v26 = vmul.f32 %v5232_v42, %v5817_v19 }
 0x3e0   : > { %v2259_v16 = vpop.xlane.xlu0 %2258  ;;  %2518 = vmatmul.mubr.bf16.gmra.mxu1 %v2323_v59 }
 0x3e1   : > { %5239 = vrcp.f32 %v2259_v16  ;;  %3746 = vst [vmem:[%s5543_s19 + $0x88] sm:$0xff] %v2302_v43  ;;  %3745 = vst [vmem:[%s5543_s19 + $0x80] sm:$0xff] %v2301_v26  ;;  %4937 = vmatpush3.bf16.msra.mxu1 %v5109_v14  ;;  %v1721_v14 = vld [vmem:[%s5946_s28 + $0x8] sm:$0xff] }
 0x3e2   : > { %v5234_v12 = vpop.eup %5233 }
 0x3e3   : > { %v2304_v30 = vmul.f32 %v5234_v12, %v5827_v36  ;;  %v2303_v31 = vmul.f32 %v5234_v12, %v5825_v23 }
 0x3e4   : > { %v2262_v34 = vpop.xlane.xlu1 %2261 }
 0x3e5   : > { %5241 = vrcp.f32 %v2262_v34  ;;  %v2326_v22 = vpack.c.bf16 %v2304_v30, %v2302_v43  ;;  %3748 = vst [vmem:[%s5543_s19 + $0x98] sm:$0xff] %v2304_v30  ;;  %v2325_v47 = vpack.c.bf16 %v2303_v31, %v2301_v26  ;;  %3747 = vst [vmem:[%s5543_s19 + $0x90] sm:$0xff] %v2303_v31 }
 0x3e6   : > { %v5236_v19 = vpop.eup %5235 }
 0x3e7   : > { %2525 = vmatprep.mubr.bf16.mxu1 %v2326_v22  ;;  %v2306_v29 = vmul.f32 %v5236_v19, %v5835_v55  ;;  %v2305_v48 = vmul.f32 %v5236_v19, %v5833_v54 }
 0x3e8   : > { %v2265_v40 = vpop.xlane.xlu0 %2264  ;;  %2526 = vmatmul.mubr.bf16.gmra.mxu1 %v2325_v47 }
 0x3e9   : > { %5243 = vrcp.f32 %v2265_v40  ;;  %3750 = vst [vmem:[%s5543_s19 + $0xa8] sm:$0xff] %v2306_v29  ;;  %3749 = vst [vmem:[%s5543_s19 + $0xa0] sm:$0xff] %v2305_v48 }
 0x3ea   : > { %v5238_v23 = vpop.eup %5237 }
 0x3eb   : > { %v2308_v36 = vmul.f32 %v5238_v23, %v5843_v0  ;;  %v2307_v62 = vmul.f32 %v5238_v23, %v5841_v63 }
 0x3ec   : > { %v2268_v51 = vpop.xlane.xlu1 %2267 }
 0x3ed   : > { %5245 = vrcp.f32 %v2268_v51  ;;  %v2328_v50 = vpack.c.bf16 %v2308_v36, %v2306_v29  ;;  %3752 = vst [vmem:[%s5543_s19 + $0xb8] sm:$0xff] %v2308_v36  ;;  %v2327_v55 = vpack.c.bf16 %v2307_v62, %v2305_v48  ;;  %3751 = vst [vmem:[%s5543_s19 + $0xb0] sm:$0xff] %v2307_v62 }
 0x3ee   : > { %v5240_v54 = vpop.eup %5239 }
 0x3ef   : > { %2533 = vmatprep.mubr.bf16.mxu1 %v2328_v50  ;;  %v2310_v52 = vmul.f32 %v5240_v54, %v5849_v7  ;;  %v2309_v41 = vmul.f32 %v5240_v54, %v5847_v3 }
 0x3f0   : > { %2534 = vmatmul.mubr.bf16.gmra.mxu1 %v2327_v55 }
 0x3f1   : > { %3754 = vst [vmem:[%s5543_s19 + $0xc8] sm:$0xff] %v2310_v52  ;;  %3753 = vst [vmem:[%s5543_s19 + $0xc0] sm:$0xff] %v2309_v41 }
 0x3f2   : > { %v5242_v63 = vpop.eup %5241 }
 0x3f3   : > { %v2312_v0 = vmul.f32 %v5242_v63, %v5855_v9  ;;  %v2311_v8 = vmul.f32 %v5242_v63, %v5853_v60 }
 0x3f5   : > { %v2330_v1 = vpack.c.bf16 %v2312_v0, %v2310_v52  ;;  %3756 = vst [vmem:[%s5543_s19 + $0xd8] sm:$0xff] %v2312_v0  ;;  %v2329_v44 = vpack.c.bf16 %v2311_v8, %v2309_v41  ;;  %3755 = vst [vmem:[%s5543_s19 + $0xd0] sm:$0xff] %v2311_v8 }
 0x3f6   : > { %v5244_v27 = vpop.eup %5243 }
 0x3f7   : > { %2541 = vmatprep.mubr.bf16.mxu1 %v2330_v1  ;;  %v2314_v3 = vmul.f32 %v5244_v27, %v5861_v11  ;;  %v2313_v7 = vmul.f32 %v5244_v27, %v5859_v6  ;;  %v5110_v11 = vld [vmem:[%s6600_s25] sm:$0xff]  }
 0x3f8   : > { %2542 = vmatmul.mubr.bf16.gmra.mxu1 %v2329_v44  ;;  %4938 = vmatprep.subr.bf16.mxu1 %v5110_v11 }
 0x3f9   : > { %3758 = vst [vmem:[%s5543_s19 + $0xe8] sm:$0xff] %v2314_v3  ;;  %3757 = vst [vmem:[%s5543_s19 + $0xe0] sm:$0xff] %v2313_v7  ;;  %4939 = vmatpush3.bf16.msra.mxu1 %v5110_v11 }
 0x3fa   : > { %v5246_v9 = vpop.eup %5245 }
 0x3fb   : > { %v2316_v60 = vmul.f32 %v5246_v9, %v5867_v15  ;;  %v2315_v28 = vmul.f32 %v5246_v9, %v5865_v38  ;;  %v1720_v9 = vld [vmem:[%s5946_s28] sm:$0xff] }
 0x3fd   : > { %v2332_v57 = vpack.c.bf16 %v2316_v60, %v2314_v3  ;;  %3760 = vst [vmem:[%s5543_s19 + $0xf8] sm:$0xff] %v2316_v60  ;;  %v2331_v13 = vpack.c.bf16 %v2315_v28, %v2313_v7  ;;  %3759 = vst [vmem:[%s5543_s19 + $0xf0] sm:$0xff] %v2315_v28 }
 0x3ff   : > { %2549 = vmatprep.mubr.bf16.mxu1 %v2332_v57  ;;  %v1722_v57 = vld [vmem:[%s5946_s28 + $0x10] sm:$0xff] }
 0x400   : > { %2550 = vmatmul.mubr.bf16.gmra.mxu1 %v2331_v13 }
 0x488   : > { %v4748_v6 = vpop.f32.mrf.mxu1 }
 0x48a   : > { %v4749_v46 = vpop.f32.mrf.mxu1 }
 0x48b   : > { %v4750_v25 = vadd.f32 %v4749_v46, %v4748_v6 }
 0x48c   : > { %v4751_v49 = vpop.f32.mrf.mxu1 }
 0x48e   : > { %v4752_v61 = vpop.f32.mrf.mxu1 }
 0x48f   : > { %v4753_v15 = vadd.f32 %v4752_v61, %v4751_v49  ;;  %v1723_v49 = vld [vmem:[%s5946_s28 + $0x18] sm:$0xff] }
 0x490   : > { %v4754_v18 = vpop.f32.mrf.mxu1 }
 0x491   : > { %v2558_v38 = vpack.c.bf16 %v4753_v15, %v4750_v25  ;;  %v1724_v15 = vld [vmem:[%s5946_s28 + $0x20] sm:$0xff] }
 0x492   : > { %v4755_v53 = vpop.f32.mrf.mxu1 }
 0x493   : > { %4940 = vmatprep.mubr.bf16.mxu1 %v2558_v38  ;;  %v4756_v33 = vadd.f32 %v4755_v53, %v4754_v18  ;;  %v1726_v53 = vld [vmem:[%s5946_s28 + $0x30] sm:$0xff] }
 0x494   : > { %v4757_v58 = vpop.f32.mrf.mxu1 }
 0x496   : > { %v4758_v32 = vpop.f32.mrf.mxu1 }
 0x497   : > { %v4759_v10 = vadd.f32 %v4758_v32, %v4757_v58  ;;  %v1725_v32 = vld [vmem:[%s5946_s28 + $0x28] sm:$0xff] }
 0x498   : > { %v4760_v35 = vpop.f32.mrf.mxu1 }
 0x499   : > { %v2559_v39 = vpack.c.bf16 %v4759_v10, %v4756_v33 }
 0x49a   : > { %v4761_v5 = vpop.f32.mrf.mxu1 }
 0x49b   : > { %4941 = vmatmul.mubr.bf16.vlgmr.msra.gmra.mxu1 %v2559_v39  ;;  %v4762_v45 = vadd.f32 %v4761_v5, %v4760_v35  ;;  %v1727_v39 = vld [vmem:[%s5946_s28 + $0x38] sm:$0xff] }
 0x49c   : > { %v4763_v37 = vpop.f32.mrf.mxu1 }
 0x49e   : > { %v4764_v17 = vpop.f32.mrf.mxu1 }
 0x49f   : > { %v4765_v56 = vadd.f32 %v4764_v17, %v4763_v37  ;;  %v1728_v17 = vld [vmem:[%s5946_s28 + $0x40] sm:$0xff] }
 0x4a0   : > { %v4766_v20 = vpop.f32.mrf.mxu1 }
 0x4a1   : > { %v2560_v21 = vpack.c.bf16 %v4765_v56, %v4762_v45 }
 0x4a2   : > { %v4767_v2 = vpop.f32.mrf.mxu1 }
 0x4a3   : > { %4944 = vmatprep.mubr.bf16.mxu1 %v2560_v21  ;;  %v4768_v59 = vadd.f32 %v4767_v2, %v4766_v20  ;;  %v1730_v20 = vld [vmem:[%s5946_s28 + $0x50] sm:$0xff]  ;;  %v1729_v2 = vld [vmem:[%s5946_s28 + $0x48] sm:$0xff] }
 0x4a4   : > { %v4769_v24 = vpop.f32.mrf.mxu1 }
 0x4a6   : > { %v4770_v4 = vpop.f32.mrf.mxu1 }
 0x4a7   : > { %v4771_v42 = vadd.f32 %v4770_v4, %v4769_v24 }
 0x4a8   : > { %v4772_v43 = vpop.f32.mrf.mxu1 }
 0x4a9   : > { %v2561_v26 = vpack.c.bf16 %v4771_v42, %v4768_v59  ;;  %v1731_v42 = vld [vmem:[%s5946_s28 + $0x58] sm:$0xff] }
 0x4aa   : > { %v4773_v16 = vpop.f32.mrf.mxu1 }
 0x4ab   : > { %4945 = vmatmul.mubr.bf16.gmra.mxu1 %v2561_v26  ;;  %v4774_v31 = vadd.f32 %v4773_v16, %v4772_v43  ;;  %v1732_v16 = vld [vmem:[%s5946_s28 + $0x60] sm:$0xff] }
 0x4ac   : > { %v4775_v12 = vpop.f32.mrf.mxu1 }
 0x4ae   : > { %v4776_v30 = vpop.f32.mrf.mxu1 }
 0x4af   : > { %v4777_v34 = vadd.f32 %v4776_v30, %v4775_v12 }
 0x4b0   : > { %v4778_v22 = vpop.f32.mrf.mxu1 }
 0x4b1   : > { %v2562_v47 = vpack.c.bf16 %v4777_v34, %v4774_v31  ;;  %v1734_v31 = vld [vmem:[%s5946_s28 + $0x70] sm:$0xff] }
 0x4b2   : > { %v4779_v19 = vpop.f32.mrf.mxu1 }
 0x4b3   : > { %4948 = vmatprep.mubr.bf16.mxu1 %v2562_v47  ;;  %v4780_v40 = vadd.f32 %v4779_v19, %v4778_v22  ;;  %v1733_v22 = vld [vmem:[%s5946_s28 + $0x68] sm:$0xff] }
 0x4b4   : > { %v4781_v29 = vpop.f32.mrf.mxu1 }
 0x4b6   : > { %v4782_v48 = vpop.f32.mrf.mxu1 }
 0x4b7   : > { %v4783_v23 = vadd.f32 %v4782_v48, %v4781_v29  ;;  %v1735_v48 = vld [vmem:[%s5946_s28 + $0x78] sm:$0xff] }
 0x4b8   : > { %v4784_v36 = vpop.f32.mrf.mxu1 }
 0x4b9   : > { %v2563_v62 = vpack.c.bf16 %v4783_v23, %v4780_v40  ;;  %v5111_v23 = vld [vmem:[%s5502_s10 + $0x70] ss:$8 sps:$4 sm:$0xff]  }
 0x4ba   : > { %v4785_v51 = vpop.f32.mrf.mxu1 }
 0x4bb   : > { %4949 = vmatmul.mubr.bf16.gmra.mxu1 %v2563_v62  ;;  %v4786_v54 = vadd.f32 %v4785_v51, %v4784_v36  ;;  %v5113_v36 = vld [vmem:[%s5502_s10 + $0x74] ss:$8 sps:$4 sm:$0xff]   ;;  %v5116_v62 = vld [vmem:[%s5502_s10 + $0x64] ss:$8 sps:$4 sm:$0xff]   ;;  %v5114_v51 = vld [vmem:[%s5502_s10 + $0x60] ss:$8 sps:$4 sm:$0xff]  }
 0x4bc   : > { %v4787_v50 = vpop.f32.mrf.mxu1  ;;  %3082 = vmatprep.subr.bf16.mxu0 %v5113_v36 }
 0x4bd   : > { %3083 = vmatpush1.bf16.msra.mxu0 %v5111_v23 }
 0x4be   : > { %v4788_v55 = vpop.f32.mrf.mxu1  ;;  %3084 = vmatprep.subr.bf16.mxu0 %v5116_v62 }
 0x4bf   : > { %v4789_v52 = vadd.f32 %v4788_v55, %v4787_v50  ;;  %v5119_v50 = vld [vmem:[%s5502_s10 + $0x54] ss:$8 sps:$4 sm:$0xff]   ;;  %v5117_v55 = vld [vmem:[%s5502_s10 + $0x50] ss:$8 sps:$4 sm:$0xff]  }
 0x4c0   : > { %v4790_v41 = vpop.f32.mrf.mxu1 }
 0x4c1   : > { %v2564_v63 = vpack.c.bf16 %v4789_v52, %v4786_v54  ;;  %3085 = vmatpush1.bf16.msra.mxu0 %v5114_v51  ;;  %v5122_v54 = vld [vmem:[%s5502_s10 + $0x44] ss:$8 sps:$4 sm:$0xff]   ;;  %v5120_v52 = vld [vmem:[%s5502_s10 + $0x40] ss:$8 sps:$4 sm:$0xff]  }
 0x4c2   : > { %v4791_v0 = vpop.f32.mrf.mxu1  ;;  %3086 = vmatprep.subr.bf16.mxu0 %v5119_v50  ;;  %v5132_v51 = vld [vmem:[%s5502_s10] ss:$8 sps:$4 sm:$0xff]   ;;  %v5134_v50 = vld [vmem:[%s5502_s10 + $0x4] ss:$8 sps:$4 sm:$0xff]  }
 0x4c3   : > { %4952 = vmatprep.mubr.bf16.mxu1 %v2564_v63  ;;  %v4792_v44 = vadd.f32 %v4791_v0, %v4790_v41  ;;  %v5125_v41 = vld [vmem:[%s5502_s10 + $0x34] ss:$8 sps:$4 sm:$0xff]   ;;  %v5123_v63 = vld [vmem:[%s5502_s10 + $0x30] ss:$8 sps:$4 sm:$0xff]  }
 0x4c4   : > { %v4793_v8 = vpop.f32.mrf.mxu1 }
 0x4c5   : > { %3087 = vmatpush1.bf16.msra.mxu0 %v5117_v55  ;;  %v5368_v55 = vmov 0  }
 0x4c6   : > { %v4794_v1 = vpop.f32.mrf.mxu1  ;;  %3088 = vmatprep.subr.bf16.mxu0 %v5122_v54  ;;  %3114 = vmatprep.mubr.bf16.mxu0 %v5368_v55 }
 0x4c7   : > { %v4795_v27 = vadd.f32 %v4794_v1, %v4793_v8 }
 0x4c9   : > { %v2565_v3 = vpack.c.bf16 %v4795_v27, %v4792_v44  ;;  %3089 = vmatpush1.bf16.msra.mxu0 %v5120_v52 }
 0x4ca   : > { %3090 = vmatprep.subr.bf16.mxu0 %v5125_v41 }
 0x4cb   : > { %4953 = vmatmul.mubr.bf16.gmra.mxu1 %v2565_v3 }
 0x4cd   : > { %3091 = vmatpush1.bf16.msra.mxu0 %v5123_v63 }
 0x55b   : > { %v4942_v7 = vpop.f32.mrf.mxu1 }
 0x55c   : > { %v5954_v6 = vadd.f32 %v4942_v7, %v1722_v57 }
 0x55d   : > { %v2664_v60 = vpop.f32.mrf.mxu1 }
 0x55e   : > { %v5949_v28 = vadd.f32 %v2664_v60, %v1720_v9 }
 0x55f   : > { %v4943_v13 = vpop.f32.mrf.mxu1 }
 0x560   : > { %2745 = vadd.xlane.f32.xlu0 %v5949_v28  ;;  %v5961_v61 = vadd.f32 %v4943_v13, %v1723_v49 }
 0x561   : > { %v2667_v11 = vpop.f32.mrf.mxu1 }
 0x562   : > { %v5956_v46 = vadd.f32 %v2667_v11, %v1721_v14 }
 0x564   : > { %2747 = vadd.xlane.f32.xlu1 %v5956_v46  ;;  %2749 = vadd.xlane.f32.xlu0 %v5954_v6 }
 0x568   : > { %2751 = vadd.xlane.f32.xlu1 %v5961_v61 }
 0x56b   : > { %v4946_v25 = vpop.f32.mrf.mxu1 }
 0x56c   : > { %v5970_v10 = vadd.f32 %v4946_v25, %v1726_v53 }
 0x56d   : > { %v2680_v18 = vpop.f32.mrf.mxu1 }
 0x56e   : > { %v5965_v38 = vadd.f32 %v2680_v18, %v1724_v15 }
 0x56f   : > { %v4947_v58 = vpop.f32.mrf.mxu1 }
 0x570   : > { %2753 = vadd.xlane.f32.xlu0 %v5965_v38  ;;  %v5977_v5 = vadd.f32 %v4947_v58, %v1727_v39 }
 0x571   : > { %v2683_v33 = vpop.f32.mrf.mxu1 }
 0x572   : > { %v5972_v35 = vadd.f32 %v2683_v33, %v1725_v32 }
 0x574   : > { %2755 = vadd.xlane.f32.xlu1 %v5972_v35  ;;  %2757 = vadd.xlane.f32.xlu0 %v5970_v10 }
 0x578   : > { %2759 = vadd.xlane.f32.xlu1 %v5977_v5 }
 0x57b   : > { %v4950_v37 = vpop.f32.mrf.mxu1 }
 0x57c   : > { %v5986_v4 = vadd.f32 %v4950_v37, %v1730_v20 }
 0x57d   : > { %v2696_v45 = vpop.f32.mrf.mxu1 }
 0x57e   : > { %v5981_v56 = vadd.f32 %v2696_v45, %v1728_v17 }
 0x57f   : > { %v4951_v21 = vpop.f32.mrf.mxu1 }
 0x580   : > { %2761 = vadd.xlane.f32.xlu0 %v5981_v56  ;;  %v5993_v43 = vadd.f32 %v4951_v21, %v1731_v42  ;;  %v5126_v42 = vld [vmem:[%s5502_s10 + $0x20] ss:$8 sps:$4 sm:$0xff]  }
 0x581   : > { %v2699_v24 = vpop.f32.mrf.mxu1 }
 0x582   : > { %v5988_v59 = vadd.f32 %v2699_v24, %v1729_v2  ;;  %v5128_v2 = vld [vmem:[%s5502_s10 + $0x24] ss:$8 sps:$4 sm:$0xff]  }
 0x583   : > { %3092 = vmatprep.subr.bf16.mxu0 %v5128_v2 }
 0x584   : > { %2763 = vadd.xlane.f32.xlu1 %v5988_v59  ;;  %2765 = vadd.xlane.f32.xlu0 %v5986_v4 }
 0x585   : > { %3093 = vmatpush1.bf16.msra.mxu0 %v5126_v42 }
 0x588   : > { %2767 = vadd.xlane.f32.xlu1 %v5993_v43 }
 0x58b   : > { %v4954_v26 = vpop.f32.mrf.mxu1 }
 0x58c   : > { %v6002_v19 = vadd.f32 %v4954_v26, %v1734_v31 }
 0x58d   : > { %v2712_v12 = vpop.f32.mrf.mxu1 }
 0x58e   : > { %v5997_v30 = vadd.f32 %v2712_v12, %v1732_v16 }
 0x58f   : > { %v4955_v34 = vpop.f32.mrf.mxu1 }
 0x590   : > { %2769 = vadd.xlane.f32.xlu0 %v5997_v30  ;;  %v6009_v40 = vadd.f32 %v4955_v34, %v1735_v48  ;;  %v5131_v34 = vld [vmem:[%s5502_s10 + $0x14] ss:$8 sps:$4 sm:$0xff]  }
 0x591   : > { %v2715_v47 = vpop.f32.mrf.mxu1  ;;  %3094 = vmatprep.subr.bf16.mxu0 %v5131_v34 }
 0x592   : > { %v6004_v29 = vadd.f32 %v2715_v47, %v1733_v22 }
 0x594   : > { %2771 = vadd.xlane.f32.xlu1 %v6004_v29  ;;  %2773 = vadd.xlane.f32.xlu0 %v6002_v19 }
 0x598   : > { %2775 = vadd.xlane.f32.xlu1 %v6009_v40 }
 0x5e9   : > { %v2746_v0 = vpop.xlane.xlu0 %2745 }
 0x5ea   : > { %v2778_v8 = vmul.f32 0.0078125, %v2746_v0 }
 0x5ec   : > { %v6023_v1 = vsub.f32 %v5949_v28, %v2778_v8 }
 0x5ed   : > { %v2748_v44 = vpop.xlane.xlu1 %2747  ;;  %v2750_v27 = vpop.xlane.xlu0 %2749 }
 0x5ee   : > { %v2779_v3 = vmul.f32 0.0078125, %v2748_v44  ;;  %v2780_v7 = vmul.f32 0.0078125, %v2750_v27  ;;  %v2810_v9 = vmul.f32 %v6023_v1, %v6023_v1 }
 0x5f0   : > { %v6028_v60 = vsub.f32 %v5956_v46, %v2779_v3  ;;  %v6031_v57 = vsub.f32 %v5954_v6, %v2780_v7  ;;  %2826 = vadd.xlane.f32.xlu0 %v2810_v9 }
 0x5f1   : > { %v2752_v13 = vpop.xlane.xlu1 %2751 }
 0x5f2   : > { %v2781_v14 = vmul.f32 0.0078125, %v2752_v13  ;;  %v2811_v28 = vmul.f32 %v6028_v60, %v6028_v60  ;;  %v2812_v11 = vmul.f32 %v6031_v57, %v6031_v57 }
 0x5f4   : > { %v6038_v49 = vsub.f32 %v5961_v61, %v2781_v14  ;;  %2828 = vadd.xlane.f32.xlu1 %v2811_v28  ;;  %2830 = vadd.xlane.f32.xlu0 %v2812_v11 }
 0x5f6   : > { %v2813_v46 = vmul.f32 %v6038_v49, %v6038_v49 }
 0x5f8   : > { %2832 = vadd.xlane.f32.xlu1 %v2813_v46 }
 0x5f9   : > { %v2754_v6 = vpop.xlane.xlu0 %2753 }
 0x5fa   : > { %v2782_v25 = vmul.f32 0.0078125, %v2754_v6 }
 0x5fc   : > { %v6043_v15 = vsub.f32 %v5965_v38, %v2782_v25 }
 0x5fd   : > { %v2756_v18 = vpop.xlane.xlu1 %2755  ;;  %v2758_v53 = vpop.xlane.xlu0 %2757 }
 0x5fe   : > { %v2783_v58 = vmul.f32 0.0078125, %v2756_v18  ;;  %v2784_v32 = vmul.f32 0.0078125, %v2758_v53  ;;  %v2814_v61 = vmul.f32 %v6043_v15, %v6043_v15 }
 0x600   : > { %v6048_v33 = vsub.f32 %v5972_v35, %v2783_v58  ;;  %v6051_v39 = vsub.f32 %v5970_v10, %v2784_v32  ;;  %2834 = vadd.xlane.f32.xlu0 %v2814_v61 }
 0x601   : > { %v2760_v37 = vpop.xlane.xlu1 %2759 }
 0x602   : > { %v2785_v17 = vmul.f32 0.0078125, %v2760_v37  ;;  %v2815_v38 = vmul.f32 %v6048_v33, %v6048_v33  ;;  %v2816_v45 = vmul.f32 %v6051_v39, %v6051_v39 }
 0x604   : > { %v6058_v20 = vsub.f32 %v5977_v5, %v2785_v17  ;;  %2836 = vadd.xlane.f32.xlu1 %v2815_v38  ;;  %2838 = vadd.xlane.f32.xlu0 %v2816_v45 }
 0x606   : > { %v2817_v35 = vmul.f32 %v6058_v20, %v6058_v20 }
 0x608   : > { %2840 = vadd.xlane.f32.xlu1 %v2817_v35 }
 0x609   : > { %v2762_v10 = vpop.xlane.xlu0 %2761 }
 0x60a   : > { %v2786_v21 = vmul.f32 0.0078125, %v2762_v10 }
 0x60c   : > { %v6064_v24 = vsub.f32 %v5981_v56, %v2786_v21  ;;  %v5129_v56 = vld [vmem:[%s5502_s10 + $0x10] ss:$8 sps:$4 sm:$0xff]   ;;  %s6601_s10 = sld [smem:[#allocation14_spill]] }
 0x60d   : > { %v2764_v26 = vpop.xlane.xlu1 %2763  ;;  %v2766_v16 = vpop.xlane.xlu0 %2765  ;;  %3095 = vmatpush1.bf16.msra.mxu0 %v5129_v56  ;;  %v6125_v56 = vld [vmem:[%s6602_s14] ss:$0 sm:$0xff] }
 0x60e   : > { %v2787_v5 = vmul.f32 0.0078125, %v2764_v26  ;;  %v2788_v12 = vmul.f32 0.0078125, %v2766_v16  ;;  %v2818_v31 = vmul.f32 %v6064_v24, %v6064_v24  ;;  %3096 = vmatprep.subr.bf16.mxu0 %v5134_v50 }
 0x610   : > { %v6071_v22 = vsub.f32 %v5988_v59, %v2787_v5  ;;  %v6074_v47 = vsub.f32 %v5986_v4, %v2788_v12  ;;  %2842 = vadd.xlane.f32.xlu0 %v2818_v31 }
 0x611   : > { %v2768_v48 = vpop.xlane.xlu1 %2767  ;;  %3097 = vmatpush1.bf16.msra.mxu0 %v5132_v51 }
 0x612   : > { %v2789_v23 = vmul.f32 0.0078125, %v2768_v48  ;;  %v2819_v36 = vmul.f32 %v6071_v22, %v6071_v22  ;;  %v2820_v62 = vmul.f32 %v6074_v47, %v6074_v47  ;;  %v5136_v28 = vld [vmem:[%s6601_s10 + $0x38] sm:$0xff]   ;;  %v5137_v11 = vld [vmem:[%s6601_s10 + $0x70] sm:$0xff]   ;;  %v5139_v6 = vld [vmem:[%s6601_s10 + $0x68] sm:$0xff]  }
 0x613   : > { %v5138_v46 = vld [vmem:[%s6601_s10 + $0x30] sm:$0xff]   ;;  %v5141_v25 = vld [vmem:[%s6601_s10 + $0x60] sm:$0xff]   ;;  %v5143_v53 = vld [vmem:[%s6601_s10 + $0x58] sm:$0xff]  }
 0x614   : > { %v6084_v59 = vsub.f32 %v5993_v43, %v2789_v23  ;;  %2844 = vadd.xlane.f32.xlu1 %v2819_v36  ;;  %2846 = vadd.xlane.f32.xlu0 %v2820_v62  ;;  %v5142_v18 = vld [vmem:[%s6601_s10 + $0x20] sm:$0xff]   ;;  %v5144_v58 = vld [vmem:[%s6601_s10 + $0x18] sm:$0xff]  }
 0x616   : > { %v2821_v4 = vmul.f32 %v6084_v59, %v6084_v59 }
 0x618   : > { %2848 = vadd.xlane.f32.xlu1 %v2821_v4 }
 0x619   : > { %v2770_v54 = vpop.xlane.xlu0 %2769 }
 0x61a   : > { %v2790_v52 = vmul.f32 0.0078125, %v2770_v54 }
 0x61c   : > { %v6090_v41 = vsub.f32 %v5997_v30, %v2790_v52 }
 0x61d   : > { %v2772_v63 = vpop.xlane.xlu1 %2771  ;;  %v2774_v0 = vpop.xlane.xlu0 %2773 }
 0x61e   : > { %v2791_v43 = vmul.f32 0.0078125, %v2772_v63  ;;  %v2792_v8 = vmul.f32 0.0078125, %v2774_v0  ;;  %v2822_v44 = vmul.f32 %v6090_v41, %v6090_v41  ;;  %v6134_v63 = vld [vmem:[%s6603_s11] ss:$0 sm:$0xff] }
 0x620   : > { %v6095_v27 = vsub.f32 %v6004_v29, %v2791_v43  ;;  %v6098_v3 = vsub.f32 %v6002_v19, %v2792_v8  ;;  %2850 = vadd.xlane.f32.xlu0 %v2822_v44  ;;  %v5135_v29 = vld [vmem:[%s6601_s10 + $0x78] sm:$0xff]  }
 0x621   : > { %v2776_v30 = vpop.xlane.xlu1 %2775  ;;  %4812 = vmatprep.subr.bf16.mxu1 %v5135_v29 }
 0x622   : > { %v2793_v7 = vmul.f32 0.0078125, %v2776_v30  ;;  %v2823_v9 = vmul.f32 %v6095_v27, %v6095_v27  ;;  %v2824_v13 = vmul.f32 %v6098_v3, %v6098_v3  ;;  %4813 = vmatpush3.bf16.msra.mxu1 %v5136_v28 }
 0x623   : > { %4814 = vmatprep.subr.bf16.mxu1 %v5137_v11 }
 0x624   : > { %v6105_v14 = vsub.f32 %v6009_v40, %v2793_v7  ;;  %2852 = vadd.xlane.f32.xlu1 %v2823_v9  ;;  %2854 = vadd.xlane.f32.xlu0 %v2824_v13  ;;  %v5140_v40 = vld [vmem:[%s6601_s10 + $0x28] sm:$0xff]  }
 0x626   : > { %v2825_v19 = vmul.f32 %v6105_v14, %v6105_v14  ;;  %4815 = vmatpush3.bf16.msra.mxu1 %v5138_v46 }
 0x627   : > { %4816 = vmatprep.subr.bf16.mxu1 %v5139_v6 }
 0x628   : > { %2856 = vadd.xlane.f32.xlu1 %v2825_v19 }
 0x62a   : > { %4817 = vmatpush3.bf16.msra.mxu1 %v5140_v40 }
 0x62b   : > { %4818 = vmatprep.subr.bf16.mxu1 %v5141_v25 }
 0x62e   : > { %4819 = vmatpush3.bf16.msra.mxu1 %v5142_v18 }
 0x62f   : > { %4820 = vmatprep.subr.bf16.mxu1 %v5143_v53 }
 0x632   : > { %4821 = vmatpush3.bf16.msra.mxu1 %v5144_v58 }
 0x679   : > { %v2827_v32 = vpop.xlane.xlu0 %2826 }
 0x67a   : > { %v2858_v61 = vmul.f32 0.0078125, %v2827_v32 }
 0x67c   : > { %v2874_v37 = vadd.f32 1e-05, %v2858_v61 }
 0x67d   : > { %v2829_v17 = vpop.xlane.xlu1 %2828  ;;  %v2831_v38 = vpop.xlane.xlu0 %2830 }
 0x67e   : > { %5247 = vrsqrt.f32 %v2874_v37  ;;  %v2859_v45 = vmul.f32 0.0078125, %v2829_v17  ;;  %v2860_v35 = vmul.f32 0.0078125, %v2831_v38 }
 0x680   : > { %v2875_v10 = vadd.f32 1e-05, %v2859_v45  ;;  %v2876_v21 = vadd.f32 1e-05, %v2860_v35 }
 0x681   : > { %v2833_v2 = vpop.xlane.xlu1 %2832 }
 0x682   : > { %5249 = vrsqrt.f32 %v2875_v10  ;;  %v2861_v42 = vmul.f32 0.0078125, %v2833_v2 }
 0x683   : > { %5251 = vrsqrt.f32 %v2876_v21 }
 0x684   : > { %v2877_v26 = vadd.f32 1e-05, %v2861_v42 }
 0x686   : > { %5253 = vrsqrt.f32 %v2877_v26 }
 0x689   : > { %v2835_v16 = vpop.xlane.xlu0 %2834 }
 0x68a   : > { %v2862_v5 = vmul.f32 0.0078125, %v2835_v16 }
 0x68b   : > { %v5248_v12 = vpop.eup %5247 }
 0x68c   : > { %v2906_v31 = vmul.f32 %v5248_v12, %v6023_v1  ;;  %v2878_v34 = vadd.f32 1e-05, %v2862_v5 }
 0x68d   : > { %v2837_v48 = vpop.xlane.xlu1 %2836  ;;  %v2839_v23 = vpop.xlane.xlu0 %2838 }
 0x68e   : > { %5255 = vrsqrt.f32 %v2878_v34  ;;  %v2863_v36 = vmul.f32 0.0078125, %v2837_v48  ;;  %v2864_v62 = vmul.f32 0.0078125, %v2839_v23  ;;  %v2928_v50 = vmul.f32 %v6125_v56, %v2906_v31 }
 0x68f   : > { %v5250_v51 = vpop.eup %5249 }
 0x690   : > { %v5252_v4 = vpop.eup %5251  ;;  %v2907_v54 = vmul.f32 %v5250_v51, %v6028_v60  ;;  %v2879_v52 = vadd.f32 1e-05, %v2863_v36  ;;  %v2880_v1 = vadd.f32 1e-05, %v2864_v62  ;;  %v6138_v30 = vadd.f32 %v6134_v63, %v2928_v50 }
 0x691   : > { %v2841_v0 = vpop.xlane.xlu1 %2840  ;;  %v2908_v7 = vmul.f32 %v5252_v4, %v6031_v57 }
 0x692   : > { %5257 = vrsqrt.f32 %v2879_v52  ;;  %v2865_v43 = vmul.f32 0.0078125, %v2841_v0  ;;  %v2929_v8 = vmul.f32 %v6125_v56, %v2907_v54 }
 0x693   : > { %v5254_v44 = vpop.eup %5253  ;;  %5259 = vrsqrt.f32 %v2880_v1  ;;  %v2930_v28 = vmul.f32 %v6125_v56, %v2908_v7 }
 0x694   : > { %v2881_v60 = vadd.f32 1e-05, %v2865_v43  ;;  %v6142_v9 = vadd.f32 %v6134_v63, %v2929_v8  ;;  %v2909_v13 = vmul.f32 %v5254_v44, %v6038_v49 }
 0x695   : > { %v6154_v49 = vadd.f32 %v6134_v63, %v2930_v28 }
 0x696   : > { %5261 = vrsqrt.f32 %v2881_v60  ;;  %v2966_v19 = vpack.c.bf16 %v6142_v9, %v6138_v30  ;;  %v2931_v29 = vmul.f32 %v6125_v56, %v2909_v13 }
 0x698   : > { %3115 = vmatmul.mubr.bf16.vlgmr.msra.gmra.mxu0 %v2966_v19  ;;  %v6151_v46 = vadd.f32 %v6134_v63, %v2931_v29 }
 0x699   : > { %v2843_v11 = vpop.xlane.xlu0 %2842  ;;  %3124 = vmatprep.mubr.bf16.mxu0 %v5368_v55 }
 0x69a   : > { %v2866_v57 = vmul.f32 0.0078125, %v2843_v11  ;;  %v2967_v61 = vpack.c.bf16 %v6151_v46, %v6154_v49 }
 0x69b   : > { %v5256_v6 = vpop.eup %5255 }
 0x69c   : > { %v2882_v40 = vadd.f32 1e-05, %v2866_v57  ;;  %v2910_v25 = vmul.f32 %v5256_v6, %v6043_v15 }
 0x69d   : > { %v2845_v18 = vpop.xlane.xlu1 %2844  ;;  %v2847_v53 = vpop.xlane.xlu0 %2846 }
 0x69e   : > { %5263 = vrsqrt.f32 %v2882_v40  ;;  %v2867_v58 = vmul.f32 0.0078125, %v2845_v18  ;;  %v2868_v32 = vmul.f32 0.0078125, %v2847_v53  ;;  %v2932_v17 = vmul.f32 %v6125_v56, %v2910_v25 }
 0x69f   : > { %v5258_v37 = vpop.eup %5257 }
 0x6a0   : > { %v2883_v38 = vadd.f32 1e-05, %v2867_v58  ;;  %v2884_v45 = vadd.f32 1e-05, %v2868_v32  ;;  %3125 = vmatmul.mubr.bf16.gmra.mxu0 %v2967_v61  ;;  %v2911_v35 = vmul.f32 %v5258_v37, %v6048_v33  ;;  %v5260_v10 = vpop.eup %5259  ;;  %v6164_v26 = vadd.f32 %v6134_v63, %v2932_v17 }
 0x6a1   : > { %v2849_v21 = vpop.xlane.xlu1 %2848  ;;  %3134 = vmatprep.mubr.bf16.mxu0 %v5368_v55  ;;  %v2912_v12 = vmul.f32 %v5260_v10, %v6051_v39 }
 0x6a2   : > { %5265 = vrsqrt.f32 %v2883_v38  ;;  %v2869_v15 = vmul.f32 0.0078125, %v2849_v21  ;;  %v2933_v2 = vmul.f32 %v6125_v56, %v2911_v35 }
 0x6a3   : > { %v5262_v42 = vpop.eup %5261  ;;  %5267 = vrsqrt.f32 %v2884_v45  ;;  %v2934_v48 = vmul.f32 %v6125_v56, %v2912_v12 }
 0x6a4   : > { %v2885_v16 = vadd.f32 1e-05, %v2869_v15  ;;  %v6167_v5 = vadd.f32 %v6134_v63, %v2933_v2  ;;  %v2913_v33 = vmul.f32 %v5262_v42, %v6058_v20 }
 0x6a5   : > { %v6180_v20 = vadd.f32 %v6134_v63, %v2934_v48  ;;  %v5148_v48 = vld [vmem:[%s6601_s10 + $0x8] sm:$0xff]  }
 0x6a6   : > { %5269 = vrsqrt.f32 %v2885_v16  ;;  %v2968_v31 = vpack.c.bf16 %v6167_v5, %v6164_v26  ;;  %v2935_v34 = vmul.f32 %v6125_v56, %v2913_v33  ;;  %v5145_v33 = vld [vmem:[%s6601_s10 + $0x50] sm:$0xff]  }
 0x6a7   : > { %4822 = vmatprep.subr.bf16.mxu1 %v5145_v33 }
 0x6a8   : > { %3135 = vmatmul.mubr.bf16.gmra.mxu0 %v2968_v31  ;;  %v6177_v62 = vadd.f32 %v6134_v63, %v2935_v34  ;;  %v5146_v31 = vld [vmem:[%s6601_s10 + $0x10] sm:$0xff]   ;;  %v5147_v34 = vld [vmem:[%s6601_s10 + $0x48] sm:$0xff]  }
 0x6a9   : > { %v2851_v23 = vpop.xlane.xlu0 %2850  ;;  %3144 = vmatprep.mubr.bf16.mxu0 %v5368_v55  ;;  %4823 = vmatpush3.bf16.msra.mxu1 %v5146_v31 }
 0x6aa   : > { %v2870_v36 = vmul.f32 0.0078125, %v2851_v23  ;;  %v2969_v0 = vpack.c.bf16 %v6177_v62, %v6180_v20  ;;  %4824 = vmatprep.subr.bf16.mxu1 %v5147_v34  ;;  %v2992_v23 = vlaneseq }
 0x6ab   : > { %v5264_v51 = vpop.eup %5263 }
 0x6ac   : > { %v2886_v39 = vadd.f32 1e-05, %v2870_v36  ;;  %v2914_v50 = vmul.f32 %v5264_v51, %v6064_v24 }
 0x6ad   : > { %v2853_v4 = vpop.xlane.xlu1 %2852  ;;  %v2855_v54 = vpop.xlane.xlu0 %2854  ;;  %4825 = vmatpush3.bf16.msra.mxu1 %v5148_v48 }
 0x6ae   : > { %5271 = vrsqrt.f32 %v2886_v39  ;;  %v2871_v52 = vmul.f32 0.0078125, %v2853_v4  ;;  %v2872_v1 = vmul.f32 0.0078125, %v2855_v54  ;;  %v2936_v8 = vmul.f32 %v6125_v56, %v2914_v50  ;;  %v2990_v39 = vld [vmem:[%s5513_s15] sm:$0x3] }
 0x6af   : > { %v5266_v43 = vpop.eup %5265 }
 0x6b0   : > { %v5268_v44 = vpop.eup %5267  ;;  %v2887_v7 = vadd.f32 1e-05, %v2871_v52  ;;  %v2888_v60 = vadd.f32 1e-05, %v2872_v1  ;;  %3145 = vmatmul.mubr.bf16.gmra.mxu0 %v2969_v0  ;;  %v2915_v13 = vmul.f32 %v5266_v43, %v6071_v22  ;;  %v6190_v11 = vadd.f32 %v6134_v63, %v2936_v8 }
 0x6b1   : > { %v2857_v19 = vpop.xlane.xlu1 %2856  ;;  %3154 = vmatprep.mubr.bf16.mxu0 %v5368_v55  ;;  %v2916_v57 = vmul.f32 %v5268_v44, %v6074_v47 }
 0x6b2   : > { %5273 = vrsqrt.f32 %v2887_v7  ;;  %v2873_v24 = vmul.f32 0.0078125, %v2857_v19  ;;  %v2937_v29 = vmul.f32 %v6125_v56, %v2915_v13 }
 0x6b3   : > { %v5270_v28 = vpop.eup %5269  ;;  %5275 = vrsqrt.f32 %v2888_v60  ;;  %v2938_v53 = vmul.f32 %v6125_v56, %v2916_v57 }
 0x6b4   : > { %v2889_v6 = vadd.f32 1e-05, %v2873_v24  ;;  %v6194_v40 = vadd.f32 %v6134_v63, %v2937_v29  ;;  %v2917_v22 = vmul.f32 %v5270_v28, %v6084_v59 }
 0x6b5   : > { %v6206_v32 = vadd.f32 %v6134_v63, %v2938_v53 }
 0x6b6   : > { %5277 = vrsqrt.f32 %v2889_v6  ;;  %v2970_v25 = vpack.c.bf16 %v6194_v40, %v6190_v11  ;;  %v2939_v18 = vmul.f32 %v6125_v56, %v2917_v22 }
 0x6b8   : > { %3155 = vmatmul.mubr.bf16.gmra.mxu0 %v2970_v25  ;;  %v6203_v47 = vadd.f32 %v6134_v63, %v2939_v18 }
 0x6b9   : > { %3164 = vmatprep.mubr.bf16.mxu0 %v5368_v55 }
 0x6ba   : > { %v2971_v61 = vpack.c.bf16 %v6203_v47, %v6206_v32 }
 0x6bb   : > { %v5272_v58 = vpop.eup %5271 }
 0x6bc   : > { %v2918_v59 = vmul.f32 %v5272_v58, %v6090_v41 }
 0x6be   : > { %v2940_v38 = vmul.f32 %v6125_v56, %v2918_v59 }
 0x6bf   : > { %v5274_v37 = vpop.eup %5273 }
 0x6c0   : > { %3165 = vmatmul.mubr.bf16.gmra.mxu0 %v2971_v61  ;;  %v2919_v17 = vmul.f32 %v5274_v37, %v6095_v27  ;;  %v5276_v45 = vpop.eup %5275  ;;  %v6216_v21 = vadd.f32 %v6134_v63, %v2940_v38 }
 0x6c1   : > { %3174 = vmatprep.mubr.bf16.mxu0 %v5368_v55  ;;  %v2920_v15 = vmul.f32 %v5276_v45, %v6098_v3 }
 0x6c2   : > { %v2941_v35 = vmul.f32 %v6125_v56, %v2919_v17 }
 0x6c3   : > { %v5278_v10 = vpop.eup %5277  ;;  %v2942_v16 = vmul.f32 %v6125_v56, %v2920_v15 }
 0x6c4   : > { %v6219_v41 = vadd.f32 %v6134_v63, %v2941_v35  ;;  %v2921_v27 = vmul.f32 %v5278_v10, %v6105_v14 }
 0x6c5   : > { %v6232_v3 = vadd.f32 %v6134_v63, %v2942_v16 }
 0x6c6   : > { %v2972_v2 = vpack.c.bf16 %v6219_v41, %v6216_v21  ;;  %v2943_v42 = vmul.f32 %v6125_v56, %v2921_v27  ;;  %v5150_v56 = vld [vmem:[%s6601_s10] sm:$0xff]  }
 0x6c8   : > { %3175 = vmatmul.mubr.bf16.gmra.mxu0 %v2972_v2  ;;  %v6229_v12 = vadd.f32 %v6134_v63, %v2943_v42  ;;  %v2993_v63 = vshrl.u32 %v2992_v23, 7 }
 0x6c9   : > { %3184 = vmatprep.mubr.bf16.mxu0 %v5368_v55  ;;  %v5149_v55 = vld [vmem:[%s6601_s10 + $0x40] sm:$0xff]  }
 0x6ca   : > { %v2973_v14 = vpack.c.bf16 %v6229_v12, %v6232_v3  ;;  %4826 = vmatprep.subr.bf16.mxu1 %v5149_v55  ;;  %v2998_v36 = vsub.s32 1, %v2993_v63  ;;  %v2994_v51 = vsub.s32 0, %v2993_v63 }
 0x6cb   : > { %4827 = vmatpush3.bf16.msra.mxu1 %v5150_v56 }
 0x6cc   : > { %v6243_v4 = vrot.slane %v2990_v39, %v2998_v36  ;;  %v6245_v54 = vrot.slane %v2990_v39, %v2994_v51 }
 0x6d0   : > { %3185 = vmatmul.mubr.bf16.gmra.mxu0 %v2973_v14 }
 0x758   : > { %v3116_v50 = vpop.f32.mrf.mxu0 }
 0x759   : > { %v3117_v8 = vadd.f32 %v3116_v50, %v6245_v54 }
 0x75a   : > { %v3118_v52 = vpop.f32.mrf.mxu0 }
 0x75b   : > { %v3119_v0 = vadd.f32 %v3118_v52, %v6243_v4  ;;  %v3195_v29 = vmax.f32 %v3117_v8, 0.0 }
 0x75c   : > { %v3120_v1 = vpop.f32.mrf.mxu0 }
 0x75d   : > { %v3121_v43 = vadd.f32 %v3120_v1, %v6245_v54  ;;  %v3196_v19 = vmax.f32 %v3119_v0, 0.0 }
 0x75e   : > { %v3122_v44 = vpop.f32.mrf.mxu0 }
 0x75f   : > { %v3123_v7 = vadd.f32 %v3122_v44, %v6243_v4  ;;  %v3197_v60 = vmax.f32 %v3121_v43, 0.0 }
 0x760   : > { %v3126_v13 = vpop.f32.mrf.mxu0 }
 0x761   : > { %v3198_v24 = vmax.f32 %v3123_v7, 0.0  ;;  %v3227_v6 = vpack.c.bf16 %v3197_v60, %v3195_v29  ;;  %v3127_v53 = vadd.f32 %v3126_v13, %v6245_v54 }
 0x762   : > { %v3128_v28 = vpop.f32.mrf.mxu0 }
 0x763   : > { %v3228_v57 = vpack.c.bf16 %v3198_v24, %v3196_v19  ;;  %v3129_v25 = vadd.f32 %v3128_v28, %v6243_v4  ;;  %v3199_v45 = vmax.f32 %v3127_v53, 0.0 }
 0x764   : > { %v3130_v22 = vpop.f32.mrf.mxu0 }
 0x765   : > { %v3131_v18 = vadd.f32 %v3130_v22, %v6245_v54  ;;  %3410 = vmatprep.mubr.bf16.mxu1 %v3228_v57  ;;  %v3200_v17 = vmax.f32 %v3129_v25, 0.0 }
 0x766   : > { %v3132_v58 = vpop.f32.mrf.mxu0  ;;  %3411 = vmatmul.mubr.bf16.vlgmr.msra.gmra.mxu1 %v3227_v6 }
 0x767   : > { %v3133_v59 = vadd.f32 %v3132_v58, %v6243_v4  ;;  %v3201_v61 = vmax.f32 %v3131_v18, 0.0 }
 0x768   : > { %v3136_v37 = vpop.f32.mrf.mxu0 }
 0x769   : > { %v3202_v38 = vmax.f32 %v3133_v59, 0.0  ;;  %v3229_v15 = vpack.c.bf16 %v3201_v61, %v3199_v45  ;;  %v3137_v16 = vadd.f32 %v3136_v37, %v6245_v54 }
 0x76a   : > { %v3138_v35 = vpop.f32.mrf.mxu0 }
 0x76b   : > { %v3230_v10 = vpack.c.bf16 %v3202_v38, %v3200_v17  ;;  %v3139_v2 = vadd.f32 %v3138_v35, %v6243_v4  ;;  %v3203_v56 = vmax.f32 %v3137_v16, 0.0 }
 0x76c   : > { %v3140_v27 = vpop.f32.mrf.mxu0 }
 0x76d   : > { %v3141_v42 = vadd.f32 %v3140_v27, %v6245_v54  ;;  %3418 = vmatprep.mubr.bf16.mxu1 %v3230_v10  ;;  %v3204_v48 = vmax.f32 %v3139_v2, 0.0 }
 0x76e   : > { %v3142_v14 = vpop.f32.mrf.mxu0  ;;  %3419 = vmatmul.mubr.bf16.gmra.mxu1 %v3229_v15 }
 0x76f   : > { %v3143_v33 = vadd.f32 %v3142_v14, %v6243_v4  ;;  %v3205_v31 = vmax.f32 %v3141_v42, 0.0 }
 0x770   : > { %v3146_v34 = vpop.f32.mrf.mxu0 }
 0x771   : > { %v3206_v55 = vmax.f32 %v3143_v33, 0.0  ;;  %v3231_v36 = vpack.c.bf16 %v3205_v31, %v3203_v56  ;;  %v3147_v52 = vadd.f32 %v3146_v34, %v6245_v54 }
 0x772   : > { %v3148_v23 = vpop.f32.mrf.mxu0 }
 0x773   : > { %v3232_v63 = vpack.c.bf16 %v3206_v55, %v3204_v48  ;;  %v3149_v39 = vadd.f32 %v3148_v23, %v6243_v4  ;;  %v3207_v60 = vmax.f32 %v3147_v52, 0.0 }
 0x774   : > { %v3150_v51 = vpop.f32.mrf.mxu0 }
 0x775   : > { %v3151_v50 = vadd.f32 %v3150_v51, %v6245_v54  ;;  %3426 = vmatprep.mubr.bf16.mxu1 %v3232_v63  ;;  %v3208_v44 = vmax.f32 %v3149_v39, 0.0 }
 0x776   : > { %v3152_v1 = vpop.f32.mrf.mxu0  ;;  %3427 = vmatmul.mubr.bf16.gmra.mxu1 %v3231_v36 }
 0x777   : > { %v3153_v0 = vadd.f32 %v3152_v1, %v6243_v4  ;;  %v3209_v43 = vmax.f32 %v3151_v50, 0.0 }
 0x778   : > { %v3156_v8 = vpop.f32.mrf.mxu0 }
 0x779   : > { %v3210_v7 = vmax.f32 %v3153_v0, 0.0  ;;  %v3233_v24 = vpack.c.bf16 %v3209_v43, %v3207_v60  ;;  %v3157_v6 = vadd.f32 %v3156_v8, %v6245_v54 }
 0x77a   : > { %v3158_v13 = vpop.f32.mrf.mxu0 }
 0x77b   : > { %v3234_v19 = vpack.c.bf16 %v3210_v7, %v3208_v44  ;;  %v3159_v28 = vadd.f32 %v3158_v13, %v6243_v4  ;;  %v3211_v61 = vmax.f32 %v3157_v6, 0.0 }
 0x77c   : > { %v3160_v29 = vpop.f32.mrf.mxu0 }
 0x77d   : > { %v3161_v57 = vadd.f32 %v3160_v29, %v6245_v54  ;;  %3434 = vmatprep.mubr.bf16.mxu1 %v3234_v19  ;;  %v3212_v58 = vmax.f32 %v3159_v28, 0.0 }
 0x77e   : > { %v3162_v22 = vpop.f32.mrf.mxu0  ;;  %3435 = vmatmul.mubr.bf16.gmra.mxu1 %v3233_v24 }
 0x77f   : > { %v3163_v25 = vadd.f32 %v3162_v22, %v6243_v4  ;;  %v3213_v18 = vmax.f32 %v3161_v57, 0.0 }
 0x780   : > { %v3166_v53 = vpop.f32.mrf.mxu0 }
 0x781   : > { %v3214_v59 = vmax.f32 %v3163_v25, 0.0  ;;  %v3235_v38 = vpack.c.bf16 %v3213_v18, %v3211_v61  ;;  %v3167_v15 = vadd.f32 %v3166_v53, %v6245_v54 }
 0x782   : > { %v3168_v37 = vpop.f32.mrf.mxu0 }
 0x783   : > { %v3236_v17 = vpack.c.bf16 %v3214_v59, %v3212_v58  ;;  %v3169_v35 = vadd.f32 %v3168_v37, %v6243_v4  ;;  %v3215_v31 = vmax.f32 %v3167_v15, 0.0  ;;  %v6284_v59 = vld [vmem:[%s6605_s24] ss:$0 sm:$0xff] }
 0x784   : > { %v3170_v45 = vpop.f32.mrf.mxu0 }
 0x785   : > { %v3171_v10 = vadd.f32 %v3170_v45, %v6245_v54  ;;  %3442 = vmatprep.mubr.bf16.mxu1 %v3236_v17  ;;  %v3216_v14 = vmax.f32 %v3169_v35, 0.0 }
 0x786   : > { %v3172_v27 = vpop.f32.mrf.mxu0  ;;  %3443 = vmatmul.mubr.bf16.gmra.mxu1 %v3235_v38 }
 0x787   : > { %v3173_v2 = vadd.f32 %v3172_v27, %v6243_v4  ;;  %v3217_v42 = vmax.f32 %v3171_v10, 0.0 }
 0x788   : > { %v3176_v16 = vpop.f32.mrf.mxu0 }
 0x789   : > { %v3218_v33 = vmax.f32 %v3173_v2, 0.0  ;;  %v3237_v55 = vpack.c.bf16 %v3217_v42, %v3215_v31  ;;  %v3177_v36 = vadd.f32 %v3176_v16, %v6245_v54 }
 0x78a   : > { %v3178_v34 = vpop.f32.mrf.mxu0 }
 0x78b   : > { %v3238_v48 = vpack.c.bf16 %v3218_v33, %v3216_v14  ;;  %v3179_v23 = vadd.f32 %v3178_v34, %v6243_v4  ;;  %v3219_v43 = vmax.f32 %v3177_v36, 0.0 }
 0x78c   : > { %v3180_v56 = vpop.f32.mrf.mxu0 }
 0x78d   : > { %v3181_v63 = vadd.f32 %v3180_v56, %v6245_v54  ;;  %3450 = vmatprep.mubr.bf16.mxu1 %v3238_v48  ;;  %v3220_v1 = vmax.f32 %v3179_v23, 0.0 }
 0x78e   : > { %v3182_v51 = vpop.f32.mrf.mxu0  ;;  %3451 = vmatmul.mubr.bf16.gmra.mxu1 %v3237_v55 }
 0x78f   : > { %v3183_v39 = vadd.f32 %v3182_v51, %v6243_v4  ;;  %v3221_v50 = vmax.f32 %v3181_v63, 0.0 }
 0x790   : > { %v3186_v52 = vpop.f32.mrf.mxu0 }
 0x791   : > { %v3222_v0 = vmax.f32 %v3183_v39, 0.0  ;;  %v3239_v7 = vpack.c.bf16 %v3221_v50, %v3219_v43  ;;  %v3187_v24 = vadd.f32 %v3186_v52, %v6245_v54 }
 0x792   : > { %v3188_v8 = vpop.f32.mrf.mxu0 }
 0x793   : > { %v3240_v44 = vpack.c.bf16 %v3222_v0, %v3220_v1  ;;  %v3189_v13 = vadd.f32 %v3188_v8, %v6243_v4  ;;  %v3223_v25 = vmax.f32 %v3187_v24, 0.0 }
 0x794   : > { %v3190_v60 = vpop.f32.mrf.mxu0 }
 0x795   : > { %v3191_v19 = vadd.f32 %v3190_v60, %v6245_v54  ;;  %3458 = vmatprep.mubr.bf16.mxu1 %v3240_v44  ;;  %v3224_v6 = vmax.f32 %v3189_v13, 0.0 }
 0x796   : > { %v3192_v29 = vpop.f32.mrf.mxu0  ;;  %3459 = vmatmul.mubr.bf16.gmra.mxu1 %v3239_v7 }
 0x797   : > { %v3193_v28 = vadd.f32 %v3192_v29, %v6243_v4  ;;  %v3225_v57 = vmax.f32 %v3191_v19, 0.0 }
 0x799   : > { %v3226_v22 = vmax.f32 %v3193_v28, 0.0  ;;  %v3241_v53 = vpack.c.bf16 %v3225_v57, %v3223_v25 }
 0x79b   : > { %v3242_v18 = vpack.c.bf16 %v3226_v22, %v3224_v6 }
 0x79d   : > { %3466 = vmatprep.mubr.bf16.mxu1 %v3242_v18 }
 0x79e   : > { %3467 = vmatmul.mubr.bf16.gmra.mxu1 %v3241_v53 }
 0x826   : > { %v4828_v58 = vpop.f32.mrf.mxu1 }
 0x828   : > { %v4829_v54 = vpop.f32.mrf.mxu1 }
 0x829   : > { %v4830_v61 = vadd.f32 %v4829_v54, %v4828_v58 }
 0x82a   : > { %v4831_v37 = vpop.f32.mrf.mxu1 }
 0x82b   : > { %v3413_v4 = vadd.f32 %v4830_v61, %v6284_v59 }
 0x82c   : > { %v4832_v17 = vpop.f32.mrf.mxu1 }
 0x82d   : > { %v4833_v38 = vadd.f32 %v4832_v17, %v4831_v37  ;;  %v6288_v45 = vadd.f32 %v3413_v4, %v6138_v30 }
 0x82e   : > { %v4834_v35 = vpop.f32.mrf.mxu1 }
 0x82f   : > { %v3416_v10 = vadd.f32 %v4833_v38, %v6284_v59  ;;  %3493 = vadd.xlane.f32.xlu0 %v6288_v45 }
 0x830   : > { %v4835_v15 = vpop.f32.mrf.mxu1 }
 0x831   : > { %v4836_v27 = vadd.f32 %v4835_v15, %v4834_v35  ;;  %v6293_v2 = vadd.f32 %v3416_v10, %v6142_v9 }
 0x832   : > { %v4837_v42 = vpop.f32.mrf.mxu1 }
 0x833   : > { %v3421_v16 = vadd.f32 %v4836_v27, %v6284_v59  ;;  %3495 = vadd.xlane.f32.xlu1 %v6293_v2 }
 0x834   : > { %v4838_v14 = vpop.f32.mrf.mxu1 }
 0x835   : > { %v4839_v33 = vadd.f32 %v4838_v14, %v4837_v42  ;;  %v6298_v30 = vadd.f32 %v3421_v16, %v6154_v49 }
 0x836   : > { %v4840_v31 = vpop.f32.mrf.mxu1 }
 0x837   : > { %v3424_v34 = vadd.f32 %v4839_v33, %v6284_v59  ;;  %3497 = vadd.xlane.f32.xlu0 %v6298_v30 }
 0x838   : > { %v4841_v48 = vpop.f32.mrf.mxu1 }
 0x839   : > { %v4842_v55 = vadd.f32 %v4841_v48, %v4840_v31  ;;  %v6303_v9 = vadd.f32 %v3424_v34, %v6151_v46 }
 0x83a   : > { %v4843_v56 = vpop.f32.mrf.mxu1 }
 0x83b   : > { %v3429_v23 = vadd.f32 %v4842_v55, %v6284_v59  ;;  %3499 = vadd.xlane.f32.xlu1 %v6303_v9 }
 0x83c   : > { %v4844_v63 = vpop.f32.mrf.mxu1 }
 0x83d   : > { %v4845_v36 = vadd.f32 %v4844_v63, %v4843_v56  ;;  %v6308_v49 = vadd.f32 %v3429_v23, %v6164_v26 }
 0x83e   : > { %v4846_v51 = vpop.f32.mrf.mxu1 }
 0x83f   : > { %v3432_v39 = vadd.f32 %v4845_v36, %v6284_v59  ;;  %3501 = vadd.xlane.f32.xlu0 %v6308_v49 }
 0x840   : > { %v4847_v50 = vpop.f32.mrf.mxu1 }
 0x841   : > { %v4848_v52 = vadd.f32 %v4847_v50, %v4846_v51  ;;  %v6313_v46 = vadd.f32 %v3432_v39, %v6167_v5 }
 0x842   : > { %v4849_v1 = vpop.f32.mrf.mxu1 }
 0x843   : > { %v3437_v0 = vadd.f32 %v4848_v52, %v6284_v59  ;;  %3503 = vadd.xlane.f32.xlu1 %v6313_v46 }
 0x844   : > { %v4850_v43 = vpop.f32.mrf.mxu1 }
 0x845   : > { %v4851_v8 = vadd.f32 %v4850_v43, %v4849_v1  ;;  %v6318_v26 = vadd.f32 %v3437_v0, %v6180_v20 }
 0x846   : > { %v4852_v44 = vpop.f32.mrf.mxu1 }
 0x847   : > { %v3440_v7 = vadd.f32 %v4851_v8, %v6284_v59  ;;  %3505 = vadd.xlane.f32.xlu0 %v6318_v26 }
 0x848   : > { %v4853_v60 = vpop.f32.mrf.mxu1 }
 0x849   : > { %v4854_v13 = vadd.f32 %v4853_v60, %v4852_v44  ;;  %v6323_v5 = vadd.f32 %v3440_v7, %v6177_v62 }
 0x84a   : > { %v4855_v19 = vpop.f32.mrf.mxu1 }
 0x84b   : > { %v3445_v24 = vadd.f32 %v4854_v13, %v6284_v59  ;;  %3507 = vadd.xlane.f32.xlu1 %v6323_v5 }
 0x84c   : > { %v4856_v29 = vpop.f32.mrf.mxu1 }
 0x84d   : > { %v4857_v28 = vadd.f32 %v4856_v29, %v4855_v19  ;;  %v6328_v20 = vadd.f32 %v3445_v24, %v6190_v11 }
 0x84e   : > { %v4858_v57 = vpop.f32.mrf.mxu1 }
 0x84f   : > { %v3448_v6 = vadd.f32 %v4857_v28, %v6284_v59  ;;  %3509 = vadd.xlane.f32.xlu0 %v6328_v20 }
 0x850   : > { %v4859_v22 = vpop.f32.mrf.mxu1 }
 0x851   : > { %v4860_v25 = vadd.f32 %v4859_v22, %v4858_v57  ;;  %v6333_v62 = vadd.f32 %v3448_v6, %v6194_v40 }
 0x852   : > { %v4861_v18 = vpop.f32.mrf.mxu1 }
 0x853   : > { %v3453_v53 = vadd.f32 %v4860_v25, %v6284_v59  ;;  %3511 = vadd.xlane.f32.xlu1 %v6333_v62 }
 0x854   : > { %v4862_v58 = vpop.f32.mrf.mxu1 }
 0x855   : > { %v4863_v54 = vadd.f32 %v4862_v58, %v4861_v18  ;;  %v6338_v11 = vadd.f32 %v3453_v53, %v6206_v32 }
 0x856   : > { %v4864_v61 = vpop.f32.mrf.mxu1 }
 0x857   : > { %v3456_v37 = vadd.f32 %v4863_v54, %v6284_v59  ;;  %3513 = vadd.xlane.f32.xlu0 %v6338_v11 }
 0x858   : > { %v4865_v4 = vpop.f32.mrf.mxu1 }
 0x859   : > { %v4866_v17 = vadd.f32 %v4865_v4, %v4864_v61  ;;  %v6343_v40 = vadd.f32 %v3456_v37, %v6203_v47 }
 0x85a   : > { %v4867_v38 = vpop.f32.mrf.mxu1 }
 0x85b   : > { %v3461_v35 = vadd.f32 %v4866_v17, %v6284_v59  ;;  %3515 = vadd.xlane.f32.xlu1 %v6343_v40 }
 0x85c   : > { %v4868_v10 = vpop.f32.mrf.mxu1 }
 0x85d   : > { %v4869_v15 = vadd.f32 %v4868_v10, %v4867_v38  ;;  %v6348_v32 = vadd.f32 %v3461_v35, %v6216_v21 }
 0x85e   : > { %v4870_v27 = vpop.f32.mrf.mxu1 }
 0x85f   : > { %v3464_v42 = vadd.f32 %v4869_v15, %v6284_v59  ;;  %3517 = vadd.xlane.f32.xlu0 %v6348_v32 }
 0x860   : > { %v4871_v16 = vpop.f32.mrf.mxu1 }
 0x861   : > { %v4872_v14 = vadd.f32 %v4871_v16, %v4870_v27  ;;  %v6353_v47 = vadd.f32 %v3464_v42, %v6219_v41 }
 0x862   : > { %v4873_v33 = vpop.f32.mrf.mxu1 }
 0x863   : > { %v3469_v31 = vadd.f32 %v4872_v14, %v6284_v59  ;;  %3519 = vadd.xlane.f32.xlu1 %v6353_v47 }
 0x864   : > { %v4874_v34 = vpop.f32.mrf.mxu1 }
 0x865   : > { %v4875_v48 = vadd.f32 %v4874_v34, %v4873_v33  ;;  %v6358_v21 = vadd.f32 %v3469_v31, %v6232_v3 }
 0x867   : > { %v3472_v55 = vadd.f32 %v4875_v48, %v6284_v59  ;;  %3521 = vadd.xlane.f32.xlu0 %v6358_v21 }
 0x869   : > { %v6363_v56 = vadd.f32 %v3472_v55, %v6229_v12 }
 0x86b   : > { %3523 = vadd.xlane.f32.xlu1 %v6363_v56 }
 0x8b8   : > { %v3494_v41 = vpop.xlane.xlu0 %3493 }
 0x8b9   : > { %v3525_v23 = vmul.f32 0.0078125, %v3494_v41 }
 0x8bb   : > { %v6367_v63 = vsub.f32 %v6288_v45, %v3525_v23 }
 0x8bc   : > { %v3496_v36 = vpop.xlane.xlu1 %3495 }
 0x8bd   : > { %v3526_v51 = vmul.f32 0.0078125, %v3496_v36  ;;  %v3557_v3 = vmul.f32 %v6367_v63, %v6367_v63 }
 0x8bf   : > { %v6372_v39 = vsub.f32 %v6293_v2, %v3526_v51  ;;  %3573 = vadd.xlane.f32.xlu0 %v3557_v3 }
 0x8c0   : > { %v3498_v59 = vpop.xlane.xlu0 %3497 }
 0x8c1   : > { %v3527_v50 = vmul.f32 0.0078125, %v3498_v59  ;;  %v3558_v12 = vmul.f32 %v6372_v39, %v6372_v39 }
 0x8c3   : > { %v6377_v52 = vsub.f32 %v6298_v30, %v3527_v50  ;;  %3575 = vadd.xlane.f32.xlu1 %v3558_v12 }
 0x8c4   : > { %v3500_v45 = vpop.xlane.xlu1 %3499 }
 0x8c5   : > { %v3528_v1 = vmul.f32 0.0078125, %v3500_v45  ;;  %v3559_v0 = vmul.f32 %v6377_v52, %v6377_v52 }
 0x8c7   : > { %v6382_v43 = vsub.f32 %v6303_v9, %v3528_v1  ;;  %3577 = vadd.xlane.f32.xlu0 %v3559_v0 }
 0x8c8   : > { %v3502_v2 = vpop.xlane.xlu0 %3501 }
 0x8c9   : > { %v3529_v8 = vmul.f32 0.0078125, %v3502_v2  ;;  %v3560_v44 = vmul.f32 %v6382_v43, %v6382_v43 }
 0x8cb   : > { %v6387_v7 = vsub.f32 %v6308_v49, %v3529_v8  ;;  %3579 = vadd.xlane.f32.xlu1 %v3560_v44 }
 0x8cc   : > { %v3504_v30 = vpop.xlane.xlu1 %3503 }
 0x8cd   : > { %v3530_v60 = vmul.f32 0.0078125, %v3504_v30  ;;  %v3561_v13 = vmul.f32 %v6387_v7, %v6387_v7 }
 0x8cf   : > { %v6392_v19 = vsub.f32 %v6313_v46, %v3530_v60  ;;  %3581 = vadd.xlane.f32.xlu0 %v3561_v13  ;;  %v6451_v60 = vld [vmem:[%s6607_s12] ss:$0 sm:$0xff] }
 0x8d0   : > { %v3506_v9 = vpop.xlane.xlu0 %3505 }
 0x8d1   : > { %v3531_v24 = vmul.f32 0.0078125, %v3506_v9  ;;  %v3562_v29 = vmul.f32 %v6392_v19, %v6392_v19 }
 0x8d3   : > { %v6397_v28 = vsub.f32 %v6318_v26, %v3531_v24  ;;  %3583 = vadd.xlane.f32.xlu1 %v3562_v29  ;;  %v6459_v24 = vld [vmem:[%s641_s30] ss:$0 sm:$0xff] }
 0x8d4   : > { %v3508_v49 = vpop.xlane.xlu1 %3507 }
 0x8d5   : > { %v3532_v57 = vmul.f32 0.0078125, %v3508_v49  ;;  %v3563_v6 = vmul.f32 %v6397_v28, %v6397_v28 }
 0x8d7   : > { %v6402_v22 = vsub.f32 %v6323_v5, %v3532_v57  ;;  %3585 = vadd.xlane.f32.xlu0 %v3563_v6 }
 0x8d8   : > { %v3510_v46 = vpop.xlane.xlu0 %3509 }
 0x8d9   : > { %v3533_v25 = vmul.f32 0.0078125, %v3510_v46  ;;  %v3564_v18 = vmul.f32 %v6402_v22, %v6402_v22 }
 0x8db   : > { %v6407_v53 = vsub.f32 %v6328_v20, %v3533_v25  ;;  %3587 = vadd.xlane.f32.xlu1 %v3564_v18 }
 0x8dc   : > { %v3512_v26 = vpop.xlane.xlu1 %3511 }
 0x8dd   : > { %v3534_v58 = vmul.f32 0.0078125, %v3512_v26  ;;  %v3565_v54 = vmul.f32 %v6407_v53, %v6407_v53 }
 0x8df   : > { %v6412_v61 = vsub.f32 %v6333_v62, %v3534_v58  ;;  %3589 = vadd.xlane.f32.xlu0 %v3565_v54 }
 0x8e0   : > { %v3514_v5 = vpop.xlane.xlu0 %3513 }
 0x8e1   : > { %v3535_v37 = vmul.f32 0.0078125, %v3514_v5  ;;  %v3566_v4 = vmul.f32 %v6412_v61, %v6412_v61 }
 0x8e3   : > { %v6417_v17 = vsub.f32 %v6338_v11, %v3535_v37  ;;  %3591 = vadd.xlane.f32.xlu1 %v3566_v4 }
 0x8e4   : > { %v3516_v20 = vpop.xlane.xlu1 %3515 }
 0x8e5   : > { %v3536_v38 = vmul.f32 0.0078125, %v3516_v20  ;;  %v3567_v35 = vmul.f32 %v6417_v17, %v6417_v17 }
 0x8e7   : > { %v6422_v10 = vsub.f32 %v6343_v40, %v3536_v38  ;;  %3593 = vadd.xlane.f32.xlu0 %v3567_v35 }
 0x8e8   : > { %v3518_v62 = vpop.xlane.xlu0 %3517 }
 0x8e9   : > { %v3537_v15 = vmul.f32 0.0078125, %v3518_v62  ;;  %v3568_v27 = vmul.f32 %v6422_v10, %v6422_v10 }
 0x8eb   : > { %v6427_v42 = vsub.f32 %v6348_v32, %v3537_v15  ;;  %3595 = vadd.xlane.f32.xlu1 %v3568_v27 }
 0x8ec   : > { %v3520_v11 = vpop.xlane.xlu1 %3519 }
 0x8ed   : > { %v3538_v16 = vmul.f32 0.0078125, %v3520_v11  ;;  %v3569_v14 = vmul.f32 %v6427_v42, %v6427_v42 }
 0x8ef   : > { %v6432_v33 = vsub.f32 %v6353_v47, %v3538_v16  ;;  %3597 = vadd.xlane.f32.xlu0 %v3569_v14 }
 0x8f0   : > { %v3522_v40 = vpop.xlane.xlu0 %3521 }
 0x8f1   : > { %v3539_v31 = vmul.f32 0.0078125, %v3522_v40  ;;  %v3570_v34 = vmul.f32 %v6432_v33, %v6432_v33 }
 0x8f3   : > { %v6437_v48 = vsub.f32 %v6358_v21, %v3539_v31  ;;  %3599 = vadd.xlane.f32.xlu1 %v3570_v34 }
 0x8f4   : > { %v3524_v32 = vpop.xlane.xlu1 %3523 }
 0x8f5   : > { %v3540_v55 = vmul.f32 0.0078125, %v3524_v32  ;;  %v3571_v41 = vmul.f32 %v6437_v48, %v6437_v48 }
 0x8f7   : > { %v6442_v23 = vsub.f32 %v6363_v56, %v3540_v55  ;;  %3601 = vadd.xlane.f32.xlu0 %v3571_v41 }
 0x8f9   : > { %v3572_v47 = vmul.f32 %v6442_v23, %v6442_v23 }
 0x8fb   : > { %3603 = vadd.xlane.f32.xlu1 %v3572_v47 }
 0x948   : > { %v3574_v36 = vpop.xlane.xlu0 %3573 }
 0x949   : > { %v3605_v51 = vmul.f32 0.0078125, %v3574_v36 }
 0x94b   : > { %v3621_v3 = vadd.f32 1e-05, %v3605_v51 }
 0x94c   : > { %v3576_v59 = vpop.xlane.xlu1 %3575 }
 0x94d   : > { %5279 = vrsqrt.f32 %v3621_v3  ;;  %v3606_v21 = vmul.f32 0.0078125, %v3576_v59 }
 0x94f   : > { %v3622_v50 = vadd.f32 1e-05, %v3606_v21 }
 0x950   : > { %v3578_v12 = vpop.xlane.xlu0 %3577 }
 0x951   : > { %5281 = vrsqrt.f32 %v3622_v50  ;;  %v3607_v45 = vmul.f32 0.0078125, %v3578_v12 }
 0x953   : > { %v3623_v1 = vadd.f32 1e-05, %v3607_v45 }
 0x954   : > { %v3580_v56 = vpop.xlane.xlu1 %3579 }
 0x955   : > { %5283 = vrsqrt.f32 %v3623_v1  ;;  %v3608_v0 = vmul.f32 0.0078125, %v3580_v56 }
 0x957   : > { %v3624_v2 = vadd.f32 1e-05, %v3608_v0 }
 0x958   : > { %v3582_v8 = vpop.xlane.xlu0 %3581 }
 0x959   : > { %5285 = vrsqrt.f32 %v3624_v2  ;;  %v3609_v44 = vmul.f32 0.0078125, %v3582_v8 }
 0x95a   : > { %v5280_v30 = vpop.eup %5279 }
 0x95b   : > { %v3653_v13 = vmul.f32 %v5280_v30, %v6367_v63  ;;  %v3625_v9 = vadd.f32 1e-05, %v3609_v44 }
 0x95c   : > { %v3584_v29 = vpop.xlane.xlu1 %3583 }
 0x95d   : > { %v3675_v49 = vmul.f32 %v6451_v60, %v3653_v13  ;;  %5287 = vrsqrt.f32 %v3625_v9  ;;  %v3610_v57 = vmul.f32 0.0078125, %v3584_v29 }
 0x95e   : > { %v5282_v6 = vpop.eup %5281 }
 0x95f   : > { %v3697_v46 = vadd.f32 %v6459_v24, %v3675_v49  ;;  %v3654_v25 = vmul.f32 %v5282_v6, %v6372_v39  ;;  %v3626_v18 = vadd.f32 1e-05, %v3610_v57 }
 0x960   : > { %v3586_v63 = vpop.xlane.xlu0 %3585 }
 0x961   : > { %3713 = vst [vmem:[%s5538_s3] sm:$0xff] %v3697_v46  ;;  %v3676_v26 = vmul.f32 %v6451_v60, %v3654_v25  ;;  %5289 = vrsqrt.f32 %v3626_v18  ;;  %v3611_v58 = vmul.f32 0.0078125, %v3586_v63 }
 0x962   : > { %v5284_v54 = vpop.eup %5283 }
 0x963   : > { %v3698_v5 = vadd.f32 %v6459_v24, %v3676_v26  ;;  %v3655_v37 = vmul.f32 %v5284_v54, %v6377_v52  ;;  %v3627_v4 = vadd.f32 1e-05, %v3611_v58 }
 0x964   : > { %v3588_v20 = vpop.xlane.xlu1 %3587 }
 0x965   : > { %3714 = vst [vmem:[%s5538_s3 + $0x8] sm:$0xff] %v3698_v5  ;;  %v3677_v38 = vmul.f32 %v6451_v60, %v3655_v37  ;;  %5291 = vrsqrt.f32 %v3627_v4  ;;  %v3612_v39 = vmul.f32 0.0078125, %v3588_v20 }
 0x966   : > { %v5286_v35 = vpop.eup %5285 }
 0x967   : > { %v3699_v62 = vadd.f32 %v6459_v24, %v3677_v38  ;;  %v3656_v15 = vmul.f32 %v5286_v35, %v6382_v43  ;;  %v3628_v27 = vadd.f32 1e-05, %v3612_v39 }
 0x968   : > { %v3590_v11 = vpop.xlane.xlu0 %3589 }
 0x969   : > { %3715 = vst [vmem:[%s5538_s3 + $0x10] sm:$0xff] %v3699_v62  ;;  %v3678_v16 = vmul.f32 %v6451_v60, %v3656_v15  ;;  %5293 = vrsqrt.f32 %v3628_v27  ;;  %v3613_v52 = vmul.f32 0.0078125, %v3590_v11 }
 0x96a   : > { %v5288_v14 = vpop.eup %5287 }
 0x96b   : > { %v3700_v40 = vadd.f32 %v6459_v24, %v3678_v16  ;;  %v3657_v31 = vmul.f32 %v5288_v14, %v6387_v7  ;;  %v3629_v34 = vadd.f32 1e-05, %v3613_v52 }
 0x96c   : > { %v3592_v32 = vpop.xlane.xlu1 %3591 }
 0x96d   : > { %3716 = vst [vmem:[%s5538_s3 + $0x18] sm:$0xff] %v3700_v40  ;;  %v3679_v55 = vmul.f32 %v6451_v60, %v3657_v31  ;;  %5295 = vrsqrt.f32 %v3629_v34  ;;  %v3614_v43 = vmul.f32 0.0078125, %v3592_v32 }
 0x96e   : > { %v5290_v41 = vpop.eup %5289 }
 0x96f   : > { %v3701_v47 = vadd.f32 %v6459_v24, %v3679_v55  ;;  %v3658_v36 = vmul.f32 %v5290_v41, %v6392_v19  ;;  %v3630_v51 = vadd.f32 1e-05, %v3614_v43 }
 0x970   : > { %v3594_v3 = vpop.xlane.xlu0 %3593 }
 0x971   : > { %3717 = vst [vmem:[%s5538_s3 + $0x20] sm:$0xff] %v3701_v47  ;;  %v3680_v59 = vmul.f32 %v6451_v60, %v3658_v36  ;;  %5297 = vrsqrt.f32 %v3630_v51  ;;  %v3615_v7 = vmul.f32 0.0078125, %v3594_v3 }
 0x972   : > { %v5292_v21 = vpop.eup %5291 }
 0x973   : > { %v3702_v50 = vadd.f32 %v6459_v24, %v3680_v59  ;;  %v3659_v12 = vmul.f32 %v5292_v21, %v6397_v28  ;;  %v3631_v45 = vadd.f32 1e-05, %v3615_v7 }
 0x974   : > { %v3596_v1 = vpop.xlane.xlu1 %3595 }
 0x975   : > { %3718 = vst [vmem:[%s5538_s3 + $0x28] sm:$0xff] %v3702_v50  ;;  %v3681_v56 = vmul.f32 %v6451_v60, %v3659_v12  ;;  %5299 = vrsqrt.f32 %v3631_v45  ;;  %v3616_v19 = vmul.f32 0.0078125, %v3596_v1 }
 0x976   : > { %v5294_v0 = vpop.eup %5293 }
 0x977   : > { %v3703_v2 = vadd.f32 %v6459_v24, %v3681_v56  ;;  %v3660_v8 = vmul.f32 %v5294_v0, %v6402_v22  ;;  %v3632_v44 = vadd.f32 1e-05, %v3616_v19 }
 0x978   : > { %v3598_v30 = vpop.xlane.xlu0 %3597 }
 0x979   : > { %3719 = vst [vmem:[%s5538_s3 + $0x30] sm:$0xff] %v3703_v2  ;;  %v3682_v13 = vmul.f32 %v6451_v60, %v3660_v8  ;;  %5301 = vrsqrt.f32 %v3632_v44  ;;  %v3617_v28 = vmul.f32 0.0078125, %v3598_v30 }
 0x97a   : > { %v5296_v9 = vpop.eup %5295 }
 0x97b   : > { %v3704_v29 = vadd.f32 %v6459_v24, %v3682_v13  ;;  %v3661_v49 = vmul.f32 %v5296_v9, %v6407_v53  ;;  %v3633_v57 = vadd.f32 1e-05, %v3617_v28 }
 0x97c   : > { %v3600_v6 = vpop.xlane.xlu1 %3599 }
 0x97d   : > { %3720 = vst [vmem:[%s5538_s3 + $0x38] sm:$0xff] %v3704_v29  ;;  %v3683_v46 = vmul.f32 %v6451_v60, %v3661_v49  ;;  %5303 = vrsqrt.f32 %v3633_v57  ;;  %v3618_v22 = vmul.f32 0.0078125, %v3600_v6 }
 0x97e   : > { %v5298_v25 = vpop.eup %5297 }
 0x97f   : > { %v3705_v18 = vadd.f32 %v6459_v24, %v3683_v46  ;;  %v3662_v63 = vmul.f32 %v5298_v25, %v6412_v61  ;;  %v3634_v26 = vadd.f32 1e-05, %v3618_v22 }
 0x980   : > { %v3602_v58 = vpop.xlane.xlu0 %3601 }
 0x981   : > { %3721 = vst [vmem:[%s5538_s3 + $0x40] sm:$0xff] %v3705_v18  ;;  %v3684_v54 = vmul.f32 %v6451_v60, %v3662_v63  ;;  %5305 = vrsqrt.f32 %v3634_v26  ;;  %v3619_v53 = vmul.f32 0.0078125, %v3602_v58 }
 0x982   : > { %v5300_v5 = vpop.eup %5299 }
 0x983   : > { %v3706_v37 = vadd.f32 %v6459_v24, %v3684_v54  ;;  %v3663_v4 = vmul.f32 %v5300_v5, %v6417_v17  ;;  %v3635_v20 = vadd.f32 1e-05, %v3619_v53 }
 0x984   : > { %v3604_v38 = vpop.xlane.xlu1 %3603 }
 0x985   : > { %3722 = vst [vmem:[%s5538_s3 + $0x48] sm:$0xff] %v3706_v37  ;;  %v3685_v39 = vmul.f32 %v6451_v60, %v3663_v4  ;;  %5307 = vrsqrt.f32 %v3635_v20  ;;  %v3620_v61 = vmul.f32 0.0078125, %v3604_v38 }
 0x986   : > { %v5302_v35 = vpop.eup %5301 }
 0x987   : > { %v3707_v62 = vadd.f32 %v6459_v24, %v3685_v39  ;;  %v3664_v15 = vmul.f32 %v5302_v35, %v6422_v10  ;;  %v3636_v27 = vadd.f32 1e-05, %v3620_v61 }
 0x989   : > { %3723 = vst [vmem:[%s5538_s3 + $0x50] sm:$0xff] %v3707_v62  ;;  %v3686_v11 = vmul.f32 %v6451_v60, %v3664_v15  ;;  %5309 = vrsqrt.f32 %v3636_v27 }
 0x98a   : > { %v5304_v17 = vpop.eup %5303 }
 0x98b   : > { %v3708_v16 = vadd.f32 %v6459_v24, %v3686_v11  ;;  %v3665_v52 = vmul.f32 %v5304_v17, %v6427_v42 }
 0x98d   : > { %3724 = vst [vmem:[%s5538_s3 + $0x58] sm:$0xff] %v3708_v16  ;;  %v3687_v14 = vmul.f32 %v6451_v60, %v3665_v52 }
 0x98e   : > { %v5306_v40 = vpop.eup %5305 }
 0x98f   : > { %v3709_v31 = vadd.f32 %v6459_v24, %v3687_v14  ;;  %v3666_v10 = vmul.f32 %v5306_v40, %v6432_v33 }
 0x991   : > { %3725 = vst [vmem:[%s5538_s3 + $0x60] sm:$0xff] %v3709_v31  ;;  %v3688_v34 = vmul.f32 %v6451_v60, %v3666_v10 }
 0x992   : > { %v5308_v32 = vpop.eup %5307 }
 0x993   : > { %v3710_v55 = vadd.f32 %v6459_v24, %v3688_v34  ;;  %v3667_v43 = vmul.f32 %v5308_v32, %v6437_v48 }
 0x995   : > { %3726 = vst [vmem:[%s5538_s3 + $0x68] sm:$0xff] %v3710_v55  ;;  %v3689_v42 = vmul.f32 %v6451_v60, %v3667_v43 }
 0x996   : > { %v5310_v41 = vpop.eup %5309 }
 0x997   : > { %v3711_v47 = vadd.f32 %v6459_v24, %v3689_v42  ;;  %v3668_v36 = vmul.f32 %v5310_v41, %v6442_v23 }
 0x999   : > { %3727 = vst [vmem:[%s5538_s3 + $0x70] sm:$0xff] %v3711_v47  ;;  %v3690_v51 = vmul.f32 %v6451_v60, %v3668_v36 }
 0x99b   : > { %v3712_v33 = vadd.f32 %v6459_v24, %v3690_v51 }
 0x99d   : > { %3728 = vst [vmem:[%s5538_s3 + $0x78] sm:$0xff] %v3712_v33 }
 0x99e PF: > { %s6609_s23 = sld [smem:[#allocation9_spill]] }
 0x99f   : > { %s6610_s21 = sld [smem:[#allocation6_spill]] }
 0x9a0   : > { %s6611_s22 = sld [smem:[#allocation7_spill]] }
 0x9a1   : > { %s6613_s24 = sld [smem:[#allocation10_spill]] }
 0x9a2   : > { %s6614_s25 = sld [smem:[#allocation11_spill]] }
 0x9a3   : > { %s6615_s26 = sld [smem:[#allocation12_spill]] }
 0x9a4   : > { %s23_s27 = sadd.s32 1, %s6609_s23   ;;  %s6612_s23 = sld [smem:[#allocation8_spill]] }
 0x9a5   : > { %p20_p10 = scmp.ge.s32.totalorder %s23_s27, 10  }
 0x9a7   :  { %22 = sbr.rel (!%p20_p10) target bundleno = 12 (0xc), region = 142 }

// kernel: encoder_forward.3
= control target key start
LH: loop header
LB: loop body
LE: loop exit
PB: predicated region body
PF: predicated region fallthrough
CT: control target
= control target key end

     0   :  { %s5800_s29 = smov 0   ;;  %s5802_s30 = smov 0   ;;  %s7109_s0 = inlined_call_operand.vmem [shape: f32[2,2,256,128], index: 0, kind: input, shape index: {}]   ;;  %s7110_s1 = inlined_call_operand.vmem [shape: bf16[2,128,384], index: 1, kind: input, shape index: {}]   ;;  %s7111_s2 = inlined_call_operand.vmem [shape: bf16[2,128,128], index: 2, kind: input, shape index: {}]   ;;  %s7112_s3 = inlined_call_operand.vmem [shape: bf16[2,128,256], index: 3, kind: input, shape index: {}]   ;;  %s7113_s4 = inlined_call_operand.vmem [shape: f32[2,1,256], index: 4, kind: input, shape index: {}]   ;;  %s7114_s5 = inlined_call_operand.vmem [shape: bf16[2,256,128], index: 5, kind: input, shape index: {}]   ;;  %s7115_s6 = inlined_call_operand.vmem [shape: f32[2,1,128], index: 6, kind: input, shape index: {}]   ;;  %s7116_s7 = inlined_call_operand.vmem [shape: f32[2,1,128], index: 7, kind: input, shape index: {}]   ;;  %s7117_s8 = inlined_call_operand.vmem [shape: f32[2,1,128], index: 8, kind: input, shape index: {}]   ;;  %s7118_s9 = inlined_call_operand.vmem [shape: f32[2,1,128], index: 9, kind: input, shape index: {}]   ;;  %s7119_s10 = inlined_call_operand.vmem [shape: f32[2,1,128], index: 10, kind: input, shape index: {}]   ;;  %s7120_s11 = inlined_call_operand.vmem [shape: f32[2,1,128], index: 11, kind: input, shape index: {}]   ;;  %s7121_s12 = inlined_call_operand.vmem [shape: f32[2,1,128], index: 12, kind: input, shape index: {}]   ;;  %s7122_s13 = inlined_call_operand.vmem [shape: f32[2,2,256,128], index: 13, kind: output, shape index: {0}]   ;;  %s7123_s14 = inlined_call_operand.vmem [shape: f32[2,2,256,256], index: 14, kind: output, shape index: {1}]  }
   0x1   :  { %7132 = sst [smem:[#allocation16_spill]] %s7109_s0  ;;  %s5804_s15 = smov 0  }
   0x2   :  { %7133 = sst [smem:[#allocation17_spill]] %s7110_s1  ;;  %s5806_s16 = smov 0  }
   0x3   :  { %7134 = sst [smem:[#allocation18_spill]] %s7111_s2  ;;  %s5808_s17 = smov 0  }
   0x4   :  { %7135 = sst [smem:[#allocation19_spill]] %s7112_s3  ;;  %s5810_s18 = smov 0  }
   0x5   :  { %7136 = sst [smem:[#allocation20_spill]] %s7113_s4  ;;  %s5812_s19 = smov 0  }
   0x6   :  { %7137 = sst [smem:[#allocation21_spill]] %s7114_s5 }
   0x7   :  { %7138 = sst [smem:[#allocation22_spill]] %s7115_s6 }
   0x8   :  { %7139 = sst [smem:[#allocation23_spill]] %s7118_s9 }
   0x9   :  { %7140 = sst [smem:[#allocation24_spill]] %s7119_s10 }
   0xa   :  { %7141 = sst [smem:[#allocation25_spill]] %s7120_s11 }
   0xb   :  { %7142 = sst [smem:[#allocation26_spill]] %s7121_s12 }
   0xc   :  { %7143 = sst [smem:[#allocation27_spill]] %s7122_s13 }
   0xd   :  { %7144 = sst [smem:[#allocation28_spill]] %s7123_s14 }
   0xe LB: > { %7145 = sst [smem:[#allocation5_spill]] %s5697_s29  ;;  %s37_s20 = sadd.s32 1, %s5709_s16  ;;  %s5721_s19 = sphi %s5812_s19, %s25_s19   ;;  %s5717_s18 = sphi %s5810_s18, %s7190_s18   ;;  %s5713_s17 = sphi %s5808_s17, %s7189_s17   ;;  %s5709_s16 = sphi %s5806_s16, %s7188_s16   ;;  %s5705_s15 = sphi %s5804_s15, %s7187_s15   ;;  %s5701_s30 = sphi %s5802_s30, %s7186_s30   ;;  %s5697_s29 = sphi %s5800_s29, %s7185_s29  }
   0xf   : > { %7146 = sst [smem:[#allocation6_spill]] %s5709_s16  ;;  %p38_p0 = scmp.ge.s32.totalorder %s37_s20, 2 }
  0x10   : > { %7147 = sst [smem:[#allocation7_spill]] %s5713_s17  ;;  %s40_s21 = sadd.s32 1, %s5713_s17 }
  0x11   : > { %7148 = sst [smem:[#allocation8_spill]] %s5717_s18  ;;  %p4383_p1 = scmp.ge.s32.totalorder %s5721_s19, 1 }
  0x12   : > { %7149 = sst [smem:[#allocation9_spill]] %s5721_s19  ;;  %p553_p2 = scmp.lt.s32.totalorder %s5721_s19, 9 }
  0x13   : > { %s7192_s20 = smov (%p38_p0, %s37_s20), 0  ;;  %s7194_s21 = smov (!%p38_p0, %s40_s21), %s5713_s17 }
  0x14   : > { %7150 = sst [smem:[#allocation10_spill]] %s7192_s20  ;;  %p554_p3 = pnand %p4383_p1, %p553_p2 }
  0x15   : > { %p42_p4 = scmp.ge.s32.totalorder %s7194_s21, 2  ;;  %s44_s22 = sadd.s32 1, %s5717_s18 }
  0x17   : > { %s7196_s21 = smov (%p42_p4, %s7194_s21), 0  ;;  %s7198_s22 = smov (!%p42_p4, %s44_s22), %s5717_s18 }
  0x18   : > { %7151 = sst [smem:[#allocation11_spill]] %s7196_s21  ;;  %p46_p5 = scmp.ge.s32.totalorder %s7198_s22, 2 }
  0x19   : > { %557 = sbr.rel (%p554_p3) target bundleno = 2772 (0xad4), region = 72 }
  0x1a   : > { %s7200_s22 = smov (%p46_p5, %s7198_s22), 0 }
  0x1b   : > { %7152 = sst [smem:[#allocation12_spill]] %s7200_s22 }
  0x1e   : > { %p670_p6 = scmp.lt.s32.totalorder %s5705_s15, 1  ;;  %p672_p7 = scmp.lt.s32.totalorder %s5701_s30, 1 }
  0x1f   : > { %s4395_s23 = sshll.u32 %s5697_s29, 4  ;;  %s7153_s2 = sld [smem:[#allocation18_spill]] }
  0x20   : > { %s7202_s15 = smov (!%p670_p6, %s5705_s15), 1  ;;  %s7204_s30 = smov (!%p672_p7, %s5701_s30), 1 }
  0x21   : > { %s4385_s24 = sshll.u32 %s7202_s15, 6  ;;  %s5296_s25 = smul.u32 192, %s7202_s15 }
  0x22   : > { %s4384_s26 = sshll.u32 %s7204_s30, 5  ;;  %s7155_s1 = sld [smem:[#allocation17_spill]] }
  0x23   : > { %s676_s21 = sadd.s32 %s4385_s24, %s4384_s26  ;;  %s4617_s19 = sshll.u32 %s7202_s15, 7 }
  0x24   : > { %s4386_s16 = sshll.u32 %s676_s21, 3  ;;  %s7156_s0 = sld [smem:[#allocation16_spill]] }
  0x25   : > { %s5852_s22 = scalar_lea.vmem %s7153_s2, %s4385_s24  ;;  %s7157_s3 = sld [smem:[#allocation19_spill]] }
  0x26   : > { %7154 = sst [smem:[#allocation13_spill]] %s5852_s22  ;;  %s4392_s28 = sshll.u32 %s7202_s15, 1 }
  0x27   : > { %s7158_s5 = sld [smem:[#allocation21_spill]]  ;;  %p729_p8 = scmp.lt.s32.totalorder %s4395_s23, 31 }
  0x28   : > { %s5857_s17 = scalar_lea.vmem %s7155_s1, %s5296_s25  ;;  %s7160_s4 = sld [smem:[#allocation20_spill]] }
  0x29   : > { %s4401_s11 = sshll.u32 %s7204_s30, 6  ;;  %s7206_s23 = smov (!%p729_p8, %s4395_s23), 31 }
  0x2a   : > { %s5863_s13 = scalar_lea.vmem %s7156_s0, %s4386_s16  ;;  %s7166_s0 = sld [smem:[#allocation26_spill]] }
  0x2b   : > { %s5868_s27 = scalar_lea.vmem %s7157_s3, %s4617_s19  ;;  %s732_s1 = sadd.s32 %s4384_s26, %s7206_s23 }
  0x2c   : > { %s4400_s12 = sshll.u32 %s7206_s23, 1  ;;  %s734_s3 = sadd.s32 %s4385_s24, %s732_s1 }
  0x2d   : > { %s5874_s10 = scalar_lea.vmem %s7158_s5, %s4617_s19  ;;  %s747_s2 = sadd.s32 %s4401_s11, %s4400_s12 }
  0x2e   : > { %7159 = sst [smem:[#allocation14_spill]] %s5874_s10  ;;  %s5879_s21 = scalar_lea.vmem %s7160_s4, %s4392_s28 }
  0x2f   : > { %7161 = sst [smem:[#allocation15_spill]] %s5879_s21  ;;  %s4398_s22 = sshll.u32 %s734_s3, 3 }
  0x30   : > { %s7164_s28 = sld [smem:[#allocation24_spill]]  ;;  %s723_s16 = scalar_lea.vmem %s7166_s0, %s7202_s15 }
  0x31   : > { %s749_s5 = sadd.s32 %s4617_s19, %s747_s2  ;;  %s7167_s18 = sld [smem:[#allocation27_spill]] }
  0x32   : > { %s4403_s4 = sshll.u32 %s749_s5, 3  ;;  %s7168_s14 = sld [smem:[#allocation28_spill]] }
  0x33   : > { %s7169_s29 = sld [smem:[#allocation5_spill]] }
  0x36   : > { %s717_s20 = scalar_lea.vmem %s7164_s28, %s7202_s15 }
  0x37   : > { %s5912_s28 = scalar_lea.vmem %s7167_s18, %s4398_s22 }
  0x38   : > { %s5917_s6 = scalar_lea.vmem %s7168_s14, %s4403_s4 }
  0x39   : > { %p4404_p9 = scmp.ne.s32.totalorder %s7169_s29, 0 }
  0x3b   : > { %757 = sbr.rel (%p4404_p9) target bundleno = 388 (0x184), region = 76 }
  0x40   : > { %v5355_v0 = vld [vmem:[%s5857_s17 + $0xac] ss:$12 sps:$4 sm:$0xff]   ;;  %v5357_v1 = vld [vmem:[%s5857_s17 + $0xa8] ss:$12 sps:$4 sm:$0xff]   ;;  %v5723_v2 = vmov 0   ;;  %v758_v17 = vld [vmem:[%s5863_s13] sm:$0xff] }
  0x41   : > { %998 = vmatprep.mubr.bf16.mxu0 %v5723_v2  ;;  %1118 = vmatprep.mubr.bf16.mxu1 %v5723_v2  ;;  %v5358_v3 = vld [vmem:[%s5857_s17 + $0x94] ss:$12 sps:$4 sm:$0xff]   ;;  %v5360_v4 = vld [vmem:[%s5857_s17 + $0x90] ss:$12 sps:$4 sm:$0xff]   ;;  %v5363_v6 = vld [vmem:[%s5857_s17 + $0x78] ss:$12 sps:$4 sm:$0xff]  }
  0x42   : > { %966 = vmatprep.subr.bf16.mxu0 %v5355_v0  ;;  %5280 = vmatprep.subr.bf16.mxu1 %v5355_v0  ;;  %v5361_v5 = vld [vmem:[%s5857_s17 + $0x7c] ss:$12 sps:$4 sm:$0xff]   ;;  %v5364_v7 = vld [vmem:[%s5857_s17 + $0x64] ss:$12 sps:$4 sm:$0xff]   ;;  %v5366_v8 = vld [vmem:[%s5857_s17 + $0x60] ss:$12 sps:$4 sm:$0xff]  }
  0x43   : > { %967 = vmatpush1.bf16.msra.mxu0 %v5357_v1  ;;  %5288 = vmatpush1.bf16.msra.mxu1 %v5357_v1  ;;  %v5367_v9 = vld [vmem:[%s5857_s17 + $0x4c] ss:$12 sps:$4 sm:$0xff]   ;;  %v5369_v10 = vld [vmem:[%s5857_s17 + $0x48] ss:$12 sps:$4 sm:$0xff]   ;;  %v5372_v12 = vld [vmem:[%s5857_s17 + $0x30] ss:$12 sps:$4 sm:$0xff]  }
  0x44   : > { %968 = vmatprep.subr.bf16.mxu0 %v5358_v3  ;;  %5281 = vmatprep.subr.bf16.mxu1 %v5358_v3  ;;  %v5370_v11 = vld [vmem:[%s5857_s17 + $0x34] ss:$12 sps:$4 sm:$0xff]   ;;  %v5373_v13 = vld [vmem:[%s5857_s17 + $0x1c] ss:$12 sps:$4 sm:$0xff]   ;;  %v5375_v14 = vld [vmem:[%s5857_s17 + $0x18] ss:$12 sps:$4 sm:$0xff]  }
  0x45   : > { %v5376_v15 = vld [vmem:[%s5857_s17 + $0x4] ss:$12 sps:$4 sm:$0xff]   ;;  %v5378_v16 = vld [vmem:[%s5857_s17] ss:$12 sps:$4 sm:$0xff]   ;;  %v761_v26 = vld [vmem:[%s5863_s13 + $0x18] sm:$0xff] }
  0x46   : > { %v759_v18 = vld [vmem:[%s5863_s13 + $0x8] sm:$0xff]  ;;  %v782_v19 = vld [vmem:[%s5863_s13 + $0xc0] sm:$0xff]  ;;  %v5379_v21 = vld [vmem:[%s5857_s17 + $0xb0] ss:$12 sps:$4 sm:$0xff]  }
  0x47   : > { %969 = vmatpush1.bf16.msra.mxu0 %v5360_v4  ;;  %5289 = vmatpush1.bf16.msra.mxu1 %v5360_v4  ;;  %v783_v20 = vld [vmem:[%s5863_s13 + $0xc8] sm:$0xff]  ;;  %v790_v22 = vpack.c.bf16 %v759_v18, %v758_v17  ;;  %v5380_v24 = vld [vmem:[%s5857_s17 + $0x98] ss:$12 sps:$4 sm:$0xff]   ;;  %v760_v25 = vld [vmem:[%s5863_s13 + $0x10] sm:$0xff] }
  0x48   : > { %970 = vmatprep.subr.bf16.mxu0 %v5361_v5  ;;  %5282 = vmatprep.subr.bf16.mxu1 %v5361_v5  ;;  %v5943_v23 = vpack.c.bf16 %v783_v20, %v782_v19  ;;  %v784_v27 = vld [vmem:[%s5863_s13 + $0xd0] sm:$0xff]  ;;  %v785_v28 = vld [vmem:[%s5863_s13 + $0xd8] sm:$0xff]  ;;  %v5381_v29 = vld [vmem:[%s5857_s17 + $0x80] ss:$12 sps:$4 sm:$0xff]   ;;  %v791_v30 = vpack.c.bf16 %v761_v26, %v760_v25 }
  0x49   : > { %v5954_v31 = vpack.c.bf16 %v785_v28, %v784_v27  ;;  %v5382_v32 = vld [vmem:[%s5857_s17 + $0x68] ss:$12 sps:$4 sm:$0xff]   ;;  %v762_v33 = vld [vmem:[%s5863_s13 + $0x20] sm:$0xff]  ;;  %v5383_v37 = vld [vmem:[%s5857_s17 + $0x50] ss:$12 sps:$4 sm:$0xff]  }
  0x4a   : > { %v763_v34 = vld [vmem:[%s5863_s13 + $0x28] sm:$0xff]  ;;  %v786_v35 = vld [vmem:[%s5863_s13 + $0xe0] sm:$0xff]  ;;  %v764_v41 = vld [vmem:[%s5863_s13 + $0x30] sm:$0xff] }
  0x4b   : > { %971 = vmatpush1.bf16.msra.mxu0 %v5363_v6  ;;  %5290 = vmatpush1.bf16.msra.mxu1 %v5363_v6  ;;  %v787_v36 = vld [vmem:[%s5863_s13 + $0xe8] sm:$0xff]  ;;  %v792_v38 = vpack.c.bf16 %v763_v34, %v762_v33  ;;  %v5384_v40 = vld [vmem:[%s5857_s17 + $0x38] ss:$12 sps:$4 sm:$0xff]   ;;  %v788_v43 = vld [vmem:[%s5863_s13 + $0xf0] sm:$0xff] }
  0x4c   : > { %972 = vmatprep.subr.bf16.mxu0 %v5364_v7  ;;  %5283 = vmatprep.subr.bf16.mxu1 %v5364_v7  ;;  %v5965_v39 = vpack.c.bf16 %v787_v36, %v786_v35  ;;  %v765_v42 = vld [vmem:[%s5863_s13 + $0x38] sm:$0xff]  ;;  %v5385_v45 = vld [vmem:[%s5857_s17 + $0x20] ss:$12 sps:$4 sm:$0xff]   ;;  %v5386_v48 = vld [vmem:[%s5857_s17 + $0x8] ss:$12 sps:$4 sm:$0xff]  }
  0x4d   : > { %v789_v44 = vld [vmem:[%s5863_s13 + $0xf8] sm:$0xff]  ;;  %v793_v46 = vpack.c.bf16 %v765_v42, %v764_v41  ;;  %v766_v49 = vld [vmem:[%s5863_s13 + $0x40] sm:$0xff]  ;;  %v767_v50 = vld [vmem:[%s5863_s13 + $0x48] sm:$0xff] }
  0x4e   : > { %v5976_v47 = vpack.c.bf16 %v789_v44, %v788_v43  ;;  %v794_v51 = vpack.c.bf16 %v767_v50, %v766_v49  ;;  %v768_v52 = vld [vmem:[%s5863_s13 + $0x50] sm:$0xff]  ;;  %v769_v53 = vld [vmem:[%s5863_s13 + $0x58] sm:$0xff]  ;;  %v770_v55 = vld [vmem:[%s5863_s13 + $0x60] sm:$0xff] }
  0x4f   : > { %973 = vmatpush1.bf16.msra.mxu0 %v5366_v8  ;;  %5291 = vmatpush1.bf16.msra.mxu1 %v5366_v8  ;;  %v795_v54 = vpack.c.bf16 %v769_v53, %v768_v52  ;;  %v771_v56 = vld [vmem:[%s5863_s13 + $0x68] sm:$0xff]  ;;  %v772_v58 = vld [vmem:[%s5863_s13 + $0x70] sm:$0xff]  ;;  %v773_v59 = vld [vmem:[%s5863_s13 + $0x78] sm:$0xff] }
  0x50   : > { %974 = vmatprep.subr.bf16.mxu0 %v5367_v9  ;;  %5284 = vmatprep.subr.bf16.mxu1 %v5367_v9  ;;  %v796_v57 = vpack.c.bf16 %v771_v56, %v770_v55  ;;  %v774_v60 = vld [vmem:[%s5863_s13 + $0x80] sm:$0xff]  ;;  %v775_v61 = vld [vmem:[%s5863_s13 + $0x88] sm:$0xff]  ;;  %v797_v62 = vpack.c.bf16 %v773_v59, %v772_v58  ;;  %v776_v0 = vld [vmem:[%s5863_s13 + $0x90] sm:$0xff] }
  0x51   : > { %v798_v63 = vpack.c.bf16 %v775_v61, %v774_v60  ;;  %v777_v1 = vld [vmem:[%s5863_s13 + $0x98] sm:$0xff]  ;;  %v778_v3 = vld [vmem:[%s5863_s13 + $0xa0] sm:$0xff]  ;;  %v779_v4 = vld [vmem:[%s5863_s13 + $0xa8] sm:$0xff] }
  0x52   : > { %v799_v5 = vpack.c.bf16 %v777_v1, %v776_v0  ;;  %v800_v6 = vpack.c.bf16 %v779_v4, %v778_v3  ;;  %v780_v7 = vld [vmem:[%s5863_s13 + $0xb0] sm:$0xff]  ;;  %v781_v8 = vld [vmem:[%s5863_s13 + $0xb8] sm:$0xff] }
  0x53   : > { %975 = vmatpush1.bf16.msra.mxu0 %v5369_v10  ;;  %5292 = vmatpush1.bf16.msra.mxu1 %v5369_v10  ;;  %v801_v9 = vpack.c.bf16 %v781_v8, %v780_v7 }
  0x54   : > { %976 = vmatprep.subr.bf16.mxu0 %v5370_v11  ;;  %5285 = vmatprep.subr.bf16.mxu1 %v5370_v11 }
  0x57   : > { %977 = vmatpush1.bf16.msra.mxu0 %v5372_v12  ;;  %5293 = vmatpush1.bf16.msra.mxu1 %v5372_v12 }
  0x58   : > { %978 = vmatprep.subr.bf16.mxu0 %v5373_v13  ;;  %5286 = vmatprep.subr.bf16.mxu1 %v5373_v13 }
  0x5b   : > { %979 = vmatpush1.bf16.msra.mxu0 %v5375_v14  ;;  %5294 = vmatpush1.bf16.msra.mxu1 %v5375_v14 }
  0x5c   : > { %980 = vmatprep.subr.bf16.mxu0 %v5376_v15  ;;  %5287 = vmatprep.subr.bf16.mxu1 %v5376_v15 }
  0x5f   : > { %981 = vmatpush1.bf16.msra.mxu0 %v5378_v16  ;;  %5295 = vmatpush1.bf16.msra.mxu1 %v5378_v16 }
  0x60   : > { %5200 = vmatprep.subr.bf16.mxu1 %v5379_v21 }
  0x62   : > { %999 = vmatmul.mubr.bf16.vlgmr.msra.gmra.mxu0 %v790_v22  ;;  %1119 = vmatmul.mubr.bf16.vlgmr.msra.gmra.mxu1 %v5943_v23 }
  0x63   : > { %5201 = vmatpush3.bf16.msra.mxu1 %v5379_v21  ;;  %1008 = vmatprep.mubr.bf16.mxu0 %v5723_v2 }
  0x64   : > { %5202 = vmatprep.subr.bf16.mxu1 %v5380_v24  ;;  %1128 = vmatprep.mubr.bf16.mxu1 %v5723_v2 }
  0x67   : > { %5203 = vmatpush3.bf16.msra.mxu1 %v5380_v24 }
  0x68   : > { %5204 = vmatprep.subr.bf16.mxu1 %v5381_v29 }
  0x6a   : > { %1009 = vmatmul.mubr.bf16.gmra.mxu0 %v791_v30  ;;  %1129 = vmatmul.mubr.bf16.gmra.mxu1 %v5954_v31 }
  0x6b   : > { %5205 = vmatpush3.bf16.msra.mxu1 %v5381_v29  ;;  %1018 = vmatprep.mubr.bf16.mxu0 %v5723_v2 }
  0x6c   : > { %5206 = vmatprep.subr.bf16.mxu1 %v5382_v32  ;;  %1138 = vmatprep.mubr.bf16.mxu1 %v5723_v2 }
  0x6f   : > { %5207 = vmatpush3.bf16.msra.mxu1 %v5382_v32 }
  0x70   : > { %5208 = vmatprep.subr.bf16.mxu1 %v5383_v37 }
  0x72   : > { %1019 = vmatmul.mubr.bf16.gmra.mxu0 %v792_v38  ;;  %1139 = vmatmul.mubr.bf16.gmra.mxu1 %v5965_v39 }
  0x73   : > { %5209 = vmatpush3.bf16.msra.mxu1 %v5383_v37  ;;  %1028 = vmatprep.mubr.bf16.mxu0 %v5723_v2 }
  0x74   : > { %5210 = vmatprep.subr.bf16.mxu1 %v5384_v40  ;;  %1148 = vmatprep.mubr.bf16.mxu1 %v5723_v2 }
  0x77   : > { %5211 = vmatpush3.bf16.msra.mxu1 %v5384_v40 }
  0x78   : > { %5212 = vmatprep.subr.bf16.mxu1 %v5385_v45 }
  0x7a   : > { %1029 = vmatmul.mubr.bf16.gmra.mxu0 %v793_v46  ;;  %1149 = vmatmul.mubr.bf16.gmra.mxu1 %v5976_v47 }
  0x7b   : > { %5213 = vmatpush3.bf16.msra.mxu1 %v5385_v45  ;;  %1038 = vmatprep.mubr.bf16.mxu0 %v5723_v2 }
  0x7c   : > { %5214 = vmatprep.subr.bf16.mxu1 %v5386_v48  ;;  %5216 = vmatprep.mubr.bf16.mxu1 %v790_v22 }
  0x7f   : > { %5215 = vmatpush3.bf16.msra.mxu1 %v5386_v48 }
  0x82   : > { %1039 = vmatmul.mubr.bf16.gmra.mxu0 %v794_v51  ;;  %5217 = vmatmul.mubr.bf16.vlgmr.msra.gmra.mxu1 %v791_v30 }
  0x83   : > { %1048 = vmatprep.mubr.bf16.mxu0 %v5723_v2  ;;  %5220 = vmatprep.mubr.bf16.mxu1 %v792_v38 }
  0x8a   : > { %1049 = vmatmul.mubr.bf16.gmra.mxu0 %v795_v54  ;;  %5221 = vmatmul.mubr.bf16.gmra.mxu1 %v793_v46 }
  0x8b   : > { %1058 = vmatprep.mubr.bf16.mxu0 %v5723_v2  ;;  %5224 = vmatprep.mubr.bf16.mxu1 %v794_v51 }
  0x92   : > { %1059 = vmatmul.mubr.bf16.gmra.mxu0 %v796_v57  ;;  %5225 = vmatmul.mubr.bf16.gmra.mxu1 %v795_v54 }
  0x93   : > { %1068 = vmatprep.mubr.bf16.mxu0 %v5723_v2  ;;  %5228 = vmatprep.mubr.bf16.mxu1 %v796_v57 }
  0x9a   : > { %1069 = vmatmul.mubr.bf16.gmra.mxu0 %v797_v62  ;;  %5229 = vmatmul.mubr.bf16.gmra.mxu1 %v797_v62 }
  0x9b   : > { %1078 = vmatprep.mubr.bf16.mxu0 %v5723_v2  ;;  %5232 = vmatprep.mubr.bf16.mxu1 %v798_v63 }
  0xa2   : > { %1079 = vmatmul.mubr.bf16.gmra.mxu0 %v798_v63  ;;  %5233 = vmatmul.mubr.bf16.gmra.mxu1 %v799_v5 }
  0xa3   : > { %1088 = vmatprep.mubr.bf16.mxu0 %v5723_v2  ;;  %5236 = vmatprep.mubr.bf16.mxu1 %v800_v6 }
  0xaa   : > { %1089 = vmatmul.mubr.bf16.gmra.mxu0 %v799_v5  ;;  %5237 = vmatmul.mubr.bf16.gmra.mxu1 %v801_v9 }
  0xab   : > { %1098 = vmatprep.mubr.bf16.mxu0 %v5723_v2  ;;  %5240 = vmatprep.mubr.bf16.mxu1 %v5943_v23 }
  0xb2   : > { %1099 = vmatmul.mubr.bf16.gmra.mxu0 %v800_v6  ;;  %5241 = vmatmul.mubr.bf16.gmra.mxu1 %v5954_v31 }
  0xb3   : > { %1108 = vmatprep.mubr.bf16.mxu0 %v5723_v2  ;;  %5244 = vmatprep.mubr.bf16.mxu1 %v5965_v39 }
  0xba   : > { %1109 = vmatmul.mubr.bf16.gmra.mxu0 %v801_v9  ;;  %5245 = vmatmul.mubr.bf16.gmra.mxu1 %v5976_v47 }
 0x122   : > { %v1000_v10 = vpop.f32.mrf.mxu0  ;;  %v1120_v11 = vpop.f32.mrf.mxu1 }
 0x124   : > { %v1002_v12 = vpop.f32.mrf.mxu0  ;;  %v1122_v13 = vpop.f32.mrf.mxu1 }
 0x126   : > { %v1004_v14 = vpop.f32.mrf.mxu0  ;;  %v1124_v15 = vpop.f32.mrf.mxu1 }
 0x127   : > { %v4718_v16 = vpack.c.bf16 %v1004_v14, %v1000_v10  ;;  %v4778_v17 = vpack.c.bf16 %v1124_v15, %v1120_v11 }
 0x128   : > { %v1006_v18 = vpop.f32.mrf.mxu0  ;;  %v1126_v19 = vpop.f32.mrf.mxu1 }
 0x129   : > { %4719 = vst [vmem:[#allocation2] sm:$0xff] %v4718_v16   ;;  %4966 = vst [vmem:[#allocation2 + $0x60] sm:$0xff] %v4778_v17   ;;  %v4798_v20 = vpack.c.bf16 %v1006_v18, %v1002_v12  ;;  %v4858_v21 = vpack.c.bf16 %v1126_v19, %v1122_v13 }
 0x12a   : > { %v1010_v2 = vpop.f32.mrf.mxu0  ;;  %v1130_v22 = vpop.f32.mrf.mxu1 }
 0x12b   : > { %4799 = vst [vmem:[#allocation3] sm:$0xff] %v4798_v20   ;;  %4981 = vst [vmem:[#allocation3 + $0x60] sm:$0xff] %v4858_v21  }
 0x12c   : > { %v1012_v23 = vpop.f32.mrf.mxu0  ;;  %v1132_v24 = vpop.f32.mrf.mxu1 }
 0x12e   : > { %v1014_v25 = vpop.f32.mrf.mxu0  ;;  %v1134_v26 = vpop.f32.mrf.mxu1 }
 0x12f   : > { %v4723_v27 = vpack.c.bf16 %v1014_v25, %v1010_v2  ;;  %v4783_v28 = vpack.c.bf16 %v1134_v26, %v1130_v22 }
 0x130   : > { %v1016_v29 = vpop.f32.mrf.mxu0  ;;  %v1136_v30 = vpop.f32.mrf.mxu1 }
 0x131   : > { %4955 = vst [vmem:[#allocation2 + $0x8] sm:$0xff] %v4723_v27   ;;  %4967 = vst [vmem:[#allocation2 + $0x68] sm:$0xff] %v4783_v28   ;;  %v4803_v31 = vpack.c.bf16 %v1016_v29, %v1012_v23  ;;  %v4863_v32 = vpack.c.bf16 %v1136_v30, %v1132_v24 }
 0x132   : > { %v1020_v33 = vpop.f32.mrf.mxu0  ;;  %v1140_v34 = vpop.f32.mrf.mxu1 }
 0x133   : > { %4970 = vst [vmem:[#allocation3 + $0x8] sm:$0xff] %v4803_v31   ;;  %4982 = vst [vmem:[#allocation3 + $0x68] sm:$0xff] %v4863_v32  }
 0x134   : > { %v1022_v35 = vpop.f32.mrf.mxu0  ;;  %v1142_v36 = vpop.f32.mrf.mxu1 }
 0x136   : > { %v1024_v37 = vpop.f32.mrf.mxu0  ;;  %v1144_v38 = vpop.f32.mrf.mxu1 }
 0x137   : > { %v4728_v39 = vpack.c.bf16 %v1024_v37, %v1020_v33  ;;  %v4788_v40 = vpack.c.bf16 %v1144_v38, %v1140_v34 }
 0x138   : > { %v1026_v41 = vpop.f32.mrf.mxu0  ;;  %v1146_v42 = vpop.f32.mrf.mxu1 }
 0x139   : > { %4956 = vst [vmem:[#allocation2 + $0x10] sm:$0xff] %v4728_v39   ;;  %4968 = vst [vmem:[#allocation2 + $0x70] sm:$0xff] %v4788_v40   ;;  %v4808_v43 = vpack.c.bf16 %v1026_v41, %v1022_v35  ;;  %v4868_v44 = vpack.c.bf16 %v1146_v42, %v1142_v36 }
 0x13a   : > { %v1030_v45 = vpop.f32.mrf.mxu0  ;;  %v1150_v46 = vpop.f32.mrf.mxu1 }
 0x13b   : > { %4971 = vst [vmem:[#allocation3 + $0x10] sm:$0xff] %v4808_v43   ;;  %4983 = vst [vmem:[#allocation3 + $0x70] sm:$0xff] %v4868_v44  }
 0x13c   : > { %v1032_v47 = vpop.f32.mrf.mxu0  ;;  %v1152_v48 = vpop.f32.mrf.mxu1 }
 0x13e   : > { %v1034_v49 = vpop.f32.mrf.mxu0  ;;  %v1154_v50 = vpop.f32.mrf.mxu1 }
 0x13f   : > { %v4733_v51 = vpack.c.bf16 %v1034_v49, %v1030_v45  ;;  %v4793_v52 = vpack.c.bf16 %v1154_v50, %v1150_v46 }
 0x140   : > { %v1036_v53 = vpop.f32.mrf.mxu0  ;;  %v1156_v54 = vpop.f32.mrf.mxu1 }
 0x141   : > { %4957 = vst [vmem:[#allocation2 + $0x18] sm:$0xff] %v4733_v51   ;;  %4969 = vst [vmem:[#allocation2 + $0x78] sm:$0xff] %v4793_v52   ;;  %v4813_v55 = vpack.c.bf16 %v1036_v53, %v1032_v47  ;;  %v4873_v56 = vpack.c.bf16 %v1156_v54, %v1152_v48 }
 0x142   : > { %v1040_v57 = vpop.f32.mrf.mxu0  ;;  %v5218_v58 = vpop.f32.mrf.mxu1 }
 0x143   : > { %4972 = vst [vmem:[#allocation3 + $0x18] sm:$0xff] %v4813_v55   ;;  %4984 = vst [vmem:[#allocation3 + $0x78] sm:$0xff] %v4873_v56  }
 0x144   : > { %v1042_v59 = vpop.f32.mrf.mxu0  ;;  %v1193_v60 = vpop.f32.mrf.mxu1 }
 0x146   : > { %v1044_v61 = vpop.f32.mrf.mxu0  ;;  %v5219_v62 = vpop.f32.mrf.mxu1 }
 0x147   : > { %v4738_v63 = vpack.c.bf16 %v1044_v61, %v1040_v57  ;;  %v4883_v0 = vpack.c.bf16 %v5219_v62, %v5218_v58 }
 0x148   : > { %v1046_v1 = vpop.f32.mrf.mxu0  ;;  %v1196_v3 = vpop.f32.mrf.mxu1 }
 0x149   : > { %4958 = vst [vmem:[#allocation2 + $0x20] sm:$0xff] %v4738_v63   ;;  %4985 = vst [vmem:[#allocation4 + $0x8] sm:$0xff] %v4883_v0   ;;  %v4818_v4 = vpack.c.bf16 %v1046_v1, %v1042_v59  ;;  %v4878_v5 = vpack.c.bf16 %v1196_v3, %v1193_v60 }
 0x14a   : > { %v1050_v6 = vpop.f32.mrf.mxu0  ;;  %v5222_v7 = vpop.f32.mrf.mxu1 }
 0x14b   : > { %4973 = vst [vmem:[#allocation3 + $0x20] sm:$0xff] %v4818_v4   ;;  %4879 = vst [vmem:[#allocation4] sm:$0xff] %v4878_v5  }
 0x14c   : > { %v1052_v8 = vpop.f32.mrf.mxu0  ;;  %v1209_v9 = vpop.f32.mrf.mxu1 }
 0x14e   : > { %v1054_v10 = vpop.f32.mrf.mxu0  ;;  %v5223_v11 = vpop.f32.mrf.mxu1 }
 0x14f   : > { %v4743_v12 = vpack.c.bf16 %v1054_v10, %v1050_v6  ;;  %v4893_v13 = vpack.c.bf16 %v5223_v11, %v5222_v7 }
 0x150   : > { %v1056_v14 = vpop.f32.mrf.mxu0  ;;  %v1212_v15 = vpop.f32.mrf.mxu1 }
 0x151   : > { %4959 = vst [vmem:[#allocation2 + $0x28] sm:$0xff] %v4743_v12   ;;  %4987 = vst [vmem:[#allocation4 + $0x18] sm:$0xff] %v4893_v13   ;;  %v4823_v16 = vpack.c.bf16 %v1056_v14, %v1052_v8  ;;  %v4888_v17 = vpack.c.bf16 %v1212_v15, %v1209_v9 }
 0x152   : > { %v1060_v18 = vpop.f32.mrf.mxu0  ;;  %v5226_v19 = vpop.f32.mrf.mxu1 }
 0x153   : > { %4974 = vst [vmem:[#allocation3 + $0x28] sm:$0xff] %v4823_v16   ;;  %4986 = vst [vmem:[#allocation4 + $0x10] sm:$0xff] %v4888_v17  }
 0x154   : > { %v1062_v20 = vpop.f32.mrf.mxu0  ;;  %v1225_v21 = vpop.f32.mrf.mxu1 }
 0x156   : > { %v1064_v2 = vpop.f32.mrf.mxu0  ;;  %v5227_v22 = vpop.f32.mrf.mxu1 }
 0x157   : > { %v4748_v23 = vpack.c.bf16 %v1064_v2, %v1060_v18  ;;  %v4903_v24 = vpack.c.bf16 %v5227_v22, %v5226_v19 }
 0x158   : > { %v1066_v25 = vpop.f32.mrf.mxu0  ;;  %v1228_v26 = vpop.f32.mrf.mxu1 }
 0x159   : > { %4960 = vst [vmem:[#allocation2 + $0x30] sm:$0xff] %v4748_v23   ;;  %4989 = vst [vmem:[#allocation4 + $0x28] sm:$0xff] %v4903_v24   ;;  %v4828_v27 = vpack.c.bf16 %v1066_v25, %v1062_v20  ;;  %v4898_v28 = vpack.c.bf16 %v1228_v26, %v1225_v21 }
 0x15a   : > { %v1070_v29 = vpop.f32.mrf.mxu0  ;;  %v5230_v30 = vpop.f32.mrf.mxu1 }
 0x15b   : > { %4975 = vst [vmem:[#allocation3 + $0x30] sm:$0xff] %v4828_v27   ;;  %4988 = vst [vmem:[#allocation4 + $0x20] sm:$0xff] %v4898_v28  }
 0x15c   : > { %v1072_v31 = vpop.f32.mrf.mxu0  ;;  %v1241_v32 = vpop.f32.mrf.mxu1 }
 0x15e   : > { %v1074_v33 = vpop.f32.mrf.mxu0  ;;  %v5231_v34 = vpop.f32.mrf.mxu1 }
 0x15f   : > { %v4753_v35 = vpack.c.bf16 %v1074_v33, %v1070_v29  ;;  %v4913_v36 = vpack.c.bf16 %v5231_v34, %v5230_v30 }
 0x160   : > { %v1076_v37 = vpop.f32.mrf.mxu0  ;;  %v1244_v38 = vpop.f32.mrf.mxu1 }
 0x161   : > { %4961 = vst [vmem:[#allocation2 + $0x38] sm:$0xff] %v4753_v35   ;;  %4991 = vst [vmem:[#allocation4 + $0x38] sm:$0xff] %v4913_v36   ;;  %v4833_v39 = vpack.c.bf16 %v1076_v37, %v1072_v31  ;;  %v4908_v40 = vpack.c.bf16 %v1244_v38, %v1241_v32 }
 0x162   : > { %v1080_v41 = vpop.f32.mrf.mxu0  ;;  %v5234_v42 = vpop.f32.mrf.mxu1 }
 0x163   : > { %4976 = vst [vmem:[#allocation3 + $0x38] sm:$0xff] %v4833_v39   ;;  %4990 = vst [vmem:[#allocation4 + $0x30] sm:$0xff] %v4908_v40  }
 0x164   : > { %v1082_v43 = vpop.f32.mrf.mxu0  ;;  %v1257_v44 = vpop.f32.mrf.mxu1 }
 0x166   : > { %v1084_v45 = vpop.f32.mrf.mxu0  ;;  %v5235_v46 = vpop.f32.mrf.mxu1 }
 0x167   : > { %v4758_v47 = vpack.c.bf16 %v1084_v45, %v1080_v41  ;;  %v4923_v48 = vpack.c.bf16 %v5235_v46, %v5234_v42 }
 0x168   : > { %v1086_v49 = vpop.f32.mrf.mxu0  ;;  %v1260_v50 = vpop.f32.mrf.mxu1 }
 0x169   : > { %4962 = vst [vmem:[#allocation2 + $0x40] sm:$0xff] %v4758_v47   ;;  %4993 = vst [vmem:[#allocation4 + $0x48] sm:$0xff] %v4923_v48   ;;  %v4838_v51 = vpack.c.bf16 %v1086_v49, %v1082_v43  ;;  %v4918_v52 = vpack.c.bf16 %v1260_v50, %v1257_v44 }
 0x16a   : > { %v1090_v53 = vpop.f32.mrf.mxu0  ;;  %v5238_v54 = vpop.f32.mrf.mxu1 }
 0x16b   : > { %4977 = vst [vmem:[#allocation3 + $0x40] sm:$0xff] %v4838_v51   ;;  %4992 = vst [vmem:[#allocation4 + $0x40] sm:$0xff] %v4918_v52  }
 0x16c   : > { %v1092_v55 = vpop.f32.mrf.mxu0  ;;  %v1273_v56 = vpop.f32.mrf.mxu1 }
 0x16e   : > { %v1094_v57 = vpop.f32.mrf.mxu0  ;;  %v5239_v58 = vpop.f32.mrf.mxu1 }
 0x16f   : > { %v4763_v59 = vpack.c.bf16 %v1094_v57, %v1090_v53  ;;  %v4933_v60 = vpack.c.bf16 %v5239_v58, %v5238_v54 }
 0x170   : > { %v1096_v61 = vpop.f32.mrf.mxu0  ;;  %v1276_v62 = vpop.f32.mrf.mxu1 }
 0x171   : > { %4963 = vst [vmem:[#allocation2 + $0x48] sm:$0xff] %v4763_v59   ;;  %4995 = vst [vmem:[#allocation4 + $0x58] sm:$0xff] %v4933_v60   ;;  %v4843_v63 = vpack.c.bf16 %v1096_v61, %v1092_v55  ;;  %v4928_v0 = vpack.c.bf16 %v1276_v62, %v1273_v56 }
 0x172   : > { %v1100_v1 = vpop.f32.mrf.mxu0  ;;  %v5242_v3 = vpop.f32.mrf.mxu1 }
 0x173   : > { %4978 = vst [vmem:[#allocation3 + $0x48] sm:$0xff] %v4843_v63   ;;  %4994 = vst [vmem:[#allocation4 + $0x50] sm:$0xff] %v4928_v0  }
 0x174   : > { %v1102_v4 = vpop.f32.mrf.mxu0  ;;  %v1289_v5 = vpop.f32.mrf.mxu1 }
 0x176   : > { %v1104_v6 = vpop.f32.mrf.mxu0  ;;  %v5243_v7 = vpop.f32.mrf.mxu1 }
 0x177   : > { %v4768_v8 = vpack.c.bf16 %v1104_v6, %v1100_v1  ;;  %v4943_v9 = vpack.c.bf16 %v5243_v7, %v5242_v3 }
 0x178   : > { %v1106_v10 = vpop.f32.mrf.mxu0  ;;  %v1292_v11 = vpop.f32.mrf.mxu1 }
 0x179   : > { %4964 = vst [vmem:[#allocation2 + $0x50] sm:$0xff] %v4768_v8   ;;  %4997 = vst [vmem:[#allocation4 + $0x68] sm:$0xff] %v4943_v9   ;;  %v4848_v12 = vpack.c.bf16 %v1106_v10, %v1102_v4  ;;  %v4938_v13 = vpack.c.bf16 %v1292_v11, %v1289_v5 }
 0x17a   : > { %v1110_v14 = vpop.f32.mrf.mxu0  ;;  %v5246_v15 = vpop.f32.mrf.mxu1 }
 0x17b   : > { %4979 = vst [vmem:[#allocation3 + $0x50] sm:$0xff] %v4848_v12   ;;  %4996 = vst [vmem:[#allocation4 + $0x60] sm:$0xff] %v4938_v13  }
 0x17c   : > { %v1112_v16 = vpop.f32.mrf.mxu0  ;;  %v1305_v17 = vpop.f32.mrf.mxu1 }
 0x17e   : > { %v1114_v18 = vpop.f32.mrf.mxu0  ;;  %v5247_v19 = vpop.f32.mrf.mxu1 }
 0x17f   : > { %v4773_v20 = vpack.c.bf16 %v1114_v18, %v1110_v14  ;;  %v4953_v21 = vpack.c.bf16 %v5247_v19, %v5246_v15 }
 0x180   : > { %v1116_v2 = vpop.f32.mrf.mxu0  ;;  %v1308_v22 = vpop.f32.mrf.mxu1 }
 0x181   : > { %4965 = vst [vmem:[#allocation2 + $0x58] sm:$0xff] %v4773_v20   ;;  %4999 = vst [vmem:[#allocation4 + $0x78] sm:$0xff] %v4953_v21   ;;  %v4853_v23 = vpack.c.bf16 %v1116_v2, %v1112_v16  ;;  %v4948_v24 = vpack.c.bf16 %v1308_v22, %v1305_v17 }
 0x183   : > { %4980 = vst [vmem:[#allocation3 + $0x58] sm:$0xff] %v4853_v23   ;;  %4998 = vst [vmem:[#allocation4 + $0x70] sm:$0xff] %v4948_v24  }
 0x184 PF: > { %v5387_v25 = vld [vmem:[#allocation3 + $0x78] sm:$0xff]   ;;  %s7170_s3 = sld [smem:[#allocation5_spill]]  ;;  %v5389_v27 = vld [vmem:[#allocation3 + $0x70] sm:$0xff]   ;;  %v5391_v29 = vld [vmem:[#allocation3 + $0x68] sm:$0xff]   ;;  %s7174_s0 = scalar_lea.vmem %s7117_s8, %s7202_s15 }
 0x185   : > { %v5388_v26 = vld [vmem:[#allocation3 + $0x38] sm:$0xff]   ;;  %5024 = vmatprep.subr.bf16.mxu0 %v5387_v25  ;;  %v5390_v28 = vld [vmem:[#allocation3 + $0x30] sm:$0xff]   ;;  %v5392_v30 = vld [vmem:[#allocation3 + $0x28] sm:$0xff]   ;;  %s7171_s19 = sld [smem:[#allocation13_spill]] }
 0x186   : > { %5025 = vmatpush3.bf16.xpose.msra.mxu0 %v5388_v26  ;;  %v5393_v31 = vld [vmem:[#allocation3 + $0x60] sm:$0xff]   ;;  %v5396_v35 = vld [vmem:[#allocation3 + $0x18] sm:$0xff]   ;;  %v5397_v36 = vld [vmem:[#allocation3 + $0x50] sm:$0xff]   ;;  %s7175_s1 = sld [smem:[#allocation15_spill]] }
 0x187   : > { %5026 = vmatprep.subr.bf16.mxu0 %v5389_v27  ;;  %v5394_v33 = vld [vmem:[#allocation3 + $0x20] sm:$0xff]   ;;  %v5398_v37 = vld [vmem:[#allocation3 + $0x10] sm:$0xff]   ;;  %v5399_v38 = vld [vmem:[#allocation3 + $0x48] sm:$0xff]   ;;  %s7176_s22 = sld [smem:[#allocation22_spill]] }
 0x188   : > { %v5400_v39 = vld [vmem:[#allocation3 + $0x8] sm:$0xff]   ;;  %v5401_v40 = vld [vmem:[#allocation3 + $0x40] sm:$0xff]   ;;  %s7178_s21 = sld [smem:[#allocation23_spill]] }
 0x189   : > { %v5402_v41 = vld [vmem:[#allocation3] sm:$0xff]  }
 0x18a   : > { %s4525_s5 = sshll.u32 %s7170_s3, 7  ;;  %v5395_v34 = vld [vmem:[#allocation3 + $0x58] sm:$0xff]  }
 0x18b   : > { %s1818_s9 = sshra.s32 %s4525_s5, 3  ;;  %s6320_s23 = scalar_lea.vmem %s5863_s13, %s4525_s5 }
 0x18c   : > { %s4526_s30 = sshll.u32 %s1818_s9, 2  ;;  %s7172_s13 = sld [smem:[#allocation14_spill]] }
 0x18d   : > { %s6011_s17 = scalar_lea.vmem [#allocation2], %s4526_s30  ;;  %s7177_s10 = scalar_lea.vmem %s7176_s22, %s7202_s15 }
 0x18e   : > { %5027 = vmatpush3.bf16.xpose.msra.mxu0 %v5390_v28  ;;  %v5403_v32 = vld [vmem:[%s6011_s17] sm:$0xff]   ;;  %v5404_v42 = vld [vmem:[%s6011_s17 + $0x8] sm:$0xff]   ;;  %v5405_v43 = vld [vmem:[%s6011_s17 + $0x10] sm:$0xff]   ;;  %s7179_s25 = scalar_lea.vmem %s7178_s21, %s7202_s15  ;;  %s7181_s9 = sld [smem:[#allocation25_spill]] }
 0x18f   : > { %5028 = vmatprep.subr.bf16.mxu0 %v5391_v29  ;;  %5040 = vmatprep.mubr.bf16.mxu0 %v5403_v32  ;;  %v5406_v44 = vld [vmem:[%s6011_s17 + $0x18] sm:$0xff]   ;;  %v5407_v45 = vld [vmem:[%s6011_s17 + $0x20] sm:$0xff]   ;;  %v5408_v46 = vld [vmem:[%s6011_s17 + $0x28] sm:$0xff]  }
 0x190   : > { %v5409_v47 = vld [vmem:[%s6011_s17 + $0x30] sm:$0xff]   ;;  %v5410_v48 = vld [vmem:[%s6011_s17 + $0x38] sm:$0xff]  }
 0x194   : > { %s7182_s30 = scalar_lea.vmem %s7181_s9, %s7202_s15 }
 0x196   : > { %5029 = vmatpush3.bf16.xpose.msra.mxu0 %v5392_v30 }
 0x197   : > { %5030 = vmatprep.subr.bf16.mxu0 %v5393_v31 }
 0x19e   : > { %5031 = vmatpush3.bf16.xpose.msra.mxu0 %v5394_v33 }
 0x19f   : > { %5032 = vmatprep.subr.bf16.mxu0 %v5395_v34 }
 0x1a6   : > { %5033 = vmatpush3.bf16.xpose.msra.mxu0 %v5396_v35 }
 0x1a7   : > { %5034 = vmatprep.subr.bf16.mxu0 %v5397_v36 }
 0x1ae   : > { %5035 = vmatpush3.bf16.xpose.msra.mxu0 %v5398_v37 }
 0x1af   : > { %5036 = vmatprep.subr.bf16.mxu0 %v5399_v38 }
 0x1b6   : > { %5037 = vmatpush3.bf16.xpose.msra.mxu0 %v5400_v39 }
 0x1b7   : > { %5038 = vmatprep.subr.bf16.mxu0 %v5401_v40 }
 0x1be   : > { %5039 = vmatpush3.bf16.xpose.msra.mxu0 %v5402_v41 }
 0x1c5   : > { %5041 = vmatmul.mubr.bf16.vlgmr.msra.gmra.mxu0 %v5403_v32 }
 0x1c6   : > { %5042 = vmatprep.mubr.bf16.mxu0 %v5404_v42 }
 0x1cd   : > { %5043 = vmatmul.mubr.bf16.gmra.mxu0 %v5404_v42 }
 0x1ce   : > { %5044 = vmatprep.mubr.bf16.mxu0 %v5405_v43 }
 0x1d5   : > { %5045 = vmatmul.mubr.bf16.gmra.mxu0 %v5405_v43 }
 0x1d6   : > { %5046 = vmatprep.mubr.bf16.mxu0 %v5406_v44 }
 0x1dd   : > { %5047 = vmatmul.mubr.bf16.gmra.mxu0 %v5406_v44 }
 0x1de   : > { %5048 = vmatprep.mubr.bf16.mxu0 %v5407_v45 }
 0x1e5   : > { %5049 = vmatmul.mubr.bf16.gmra.mxu0 %v5407_v45 }
 0x1e6   : > { %5050 = vmatprep.mubr.bf16.mxu0 %v5408_v46 }
 0x1ed   : > { %5051 = vmatmul.mubr.bf16.gmra.mxu0 %v5408_v46 }
 0x1ee   : > { %5052 = vmatprep.mubr.bf16.mxu0 %v5409_v47 }
 0x1f5   : > { %5053 = vmatmul.mubr.bf16.gmra.mxu0 %v5409_v47 }
 0x1f6   : > { %5054 = vmatprep.mubr.bf16.mxu0 %v5410_v48 }
 0x1fd   : > { %5055 = vmatmul.mubr.bf16.gmra.mxu0 %v5410_v48 }
 0x285   : > { %v2048_v49 = vpop.f32.mrf.mxu0 }
 0x286   : > { %v6021_v51 = vmul.f32 0.088388346, %v2048_v49 }
 0x287   : > { %v2050_v50 = vpop.f32.mrf.mxu0 }
 0x288   : > { %v6023_v52 = vmul.f32 0.088388346, %v2050_v50 }
 0x289   : > { %v2052_v53 = vpop.f32.mrf.mxu0 }
 0x28a   : > { %v2159_v54 = vmax.f32 %v6021_v51, %v6023_v52  ;;  %v6027_v56 = vmul.f32 0.088388346, %v2052_v53 }
 0x28b   : > { %v2054_v55 = vpop.f32.mrf.mxu0 }
 0x28c   : > { %v6029_v57 = vmul.f32 0.088388346, %v2054_v55  ;;  %2160 = vmax.xlane.f32.xlu0 %v2159_v54 }
 0x28d   : > { %v2058_v58 = vpop.f32.mrf.mxu0 }
 0x28e   : > { %v2162_v59 = vmax.f32 %v6027_v56, %v6029_v57  ;;  %v6033_v61 = vmul.f32 0.088388346, %v2058_v58 }
 0x28f   : > { %v2060_v60 = vpop.f32.mrf.mxu0 }
 0x290   : > { %v6035_v62 = vmul.f32 0.088388346, %v2060_v60  ;;  %2163 = vmax.xlane.f32.xlu0 %v2162_v59 }
 0x291   : > { %v2062_v63 = vpop.f32.mrf.mxu0 }
 0x292   : > { %v2165_v0 = vmax.f32 %v6033_v61, %v6035_v62  ;;  %v6039_v3 = vmul.f32 0.088388346, %v2062_v63 }
 0x293   : > { %v2064_v1 = vpop.f32.mrf.mxu0 }
 0x294   : > { %v6041_v4 = vmul.f32 0.088388346, %v2064_v1  ;;  %2166 = vmax.xlane.f32.xlu1 %v2165_v0 }
 0x295   : > { %v2068_v5 = vpop.f32.mrf.mxu0 }
 0x296   : > { %v2168_v6 = vmax.f32 %v6039_v3, %v6041_v4  ;;  %v6045_v8 = vmul.f32 0.088388346, %v2068_v5 }
 0x297   : > { %v2070_v7 = vpop.f32.mrf.mxu0 }
 0x298   : > { %v6047_v9 = vmul.f32 0.088388346, %v2070_v7  ;;  %2169 = vmax.xlane.f32.xlu1 %v2168_v6 }
 0x299   : > { %v2072_v10 = vpop.f32.mrf.mxu0 }
 0x29a   : > { %v2171_v11 = vmax.f32 %v6045_v8, %v6047_v9  ;;  %v6051_v13 = vmul.f32 0.088388346, %v2072_v10 }
 0x29b   : > { %v2074_v12 = vpop.f32.mrf.mxu0 }
 0x29c   : > { %v6053_v14 = vmul.f32 0.088388346, %v2074_v12  ;;  %2172 = vmax.xlane.f32.xlu0 %v2171_v11  ;;  %v5411_v12 = vld [vmem:[#allocation4 + $0x78] sm:$0xff]  }
 0x29d   : > { %v2078_v15 = vpop.f32.mrf.mxu0  ;;  %5056 = vmatprep.subr.bf16.mxu1 %v5411_v12 }
 0x29e   : > { %v2174_v16 = vmax.f32 %v6051_v13, %v6053_v14  ;;  %v6057_v18 = vmul.f32 0.088388346, %v2078_v15  ;;  %v5412_v15 = vld [vmem:[#allocation4 + $0x38] sm:$0xff]  }
 0x29f   : > { %v2080_v17 = vpop.f32.mrf.mxu0  ;;  %5057 = vmatpush3.bf16.msra.mxu1 %v5412_v15 }
 0x2a0   : > { %v6059_v19 = vmul.f32 0.088388346, %v2080_v17  ;;  %2175 = vmax.xlane.f32.xlu1 %v2174_v16  ;;  %v5413_v16 = vld [vmem:[#allocation4 + $0x70] sm:$0xff]  }
 0x2a1   : > { %v2082_v20 = vpop.f32.mrf.mxu0  ;;  %v5414_v17 = vld [vmem:[#allocation4 + $0x30] sm:$0xff]   ;;  %5058 = vmatprep.subr.bf16.mxu1 %v5413_v16 }
 0x2a2   : > { %v2177_v21 = vmax.f32 %v6057_v18, %v6059_v19  ;;  %v6063_v22 = vmul.f32 0.088388346, %v2082_v20  ;;  %v5415_v20 = vld [vmem:[#allocation4 + $0x68] sm:$0xff]  }
 0x2a3   : > { %v2084_v2 = vpop.f32.mrf.mxu0  ;;  %5059 = vmatpush3.bf16.msra.mxu1 %v5414_v17 }
 0x2a4   : > { %v6065_v23 = vmul.f32 0.088388346, %v2084_v2  ;;  %2178 = vmax.xlane.f32.xlu0 %v2177_v21  ;;  %5060 = vmatprep.subr.bf16.mxu1 %v5415_v20 }
 0x2a5   : > { %v2088_v24 = vpop.f32.mrf.mxu0 }
 0x2a6   : > { %v2180_v25 = vmax.f32 %v6063_v22, %v6065_v23  ;;  %v6069_v27 = vmul.f32 0.088388346, %v2088_v24 }
 0x2a7   : > { %v2090_v26 = vpop.f32.mrf.mxu0 }
 0x2a8   : > { %v6071_v28 = vmul.f32 0.088388346, %v2090_v26  ;;  %2181 = vmax.xlane.f32.xlu1 %v2180_v25 }
 0x2a9   : > { %v2092_v29 = vpop.f32.mrf.mxu0 }
 0x2aa   : > { %v2183_v30 = vmax.f32 %v6069_v27, %v6071_v28  ;;  %v6075_v32 = vmul.f32 0.088388346, %v2092_v29 }
 0x2ab   : > { %v2094_v31 = vpop.f32.mrf.mxu0 }
 0x2ac   : > { %v6077_v33 = vmul.f32 0.088388346, %v2094_v31  ;;  %2184 = vmax.xlane.f32.xlu0 %v2183_v30 }
 0x2ad   : > { %v2098_v34 = vpop.f32.mrf.mxu0 }
 0x2ae   : > { %v2186_v35 = vmax.f32 %v6075_v32, %v6077_v33  ;;  %v6081_v37 = vmul.f32 0.088388346, %v2098_v34 }
 0x2af   : > { %v2100_v36 = vpop.f32.mrf.mxu0 }
 0x2b0   : > { %v6083_v38 = vmul.f32 0.088388346, %v2100_v36  ;;  %2187 = vmax.xlane.f32.xlu1 %v2186_v35 }
 0x2b1   : > { %v2102_v39 = vpop.f32.mrf.mxu0 }
 0x2b2   : > { %v2189_v40 = vmax.f32 %v6081_v37, %v6083_v38  ;;  %v6087_v42 = vmul.f32 0.088388346, %v2102_v39 }
 0x2b3   : > { %v2104_v41 = vpop.f32.mrf.mxu0 }
 0x2b4   : > { %v6089_v43 = vmul.f32 0.088388346, %v2104_v41  ;;  %2190 = vmax.xlane.f32.xlu0 %v2189_v40 }
 0x2b5   : > { %v2108_v44 = vpop.f32.mrf.mxu0 }
 0x2b6   : > { %v2192_v45 = vmax.f32 %v6087_v42, %v6089_v43  ;;  %v6093_v47 = vmul.f32 0.088388346, %v2108_v44 }
 0x2b7   : > { %v2110_v46 = vpop.f32.mrf.mxu0 }
 0x2b8   : > { %v6095_v48 = vmul.f32 0.088388346, %v2110_v46  ;;  %2193 = vmax.xlane.f32.xlu1 %v2192_v45 }
 0x2b9   : > { %v2112_v49 = vpop.f32.mrf.mxu0 }
 0x2ba   : > { %v2195_v50 = vmax.f32 %v6093_v47, %v6095_v48  ;;  %v6099_v54 = vmul.f32 0.088388346, %v2112_v49 }
 0x2bb   : > { %v2114_v53 = vpop.f32.mrf.mxu0 }
 0x2bc   : > { %v6101_v55 = vmul.f32 0.088388346, %v2114_v53  ;;  %2196 = vmax.xlane.f32.xlu0 %v2195_v50 }
 0x2bd   : > { %v2118_v58 = vpop.f32.mrf.mxu0 }
 0x2be   : > { %v2198_v59 = vmax.f32 %v6099_v54, %v6101_v55  ;;  %v6105_v63 = vmul.f32 0.088388346, %v2118_v58 }
 0x2bf   : > { %v2120_v60 = vpop.f32.mrf.mxu0 }
 0x2c0   : > { %v6107_v0 = vmul.f32 0.088388346, %v2120_v60  ;;  %2199 = vmax.xlane.f32.xlu1 %v2198_v59 }
 0x2c1   : > { %v2122_v1 = vpop.f32.mrf.mxu0 }
 0x2c2   : > { %v2201_v5 = vmax.f32 %v6105_v63, %v6107_v0  ;;  %v6111_v7 = vmul.f32 0.088388346, %v2122_v1 }
 0x2c3   : > { %v2124_v6 = vpop.f32.mrf.mxu0 }
 0x2c4   : > { %v6113_v10 = vmul.f32 0.088388346, %v2124_v6  ;;  %2202 = vmax.xlane.f32.xlu0 %v2201_v5 }
 0x2c6   : > { %v2204_v11 = vmax.f32 %v6111_v7, %v6113_v10 }
 0x2c8   : > { %2205 = vmax.xlane.f32.xlu1 %v2204_v11 }
 0x315   : > { %v2161_v21 = vpop.xlane.xlu0 %2160 }
 0x316   : > { %v2207_v2 = vsub.f32 %v6021_v51, %v2161_v21  ;;  %v2208_v24 = vsub.f32 %v6023_v52, %v2161_v21 }
 0x318   : > { %v2239_v25 = vmul.f32 1.442695, %v2207_v2  ;;  %v2241_v26 = vmul.f32 1.442695, %v2208_v24 }
 0x319   : > { %v2164_v29 = vpop.xlane.xlu0 %2163 }
 0x31a   : > { %5475 = vpow2.f32 %v2239_v25  ;;  %v2209_v30 = vsub.f32 %v6027_v56, %v2164_v29  ;;  %v2210_v31 = vsub.f32 %v6029_v57, %v2164_v29 }
 0x31b   : > { %5477 = vpow2.f32 %v2241_v26 }
 0x31c   : > { %v2243_v34 = vmul.f32 1.442695, %v2209_v30  ;;  %v2245_v35 = vmul.f32 1.442695, %v2210_v31 }
 0x31d   : > { %v2167_v36 = vpop.xlane.xlu1 %2166 }
 0x31e   : > { %5479 = vpow2.f32 %v2243_v34  ;;  %v2211_v39 = vsub.f32 %v6033_v61, %v2167_v36  ;;  %v2212_v40 = vsub.f32 %v6035_v62, %v2167_v36  ;;  %v5417_v34 = vld [vmem:[#allocation4 + $0x60] sm:$0xff]  }
 0x31f   : > { %5481 = vpow2.f32 %v2245_v35  ;;  %v5418_v36 = vld [vmem:[#allocation4 + $0x20] sm:$0xff]  }
 0x320   : > { %v2247_v51 = vmul.f32 1.442695, %v2211_v39  ;;  %v2249_v52 = vmul.f32 1.442695, %v2212_v40 }
 0x321   : > { %v2170_v41 = vpop.xlane.xlu1 %2169 }
 0x322   : > { %5483 = vpow2.f32 %v2247_v51  ;;  %v2213_v44 = vsub.f32 %v6039_v3, %v2170_v41  ;;  %v2214_v56 = vsub.f32 %v6041_v4, %v2170_v41 }
 0x323   : > { %5485 = vpow2.f32 %v2249_v52 }
 0x324   : > { %v2251_v57 = vmul.f32 1.442695, %v2213_v44  ;;  %v2253_v45 = vmul.f32 1.442695, %v2214_v56  ;;  %v5419_v44 = vld [vmem:[#allocation4 + $0x58] sm:$0xff]  }
 0x325   : > { %v2173_v46 = vpop.xlane.xlu0 %2172 }
 0x326   : > { %5487 = vpow2.f32 %v2251_v57  ;;  %v2215_v49 = vsub.f32 %v6045_v8, %v2173_v46  ;;  %v2216_v61 = vsub.f32 %v6047_v9, %v2173_v46  ;;  %v5420_v57 = vld [vmem:[#allocation4 + $0x18] sm:$0xff]  }
 0x327   : > { %v6127_v50 = vpop.eup %5475  ;;  %5489 = vpow2.f32 %v2253_v45 }
 0x328   : > { %v6129_v62 = vpop.eup %5477  ;;  %v2255_v53 = vmul.f32 1.442695, %v2215_v49  ;;  %v2257_v58 = vmul.f32 1.442695, %v2216_v61 }
 0x329   : > { %v2176_v59 = vpop.xlane.xlu1 %2175  ;;  %v2303_v3 = vadd.f32 %v6129_v62, %v6127_v50 }
 0x32a   : > { %5491 = vpow2.f32 %v2255_v53  ;;  %v2217_v4 = vsub.f32 %v6051_v13, %v2176_v59  ;;  %v2218_v60 = vsub.f32 %v6053_v14, %v2176_v59 }
 0x32b   : > { %v6135_v1 = vpop.eup %5479  ;;  %5493 = vpow2.f32 %v2257_v58  ;;  %2304 = vadd.xlane.f32.xlu0 %v2303_v3  ;;  %v5421_v58 = vld [vmem:[#allocation4 + $0x50] sm:$0xff]  }
 0x32c   : > { %v6137_v8 = vpop.eup %5481  ;;  %v2259_v9 = vmul.f32 1.442695, %v2217_v4  ;;  %v2261_v5 = vmul.f32 1.442695, %v2218_v60  ;;  %v5422_v3 = vld [vmem:[#allocation4 + $0x10] sm:$0xff]  }
 0x32d   : > { %v2179_v6 = vpop.xlane.xlu0 %2178  ;;  %v2306_v11 = vadd.f32 %v6137_v8, %v6135_v1 }
 0x32e   : > { %5495 = vpow2.f32 %v2259_v9  ;;  %v2219_v12 = vsub.f32 %v6057_v18, %v2179_v6  ;;  %v2220_v15 = vsub.f32 %v6059_v19, %v2179_v6  ;;  %v5416_v19 = vld [vmem:[#allocation4 + $0x28] sm:$0xff]  }
 0x32f   : > { %v6143_v13 = vpop.eup %5483  ;;  %5497 = vpow2.f32 %v2261_v5  ;;  %2307 = vadd.xlane.f32.xlu1 %v2306_v11  ;;  %5061 = vmatpush3.bf16.msra.mxu1 %v5416_v19  ;;  %v5423_v11 = vld [vmem:[#allocation4 + $0x48] sm:$0xff]  }
 0x330   : > { %v6145_v14 = vpop.eup %5485  ;;  %v2263_v16 = vmul.f32 1.442695, %v2219_v12  ;;  %v2265_v17 = vmul.f32 1.442695, %v2220_v15  ;;  %5062 = vmatprep.subr.bf16.mxu1 %v5417_v34  ;;  %v5424_v15 = vld [vmem:[#allocation4 + $0x8] sm:$0xff]  }
 0x331   : > { %v2182_v20 = vpop.xlane.xlu1 %2181  ;;  %v2309_v21 = vadd.f32 %v6145_v14, %v6143_v13 }
 0x332   : > { %5499 = vpow2.f32 %v2263_v16  ;;  %v2221_v2 = vsub.f32 %v6063_v22, %v2182_v20  ;;  %v2222_v24 = vsub.f32 %v6065_v23, %v2182_v20 }
 0x333   : > { %v6151_v18 = vpop.eup %5487  ;;  %5501 = vpow2.f32 %v2265_v17  ;;  %2310 = vadd.xlane.f32.xlu0 %v2309_v21  ;;  %5063 = vmatpush3.bf16.msra.mxu1 %v5418_v36 }
 0x334   : > { %v6153_v25 = vpop.eup %5489  ;;  %v2267_v26 = vmul.f32 1.442695, %v2221_v2  ;;  %v2269_v29 = vmul.f32 1.442695, %v2222_v24  ;;  %5064 = vmatprep.subr.bf16.mxu1 %v5419_v44  ;;  %v5425_v24 = vld [vmem:[#allocation4 + $0x40] sm:$0xff]  }
 0x335   : > { %v2185_v30 = vpop.xlane.xlu0 %2184  ;;  %v2312_v31 = vadd.f32 %v6153_v25, %v6151_v18 }
 0x336   : > { %5503 = vpow2.f32 %v2267_v26  ;;  %v2223_v22 = vsub.f32 %v6069_v27, %v2185_v30  ;;  %v2224_v23 = vsub.f32 %v6071_v28, %v2185_v30  ;;  %v5426_v26 = vld [vmem:[#allocation4] sm:$0xff]  }
 0x337   : > { %v6159_v35 = vpop.eup %5491  ;;  %5505 = vpow2.f32 %v2269_v29  ;;  %2313 = vadd.xlane.f32.xlu1 %v2312_v31  ;;  %5065 = vmatpush3.bf16.msra.mxu1 %v5420_v57 }
 0x338   : > { %v6161_v39 = vpop.eup %5493  ;;  %v2271_v40 = vmul.f32 1.442695, %v2223_v22  ;;  %v2273_v51 = vmul.f32 1.442695, %v2224_v23  ;;  %5066 = vmatprep.subr.bf16.mxu1 %v5421_v58 }
 0x339   : > { %v2188_v52 = vpop.xlane.xlu1 %2187  ;;  %v2315_v41 = vadd.f32 %v6161_v39, %v6159_v35 }
 0x33a   : > { %5507 = vpow2.f32 %v2271_v40  ;;  %v2225_v27 = vsub.f32 %v6075_v32, %v2188_v52  ;;  %v2226_v28 = vsub.f32 %v6077_v33, %v2188_v52 }
 0x33b   : > { %v6167_v56 = vpop.eup %5495  ;;  %5509 = vpow2.f32 %v2273_v51  ;;  %2316 = vadd.xlane.f32.xlu0 %v2315_v41  ;;  %5067 = vmatpush3.bf16.msra.mxu1 %v5422_v3 }
 0x33c   : > { %v6169_v45 = vpop.eup %5497  ;;  %v2275_v46 = vmul.f32 1.442695, %v2225_v27  ;;  %v2277_v49 = vmul.f32 1.442695, %v2226_v28  ;;  %5068 = vmatprep.subr.bf16.mxu1 %v5423_v11 }
 0x33d   : > { %v2191_v61 = vpop.xlane.xlu0 %2190  ;;  %v2318_v53 = vadd.f32 %v6169_v45, %v6167_v56 }
 0x33e   : > { %5511 = vpow2.f32 %v2275_v46  ;;  %v2227_v32 = vsub.f32 %v6081_v37, %v2191_v61  ;;  %v2228_v33 = vsub.f32 %v6083_v38, %v2191_v61 }
 0x33f   : > { %v6175_v59 = vpop.eup %5499  ;;  %5513 = vpow2.f32 %v2277_v49  ;;  %2319 = vadd.xlane.f32.xlu1 %v2318_v53  ;;  %5069 = vmatpush3.bf16.msra.mxu1 %v5424_v15 }
 0x340   : > { %v6177_v4 = vpop.eup %5501  ;;  %v2279_v60 = vmul.f32 1.442695, %v2227_v32  ;;  %v2281_v9 = vmul.f32 1.442695, %v2228_v33  ;;  %5070 = vmatprep.subr.bf16.mxu1 %v5425_v24 }
 0x341   : > { %v2194_v5 = vpop.xlane.xlu1 %2193  ;;  %v2321_v6 = vadd.f32 %v6177_v4, %v6175_v59 }
 0x342   : > { %5515 = vpow2.f32 %v2279_v60  ;;  %v2229_v37 = vsub.f32 %v6087_v42, %v2194_v5  ;;  %v2230_v38 = vsub.f32 %v6089_v43, %v2194_v5 }
 0x343   : > { %v6183_v12 = vpop.eup %5503  ;;  %5517 = vpow2.f32 %v2281_v9  ;;  %2322 = vadd.xlane.f32.xlu0 %v2321_v6  ;;  %5071 = vmatpush3.bf16.msra.mxu1 %v5426_v26 }
 0x344   : > { %v6185_v16 = vpop.eup %5505  ;;  %v2283_v17 = vmul.f32 1.442695, %v2229_v37  ;;  %v2285_v20 = vmul.f32 1.442695, %v2230_v38 }
 0x345   : > { %v2197_v21 = vpop.xlane.xlu0 %2196  ;;  %v2324_v2 = vadd.f32 %v6185_v16, %v6183_v12 }
 0x346   : > { %5519 = vpow2.f32 %v2283_v17  ;;  %v2231_v42 = vsub.f32 %v6093_v47, %v2197_v21  ;;  %v2232_v43 = vsub.f32 %v6095_v48, %v2197_v21 }
 0x347   : > { %v6191_v19 = vpop.eup %5507  ;;  %5521 = vpow2.f32 %v2285_v20  ;;  %2325 = vadd.xlane.f32.xlu1 %v2324_v2  ;;  %v5427_v20 = vld [vmem:[%s7171_s19 + $0x38] sm:$0xff]  }
 0x348   : > { %v6193_v29 = vpop.eup %5509  ;;  %v2287_v30 = vmul.f32 1.442695, %v2231_v42  ;;  %v2289_v31 = vmul.f32 1.442695, %v2232_v43  ;;  %5248 = vmatprep.subr.bf16.mxu1 %v5427_v20 }
 0x349   : > { %v2200_v34 = vpop.xlane.xlu1 %2199  ;;  %v2327_v22 = vadd.f32 %v6193_v29, %v6191_v19 }
 0x34a   : > { %5523 = vpow2.f32 %v2287_v30  ;;  %v2233_v47 = vsub.f32 %v6099_v54, %v2200_v34  ;;  %v2234_v48 = vsub.f32 %v6101_v55, %v2200_v34 }
 0x34b   : > { %v6199_v23 = vpop.eup %5511  ;;  %5525 = vpow2.f32 %v2289_v31  ;;  %2328 = vadd.xlane.f32.xlu0 %v2327_v22 }
 0x34c   : > { %v6201_v36 = vpop.eup %5513  ;;  %v2291_v40 = vmul.f32 1.442695, %v2233_v47  ;;  %v2293_v51 = vmul.f32 1.442695, %v2234_v48 }
 0x34d   : > { %v2203_v52 = vpop.xlane.xlu0 %2202  ;;  %v2330_v41 = vadd.f32 %v6201_v36, %v6199_v23 }
 0x34e   : > { %5527 = vpow2.f32 %v2291_v40  ;;  %v2235_v44 = vsub.f32 %v6105_v63, %v2203_v52  ;;  %v2236_v27 = vsub.f32 %v6107_v0, %v2203_v52 }
 0x34f   : > { %v6207_v54 = vpop.eup %5515  ;;  %5529 = vpow2.f32 %v2293_v51  ;;  %2331 = vadd.xlane.f32.xlu1 %v2330_v41 }
 0x350   : > { %v6209_v55 = vpop.eup %5517  ;;  %v2295_v28 = vmul.f32 1.442695, %v2235_v44  ;;  %v2297_v57 = vmul.f32 1.442695, %v2236_v27  ;;  %v5429_v44 = vld [vmem:[%s7171_s19 + $0x28] sm:$0xff]  }
 0x351   : > { %v2206_v46 = vpop.xlane.xlu1 %2205  ;;  %v2333_v49 = vadd.f32 %v6209_v55, %v6207_v54 }
 0x352   : > { %5531 = vpow2.f32 %v2295_v28  ;;  %v2237_v61 = vsub.f32 %v6111_v7, %v2206_v46  ;;  %v2238_v53 = vsub.f32 %v6113_v10, %v2206_v46 }
 0x353   : > { %v6215_v63 = vpop.eup %5519  ;;  %5533 = vpow2.f32 %v2297_v57  ;;  %2334 = vadd.xlane.f32.xlu0 %v2333_v49  ;;  %v5430_v49 = vld [vmem:[%s7171_s19 + $0x20] sm:$0xff]  }
 0x354   : > { %v6217_v0 = vpop.eup %5521  ;;  %v2299_v58 = vmul.f32 1.442695, %v2237_v61  ;;  %v2301_v32 = vmul.f32 1.442695, %v2238_v53 }
 0x355   : > { %v2336_v33 = vadd.f32 %v6217_v0, %v6215_v63 }
 0x356   : > { %5535 = vpow2.f32 %v2299_v58  ;;  %v5431_v58 = vld [vmem:[%s7171_s19 + $0x18] sm:$0xff]  }
 0x357   : > { %v6221_v3 = vpop.eup %5523  ;;  %5537 = vpow2.f32 %v2301_v32  ;;  %2337 = vadd.xlane.f32.xlu1 %v2336_v33 }
 0x358   : > { %v6223_v7 = vpop.eup %5525 }
 0x359   : > { %v2339_v10 = vadd.f32 %v6223_v7, %v6221_v3 }
 0x35b   : > { %v6227_v60 = vpop.eup %5527  ;;  %2340 = vadd.xlane.f32.xlu0 %v2339_v10 }
 0x35c   : > { %v6229_v9 = vpop.eup %5529 }
 0x35d   : > { %v2342_v5 = vadd.f32 %v6229_v9, %v6227_v60 }
 0x35f   : > { %v6233_v6 = vpop.eup %5531  ;;  %2343 = vadd.xlane.f32.xlu1 %v2342_v5 }
 0x360   : > { %v6235_v11 = vpop.eup %5533 }
 0x361   : > { %v2345_v37 = vadd.f32 %v6235_v11, %v6233_v6 }
 0x363   : > { %v6239_v38 = vpop.eup %5535  ;;  %2346 = vadd.xlane.f32.xlu0 %v2345_v37  ;;  %v5432_v37 = vld [vmem:[%s7171_s19 + $0x10] sm:$0xff]  }
 0x364   : > { %v6241_v15 = vpop.eup %5537 }
 0x365   : > { %v2348_v17 = vadd.f32 %v6241_v15, %v6239_v38 }
 0x367   : > { %2349 = vadd.xlane.f32.xlu1 %v2348_v17 }
 0x3b4   : > { %v2305_v21 = vpop.xlane.xlu0 %2304 }
 0x3b5   : > { %5539 = vrcp.f32 %v2305_v21 }
 0x3b8   : > { %v2308_v2 = vpop.xlane.xlu1 %2307 }
 0x3b9   : > { %5541 = vrcp.f32 %v2308_v2 }
 0x3bc   : > { %v2311_v24 = vpop.xlane.xlu0 %2310 }
 0x3bd   : > { %5543 = vrcp.f32 %v2311_v24 }
 0x3c0   : > { %v2314_v42 = vpop.xlane.xlu1 %2313 }
 0x3c1   : > { %5545 = vrcp.f32 %v2314_v42 }
 0x3c2   : > { %v5540_v43 = vpop.eup %5539 }
 0x3c3   : > { %v2368_v26 = vmul.f32 %v5540_v43, %v6129_v62  ;;  %v2367_v30 = vmul.f32 %v5540_v43, %v6127_v50  ;;  %v5428_v50 = vld [vmem:[%s7171_s19 + $0x30] sm:$0xff]  }
 0x3c4   : > { %v2317_v31 = vpop.xlane.xlu0 %2316 }
 0x3c5   : > { %5547 = vrcp.f32 %v2317_v31  ;;  %4034 = vst [vmem:[%s5917_s6 + $0x8] sm:$0xff] %v2368_v26  ;;  %4033 = vst [vmem:[%s5917_s6] sm:$0xff] %v2367_v30 }
 0x3c6   : > { %v5542_v34 = vpop.eup %5541 }
 0x3c7   : > { %v2370_v22 = vmul.f32 %v5542_v34, %v6137_v8  ;;  %v2369_v47 = vmul.f32 %v5542_v34, %v6135_v1 }
 0x3c8   : > { %v2320_v48 = vpop.xlane.xlu1 %2319 }
 0x3c9   : > { %5549 = vrcp.f32 %v2320_v48  ;;  %v2400_v40 = vpack.c.bf16 %v2370_v22, %v2368_v26  ;;  %4036 = vst [vmem:[%s5917_s6 + $0x18] sm:$0xff] %v2370_v22  ;;  %v2399_v62 = vpack.c.bf16 %v2369_v47, %v2367_v30  ;;  %4035 = vst [vmem:[%s5917_s6 + $0x10] sm:$0xff] %v2369_v47 }
 0x3ca   : > { %v5544_v51 = vpop.eup %5543 }
 0x3cb   : > { %2575 = vmatprep.mubr.bf16.mxu1 %v2400_v40  ;;  %v2372_v52 = vmul.f32 %v5544_v51, %v6145_v14  ;;  %v2371_v41 = vmul.f32 %v5544_v51, %v6143_v13 }
 0x3cc   : > { %v2323_v8 = vpop.xlane.xlu0 %2322  ;;  %2576 = vmatmul.mubr.bf16.vlgmr.msra.gmra.mxu1 %v2399_v62 }
 0x3cd   : > { %5551 = vrcp.f32 %v2323_v8  ;;  %4038 = vst [vmem:[%s5917_s6 + $0x28] sm:$0xff] %v2372_v52  ;;  %4037 = vst [vmem:[%s5917_s6 + $0x20] sm:$0xff] %v2371_v41  ;;  %5249 = vmatpush3.bf16.msra.mxu1 %v5427_v20 }
 0x3ce   : > { %v5546_v1 = vpop.eup %5545  ;;  %5250 = vmatprep.subr.bf16.mxu1 %v5428_v50 }
 0x3cf   : > { %v2374_v27 = vmul.f32 %v5546_v1, %v6153_v25  ;;  %v2373_v28 = vmul.f32 %v5546_v1, %v6151_v18 }
 0x3d0   : > { %v2326_v57 = vpop.xlane.xlu1 %2325 }
 0x3d1   : > { %5553 = vrcp.f32 %v2326_v57  ;;  %v2402_v13 = vpack.c.bf16 %v2374_v27, %v2372_v52  ;;  %4040 = vst [vmem:[%s5917_s6 + $0x38] sm:$0xff] %v2374_v27  ;;  %v2401_v14 = vpack.c.bf16 %v2373_v28, %v2371_v41  ;;  %4039 = vst [vmem:[%s5917_s6 + $0x30] sm:$0xff] %v2373_v28  ;;  %5251 = vmatpush3.bf16.msra.mxu1 %v5428_v50 }
 0x3d2   : > { %v5548_v46 = vpop.eup %5547  ;;  %5252 = vmatprep.subr.bf16.mxu1 %v5429_v44 }
 0x3d3   : > { %2583 = vmatprep.mubr.bf16.mxu1 %v2402_v13  ;;  %v2376_v61 = vmul.f32 %v5548_v46, %v6161_v39  ;;  %v2375_v25 = vmul.f32 %v5548_v46, %v6159_v35 }
 0x3d4   : > { %v2329_v18 = vpop.xlane.xlu0 %2328  ;;  %2584 = vmatmul.mubr.bf16.gmra.mxu1 %v2401_v14  ;;  %v5433_v14 = vld [vmem:[%s7171_s19 + $0x8] sm:$0xff]  }
 0x3d5   : > { %5555 = vrcp.f32 %v2329_v18  ;;  %4042 = vst [vmem:[%s5917_s6 + $0x48] sm:$0xff] %v2376_v61  ;;  %4041 = vst [vmem:[%s5917_s6 + $0x40] sm:$0xff] %v2375_v25  ;;  %5253 = vmatpush3.bf16.msra.mxu1 %v5429_v44 }
 0x3d6   : > { %v5550_v53 = vpop.eup %5549  ;;  %5254 = vmatprep.subr.bf16.mxu1 %v5430_v49 }
 0x3d7   : > { %v2378_v32 = vmul.f32 %v5550_v53, %v6169_v45  ;;  %v2377_v33 = vmul.f32 %v5550_v53, %v6167_v56 }
 0x3d8   : > { %v2332_v10 = vpop.xlane.xlu1 %2331 }
 0x3d9   : > { %5557 = vrcp.f32 %v2332_v10  ;;  %v2404_v35 = vpack.c.bf16 %v2378_v32, %v2376_v61  ;;  %4044 = vst [vmem:[%s5917_s6 + $0x58] sm:$0xff] %v2378_v32  ;;  %v2403_v39 = vpack.c.bf16 %v2377_v33, %v2375_v25  ;;  %4043 = vst [vmem:[%s5917_s6 + $0x50] sm:$0xff] %v2377_v33  ;;  %5255 = vmatpush3.bf16.msra.mxu1 %v5430_v49 }
 0x3da   : > { %v5552_v5 = vpop.eup %5551  ;;  %5256 = vmatprep.subr.bf16.mxu1 %v5431_v58 }
 0x3db   : > { %2591 = vmatprep.mubr.bf16.mxu1 %v2404_v35  ;;  %v2380_v17 = vmul.f32 %v5552_v5, %v6177_v4  ;;  %v2379_v45 = vmul.f32 %v5552_v5, %v6175_v59 }
 0x3dc   : > { %v2335_v56 = vpop.xlane.xlu0 %2334  ;;  %2592 = vmatmul.mubr.bf16.gmra.mxu1 %v2403_v39 }
 0x3dd   : > { %5559 = vrcp.f32 %v2335_v56  ;;  %4046 = vst [vmem:[%s5917_s6 + $0x68] sm:$0xff] %v2380_v17  ;;  %4045 = vst [vmem:[%s5917_s6 + $0x60] sm:$0xff] %v2379_v45  ;;  %5257 = vmatpush3.bf16.msra.mxu1 %v5431_v58 }
 0x3de   : > { %v5554_v20 = vpop.eup %5553  ;;  %5258 = vmatprep.subr.bf16.mxu1 %v5432_v37 }
 0x3df   : > { %v2382_v21 = vmul.f32 %v5554_v20, %v6185_v16  ;;  %v2381_v2 = vmul.f32 %v5554_v20, %v6183_v12 }
 0x3e0   : > { %v2338_v24 = vpop.xlane.xlu1 %2337 }
 0x3e1   : > { %5561 = vrcp.f32 %v2338_v24  ;;  %v2406_v4 = vpack.c.bf16 %v2382_v21, %v2380_v17  ;;  %4048 = vst [vmem:[%s5917_s6 + $0x78] sm:$0xff] %v2382_v21  ;;  %v2405_v59 = vpack.c.bf16 %v2381_v2, %v2379_v45  ;;  %4047 = vst [vmem:[%s5917_s6 + $0x70] sm:$0xff] %v2381_v2  ;;  %5259 = vmatpush3.bf16.msra.mxu1 %v5432_v37 }
 0x3e2   : > { %v5556_v42 = vpop.eup %5555  ;;  %5260 = vmatprep.subr.bf16.mxu1 %v5433_v14 }
 0x3e3   : > { %2599 = vmatprep.mubr.bf16.mxu1 %v2406_v4  ;;  %v2384_v43 = vmul.f32 %v5556_v42, %v6193_v29  ;;  %v2383_v26 = vmul.f32 %v5556_v42, %v6191_v19 }
 0x3e4   : > { %v2341_v16 = vpop.xlane.xlu0 %2340  ;;  %2600 = vmatmul.mubr.bf16.gmra.mxu1 %v2405_v59 }
 0x3e5   : > { %5563 = vrcp.f32 %v2341_v16  ;;  %4050 = vst [vmem:[%s5917_s6 + $0x88] sm:$0xff] %v2384_v43  ;;  %4049 = vst [vmem:[%s5917_s6 + $0x80] sm:$0xff] %v2383_v26  ;;  %5261 = vmatpush3.bf16.msra.mxu1 %v5433_v14  ;;  %v1803_v14 = vld [vmem:[%s6320_s23 + $0x8] sm:$0xff] }
 0x3e6   : > { %v5558_v12 = vpop.eup %5557 }
 0x3e7   : > { %v2386_v30 = vmul.f32 %v5558_v12, %v6201_v36  ;;  %v2385_v31 = vmul.f32 %v5558_v12, %v6199_v23 }
 0x3e8   : > { %v2344_v34 = vpop.xlane.xlu1 %2343 }
 0x3e9   : > { %5565 = vrcp.f32 %v2344_v34  ;;  %v2408_v22 = vpack.c.bf16 %v2386_v30, %v2384_v43  ;;  %4052 = vst [vmem:[%s5917_s6 + $0x98] sm:$0xff] %v2386_v30  ;;  %v2407_v47 = vpack.c.bf16 %v2385_v31, %v2383_v26  ;;  %4051 = vst [vmem:[%s5917_s6 + $0x90] sm:$0xff] %v2385_v31 }
 0x3ea   : > { %v5560_v19 = vpop.eup %5559 }
 0x3eb   : > { %2607 = vmatprep.mubr.bf16.mxu1 %v2408_v22  ;;  %v2388_v29 = vmul.f32 %v5560_v19, %v6209_v55  ;;  %v2387_v48 = vmul.f32 %v5560_v19, %v6207_v54 }
 0x3ec   : > { %v2347_v40 = vpop.xlane.xlu0 %2346  ;;  %2608 = vmatmul.mubr.bf16.gmra.mxu1 %v2407_v47 }
 0x3ed   : > { %5567 = vrcp.f32 %v2347_v40  ;;  %4054 = vst [vmem:[%s5917_s6 + $0xa8] sm:$0xff] %v2388_v29  ;;  %4053 = vst [vmem:[%s5917_s6 + $0xa0] sm:$0xff] %v2387_v48 }
 0x3ee   : > { %v5562_v23 = vpop.eup %5561 }
 0x3ef   : > { %v2390_v36 = vmul.f32 %v5562_v23, %v6217_v0  ;;  %v2389_v62 = vmul.f32 %v5562_v23, %v6215_v63 }
 0x3f0   : > { %v2350_v51 = vpop.xlane.xlu1 %2349 }
 0x3f1   : > { %5569 = vrcp.f32 %v2350_v51  ;;  %v2410_v50 = vpack.c.bf16 %v2390_v36, %v2388_v29  ;;  %4056 = vst [vmem:[%s5917_s6 + $0xb8] sm:$0xff] %v2390_v36  ;;  %v2409_v55 = vpack.c.bf16 %v2389_v62, %v2387_v48  ;;  %4055 = vst [vmem:[%s5917_s6 + $0xb0] sm:$0xff] %v2389_v62 }
 0x3f2   : > { %v5564_v54 = vpop.eup %5563 }
 0x3f3   : > { %2615 = vmatprep.mubr.bf16.mxu1 %v2410_v50  ;;  %v2392_v52 = vmul.f32 %v5564_v54, %v6223_v7  ;;  %v2391_v41 = vmul.f32 %v5564_v54, %v6221_v3 }
 0x3f4   : > { %2616 = vmatmul.mubr.bf16.gmra.mxu1 %v2409_v55 }
 0x3f5   : > { %4058 = vst [vmem:[%s5917_s6 + $0xc8] sm:$0xff] %v2392_v52  ;;  %4057 = vst [vmem:[%s5917_s6 + $0xc0] sm:$0xff] %v2391_v41 }
 0x3f6   : > { %v5566_v63 = vpop.eup %5565 }
 0x3f7   : > { %v2394_v0 = vmul.f32 %v5566_v63, %v6229_v9  ;;  %v2393_v8 = vmul.f32 %v5566_v63, %v6227_v60 }
 0x3f9   : > { %v2412_v1 = vpack.c.bf16 %v2394_v0, %v2392_v52  ;;  %4060 = vst [vmem:[%s5917_s6 + $0xd8] sm:$0xff] %v2394_v0  ;;  %v2411_v44 = vpack.c.bf16 %v2393_v8, %v2391_v41  ;;  %4059 = vst [vmem:[%s5917_s6 + $0xd0] sm:$0xff] %v2393_v8 }
 0x3fa   : > { %v5568_v27 = vpop.eup %5567 }
 0x3fb   : > { %2623 = vmatprep.mubr.bf16.mxu1 %v2412_v1  ;;  %v2396_v3 = vmul.f32 %v5568_v27, %v6235_v11  ;;  %v2395_v7 = vmul.f32 %v5568_v27, %v6233_v6  ;;  %v5434_v11 = vld [vmem:[%s7171_s19] sm:$0xff]  }
 0x3fc   : > { %2624 = vmatmul.mubr.bf16.gmra.mxu1 %v2411_v44  ;;  %5262 = vmatprep.subr.bf16.mxu1 %v5434_v11 }
 0x3fd   : > { %4062 = vst [vmem:[%s5917_s6 + $0xe8] sm:$0xff] %v2396_v3  ;;  %4061 = vst [vmem:[%s5917_s6 + $0xe0] sm:$0xff] %v2395_v7  ;;  %5263 = vmatpush3.bf16.msra.mxu1 %v5434_v11 }
 0x3fe   : > { %v5570_v9 = vpop.eup %5569 }
 0x3ff   : > { %v2398_v60 = vmul.f32 %v5570_v9, %v6241_v15  ;;  %v2397_v28 = vmul.f32 %v5570_v9, %v6239_v38  ;;  %v1802_v9 = vld [vmem:[%s6320_s23] sm:$0xff] }
 0x401   : > { %v2414_v57 = vpack.c.bf16 %v2398_v60, %v2396_v3  ;;  %4064 = vst [vmem:[%s5917_s6 + $0xf8] sm:$0xff] %v2398_v60  ;;  %v2413_v13 = vpack.c.bf16 %v2397_v28, %v2395_v7  ;;  %4063 = vst [vmem:[%s5917_s6 + $0xf0] sm:$0xff] %v2397_v28 }
 0x403   : > { %2631 = vmatprep.mubr.bf16.mxu1 %v2414_v57  ;;  %v1804_v57 = vld [vmem:[%s6320_s23 + $0x10] sm:$0xff] }
 0x404   : > { %2632 = vmatmul.mubr.bf16.gmra.mxu1 %v2413_v13 }
 0x48c   : > { %v5072_v6 = vpop.f32.mrf.mxu1 }
 0x48e   : > { %v5073_v46 = vpop.f32.mrf.mxu1 }
 0x48f   : > { %v5074_v25 = vadd.f32 %v5073_v46, %v5072_v6 }
 0x490   : > { %v5075_v49 = vpop.f32.mrf.mxu1 }
 0x492   : > { %v5076_v61 = vpop.f32.mrf.mxu1 }
 0x493   : > { %v5077_v15 = vadd.f32 %v5076_v61, %v5075_v49  ;;  %v1805_v49 = vld [vmem:[%s6320_s23 + $0x18] sm:$0xff] }
 0x494   : > { %v5078_v18 = vpop.f32.mrf.mxu1 }
 0x495   : > { %v2640_v38 = vpack.c.bf16 %v5077_v15, %v5074_v25  ;;  %v1806_v15 = vld [vmem:[%s6320_s23 + $0x20] sm:$0xff] }
 0x496   : > { %v5079_v53 = vpop.f32.mrf.mxu1 }
 0x497   : > { %5264 = vmatprep.mubr.bf16.mxu1 %v2640_v38  ;;  %v5080_v33 = vadd.f32 %v5079_v53, %v5078_v18  ;;  %v1808_v53 = vld [vmem:[%s6320_s23 + $0x30] sm:$0xff] }
 0x498   : > { %v5081_v58 = vpop.f32.mrf.mxu1 }
 0x49a   : > { %v5082_v32 = vpop.f32.mrf.mxu1 }
 0x49b   : > { %v5083_v10 = vadd.f32 %v5082_v32, %v5081_v58  ;;  %v1807_v32 = vld [vmem:[%s6320_s23 + $0x28] sm:$0xff] }
 0x49c   : > { %v5084_v35 = vpop.f32.mrf.mxu1 }
 0x49d   : > { %v2641_v39 = vpack.c.bf16 %v5083_v10, %v5080_v33 }
 0x49e   : > { %v5085_v5 = vpop.f32.mrf.mxu1 }
 0x49f   : > { %5265 = vmatmul.mubr.bf16.vlgmr.msra.gmra.mxu1 %v2641_v39  ;;  %v5086_v45 = vadd.f32 %v5085_v5, %v5084_v35  ;;  %v1809_v39 = vld [vmem:[%s6320_s23 + $0x38] sm:$0xff] }
 0x4a0   : > { %v5087_v37 = vpop.f32.mrf.mxu1 }
 0x4a2   : > { %v5088_v17 = vpop.f32.mrf.mxu1 }
 0x4a3   : > { %v5089_v56 = vadd.f32 %v5088_v17, %v5087_v37  ;;  %v1810_v17 = vld [vmem:[%s6320_s23 + $0x40] sm:$0xff] }
 0x4a4   : > { %v5090_v20 = vpop.f32.mrf.mxu1 }
 0x4a5   : > { %v2642_v21 = vpack.c.bf16 %v5089_v56, %v5086_v45 }
 0x4a6   : > { %v5091_v2 = vpop.f32.mrf.mxu1 }
 0x4a7   : > { %5268 = vmatprep.mubr.bf16.mxu1 %v2642_v21  ;;  %v5092_v59 = vadd.f32 %v5091_v2, %v5090_v20  ;;  %v1812_v20 = vld [vmem:[%s6320_s23 + $0x50] sm:$0xff]  ;;  %v1811_v2 = vld [vmem:[%s6320_s23 + $0x48] sm:$0xff] }
 0x4a8   : > { %v5093_v24 = vpop.f32.mrf.mxu1 }
 0x4aa   : > { %v5094_v4 = vpop.f32.mrf.mxu1 }
 0x4ab   : > { %v5095_v42 = vadd.f32 %v5094_v4, %v5093_v24 }
 0x4ac   : > { %v5096_v43 = vpop.f32.mrf.mxu1 }
 0x4ad   : > { %v2643_v26 = vpack.c.bf16 %v5095_v42, %v5092_v59  ;;  %v1813_v42 = vld [vmem:[%s6320_s23 + $0x58] sm:$0xff] }
 0x4ae   : > { %v5097_v16 = vpop.f32.mrf.mxu1 }
 0x4af   : > { %5269 = vmatmul.mubr.bf16.gmra.mxu1 %v2643_v26  ;;  %v5098_v31 = vadd.f32 %v5097_v16, %v5096_v43  ;;  %v1814_v16 = vld [vmem:[%s6320_s23 + $0x60] sm:$0xff] }
 0x4b0   : > { %v5099_v12 = vpop.f32.mrf.mxu1 }
 0x4b2   : > { %v5100_v30 = vpop.f32.mrf.mxu1 }
 0x4b3   : > { %v5101_v34 = vadd.f32 %v5100_v30, %v5099_v12 }
 0x4b4   : > { %v5102_v22 = vpop.f32.mrf.mxu1 }
 0x4b5   : > { %v2644_v47 = vpack.c.bf16 %v5101_v34, %v5098_v31  ;;  %v1816_v31 = vld [vmem:[%s6320_s23 + $0x70] sm:$0xff] }
 0x4b6   : > { %v5103_v19 = vpop.f32.mrf.mxu1 }
 0x4b7   : > { %5272 = vmatprep.mubr.bf16.mxu1 %v2644_v47  ;;  %v5104_v40 = vadd.f32 %v5103_v19, %v5102_v22  ;;  %v1815_v22 = vld [vmem:[%s6320_s23 + $0x68] sm:$0xff] }
 0x4b8   : > { %v5105_v29 = vpop.f32.mrf.mxu1 }
 0x4ba   : > { %v5106_v48 = vpop.f32.mrf.mxu1 }
 0x4bb   : > { %v5107_v23 = vadd.f32 %v5106_v48, %v5105_v29  ;;  %v1817_v48 = vld [vmem:[%s6320_s23 + $0x78] sm:$0xff] }
 0x4bc   : > { %v5108_v36 = vpop.f32.mrf.mxu1 }
 0x4bd   : > { %v2645_v62 = vpack.c.bf16 %v5107_v23, %v5104_v40  ;;  %v5435_v23 = vld [vmem:[%s5868_s27 + $0x70] ss:$8 sps:$4 sm:$0xff]  }
 0x4be   : > { %v5109_v51 = vpop.f32.mrf.mxu1 }
 0x4bf   : > { %5273 = vmatmul.mubr.bf16.gmra.mxu1 %v2645_v62  ;;  %v5110_v54 = vadd.f32 %v5109_v51, %v5108_v36  ;;  %v5437_v36 = vld [vmem:[%s5868_s27 + $0x74] ss:$8 sps:$4 sm:$0xff]   ;;  %v5440_v62 = vld [vmem:[%s5868_s27 + $0x64] ss:$8 sps:$4 sm:$0xff]   ;;  %v5438_v51 = vld [vmem:[%s5868_s27 + $0x60] ss:$8 sps:$4 sm:$0xff]  }
 0x4c0   : > { %v5111_v50 = vpop.f32.mrf.mxu1  ;;  %3164 = vmatprep.subr.bf16.mxu0 %v5437_v36 }
 0x4c1   : > { %3165 = vmatpush1.bf16.msra.mxu0 %v5435_v23 }
 0x4c2   : > { %v5112_v55 = vpop.f32.mrf.mxu1  ;;  %3166 = vmatprep.subr.bf16.mxu0 %v5440_v62 }
 0x4c3   : > { %v5113_v52 = vadd.f32 %v5112_v55, %v5111_v50  ;;  %v5443_v50 = vld [vmem:[%s5868_s27 + $0x54] ss:$8 sps:$4 sm:$0xff]   ;;  %v5441_v55 = vld [vmem:[%s5868_s27 + $0x50] ss:$8 sps:$4 sm:$0xff]  }
 0x4c4   : > { %v5114_v41 = vpop.f32.mrf.mxu1 }
 0x4c5   : > { %v2646_v63 = vpack.c.bf16 %v5113_v52, %v5110_v54  ;;  %3167 = vmatpush1.bf16.msra.mxu0 %v5438_v51  ;;  %v5446_v54 = vld [vmem:[%s5868_s27 + $0x44] ss:$8 sps:$4 sm:$0xff]   ;;  %v5444_v52 = vld [vmem:[%s5868_s27 + $0x40] ss:$8 sps:$4 sm:$0xff]  }
 0x4c6   : > { %v5115_v0 = vpop.f32.mrf.mxu1  ;;  %3168 = vmatprep.subr.bf16.mxu0 %v5443_v50  ;;  %v5456_v51 = vld [vmem:[%s5868_s27] ss:$8 sps:$4 sm:$0xff]   ;;  %v5458_v50 = vld [vmem:[%s5868_s27 + $0x4] ss:$8 sps:$4 sm:$0xff]  }
 0x4c7   : > { %5276 = vmatprep.mubr.bf16.mxu1 %v2646_v63  ;;  %v5116_v44 = vadd.f32 %v5115_v0, %v5114_v41  ;;  %v5449_v41 = vld [vmem:[%s5868_s27 + $0x34] ss:$8 sps:$4 sm:$0xff]   ;;  %v5447_v63 = vld [vmem:[%s5868_s27 + $0x30] ss:$8 sps:$4 sm:$0xff]  }
 0x4c8   : > { %v5117_v8 = vpop.f32.mrf.mxu1 }
 0x4c9   : > { %3169 = vmatpush1.bf16.msra.mxu0 %v5441_v55  ;;  %v5724_v55 = vmov 0  }
 0x4ca   : > { %v5118_v1 = vpop.f32.mrf.mxu1  ;;  %3170 = vmatprep.subr.bf16.mxu0 %v5446_v54  ;;  %3196 = vmatprep.mubr.bf16.mxu0 %v5724_v55 }
 0x4cb   : > { %v5119_v27 = vadd.f32 %v5118_v1, %v5117_v8 }
 0x4cd   : > { %v2647_v3 = vpack.c.bf16 %v5119_v27, %v5116_v44  ;;  %3171 = vmatpush1.bf16.msra.mxu0 %v5444_v52 }
 0x4ce   : > { %3172 = vmatprep.subr.bf16.mxu0 %v5449_v41 }
 0x4cf   : > { %5277 = vmatmul.mubr.bf16.gmra.mxu1 %v2647_v3 }
 0x4d1   : > { %3173 = vmatpush1.bf16.msra.mxu0 %v5447_v63 }
 0x55f   : > { %v5266_v7 = vpop.f32.mrf.mxu1 }
 0x560   : > { %v6328_v6 = vadd.f32 %v5266_v7, %v1804_v57 }
 0x561   : > { %v2746_v60 = vpop.f32.mrf.mxu1 }
 0x562   : > { %v6323_v28 = vadd.f32 %v2746_v60, %v1802_v9 }
 0x563   : > { %v5267_v13 = vpop.f32.mrf.mxu1 }
 0x564   : > { %2827 = vadd.xlane.f32.xlu0 %v6323_v28  ;;  %v6335_v61 = vadd.f32 %v5267_v13, %v1805_v49 }
 0x565   : > { %v2749_v11 = vpop.f32.mrf.mxu1 }
 0x566   : > { %v6330_v46 = vadd.f32 %v2749_v11, %v1803_v14 }
 0x568   : > { %2829 = vadd.xlane.f32.xlu1 %v6330_v46  ;;  %2831 = vadd.xlane.f32.xlu0 %v6328_v6 }
 0x56c   : > { %2833 = vadd.xlane.f32.xlu1 %v6335_v61 }
 0x56f   : > { %v5270_v25 = vpop.f32.mrf.mxu1 }
 0x570   : > { %v6344_v10 = vadd.f32 %v5270_v25, %v1808_v53 }
 0x571   : > { %v2762_v18 = vpop.f32.mrf.mxu1 }
 0x572   : > { %v6339_v38 = vadd.f32 %v2762_v18, %v1806_v15 }
 0x573   : > { %v5271_v58 = vpop.f32.mrf.mxu1 }
 0x574   : > { %2835 = vadd.xlane.f32.xlu0 %v6339_v38  ;;  %v6351_v5 = vadd.f32 %v5271_v58, %v1809_v39 }
 0x575   : > { %v2765_v33 = vpop.f32.mrf.mxu1 }
 0x576   : > { %v6346_v35 = vadd.f32 %v2765_v33, %v1807_v32 }
 0x578   : > { %2837 = vadd.xlane.f32.xlu1 %v6346_v35  ;;  %2839 = vadd.xlane.f32.xlu0 %v6344_v10 }
 0x57c   : > { %2841 = vadd.xlane.f32.xlu1 %v6351_v5 }
 0x57f   : > { %v5274_v37 = vpop.f32.mrf.mxu1 }
 0x580   : > { %v6360_v4 = vadd.f32 %v5274_v37, %v1812_v20 }
 0x581   : > { %v2778_v45 = vpop.f32.mrf.mxu1 }
 0x582   : > { %v6355_v56 = vadd.f32 %v2778_v45, %v1810_v17 }
 0x583   : > { %v5275_v21 = vpop.f32.mrf.mxu1 }
 0x584   : > { %2843 = vadd.xlane.f32.xlu0 %v6355_v56  ;;  %v6367_v43 = vadd.f32 %v5275_v21, %v1813_v42  ;;  %v5450_v42 = vld [vmem:[%s5868_s27 + $0x20] ss:$8 sps:$4 sm:$0xff]  }
 0x585   : > { %v2781_v24 = vpop.f32.mrf.mxu1 }
 0x586   : > { %v6362_v59 = vadd.f32 %v2781_v24, %v1811_v2  ;;  %v5452_v2 = vld [vmem:[%s5868_s27 + $0x24] ss:$8 sps:$4 sm:$0xff]  }
 0x587   : > { %3174 = vmatprep.subr.bf16.mxu0 %v5452_v2 }
 0x588   : > { %2845 = vadd.xlane.f32.xlu1 %v6362_v59  ;;  %2847 = vadd.xlane.f32.xlu0 %v6360_v4 }
 0x589   : > { %3175 = vmatpush1.bf16.msra.mxu0 %v5450_v42 }
 0x58c   : > { %2849 = vadd.xlane.f32.xlu1 %v6367_v43 }
 0x58f   : > { %v5278_v26 = vpop.f32.mrf.mxu1 }
 0x590   : > { %v6376_v19 = vadd.f32 %v5278_v26, %v1816_v31 }
 0x591   : > { %v2794_v12 = vpop.f32.mrf.mxu1 }
 0x592   : > { %v6371_v30 = vadd.f32 %v2794_v12, %v1814_v16 }
 0x593   : > { %v5279_v34 = vpop.f32.mrf.mxu1 }
 0x594   : > { %2851 = vadd.xlane.f32.xlu0 %v6371_v30  ;;  %v6383_v40 = vadd.f32 %v5279_v34, %v1817_v48  ;;  %v5455_v34 = vld [vmem:[%s5868_s27 + $0x14] ss:$8 sps:$4 sm:$0xff]  }
 0x595   : > { %v2797_v47 = vpop.f32.mrf.mxu1  ;;  %3176 = vmatprep.subr.bf16.mxu0 %v5455_v34 }
 0x596   : > { %v6378_v29 = vadd.f32 %v2797_v47, %v1815_v22 }
 0x598   : > { %2853 = vadd.xlane.f32.xlu1 %v6378_v29  ;;  %2855 = vadd.xlane.f32.xlu0 %v6376_v19 }
 0x59c   : > { %2857 = vadd.xlane.f32.xlu1 %v6383_v40 }
 0x5ed   : > { %v2828_v0 = vpop.xlane.xlu0 %2827 }
 0x5ee   : > { %v2860_v8 = vmul.f32 0.0078125, %v2828_v0 }
 0x5f0   : > { %v6397_v1 = vsub.f32 %v6323_v28, %v2860_v8 }
 0x5f1   : > { %v2830_v44 = vpop.xlane.xlu1 %2829  ;;  %v2832_v27 = vpop.xlane.xlu0 %2831 }
 0x5f2   : > { %v2861_v3 = vmul.f32 0.0078125, %v2830_v44  ;;  %v2862_v7 = vmul.f32 0.0078125, %v2832_v27  ;;  %v2892_v9 = vmul.f32 %v6397_v1, %v6397_v1 }
 0x5f4   : > { %v6402_v60 = vsub.f32 %v6330_v46, %v2861_v3  ;;  %v6405_v57 = vsub.f32 %v6328_v6, %v2862_v7  ;;  %2908 = vadd.xlane.f32.xlu0 %v2892_v9 }
 0x5f5   : > { %v2834_v13 = vpop.xlane.xlu1 %2833 }
 0x5f6   : > { %v2863_v14 = vmul.f32 0.0078125, %v2834_v13  ;;  %v2893_v28 = vmul.f32 %v6402_v60, %v6402_v60  ;;  %v2894_v11 = vmul.f32 %v6405_v57, %v6405_v57 }
 0x5f8   : > { %v6412_v49 = vsub.f32 %v6335_v61, %v2863_v14  ;;  %2910 = vadd.xlane.f32.xlu1 %v2893_v28  ;;  %2912 = vadd.xlane.f32.xlu0 %v2894_v11  ;;  %v5460_v28 = vld [vmem:[%s7172_s13 + $0x38] sm:$0xff]   ;;  %v5461_v11 = vld [vmem:[%s7172_s13 + $0x70] sm:$0xff]  }
 0x5fa   : > { %v2895_v46 = vmul.f32 %v6412_v49, %v6412_v49 }
 0x5fc   : > { %2914 = vadd.xlane.f32.xlu1 %v2895_v46  ;;  %v5462_v46 = vld [vmem:[%s7172_s13 + $0x30] sm:$0xff]  }
 0x5fd   : > { %v2836_v6 = vpop.xlane.xlu0 %2835 }
 0x5fe   : > { %v2864_v25 = vmul.f32 0.0078125, %v2836_v6  ;;  %v5463_v6 = vld [vmem:[%s7172_s13 + $0x68] sm:$0xff]  }
 0x600   : > { %v6417_v15 = vsub.f32 %v6339_v38, %v2864_v25  ;;  %v5465_v25 = vld [vmem:[%s7172_s13 + $0x60] sm:$0xff]  }
 0x601   : > { %v2838_v18 = vpop.xlane.xlu1 %2837  ;;  %v2840_v53 = vpop.xlane.xlu0 %2839 }
 0x602   : > { %v2865_v58 = vmul.f32 0.0078125, %v2838_v18  ;;  %v2866_v32 = vmul.f32 0.0078125, %v2840_v53  ;;  %v2896_v61 = vmul.f32 %v6417_v15, %v6417_v15  ;;  %v5466_v18 = vld [vmem:[%s7172_s13 + $0x20] sm:$0xff]   ;;  %v5467_v53 = vld [vmem:[%s7172_s13 + $0x58] sm:$0xff]  }
 0x604   : > { %v6422_v33 = vsub.f32 %v6346_v35, %v2865_v58  ;;  %v6425_v39 = vsub.f32 %v6344_v10, %v2866_v32  ;;  %2916 = vadd.xlane.f32.xlu0 %v2896_v61  ;;  %v5468_v58 = vld [vmem:[%s7172_s13 + $0x18] sm:$0xff]  }
 0x605   : > { %v2842_v37 = vpop.xlane.xlu1 %2841 }
 0x606   : > { %v2867_v17 = vmul.f32 0.0078125, %v2842_v37  ;;  %v2897_v38 = vmul.f32 %v6422_v33, %v6422_v33  ;;  %v2898_v45 = vmul.f32 %v6425_v39, %v6425_v39 }
 0x608   : > { %v6432_v20 = vsub.f32 %v6351_v5, %v2867_v17  ;;  %2918 = vadd.xlane.f32.xlu1 %v2897_v38  ;;  %2920 = vadd.xlane.f32.xlu0 %v2898_v45 }
 0x60a   : > { %v2899_v35 = vmul.f32 %v6432_v20, %v6432_v20 }
 0x60c   : > { %2922 = vadd.xlane.f32.xlu1 %v2899_v35 }
 0x60d   : > { %v2844_v10 = vpop.xlane.xlu0 %2843 }
 0x60e   : > { %v2868_v21 = vmul.f32 0.0078125, %v2844_v10 }
 0x610   : > { %v6438_v24 = vsub.f32 %v6355_v56, %v2868_v21  ;;  %v5453_v56 = vld [vmem:[%s5868_s27 + $0x10] ss:$8 sps:$4 sm:$0xff]   ;;  %s7173_s27 = scalar_lea.vmem %s7116_s7, %s7202_s15 }
 0x611   : > { %v2846_v26 = vpop.xlane.xlu1 %2845  ;;  %v2848_v16 = vpop.xlane.xlu0 %2847  ;;  %3177 = vmatpush1.bf16.msra.mxu0 %v5453_v56  ;;  %v6499_v56 = vld [vmem:[%s7173_s27] ss:$0 sm:$0xff] }
 0x612   : > { %v2869_v5 = vmul.f32 0.0078125, %v2846_v26  ;;  %v2870_v12 = vmul.f32 0.0078125, %v2848_v16  ;;  %v2900_v31 = vmul.f32 %v6438_v24, %v6438_v24  ;;  %3178 = vmatprep.subr.bf16.mxu0 %v5458_v50 }
 0x614   : > { %v6445_v22 = vsub.f32 %v6362_v59, %v2869_v5  ;;  %v6448_v47 = vsub.f32 %v6360_v4, %v2870_v12  ;;  %2924 = vadd.xlane.f32.xlu0 %v2900_v31 }
 0x615   : > { %v2850_v48 = vpop.xlane.xlu1 %2849  ;;  %3179 = vmatpush1.bf16.msra.mxu0 %v5456_v51 }
 0x616   : > { %v2871_v23 = vmul.f32 0.0078125, %v2850_v48  ;;  %v2901_v36 = vmul.f32 %v6445_v22, %v6445_v22  ;;  %v2902_v62 = vmul.f32 %v6448_v47, %v6448_v47 }
 0x618   : > { %v6458_v59 = vsub.f32 %v6367_v43, %v2871_v23  ;;  %2926 = vadd.xlane.f32.xlu1 %v2901_v36  ;;  %2928 = vadd.xlane.f32.xlu0 %v2902_v62 }
 0x61a   : > { %v2903_v4 = vmul.f32 %v6458_v59, %v6458_v59 }
 0x61c   : > { %2930 = vadd.xlane.f32.xlu1 %v2903_v4 }
 0x61d   : > { %v2852_v54 = vpop.xlane.xlu0 %2851 }
 0x61e   : > { %v2872_v52 = vmul.f32 0.0078125, %v2852_v54 }
 0x620   : > { %v6464_v41 = vsub.f32 %v6371_v30, %v2872_v52 }
 0x621   : > { %v2854_v63 = vpop.xlane.xlu1 %2853  ;;  %v2856_v0 = vpop.xlane.xlu0 %2855 }
 0x622   : > { %v2873_v43 = vmul.f32 0.0078125, %v2854_v63  ;;  %v2874_v8 = vmul.f32 0.0078125, %v2856_v0  ;;  %v2904_v44 = vmul.f32 %v6464_v41, %v6464_v41  ;;  %v6508_v63 = vld [vmem:[%s7174_s0] ss:$0 sm:$0xff] }
 0x624   : > { %v6469_v27 = vsub.f32 %v6378_v29, %v2873_v43  ;;  %v6472_v3 = vsub.f32 %v6376_v19, %v2874_v8  ;;  %2932 = vadd.xlane.f32.xlu0 %v2904_v44  ;;  %v5459_v29 = vld [vmem:[%s7172_s13 + $0x78] sm:$0xff]  }
 0x625   : > { %v2858_v30 = vpop.xlane.xlu1 %2857  ;;  %5136 = vmatprep.subr.bf16.mxu1 %v5459_v29 }
 0x626   : > { %v2875_v7 = vmul.f32 0.0078125, %v2858_v30  ;;  %v2905_v9 = vmul.f32 %v6469_v27, %v6469_v27  ;;  %v2906_v13 = vmul.f32 %v6472_v3, %v6472_v3  ;;  %5137 = vmatpush3.bf16.msra.mxu1 %v5460_v28 }
 0x627   : > { %5138 = vmatprep.subr.bf16.mxu1 %v5461_v11 }
 0x628   : > { %v6479_v14 = vsub.f32 %v6383_v40, %v2875_v7  ;;  %2934 = vadd.xlane.f32.xlu1 %v2905_v9  ;;  %2936 = vadd.xlane.f32.xlu0 %v2906_v13  ;;  %v5464_v40 = vld [vmem:[%s7172_s13 + $0x28] sm:$0xff]  }
 0x62a   : > { %v2907_v19 = vmul.f32 %v6479_v14, %v6479_v14  ;;  %5139 = vmatpush3.bf16.msra.mxu1 %v5462_v46 }
 0x62b   : > { %5140 = vmatprep.subr.bf16.mxu1 %v5463_v6 }
 0x62c   : > { %2938 = vadd.xlane.f32.xlu1 %v2907_v19 }
 0x62e   : > { %5141 = vmatpush3.bf16.msra.mxu1 %v5464_v40 }
 0x62f   : > { %5142 = vmatprep.subr.bf16.mxu1 %v5465_v25 }
 0x632   : > { %5143 = vmatpush3.bf16.msra.mxu1 %v5466_v18 }
 0x633   : > { %5144 = vmatprep.subr.bf16.mxu1 %v5467_v53 }
 0x636   : > { %5145 = vmatpush3.bf16.msra.mxu1 %v5468_v58 }
 0x67d   : > { %v2909_v32 = vpop.xlane.xlu0 %2908 }
 0x67e   : > { %v2940_v61 = vmul.f32 0.0078125, %v2909_v32 }
 0x680   : > { %v2956_v37 = vadd.f32 1e-05, %v2940_v61 }
 0x681   : > { %v2911_v17 = vpop.xlane.xlu1 %2910  ;;  %v2913_v38 = vpop.xlane.xlu0 %2912 }
 0x682   : > { %5571 = vrsqrt.f32 %v2956_v37  ;;  %v2941_v45 = vmul.f32 0.0078125, %v2911_v17  ;;  %v2942_v35 = vmul.f32 0.0078125, %v2913_v38 }
 0x684   : > { %v2957_v10 = vadd.f32 1e-05, %v2941_v45  ;;  %v2958_v21 = vadd.f32 1e-05, %v2942_v35 }
 0x685   : > { %v2915_v2 = vpop.xlane.xlu1 %2914 }
 0x686   : > { %5573 = vrsqrt.f32 %v2957_v10  ;;  %v2943_v42 = vmul.f32 0.0078125, %v2915_v2 }
 0x687   : > { %5575 = vrsqrt.f32 %v2958_v21 }
 0x688   : > { %v2959_v26 = vadd.f32 1e-05, %v2943_v42 }
 0x68a   : > { %5577 = vrsqrt.f32 %v2959_v26 }
 0x68d   : > { %v2917_v16 = vpop.xlane.xlu0 %2916 }
 0x68e   : > { %v2944_v5 = vmul.f32 0.0078125, %v2917_v16 }
 0x68f   : > { %v5572_v12 = vpop.eup %5571 }
 0x690   : > { %v2988_v31 = vmul.f32 %v5572_v12, %v6397_v1  ;;  %v2960_v34 = vadd.f32 1e-05, %v2944_v5 }
 0x691   : > { %v2919_v48 = vpop.xlane.xlu1 %2918  ;;  %v2921_v23 = vpop.xlane.xlu0 %2920 }
 0x692   : > { %5579 = vrsqrt.f32 %v2960_v34  ;;  %v2945_v36 = vmul.f32 0.0078125, %v2919_v48  ;;  %v2946_v62 = vmul.f32 0.0078125, %v2921_v23  ;;  %v3010_v50 = vmul.f32 %v6499_v56, %v2988_v31 }
 0x693   : > { %v5574_v51 = vpop.eup %5573 }
 0x694   : > { %v5576_v4 = vpop.eup %5575  ;;  %v2989_v54 = vmul.f32 %v5574_v51, %v6402_v60  ;;  %v2961_v52 = vadd.f32 1e-05, %v2945_v36  ;;  %v2962_v1 = vadd.f32 1e-05, %v2946_v62  ;;  %v6512_v30 = vadd.f32 %v6508_v63, %v3010_v50 }
 0x695   : > { %v2923_v0 = vpop.xlane.xlu1 %2922  ;;  %v2990_v7 = vmul.f32 %v5576_v4, %v6405_v57 }
 0x696   : > { %5581 = vrsqrt.f32 %v2961_v52  ;;  %v2947_v43 = vmul.f32 0.0078125, %v2923_v0  ;;  %v3011_v8 = vmul.f32 %v6499_v56, %v2989_v54 }
 0x697   : > { %v5578_v44 = vpop.eup %5577  ;;  %5583 = vrsqrt.f32 %v2962_v1  ;;  %v3012_v28 = vmul.f32 %v6499_v56, %v2990_v7 }
 0x698   : > { %v2963_v60 = vadd.f32 1e-05, %v2947_v43  ;;  %v6516_v9 = vadd.f32 %v6508_v63, %v3011_v8  ;;  %v2991_v13 = vmul.f32 %v5578_v44, %v6412_v49 }
 0x699   : > { %v6528_v49 = vadd.f32 %v6508_v63, %v3012_v28 }
 0x69a   : > { %5585 = vrsqrt.f32 %v2963_v60  ;;  %v3048_v19 = vpack.c.bf16 %v6516_v9, %v6512_v30  ;;  %v3013_v29 = vmul.f32 %v6499_v56, %v2991_v13 }
 0x69c   : > { %3197 = vmatmul.mubr.bf16.vlgmr.msra.gmra.mxu0 %v3048_v19  ;;  %v6525_v46 = vadd.f32 %v6508_v63, %v3013_v29 }
 0x69d   : > { %v2925_v11 = vpop.xlane.xlu0 %2924  ;;  %3206 = vmatprep.mubr.bf16.mxu0 %v5724_v55 }
 0x69e   : > { %v2948_v57 = vmul.f32 0.0078125, %v2925_v11  ;;  %v3049_v61 = vpack.c.bf16 %v6525_v46, %v6528_v49 }
 0x69f   : > { %v5580_v6 = vpop.eup %5579 }
 0x6a0   : > { %v2964_v40 = vadd.f32 1e-05, %v2948_v57  ;;  %v2992_v25 = vmul.f32 %v5580_v6, %v6417_v15 }
 0x6a1   : > { %v2927_v18 = vpop.xlane.xlu1 %2926  ;;  %v2929_v53 = vpop.xlane.xlu0 %2928 }
 0x6a2   : > { %5587 = vrsqrt.f32 %v2964_v40  ;;  %v2949_v58 = vmul.f32 0.0078125, %v2927_v18  ;;  %v2950_v32 = vmul.f32 0.0078125, %v2929_v53  ;;  %v3014_v17 = vmul.f32 %v6499_v56, %v2992_v25 }
 0x6a3   : > { %v5582_v37 = vpop.eup %5581 }
 0x6a4   : > { %v2965_v38 = vadd.f32 1e-05, %v2949_v58  ;;  %v2966_v45 = vadd.f32 1e-05, %v2950_v32  ;;  %3207 = vmatmul.mubr.bf16.gmra.mxu0 %v3049_v61  ;;  %v2993_v35 = vmul.f32 %v5582_v37, %v6422_v33  ;;  %v5584_v10 = vpop.eup %5583  ;;  %v6538_v26 = vadd.f32 %v6508_v63, %v3014_v17 }
 0x6a5   : > { %v2931_v21 = vpop.xlane.xlu1 %2930  ;;  %3216 = vmatprep.mubr.bf16.mxu0 %v5724_v55  ;;  %v2994_v12 = vmul.f32 %v5584_v10, %v6425_v39 }
 0x6a6   : > { %5589 = vrsqrt.f32 %v2965_v38  ;;  %v2951_v15 = vmul.f32 0.0078125, %v2931_v21  ;;  %v3015_v2 = vmul.f32 %v6499_v56, %v2993_v35 }
 0x6a7   : > { %v5586_v42 = vpop.eup %5585  ;;  %5591 = vrsqrt.f32 %v2966_v45  ;;  %v3016_v48 = vmul.f32 %v6499_v56, %v2994_v12 }
 0x6a8   : > { %v2967_v16 = vadd.f32 1e-05, %v2951_v15  ;;  %v6541_v5 = vadd.f32 %v6508_v63, %v3015_v2  ;;  %v2995_v33 = vmul.f32 %v5586_v42, %v6432_v20 }
 0x6a9   : > { %v6554_v20 = vadd.f32 %v6508_v63, %v3016_v48  ;;  %v5472_v48 = vld [vmem:[%s7172_s13 + $0x8] sm:$0xff]  }
 0x6aa   : > { %5593 = vrsqrt.f32 %v2967_v16  ;;  %v3050_v31 = vpack.c.bf16 %v6541_v5, %v6538_v26  ;;  %v3017_v34 = vmul.f32 %v6499_v56, %v2995_v33  ;;  %v5469_v33 = vld [vmem:[%s7172_s13 + $0x50] sm:$0xff]  }
 0x6ab   : > { %5146 = vmatprep.subr.bf16.mxu1 %v5469_v33 }
 0x6ac   : > { %3217 = vmatmul.mubr.bf16.gmra.mxu0 %v3050_v31  ;;  %v6551_v62 = vadd.f32 %v6508_v63, %v3017_v34  ;;  %v5470_v31 = vld [vmem:[%s7172_s13 + $0x10] sm:$0xff]   ;;  %v5471_v34 = vld [vmem:[%s7172_s13 + $0x48] sm:$0xff]  }
 0x6ad   : > { %v2933_v23 = vpop.xlane.xlu0 %2932  ;;  %3226 = vmatprep.mubr.bf16.mxu0 %v5724_v55  ;;  %5147 = vmatpush3.bf16.msra.mxu1 %v5470_v31 }
 0x6ae   : > { %v2952_v36 = vmul.f32 0.0078125, %v2933_v23  ;;  %v3051_v0 = vpack.c.bf16 %v6551_v62, %v6554_v20  ;;  %5148 = vmatprep.subr.bf16.mxu1 %v5471_v34  ;;  %v3074_v23 = vlaneseq }
 0x6af   : > { %v5588_v51 = vpop.eup %5587 }
 0x6b0   : > { %v2968_v39 = vadd.f32 1e-05, %v2952_v36  ;;  %v2996_v50 = vmul.f32 %v5588_v51, %v6438_v24 }
 0x6b1   : > { %v2935_v4 = vpop.xlane.xlu1 %2934  ;;  %v2937_v54 = vpop.xlane.xlu0 %2936  ;;  %5149 = vmatpush3.bf16.msra.mxu1 %v5472_v48 }
 0x6b2   : > { %5595 = vrsqrt.f32 %v2968_v39  ;;  %v2953_v52 = vmul.f32 0.0078125, %v2935_v4  ;;  %v2954_v1 = vmul.f32 0.0078125, %v2937_v54  ;;  %v3018_v8 = vmul.f32 %v6499_v56, %v2996_v50  ;;  %v3072_v39 = vld [vmem:[%s7175_s1] sm:$0x3] }
 0x6b3   : > { %v5590_v43 = vpop.eup %5589 }
 0x6b4   : > { %v5592_v44 = vpop.eup %5591  ;;  %v2969_v7 = vadd.f32 1e-05, %v2953_v52  ;;  %v2970_v60 = vadd.f32 1e-05, %v2954_v1  ;;  %3227 = vmatmul.mubr.bf16.gmra.mxu0 %v3051_v0  ;;  %v2997_v13 = vmul.f32 %v5590_v43, %v6445_v22  ;;  %v6564_v11 = vadd.f32 %v6508_v63, %v3018_v8 }
 0x6b5   : > { %v2939_v19 = vpop.xlane.xlu1 %2938  ;;  %3236 = vmatprep.mubr.bf16.mxu0 %v5724_v55  ;;  %v2998_v57 = vmul.f32 %v5592_v44, %v6448_v47 }
 0x6b6   : > { %5597 = vrsqrt.f32 %v2969_v7  ;;  %v2955_v24 = vmul.f32 0.0078125, %v2939_v19  ;;  %v3019_v29 = vmul.f32 %v6499_v56, %v2997_v13 }
 0x6b7   : > { %v5594_v28 = vpop.eup %5593  ;;  %5599 = vrsqrt.f32 %v2970_v60  ;;  %v3020_v53 = vmul.f32 %v6499_v56, %v2998_v57 }
 0x6b8   : > { %v2971_v6 = vadd.f32 1e-05, %v2955_v24  ;;  %v6568_v40 = vadd.f32 %v6508_v63, %v3019_v29  ;;  %v2999_v22 = vmul.f32 %v5594_v28, %v6458_v59 }
 0x6b9   : > { %v6580_v32 = vadd.f32 %v6508_v63, %v3020_v53 }
 0x6ba   : > { %5601 = vrsqrt.f32 %v2971_v6  ;;  %v3052_v25 = vpack.c.bf16 %v6568_v40, %v6564_v11  ;;  %v3021_v18 = vmul.f32 %v6499_v56, %v2999_v22 }
 0x6bc   : > { %3237 = vmatmul.mubr.bf16.gmra.mxu0 %v3052_v25  ;;  %v6577_v47 = vadd.f32 %v6508_v63, %v3021_v18 }
 0x6bd   : > { %3246 = vmatprep.mubr.bf16.mxu0 %v5724_v55 }
 0x6be   : > { %v3053_v61 = vpack.c.bf16 %v6577_v47, %v6580_v32 }
 0x6bf   : > { %v5596_v58 = vpop.eup %5595 }
 0x6c0   : > { %v3000_v59 = vmul.f32 %v5596_v58, %v6464_v41 }
 0x6c2   : > { %v3022_v38 = vmul.f32 %v6499_v56, %v3000_v59 }
 0x6c3   : > { %v5598_v37 = vpop.eup %5597 }
 0x6c4   : > { %3247 = vmatmul.mubr.bf16.gmra.mxu0 %v3053_v61  ;;  %v3001_v17 = vmul.f32 %v5598_v37, %v6469_v27  ;;  %v5600_v45 = vpop.eup %5599  ;;  %v6590_v21 = vadd.f32 %v6508_v63, %v3022_v38 }
 0x6c5   : > { %3256 = vmatprep.mubr.bf16.mxu0 %v5724_v55  ;;  %v3002_v15 = vmul.f32 %v5600_v45, %v6472_v3 }
 0x6c6   : > { %v3023_v35 = vmul.f32 %v6499_v56, %v3001_v17 }
 0x6c7   : > { %v5602_v10 = vpop.eup %5601  ;;  %v3024_v16 = vmul.f32 %v6499_v56, %v3002_v15 }
 0x6c8   : > { %v6593_v41 = vadd.f32 %v6508_v63, %v3023_v35  ;;  %v3003_v27 = vmul.f32 %v5602_v10, %v6479_v14 }
 0x6c9   : > { %v6606_v3 = vadd.f32 %v6508_v63, %v3024_v16 }
 0x6ca   : > { %v3054_v2 = vpack.c.bf16 %v6593_v41, %v6590_v21  ;;  %v3025_v42 = vmul.f32 %v6499_v56, %v3003_v27  ;;  %v5474_v56 = vld [vmem:[%s7172_s13] sm:$0xff]  }
 0x6cc   : > { %3257 = vmatmul.mubr.bf16.gmra.mxu0 %v3054_v2  ;;  %v6603_v12 = vadd.f32 %v6508_v63, %v3025_v42  ;;  %v3075_v63 = vshrl.u32 %v3074_v23, 7 }
 0x6cd   : > { %3266 = vmatprep.mubr.bf16.mxu0 %v5724_v55  ;;  %v5473_v55 = vld [vmem:[%s7172_s13 + $0x40] sm:$0xff]  }
 0x6ce   : > { %v3055_v14 = vpack.c.bf16 %v6603_v12, %v6606_v3  ;;  %5150 = vmatprep.subr.bf16.mxu1 %v5473_v55  ;;  %v3080_v36 = vsub.s32 1, %v3075_v63  ;;  %v3076_v51 = vsub.s32 0, %v3075_v63 }
 0x6cf   : > { %5151 = vmatpush3.bf16.msra.mxu1 %v5474_v56 }
 0x6d0   : > { %v6617_v4 = vrot.slane %v3072_v39, %v3080_v36  ;;  %v6619_v54 = vrot.slane %v3072_v39, %v3076_v51 }
 0x6d4   : > { %3267 = vmatmul.mubr.bf16.gmra.mxu0 %v3055_v14 }
 0x75c   : > { %v3198_v50 = vpop.f32.mrf.mxu0 }
 0x75d   : > { %v3199_v8 = vadd.f32 %v3198_v50, %v6619_v54 }
 0x75e   : > { %v3200_v52 = vpop.f32.mrf.mxu0 }
 0x75f   : > { %v3201_v0 = vadd.f32 %v3200_v52, %v6617_v4  ;;  %v3277_v29 = vmax.f32 %v3199_v8, 0.0 }
 0x760   : > { %v3202_v1 = vpop.f32.mrf.mxu0 }
 0x761   : > { %v3203_v43 = vadd.f32 %v3202_v1, %v6619_v54  ;;  %v3278_v19 = vmax.f32 %v3201_v0, 0.0 }
 0x762   : > { %v3204_v44 = vpop.f32.mrf.mxu0 }
 0x763   : > { %v3205_v7 = vadd.f32 %v3204_v44, %v6617_v4  ;;  %v3279_v60 = vmax.f32 %v3203_v43, 0.0 }
 0x764   : > { %v3208_v13 = vpop.f32.mrf.mxu0 }
 0x765   : > { %v3280_v24 = vmax.f32 %v3205_v7, 0.0  ;;  %v3309_v6 = vpack.c.bf16 %v3279_v60, %v3277_v29  ;;  %v3209_v53 = vadd.f32 %v3208_v13, %v6619_v54 }
 0x766   : > { %v3210_v28 = vpop.f32.mrf.mxu0 }
 0x767   : > { %v3310_v57 = vpack.c.bf16 %v3280_v24, %v3278_v19  ;;  %v3211_v25 = vadd.f32 %v3210_v28, %v6617_v4  ;;  %v3281_v45 = vmax.f32 %v3209_v53, 0.0 }
 0x768   : > { %v3212_v22 = vpop.f32.mrf.mxu0 }
 0x769   : > { %v3213_v18 = vadd.f32 %v3212_v22, %v6619_v54  ;;  %3492 = vmatprep.mubr.bf16.mxu1 %v3310_v57  ;;  %v3282_v17 = vmax.f32 %v3211_v25, 0.0 }
 0x76a   : > { %v3214_v58 = vpop.f32.mrf.mxu0  ;;  %3493 = vmatmul.mubr.bf16.vlgmr.msra.gmra.mxu1 %v3309_v6 }
 0x76b   : > { %v3215_v59 = vadd.f32 %v3214_v58, %v6617_v4  ;;  %v3283_v61 = vmax.f32 %v3213_v18, 0.0 }
 0x76c   : > { %v3218_v37 = vpop.f32.mrf.mxu0 }
 0x76d   : > { %v3284_v38 = vmax.f32 %v3215_v59, 0.0  ;;  %v3311_v15 = vpack.c.bf16 %v3283_v61, %v3281_v45  ;;  %v3219_v16 = vadd.f32 %v3218_v37, %v6619_v54 }
 0x76e   : > { %v3220_v35 = vpop.f32.mrf.mxu0 }
 0x76f   : > { %v3312_v10 = vpack.c.bf16 %v3284_v38, %v3282_v17  ;;  %v3221_v2 = vadd.f32 %v3220_v35, %v6617_v4  ;;  %v3285_v56 = vmax.f32 %v3219_v16, 0.0 }
 0x770   : > { %v3222_v27 = vpop.f32.mrf.mxu0 }
 0x771   : > { %v3223_v42 = vadd.f32 %v3222_v27, %v6619_v54  ;;  %3500 = vmatprep.mubr.bf16.mxu1 %v3312_v10  ;;  %v3286_v48 = vmax.f32 %v3221_v2, 0.0 }
 0x772   : > { %v3224_v14 = vpop.f32.mrf.mxu0  ;;  %3501 = vmatmul.mubr.bf16.gmra.mxu1 %v3311_v15 }
 0x773   : > { %v3225_v33 = vadd.f32 %v3224_v14, %v6617_v4  ;;  %v3287_v31 = vmax.f32 %v3223_v42, 0.0 }
 0x774   : > { %v3228_v34 = vpop.f32.mrf.mxu0 }
 0x775   : > { %v3288_v55 = vmax.f32 %v3225_v33, 0.0  ;;  %v3313_v36 = vpack.c.bf16 %v3287_v31, %v3285_v56  ;;  %v3229_v52 = vadd.f32 %v3228_v34, %v6619_v54 }
 0x776   : > { %v3230_v23 = vpop.f32.mrf.mxu0 }
 0x777   : > { %v3314_v63 = vpack.c.bf16 %v3288_v55, %v3286_v48  ;;  %v3231_v39 = vadd.f32 %v3230_v23, %v6617_v4  ;;  %v3289_v60 = vmax.f32 %v3229_v52, 0.0 }
 0x778   : > { %v3232_v51 = vpop.f32.mrf.mxu0 }
 0x779   : > { %v3233_v50 = vadd.f32 %v3232_v51, %v6619_v54  ;;  %3508 = vmatprep.mubr.bf16.mxu1 %v3314_v63  ;;  %v3290_v44 = vmax.f32 %v3231_v39, 0.0 }
 0x77a   : > { %v3234_v1 = vpop.f32.mrf.mxu0  ;;  %3509 = vmatmul.mubr.bf16.gmra.mxu1 %v3313_v36 }
 0x77b   : > { %v3235_v0 = vadd.f32 %v3234_v1, %v6617_v4  ;;  %v3291_v43 = vmax.f32 %v3233_v50, 0.0 }
 0x77c   : > { %v3238_v8 = vpop.f32.mrf.mxu0 }
 0x77d   : > { %v3292_v7 = vmax.f32 %v3235_v0, 0.0  ;;  %v3315_v24 = vpack.c.bf16 %v3291_v43, %v3289_v60  ;;  %v3239_v6 = vadd.f32 %v3238_v8, %v6619_v54 }
 0x77e   : > { %v3240_v13 = vpop.f32.mrf.mxu0 }
 0x77f   : > { %v3316_v19 = vpack.c.bf16 %v3292_v7, %v3290_v44  ;;  %v3241_v28 = vadd.f32 %v3240_v13, %v6617_v4  ;;  %v3293_v61 = vmax.f32 %v3239_v6, 0.0 }
 0x780   : > { %v3242_v29 = vpop.f32.mrf.mxu0 }
 0x781   : > { %v3243_v57 = vadd.f32 %v3242_v29, %v6619_v54  ;;  %3516 = vmatprep.mubr.bf16.mxu1 %v3316_v19  ;;  %v3294_v58 = vmax.f32 %v3241_v28, 0.0 }
 0x782   : > { %v3244_v22 = vpop.f32.mrf.mxu0  ;;  %3517 = vmatmul.mubr.bf16.gmra.mxu1 %v3315_v24 }
 0x783   : > { %v3245_v25 = vadd.f32 %v3244_v22, %v6617_v4  ;;  %v3295_v18 = vmax.f32 %v3243_v57, 0.0 }
 0x784   : > { %v3248_v53 = vpop.f32.mrf.mxu0 }
 0x785   : > { %v3296_v59 = vmax.f32 %v3245_v25, 0.0  ;;  %v3317_v38 = vpack.c.bf16 %v3295_v18, %v3293_v61  ;;  %v3249_v15 = vadd.f32 %v3248_v53, %v6619_v54 }
 0x786   : > { %v3250_v37 = vpop.f32.mrf.mxu0 }
 0x787   : > { %v3318_v17 = vpack.c.bf16 %v3296_v59, %v3294_v58  ;;  %v3251_v35 = vadd.f32 %v3250_v37, %v6617_v4  ;;  %v3297_v31 = vmax.f32 %v3249_v15, 0.0  ;;  %v6658_v59 = vld [vmem:[%s7177_s10] ss:$0 sm:$0xff] }
 0x788   : > { %v3252_v45 = vpop.f32.mrf.mxu0 }
 0x789   : > { %v3253_v10 = vadd.f32 %v3252_v45, %v6619_v54  ;;  %3524 = vmatprep.mubr.bf16.mxu1 %v3318_v17  ;;  %v3298_v14 = vmax.f32 %v3251_v35, 0.0 }
 0x78a   : > { %v3254_v27 = vpop.f32.mrf.mxu0  ;;  %3525 = vmatmul.mubr.bf16.gmra.mxu1 %v3317_v38 }
 0x78b   : > { %v3255_v2 = vadd.f32 %v3254_v27, %v6617_v4  ;;  %v3299_v42 = vmax.f32 %v3253_v10, 0.0 }
 0x78c   : > { %v3258_v16 = vpop.f32.mrf.mxu0 }
 0x78d   : > { %v3300_v33 = vmax.f32 %v3255_v2, 0.0  ;;  %v3319_v55 = vpack.c.bf16 %v3299_v42, %v3297_v31  ;;  %v3259_v36 = vadd.f32 %v3258_v16, %v6619_v54 }
 0x78e   : > { %v3260_v34 = vpop.f32.mrf.mxu0 }
 0x78f   : > { %v3320_v48 = vpack.c.bf16 %v3300_v33, %v3298_v14  ;;  %v3261_v23 = vadd.f32 %v3260_v34, %v6617_v4  ;;  %v3301_v43 = vmax.f32 %v3259_v36, 0.0 }
 0x790   : > { %v3262_v56 = vpop.f32.mrf.mxu0 }
 0x791   : > { %v3263_v63 = vadd.f32 %v3262_v56, %v6619_v54  ;;  %3532 = vmatprep.mubr.bf16.mxu1 %v3320_v48  ;;  %v3302_v1 = vmax.f32 %v3261_v23, 0.0 }
 0x792   : > { %v3264_v51 = vpop.f32.mrf.mxu0  ;;  %3533 = vmatmul.mubr.bf16.gmra.mxu1 %v3319_v55 }
 0x793   : > { %v3265_v39 = vadd.f32 %v3264_v51, %v6617_v4  ;;  %v3303_v50 = vmax.f32 %v3263_v63, 0.0 }
 0x794   : > { %v3268_v52 = vpop.f32.mrf.mxu0 }
 0x795   : > { %v3304_v0 = vmax.f32 %v3265_v39, 0.0  ;;  %v3321_v7 = vpack.c.bf16 %v3303_v50, %v3301_v43  ;;  %v3269_v24 = vadd.f32 %v3268_v52, %v6619_v54 }
 0x796   : > { %v3270_v8 = vpop.f32.mrf.mxu0 }
 0x797   : > { %v3322_v44 = vpack.c.bf16 %v3304_v0, %v3302_v1  ;;  %v3271_v13 = vadd.f32 %v3270_v8, %v6617_v4  ;;  %v3305_v25 = vmax.f32 %v3269_v24, 0.0 }
 0x798   : > { %v3272_v60 = vpop.f32.mrf.mxu0 }
 0x799   : > { %v3273_v19 = vadd.f32 %v3272_v60, %v6619_v54  ;;  %3540 = vmatprep.mubr.bf16.mxu1 %v3322_v44  ;;  %v3306_v6 = vmax.f32 %v3271_v13, 0.0 }
 0x79a   : > { %v3274_v29 = vpop.f32.mrf.mxu0  ;;  %3541 = vmatmul.mubr.bf16.gmra.mxu1 %v3321_v7 }
 0x79b   : > { %v3275_v28 = vadd.f32 %v3274_v29, %v6617_v4  ;;  %v3307_v57 = vmax.f32 %v3273_v19, 0.0 }
 0x79d   : > { %v3308_v22 = vmax.f32 %v3275_v28, 0.0  ;;  %v3323_v53 = vpack.c.bf16 %v3307_v57, %v3305_v25 }
 0x79f   : > { %v3324_v18 = vpack.c.bf16 %v3308_v22, %v3306_v6 }
 0x7a1   : > { %3548 = vmatprep.mubr.bf16.mxu1 %v3324_v18 }
 0x7a2   : > { %3549 = vmatmul.mubr.bf16.gmra.mxu1 %v3323_v53 }
 0x82a   : > { %v5152_v58 = vpop.f32.mrf.mxu1 }
 0x82c   : > { %v5153_v54 = vpop.f32.mrf.mxu1 }
 0x82d   : > { %v5154_v61 = vadd.f32 %v5153_v54, %v5152_v58 }
 0x82e   : > { %v5155_v37 = vpop.f32.mrf.mxu1 }
 0x82f   : > { %v3495_v4 = vadd.f32 %v5154_v61, %v6658_v59 }
 0x830   : > { %v5156_v17 = vpop.f32.mrf.mxu1 }
 0x831   : > { %v5157_v38 = vadd.f32 %v5156_v17, %v5155_v37  ;;  %v6662_v45 = vadd.f32 %v3495_v4, %v6512_v30 }
 0x832   : > { %v5158_v35 = vpop.f32.mrf.mxu1 }
 0x833   : > { %v3498_v10 = vadd.f32 %v5157_v38, %v6658_v59  ;;  %3575 = vadd.xlane.f32.xlu0 %v6662_v45 }
 0x834   : > { %v5159_v15 = vpop.f32.mrf.mxu1 }
 0x835   : > { %v5160_v27 = vadd.f32 %v5159_v15, %v5158_v35  ;;  %v6667_v2 = vadd.f32 %v3498_v10, %v6516_v9 }
 0x836   : > { %v5161_v42 = vpop.f32.mrf.mxu1 }
 0x837   : > { %v3503_v16 = vadd.f32 %v5160_v27, %v6658_v59  ;;  %3577 = vadd.xlane.f32.xlu1 %v6667_v2 }
 0x838   : > { %v5162_v14 = vpop.f32.mrf.mxu1 }
 0x839   : > { %v5163_v33 = vadd.f32 %v5162_v14, %v5161_v42  ;;  %v6672_v30 = vadd.f32 %v3503_v16, %v6528_v49 }
 0x83a   : > { %v5164_v31 = vpop.f32.mrf.mxu1 }
 0x83b   : > { %v3506_v34 = vadd.f32 %v5163_v33, %v6658_v59  ;;  %3579 = vadd.xlane.f32.xlu0 %v6672_v30 }
 0x83c   : > { %v5165_v48 = vpop.f32.mrf.mxu1 }
 0x83d   : > { %v5166_v55 = vadd.f32 %v5165_v48, %v5164_v31  ;;  %v6677_v9 = vadd.f32 %v3506_v34, %v6525_v46 }
 0x83e   : > { %v5167_v56 = vpop.f32.mrf.mxu1 }
 0x83f   : > { %v3511_v23 = vadd.f32 %v5166_v55, %v6658_v59  ;;  %3581 = vadd.xlane.f32.xlu1 %v6677_v9 }
 0x840   : > { %v5168_v63 = vpop.f32.mrf.mxu1 }
 0x841   : > { %v5169_v36 = vadd.f32 %v5168_v63, %v5167_v56  ;;  %v6682_v49 = vadd.f32 %v3511_v23, %v6538_v26 }
 0x842   : > { %v5170_v51 = vpop.f32.mrf.mxu1 }
 0x843   : > { %v3514_v39 = vadd.f32 %v5169_v36, %v6658_v59  ;;  %3583 = vadd.xlane.f32.xlu0 %v6682_v49 }
 0x844   : > { %v5171_v50 = vpop.f32.mrf.mxu1 }
 0x845   : > { %v5172_v52 = vadd.f32 %v5171_v50, %v5170_v51  ;;  %v6687_v46 = vadd.f32 %v3514_v39, %v6541_v5 }
 0x846   : > { %v5173_v1 = vpop.f32.mrf.mxu1 }
 0x847   : > { %v3519_v0 = vadd.f32 %v5172_v52, %v6658_v59  ;;  %3585 = vadd.xlane.f32.xlu1 %v6687_v46 }
 0x848   : > { %v5174_v43 = vpop.f32.mrf.mxu1 }
 0x849   : > { %v5175_v8 = vadd.f32 %v5174_v43, %v5173_v1  ;;  %v6692_v26 = vadd.f32 %v3519_v0, %v6554_v20 }
 0x84a   : > { %v5176_v44 = vpop.f32.mrf.mxu1 }
 0x84b   : > { %v3522_v7 = vadd.f32 %v5175_v8, %v6658_v59  ;;  %3587 = vadd.xlane.f32.xlu0 %v6692_v26 }
 0x84c   : > { %v5177_v60 = vpop.f32.mrf.mxu1 }
 0x84d   : > { %v5178_v13 = vadd.f32 %v5177_v60, %v5176_v44  ;;  %v6697_v5 = vadd.f32 %v3522_v7, %v6551_v62 }
 0x84e   : > { %v5179_v19 = vpop.f32.mrf.mxu1 }
 0x84f   : > { %v3527_v24 = vadd.f32 %v5178_v13, %v6658_v59  ;;  %3589 = vadd.xlane.f32.xlu1 %v6697_v5 }
 0x850   : > { %v5180_v29 = vpop.f32.mrf.mxu1 }
 0x851   : > { %v5181_v28 = vadd.f32 %v5180_v29, %v5179_v19  ;;  %v6702_v20 = vadd.f32 %v3527_v24, %v6564_v11 }
 0x852   : > { %v5182_v57 = vpop.f32.mrf.mxu1 }
 0x853   : > { %v3530_v6 = vadd.f32 %v5181_v28, %v6658_v59  ;;  %3591 = vadd.xlane.f32.xlu0 %v6702_v20 }
 0x854   : > { %v5183_v22 = vpop.f32.mrf.mxu1 }
 0x855   : > { %v5184_v25 = vadd.f32 %v5183_v22, %v5182_v57  ;;  %v6707_v62 = vadd.f32 %v3530_v6, %v6568_v40 }
 0x856   : > { %v5185_v18 = vpop.f32.mrf.mxu1 }
 0x857   : > { %v3535_v53 = vadd.f32 %v5184_v25, %v6658_v59  ;;  %3593 = vadd.xlane.f32.xlu1 %v6707_v62 }
 0x858   : > { %v5186_v58 = vpop.f32.mrf.mxu1 }
 0x859   : > { %v5187_v54 = vadd.f32 %v5186_v58, %v5185_v18  ;;  %v6712_v11 = vadd.f32 %v3535_v53, %v6580_v32 }
 0x85a   : > { %v5188_v61 = vpop.f32.mrf.mxu1 }
 0x85b   : > { %v3538_v37 = vadd.f32 %v5187_v54, %v6658_v59  ;;  %3595 = vadd.xlane.f32.xlu0 %v6712_v11 }
 0x85c   : > { %v5189_v4 = vpop.f32.mrf.mxu1 }
 0x85d   : > { %v5190_v17 = vadd.f32 %v5189_v4, %v5188_v61  ;;  %v6717_v40 = vadd.f32 %v3538_v37, %v6577_v47 }
 0x85e   : > { %v5191_v38 = vpop.f32.mrf.mxu1 }
 0x85f   : > { %v3543_v35 = vadd.f32 %v5190_v17, %v6658_v59  ;;  %3597 = vadd.xlane.f32.xlu1 %v6717_v40 }
 0x860   : > { %v5192_v10 = vpop.f32.mrf.mxu1 }
 0x861   : > { %v5193_v15 = vadd.f32 %v5192_v10, %v5191_v38  ;;  %v6722_v32 = vadd.f32 %v3543_v35, %v6590_v21 }
 0x862   : > { %v5194_v27 = vpop.f32.mrf.mxu1 }
 0x863   : > { %v3546_v42 = vadd.f32 %v5193_v15, %v6658_v59  ;;  %3599 = vadd.xlane.f32.xlu0 %v6722_v32 }
 0x864   : > { %v5195_v16 = vpop.f32.mrf.mxu1 }
 0x865   : > { %v5196_v14 = vadd.f32 %v5195_v16, %v5194_v27  ;;  %v6727_v47 = vadd.f32 %v3546_v42, %v6593_v41 }
 0x866   : > { %v5197_v33 = vpop.f32.mrf.mxu1 }
 0x867   : > { %v3551_v31 = vadd.f32 %v5196_v14, %v6658_v59  ;;  %3601 = vadd.xlane.f32.xlu1 %v6727_v47 }
 0x868   : > { %v5198_v34 = vpop.f32.mrf.mxu1 }
 0x869   : > { %v5199_v48 = vadd.f32 %v5198_v34, %v5197_v33  ;;  %v6732_v21 = vadd.f32 %v3551_v31, %v6606_v3 }
 0x86b   : > { %v3554_v55 = vadd.f32 %v5199_v48, %v6658_v59  ;;  %3603 = vadd.xlane.f32.xlu0 %v6732_v21 }
 0x86d   : > { %v6737_v56 = vadd.f32 %v3554_v55, %v6603_v12 }
 0x86f   : > { %3605 = vadd.xlane.f32.xlu1 %v6737_v56 }
 0x8bc   : > { %v3576_v41 = vpop.xlane.xlu0 %3575 }
 0x8bd   : > { %v3607_v23 = vmul.f32 0.0078125, %v3576_v41 }
 0x8bf   : > { %v6741_v63 = vsub.f32 %v6662_v45, %v3607_v23 }
 0x8c0   : > { %v3578_v36 = vpop.xlane.xlu1 %3577 }
 0x8c1   : > { %v3608_v51 = vmul.f32 0.0078125, %v3578_v36  ;;  %v3639_v3 = vmul.f32 %v6741_v63, %v6741_v63 }
 0x8c3   : > { %v6746_v39 = vsub.f32 %v6667_v2, %v3608_v51  ;;  %3655 = vadd.xlane.f32.xlu0 %v3639_v3 }
 0x8c4   : > { %v3580_v59 = vpop.xlane.xlu0 %3579 }
 0x8c5   : > { %v3609_v50 = vmul.f32 0.0078125, %v3580_v59  ;;  %v3640_v12 = vmul.f32 %v6746_v39, %v6746_v39 }
 0x8c7   : > { %v6751_v52 = vsub.f32 %v6672_v30, %v3609_v50  ;;  %3657 = vadd.xlane.f32.xlu1 %v3640_v12 }
 0x8c8   : > { %v3582_v45 = vpop.xlane.xlu1 %3581 }
 0x8c9   : > { %v3610_v1 = vmul.f32 0.0078125, %v3582_v45  ;;  %v3641_v0 = vmul.f32 %v6751_v52, %v6751_v52 }
 0x8cb   : > { %v6756_v43 = vsub.f32 %v6677_v9, %v3610_v1  ;;  %3659 = vadd.xlane.f32.xlu0 %v3641_v0 }
 0x8cc   : > { %v3584_v2 = vpop.xlane.xlu0 %3583 }
 0x8cd   : > { %v3611_v8 = vmul.f32 0.0078125, %v3584_v2  ;;  %v3642_v44 = vmul.f32 %v6756_v43, %v6756_v43 }
 0x8cf   : > { %v6761_v7 = vsub.f32 %v6682_v49, %v3611_v8  ;;  %3661 = vadd.xlane.f32.xlu1 %v3642_v44 }
 0x8d0   : > { %v3586_v30 = vpop.xlane.xlu1 %3585 }
 0x8d1   : > { %v3612_v60 = vmul.f32 0.0078125, %v3586_v30  ;;  %v3643_v13 = vmul.f32 %v6761_v7, %v6761_v7 }
 0x8d3   : > { %v6766_v19 = vsub.f32 %v6687_v46, %v3612_v60  ;;  %3663 = vadd.xlane.f32.xlu0 %v3643_v13  ;;  %v6825_v60 = vld [vmem:[%s7179_s25] ss:$0 sm:$0xff] }
 0x8d4   : > { %v3588_v9 = vpop.xlane.xlu0 %3587 }
 0x8d5   : > { %v3613_v24 = vmul.f32 0.0078125, %v3588_v9  ;;  %v3644_v29 = vmul.f32 %v6766_v19, %v6766_v19 }
 0x8d7   : > { %v6771_v28 = vsub.f32 %v6692_v26, %v3613_v24  ;;  %3665 = vadd.xlane.f32.xlu1 %v3644_v29  ;;  %v6833_v29 = vld [vmem:[%s717_s20] ss:$0 sm:$0xff] }
 0x8d8   : > { %v3590_v49 = vpop.xlane.xlu1 %3589 }
 0x8d9   : > { %v3614_v57 = vmul.f32 0.0078125, %v3590_v49  ;;  %v3645_v6 = vmul.f32 %v6771_v28, %v6771_v28 }
 0x8db   : > { %v6776_v22 = vsub.f32 %v6697_v5, %v3614_v57  ;;  %3667 = vadd.xlane.f32.xlu0 %v3645_v6 }
 0x8dc   : > { %v3592_v46 = vpop.xlane.xlu0 %3591 }
 0x8dd   : > { %v3615_v25 = vmul.f32 0.0078125, %v3592_v46  ;;  %v3646_v18 = vmul.f32 %v6776_v22, %v6776_v22 }
 0x8df   : > { %v6781_v53 = vsub.f32 %v6702_v20, %v3615_v25  ;;  %3669 = vadd.xlane.f32.xlu1 %v3646_v18 }
 0x8e0   : > { %v3594_v26 = vpop.xlane.xlu1 %3593 }
 0x8e1   : > { %v3616_v58 = vmul.f32 0.0078125, %v3594_v26  ;;  %v3647_v54 = vmul.f32 %v6781_v53, %v6781_v53 }
 0x8e3   : > { %v6786_v61 = vsub.f32 %v6707_v62, %v3616_v58  ;;  %3671 = vadd.xlane.f32.xlu0 %v3647_v54 }
 0x8e4   : > { %v3596_v5 = vpop.xlane.xlu0 %3595 }
 0x8e5   : > { %v3617_v37 = vmul.f32 0.0078125, %v3596_v5  ;;  %v3648_v4 = vmul.f32 %v6786_v61, %v6786_v61 }
 0x8e7   : > { %v6791_v17 = vsub.f32 %v6712_v11, %v3617_v37  ;;  %3673 = vadd.xlane.f32.xlu1 %v3648_v4 }
 0x8e8   : > { %v3598_v20 = vpop.xlane.xlu1 %3597 }
 0x8e9   : > { %v3618_v38 = vmul.f32 0.0078125, %v3598_v20  ;;  %v3649_v35 = vmul.f32 %v6791_v17, %v6791_v17 }
 0x8eb   : > { %v6796_v10 = vsub.f32 %v6717_v40, %v3618_v38  ;;  %3675 = vadd.xlane.f32.xlu0 %v3649_v35 }
 0x8ec   : > { %v3600_v62 = vpop.xlane.xlu0 %3599 }
 0x8ed   : > { %v3619_v15 = vmul.f32 0.0078125, %v3600_v62  ;;  %v3650_v27 = vmul.f32 %v6796_v10, %v6796_v10 }
 0x8ef   : > { %v6801_v42 = vsub.f32 %v6722_v32, %v3619_v15  ;;  %3677 = vadd.xlane.f32.xlu1 %v3650_v27 }
 0x8f0   : > { %v3602_v11 = vpop.xlane.xlu1 %3601 }
 0x8f1   : > { %v3620_v16 = vmul.f32 0.0078125, %v3602_v11  ;;  %v3651_v14 = vmul.f32 %v6801_v42, %v6801_v42 }
 0x8f3   : > { %v6806_v33 = vsub.f32 %v6727_v47, %v3620_v16  ;;  %3679 = vadd.xlane.f32.xlu0 %v3651_v14 }
 0x8f4   : > { %v3604_v40 = vpop.xlane.xlu0 %3603 }
 0x8f5   : > { %v3621_v31 = vmul.f32 0.0078125, %v3604_v40  ;;  %v3652_v34 = vmul.f32 %v6806_v33, %v6806_v33 }
 0x8f7   : > { %v6811_v48 = vsub.f32 %v6732_v21, %v3621_v31  ;;  %3681 = vadd.xlane.f32.xlu1 %v3652_v34 }
 0x8f8   : > { %v3606_v32 = vpop.xlane.xlu1 %3605 }
 0x8f9   : > { %v3622_v55 = vmul.f32 0.0078125, %v3606_v32  ;;  %v3653_v41 = vmul.f32 %v6811_v48, %v6811_v48 }
 0x8fb   : > { %v6816_v23 = vsub.f32 %v6737_v56, %v3622_v55  ;;  %3683 = vadd.xlane.f32.xlu0 %v3653_v41 }
 0x8fd   : > { %v3654_v47 = vmul.f32 %v6816_v23, %v6816_v23 }
 0x8ff   : > { %3685 = vadd.xlane.f32.xlu1 %v3654_v47 }
 0x94c   : > { %v3656_v36 = vpop.xlane.xlu0 %3655 }
 0x94d   : > { %v3687_v51 = vmul.f32 0.0078125, %v3656_v36 }
 0x94f   : > { %v3703_v3 = vadd.f32 1e-05, %v3687_v51 }
 0x950   : > { %v3658_v59 = vpop.xlane.xlu1 %3657 }
 0x951   : > { %5603 = vrsqrt.f32 %v3703_v3  ;;  %v3688_v21 = vmul.f32 0.0078125, %v3658_v59 }
 0x953   : > { %v3704_v50 = vadd.f32 1e-05, %v3688_v21 }
 0x954   : > { %v3660_v12 = vpop.xlane.xlu0 %3659 }
 0x955   : > { %5605 = vrsqrt.f32 %v3704_v50  ;;  %v3689_v45 = vmul.f32 0.0078125, %v3660_v12 }
 0x957   : > { %v3705_v1 = vadd.f32 1e-05, %v3689_v45 }
 0x958   : > { %v3662_v56 = vpop.xlane.xlu1 %3661 }
 0x959   : > { %5607 = vrsqrt.f32 %v3705_v1  ;;  %v3690_v0 = vmul.f32 0.0078125, %v3662_v56 }
 0x95b   : > { %v3706_v2 = vadd.f32 1e-05, %v3690_v0 }
 0x95c   : > { %v3664_v8 = vpop.xlane.xlu0 %3663 }
 0x95d   : > { %5609 = vrsqrt.f32 %v3706_v2  ;;  %v3691_v44 = vmul.f32 0.0078125, %v3664_v8 }
 0x95e   : > { %v5604_v30 = vpop.eup %5603 }
 0x95f   : > { %v3707_v13 = vadd.f32 1e-05, %v3691_v44  ;;  %v3735_v9 = vmul.f32 %v5604_v30, %v6741_v63 }
 0x960   : > { %v3666_v24 = vpop.xlane.xlu1 %3665 }
 0x961   : > { %5611 = vrsqrt.f32 %v3707_v13  ;;  %v3692_v49 = vmul.f32 0.0078125, %v3666_v24  ;;  %v3757_v57 = vmul.f32 %v6825_v60, %v3735_v9 }
 0x962   : > { %v5606_v6 = vpop.eup %5605 }
 0x963   : > { %v3708_v46 = vadd.f32 1e-05, %v3692_v49  ;;  %v6837_v25 = vadd.f32 %v6833_v29, %v3757_v57  ;;  %v3736_v18 = vmul.f32 %v5606_v6, %v6746_v39 }
 0x964   : > { %v3668_v26 = vpop.xlane.xlu0 %3667 }
 0x965   : > { %5613 = vrsqrt.f32 %v3708_v46  ;;  %v3693_v63 = vmul.f32 0.0078125, %v3668_v26  ;;  %3797 = vadd.xlane.f32.xlu0 %v6837_v25  ;;  %v3758_v58 = vmul.f32 %v6825_v60, %v3736_v18 }
 0x966   : > { %v5608_v54 = vpop.eup %5607 }
 0x967   : > { %v3709_v5 = vadd.f32 1e-05, %v3693_v63  ;;  %v6843_v37 = vadd.f32 %v6833_v29, %v3758_v58  ;;  %v3737_v4 = vmul.f32 %v5608_v54, %v6751_v52 }
 0x968   : > { %v3670_v20 = vpop.xlane.xlu1 %3669 }
 0x969   : > { %5615 = vrsqrt.f32 %v3709_v5  ;;  %v3694_v38 = vmul.f32 0.0078125, %v3670_v20  ;;  %3799 = vadd.xlane.f32.xlu1 %v6843_v37  ;;  %v3759_v39 = vmul.f32 %v6825_v60, %v3737_v4 }
 0x96a   : > { %v5610_v35 = vpop.eup %5609 }
 0x96b   : > { %v3710_v62 = vadd.f32 1e-05, %v3694_v38  ;;  %v6849_v15 = vadd.f32 %v6833_v29, %v3759_v39  ;;  %v3738_v27 = vmul.f32 %v5610_v35, %v6756_v43 }
 0x96c   : > { %v3672_v11 = vpop.xlane.xlu0 %3671 }
 0x96d   : > { %5617 = vrsqrt.f32 %v3710_v62  ;;  %v3695_v16 = vmul.f32 0.0078125, %v3672_v11  ;;  %3801 = vadd.xlane.f32.xlu0 %v6849_v15  ;;  %v3760_v52 = vmul.f32 %v6825_v60, %v3738_v27 }
 0x96e   : > { %v5612_v14 = vpop.eup %5611 }
 0x96f   : > { %v3711_v40 = vadd.f32 1e-05, %v3695_v16  ;;  %v6855_v31 = vadd.f32 %v6833_v29, %v3760_v52  ;;  %v3739_v34 = vmul.f32 %v5612_v14, %v6761_v7 }
 0x970   : > { %v3674_v32 = vpop.xlane.xlu1 %3673 }
 0x971   : > { %5619 = vrsqrt.f32 %v3711_v40  ;;  %v3696_v55 = vmul.f32 0.0078125, %v3674_v32  ;;  %3803 = vadd.xlane.f32.xlu1 %v6855_v31  ;;  %v3761_v43 = vmul.f32 %v6825_v60, %v3739_v34 }
 0x972   : > { %v5614_v41 = vpop.eup %5613 }
 0x973   : > { %v3712_v47 = vadd.f32 1e-05, %v3696_v55  ;;  %v6861_v36 = vadd.f32 %v6833_v29, %v3761_v43  ;;  %v3740_v51 = vmul.f32 %v5614_v41, %v6766_v19 }
 0x974   : > { %v3676_v3 = vpop.xlane.xlu0 %3675 }
 0x975   : > { %5621 = vrsqrt.f32 %v3712_v47  ;;  %v3697_v59 = vmul.f32 0.0078125, %v3676_v3  ;;  %3805 = vadd.xlane.f32.xlu0 %v6861_v36  ;;  %v3762_v7 = vmul.f32 %v6825_v60, %v3740_v51 }
 0x976   : > { %v5616_v21 = vpop.eup %5615 }
 0x977   : > { %v3713_v50 = vadd.f32 1e-05, %v3697_v59  ;;  %v6867_v12 = vadd.f32 %v6833_v29, %v3762_v7  ;;  %v3741_v45 = vmul.f32 %v5616_v21, %v6771_v28 }
 0x978   : > { %v3678_v1 = vpop.xlane.xlu1 %3677 }
 0x979   : > { %5623 = vrsqrt.f32 %v3713_v50  ;;  %v3698_v56 = vmul.f32 0.0078125, %v3678_v1  ;;  %3807 = vadd.xlane.f32.xlu1 %v6867_v12  ;;  %v3763_v19 = vmul.f32 %v6825_v60, %v3741_v45 }
 0x97a   : > { %v5618_v0 = vpop.eup %5617 }
 0x97b   : > { %v3714_v2 = vadd.f32 1e-05, %v3698_v56  ;;  %v6873_v8 = vadd.f32 %v6833_v29, %v3763_v19  ;;  %v3742_v44 = vmul.f32 %v5618_v0, %v6776_v22 }
 0x97c   : > { %v3680_v30 = vpop.xlane.xlu0 %3679 }
 0x97d   : > { %5625 = vrsqrt.f32 %v3714_v2  ;;  %v3699_v13 = vmul.f32 0.0078125, %v3680_v30  ;;  %3809 = vadd.xlane.f32.xlu0 %v6873_v8  ;;  %v3764_v28 = vmul.f32 %v6825_v60, %v3742_v44 }
 0x97e   : > { %v5620_v9 = vpop.eup %5619 }
 0x97f   : > { %v3715_v24 = vadd.f32 1e-05, %v3699_v13  ;;  %v6879_v49 = vadd.f32 %v6833_v29, %v3764_v28  ;;  %v3743_v57 = vmul.f32 %v5620_v9, %v6781_v53 }
 0x980   : > { %v3682_v6 = vpop.xlane.xlu1 %3681 }
 0x981   : > { %5627 = vrsqrt.f32 %v3715_v24  ;;  %v3700_v46 = vmul.f32 0.0078125, %v3682_v6  ;;  %3811 = vadd.xlane.f32.xlu1 %v6879_v49  ;;  %v3765_v22 = vmul.f32 %v6825_v60, %v3743_v57 }
 0x982   : > { %v5622_v18 = vpop.eup %5621 }
 0x983   : > { %v3716_v26 = vadd.f32 1e-05, %v3700_v46  ;;  %v6885_v63 = vadd.f32 %v6833_v29, %v3765_v22  ;;  %v3744_v58 = vmul.f32 %v5622_v18, %v6786_v61 }
 0x984   : > { %v3684_v54 = vpop.xlane.xlu0 %3683 }
 0x985   : > { %5629 = vrsqrt.f32 %v3716_v26  ;;  %v3701_v5 = vmul.f32 0.0078125, %v3684_v54  ;;  %3813 = vadd.xlane.f32.xlu0 %v6885_v63  ;;  %v3766_v53 = vmul.f32 %v6825_v60, %v3744_v58 }
 0x986   : > { %v5624_v4 = vpop.eup %5623 }
 0x987   : > { %v3717_v20 = vadd.f32 1e-05, %v3701_v5  ;;  %v6891_v38 = vadd.f32 %v6833_v29, %v3766_v53  ;;  %v3745_v39 = vmul.f32 %v5624_v4, %v6791_v17 }
 0x988   : > { %v3686_v35 = vpop.xlane.xlu1 %3685 }
 0x989   : > { %5631 = vrsqrt.f32 %v3717_v20  ;;  %v3702_v62 = vmul.f32 0.0078125, %v3686_v35  ;;  %3815 = vadd.xlane.f32.xlu1 %v6891_v38  ;;  %v3767_v61 = vmul.f32 %v6825_v60, %v3745_v39 }
 0x98a   : > { %v5626_v27 = vpop.eup %5625 }
 0x98b   : > { %v3718_v11 = vadd.f32 1e-05, %v3702_v62  ;;  %v6897_v16 = vadd.f32 %v6833_v29, %v3767_v61  ;;  %v3746_v52 = vmul.f32 %v5626_v27, %v6796_v10 }
 0x98d   : > { %5633 = vrsqrt.f32 %v3718_v11  ;;  %3817 = vadd.xlane.f32.xlu0 %v6897_v16  ;;  %v3768_v14 = vmul.f32 %v6825_v60, %v3746_v52 }
 0x98e   : > { %v5628_v17 = vpop.eup %5627 }
 0x98f   : > { %v6903_v40 = vadd.f32 %v6833_v29, %v3768_v14  ;;  %v3747_v34 = vmul.f32 %v5628_v17, %v6801_v42 }
 0x991   : > { %3819 = vadd.xlane.f32.xlu1 %v6903_v40  ;;  %v3769_v32 = vmul.f32 %v6825_v60, %v3747_v34 }
 0x992   : > { %v5630_v55 = vpop.eup %5629 }
 0x993   : > { %v6909_v43 = vadd.f32 %v6833_v29, %v3769_v32  ;;  %v3748_v10 = vmul.f32 %v5630_v55, %v6806_v33 }
 0x995   : > { %3821 = vadd.xlane.f32.xlu0 %v6909_v43  ;;  %v3770_v41 = vmul.f32 %v6825_v60, %v3748_v10 }
 0x996   : > { %v5632_v47 = vpop.eup %5631 }
 0x997   : > { %v6915_v51 = vadd.f32 %v6833_v29, %v3770_v41  ;;  %v3749_v42 = vmul.f32 %v5632_v47, %v6811_v48 }
 0x999   : > { %3823 = vadd.xlane.f32.xlu1 %v6915_v51  ;;  %v3771_v3 = vmul.f32 %v6825_v60, %v3749_v42 }
 0x99a   : > { %v5634_v59 = vpop.eup %5633 }
 0x99b   : > { %v6921_v7 = vadd.f32 %v6833_v29, %v3771_v3  ;;  %v3750_v33 = vmul.f32 %v5634_v59, %v6816_v23 }
 0x99d   : > { %3825 = vadd.xlane.f32.xlu0 %v6921_v7  ;;  %v3772_v21 = vmul.f32 %v6825_v60, %v3750_v33 }
 0x99f   : > { %v6927_v50 = vadd.f32 %v6833_v29, %v3772_v21 }
 0x9a1   : > { %3827 = vadd.xlane.f32.xlu1 %v6927_v50 }
 0x9ee   : > { %v3798_v48 = vpop.xlane.xlu0 %3797 }
 0x9ef   : > { %v3829_v45 = vmul.f32 0.0078125, %v3798_v48 }
 0x9f1   : > { %v6931_v1 = vsub.f32 %v6837_v25, %v3829_v45 }
 0x9f2   : > { %v3800_v56 = vpop.xlane.xlu1 %3799 }
 0x9f3   : > { %v3830_v19 = vmul.f32 0.0078125, %v3800_v56  ;;  %v3861_v0 = vmul.f32 %v6931_v1, %v6931_v1 }
 0x9f5   : > { %v6936_v23 = vsub.f32 %v6843_v37, %v3830_v19  ;;  %3877 = vadd.xlane.f32.xlu0 %v3861_v0 }
 0x9f6   : > { %v3802_v60 = vpop.xlane.xlu0 %3801 }
 0x9f7   : > { %v3831_v2 = vmul.f32 0.0078125, %v3802_v60  ;;  %v3862_v29 = vmul.f32 %v6936_v23, %v6936_v23 }
 0x9f9   : > { %v6941_v44 = vsub.f32 %v6849_v15, %v3831_v2  ;;  %3879 = vadd.xlane.f32.xlu1 %v3862_v29 }
 0x9fa   : > { %v3804_v25 = vpop.xlane.xlu1 %3803 }
 0x9fb   : > { %v3832_v30 = vmul.f32 0.0078125, %v3804_v25  ;;  %v3863_v13 = vmul.f32 %v6941_v44, %v6941_v44 }
 0x9fd   : > { %v6946_v28 = vsub.f32 %v6855_v31, %v3832_v30  ;;  %3881 = vadd.xlane.f32.xlu0 %v3863_v13 }
 0x9fe   : > { %v3806_v37 = vpop.xlane.xlu0 %3805 }
 0x9ff   : > { %v3833_v9 = vmul.f32 0.0078125, %v3806_v37  ;;  %v3864_v24 = vmul.f32 %v6946_v28, %v6946_v28 }
 0xa01   : > { %v6951_v57 = vsub.f32 %v6861_v36, %v3833_v9  ;;  %3883 = vadd.xlane.f32.xlu1 %v3864_v24 }
 0xa02   : > { %v3808_v15 = vpop.xlane.xlu1 %3807 }
 0xa03   : > { %v3834_v6 = vmul.f32 0.0078125, %v3808_v15  ;;  %v3865_v46 = vmul.f32 %v6951_v57, %v6951_v57 }
 0xa05   : > { %v6956_v22 = vsub.f32 %v6867_v12, %v3834_v6  ;;  %3885 = vadd.xlane.f32.xlu0 %v3865_v46  ;;  %v7015_v6 = vld [vmem:[%s7182_s30] ss:$0 sm:$0xff] }
 0xa06   : > { %v3810_v31 = vpop.xlane.xlu0 %3809 }
 0xa07   : > { %v3835_v18 = vmul.f32 0.0078125, %v3810_v31  ;;  %v3866_v26 = vmul.f32 %v6956_v22, %v6956_v22 }
 0xa09   : > { %v6961_v58 = vsub.f32 %v6873_v8, %v3835_v18  ;;  %3887 = vadd.xlane.f32.xlu1 %v3866_v26  ;;  %v7023_v18 = vld [vmem:[%s723_s16] ss:$0 sm:$0xff] }
 0xa0a   : > { %v3812_v36 = vpop.xlane.xlu1 %3811 }
 0xa0b   : > { %v3836_v54 = vmul.f32 0.0078125, %v3812_v36  ;;  %v3867_v5 = vmul.f32 %v6961_v58, %v6961_v58 }
 0xa0d   : > { %v6966_v53 = vsub.f32 %v6879_v49, %v3836_v54  ;;  %3889 = vadd.xlane.f32.xlu0 %v3867_v5 }
 0xa0e   : > { %v3814_v12 = vpop.xlane.xlu0 %3813 }
 0xa0f   : > { %v3837_v4 = vmul.f32 0.0078125, %v3814_v12  ;;  %v3868_v20 = vmul.f32 %v6966_v53, %v6966_v53 }
 0xa11   : > { %v6971_v39 = vsub.f32 %v6885_v63, %v3837_v4  ;;  %3891 = vadd.xlane.f32.xlu1 %v3868_v20 }
 0xa12   : > { %v3816_v8 = vpop.xlane.xlu1 %3815 }
 0xa13   : > { %v3838_v35 = vmul.f32 0.0078125, %v3816_v8  ;;  %v3869_v62 = vmul.f32 %v6971_v39, %v6971_v39 }
 0xa15   : > { %v6976_v61 = vsub.f32 %v6891_v38, %v3838_v35  ;;  %3893 = vadd.xlane.f32.xlu0 %v3869_v62 }
 0xa16   : > { %v3818_v49 = vpop.xlane.xlu0 %3817 }
 0xa17   : > { %v3839_v27 = vmul.f32 0.0078125, %v3818_v49  ;;  %v3870_v11 = vmul.f32 %v6976_v61, %v6976_v61 }
 0xa19   : > { %v6981_v52 = vsub.f32 %v6897_v16, %v3839_v27  ;;  %3895 = vadd.xlane.f32.xlu1 %v3870_v11 }
 0xa1a   : > { %v3820_v63 = vpop.xlane.xlu1 %3819 }
 0xa1b   : > { %v3840_v14 = vmul.f32 0.0078125, %v3820_v63  ;;  %v3871_v17 = vmul.f32 %v6981_v52, %v6981_v52 }
 0xa1d   : > { %v6986_v34 = vsub.f32 %v6903_v40, %v3840_v14  ;;  %3897 = vadd.xlane.f32.xlu0 %v3871_v17 }
 0xa1e   : > { %v3822_v38 = vpop.xlane.xlu0 %3821 }
 0xa1f   : > { %v3841_v32 = vmul.f32 0.0078125, %v3822_v38  ;;  %v3872_v55 = vmul.f32 %v6986_v34, %v6986_v34 }
 0xa21   : > { %v6991_v10 = vsub.f32 %v6909_v43, %v3841_v32  ;;  %3899 = vadd.xlane.f32.xlu1 %v3872_v55 }
 0xa22   : > { %v3824_v16 = vpop.xlane.xlu1 %3823 }
 0xa23   : > { %v3842_v41 = vmul.f32 0.0078125, %v3824_v16  ;;  %v3873_v47 = vmul.f32 %v6991_v10, %v6991_v10 }
 0xa25   : > { %v6996_v42 = vsub.f32 %v6915_v51, %v3842_v41  ;;  %3901 = vadd.xlane.f32.xlu0 %v3873_v47 }
 0xa26   : > { %v3826_v40 = vpop.xlane.xlu0 %3825 }
 0xa27   : > { %v3843_v3 = vmul.f32 0.0078125, %v3826_v40  ;;  %v3874_v59 = vmul.f32 %v6996_v42, %v6996_v42 }
 0xa29   : > { %v7001_v33 = vsub.f32 %v6921_v7, %v3843_v3  ;;  %3903 = vadd.xlane.f32.xlu1 %v3874_v59 }
 0xa2a   : > { %v3828_v43 = vpop.xlane.xlu1 %3827 }
 0xa2b   : > { %v3844_v21 = vmul.f32 0.0078125, %v3828_v43  ;;  %v3875_v48 = vmul.f32 %v7001_v33, %v7001_v33 }
 0xa2d   : > { %v7006_v45 = vsub.f32 %v6927_v50, %v3844_v21  ;;  %3905 = vadd.xlane.f32.xlu0 %v3875_v48 }
 0xa2f   : > { %v3876_v51 = vmul.f32 %v7006_v45, %v7006_v45 }
 0xa31   : > { %3907 = vadd.xlane.f32.xlu1 %v3876_v51 }
 0xa7e   : > { %v3878_v56 = vpop.xlane.xlu0 %3877 }
 0xa7f   : > { %v3909_v19 = vmul.f32 0.0078125, %v3878_v56 }
 0xa81   : > { %v3925_v0 = vadd.f32 1e-05, %v3909_v19 }
 0xa82   : > { %v3880_v60 = vpop.xlane.xlu1 %3879 }
 0xa83   : > { %5635 = vrsqrt.f32 %v3925_v0  ;;  %v3910_v7 = vmul.f32 0.0078125, %v3880_v60 }
 0xa85   : > { %v3926_v2 = vadd.f32 1e-05, %v3910_v7 }
 0xa86   : > { %v3882_v29 = vpop.xlane.xlu0 %3881 }
 0xa87   : > { %5637 = vrsqrt.f32 %v3926_v2  ;;  %v3911_v25 = vmul.f32 0.0078125, %v3882_v29 }
 0xa89   : > { %v3927_v30 = vadd.f32 1e-05, %v3911_v25 }
 0xa8a   : > { %v3884_v50 = vpop.xlane.xlu1 %3883 }
 0xa8b   : > { %5639 = vrsqrt.f32 %v3927_v30  ;;  %v3912_v13 = vmul.f32 0.0078125, %v3884_v50 }
 0xa8d   : > { %v3928_v37 = vadd.f32 1e-05, %v3912_v13 }
 0xa8e   : > { %v3886_v9 = vpop.xlane.xlu0 %3885 }
 0xa8f   : > { %5641 = vrsqrt.f32 %v3928_v37  ;;  %v3913_v24 = vmul.f32 0.0078125, %v3886_v9 }
 0xa90   : > { %v5636_v15 = vpop.eup %5635 }
 0xa91   : > { %v3957_v46 = vmul.f32 %v5636_v15, %v6931_v1  ;;  %v3929_v31 = vadd.f32 1e-05, %v3913_v24 }
 0xa92   : > { %v3888_v26 = vpop.xlane.xlu1 %3887 }
 0xa93   : > { %v3979_v36 = vmul.f32 %v7015_v6, %v3957_v46  ;;  %5643 = vrsqrt.f32 %v3929_v31  ;;  %v3914_v54 = vmul.f32 0.0078125, %v3888_v26 }
 0xa94   : > { %v5638_v5 = vpop.eup %5637 }
 0xa95   : > { %v4001_v12 = vadd.f32 %v7023_v18, %v3979_v36  ;;  %v3958_v4 = vmul.f32 %v5638_v5, %v6936_v23  ;;  %v3930_v20 = vadd.f32 1e-05, %v3914_v54 }
 0xa96   : > { %v3890_v1 = vpop.xlane.xlu0 %3889 }
 0xa97   : > { %4017 = vst [vmem:[%s5912_s28] sm:$0xff] %v4001_v12  ;;  %v3980_v8 = vmul.f32 %v7015_v6, %v3958_v4  ;;  %5645 = vrsqrt.f32 %v3930_v20  ;;  %v3915_v35 = vmul.f32 0.0078125, %v3890_v1 }
 0xa98   : > { %v5640_v62 = vpop.eup %5639 }
 0xa99   : > { %v4002_v49 = vadd.f32 %v7023_v18, %v3980_v8  ;;  %v3959_v27 = vmul.f32 %v5640_v62, %v6941_v44  ;;  %v3931_v11 = vadd.f32 1e-05, %v3915_v35 }
 0xa9a   : > { %v3892_v63 = vpop.xlane.xlu1 %3891 }
 0xa9b   : > { %4018 = vst [vmem:[%s5912_s28 + $0x8] sm:$0xff] %v4002_v49  ;;  %v3981_v14 = vmul.f32 %v7015_v6, %v3959_v27  ;;  %5647 = vrsqrt.f32 %v3931_v11  ;;  %v3916_v23 = vmul.f32 0.0078125, %v3892_v63 }
 0xa9c   : > { %v5642_v17 = vpop.eup %5641 }
 0xa9d   : > { %v4003_v38 = vadd.f32 %v7023_v18, %v3981_v14  ;;  %v3960_v32 = vmul.f32 %v5642_v17, %v6946_v28  ;;  %v3932_v55 = vadd.f32 1e-05, %v3916_v23 }
 0xa9e   : > { %v3894_v16 = vpop.xlane.xlu0 %3893 }
 0xa9f   : > { %4019 = vst [vmem:[%s5912_s28 + $0x10] sm:$0xff] %v4003_v38  ;;  %v3982_v41 = vmul.f32 %v7015_v6, %v3960_v32  ;;  %5649 = vrsqrt.f32 %v3932_v55  ;;  %v3917_v44 = vmul.f32 0.0078125, %v3894_v16 }
 0xaa0   : > { %v5644_v47 = vpop.eup %5643 }
 0xaa1   : > { %v4004_v40 = vadd.f32 %v7023_v18, %v3982_v41  ;;  %v3961_v3 = vmul.f32 %v5644_v47, %v6951_v57  ;;  %v3933_v59 = vadd.f32 1e-05, %v3917_v44 }
 0xaa2   : > { %v3896_v43 = vpop.xlane.xlu1 %3895 }
 0xaa3   : > { %4020 = vst [vmem:[%s5912_s28 + $0x18] sm:$0xff] %v4004_v40  ;;  %v3983_v21 = vmul.f32 %v7015_v6, %v3961_v3  ;;  %5651 = vrsqrt.f32 %v3933_v59  ;;  %v3918_v28 = vmul.f32 0.0078125, %v3896_v43 }
 0xaa4   : > { %v5646_v48 = vpop.eup %5645 }
 0xaa5   : > { %v4005_v51 = vadd.f32 %v7023_v18, %v3983_v21  ;;  %v3962_v56 = vmul.f32 %v5646_v48, %v6956_v22  ;;  %v3934_v19 = vadd.f32 1e-05, %v3918_v28 }
 0xaa6   : > { %v3898_v0 = vpop.xlane.xlu0 %3897 }
 0xaa7   : > { %4021 = vst [vmem:[%s5912_s28 + $0x20] sm:$0xff] %v4005_v51  ;;  %v3984_v60 = vmul.f32 %v7015_v6, %v3962_v56  ;;  %5653 = vrsqrt.f32 %v3934_v19  ;;  %v3919_v57 = vmul.f32 0.0078125, %v3898_v0 }
 0xaa8   : > { %v5648_v7 = vpop.eup %5647 }
 0xaa9   : > { %v4006_v2 = vadd.f32 %v7023_v18, %v3984_v60  ;;  %v3963_v29 = vmul.f32 %v5648_v7, %v6961_v58  ;;  %v3935_v25 = vadd.f32 1e-05, %v3919_v57 }
 0xaaa   : > { %v3900_v30 = vpop.xlane.xlu1 %3899 }
 0xaab   : > { %4022 = vst [vmem:[%s5912_s28 + $0x28] sm:$0xff] %v4006_v2  ;;  %v3985_v50 = vmul.f32 %v7015_v6, %v3963_v29  ;;  %5655 = vrsqrt.f32 %v3935_v25  ;;  %v3920_v22 = vmul.f32 0.0078125, %v3900_v30 }
 0xaac   : > { %v5650_v13 = vpop.eup %5649 }
 0xaad   : > { %v4007_v37 = vadd.f32 %v7023_v18, %v3985_v50  ;;  %v3964_v9 = vmul.f32 %v5650_v13, %v6966_v53  ;;  %v3936_v24 = vadd.f32 1e-05, %v3920_v22 }
 0xaae   : > { %v3902_v15 = vpop.xlane.xlu0 %3901 }
 0xaaf   : > { %4023 = vst [vmem:[%s5912_s28 + $0x30] sm:$0xff] %v4007_v37  ;;  %v3986_v46 = vmul.f32 %v7015_v6, %v3964_v9  ;;  %5657 = vrsqrt.f32 %v3936_v24  ;;  %v3921_v58 = vmul.f32 0.0078125, %v3902_v15 }
 0xab0   : > { %v5652_v31 = vpop.eup %5651 }
 0xab1   : > { %v4008_v26 = vadd.f32 %v7023_v18, %v3986_v46  ;;  %v3965_v36 = vmul.f32 %v5652_v31, %v6971_v39  ;;  %v3937_v54 = vadd.f32 1e-05, %v3921_v58 }
 0xab2   : > { %v3904_v5 = vpop.xlane.xlu1 %3903 }
 0xab3   : > { %4024 = vst [vmem:[%s5912_s28 + $0x38] sm:$0xff] %v4008_v26  ;;  %v3987_v12 = vmul.f32 %v7015_v6, %v3965_v36  ;;  %5659 = vrsqrt.f32 %v3937_v54  ;;  %v3922_v53 = vmul.f32 0.0078125, %v3904_v5 }
 0xab4   : > { %v5654_v4 = vpop.eup %5653 }
 0xab5   : > { %v4009_v20 = vadd.f32 %v7023_v18, %v3987_v12  ;;  %v3966_v1 = vmul.f32 %v5654_v4, %v6976_v61  ;;  %v3938_v8 = vadd.f32 1e-05, %v3922_v53 }
 0xab6   : > { %v3906_v35 = vpop.xlane.xlu0 %3905 }
 0xab7   : > { %4025 = vst [vmem:[%s5912_s28 + $0x40] sm:$0xff] %v4009_v20  ;;  %v3988_v62 = vmul.f32 %v7015_v6, %v3966_v1  ;;  %5661 = vrsqrt.f32 %v3938_v8  ;;  %v3923_v39 = vmul.f32 0.0078125, %v3906_v35 }
 0xab8   : > { %v5656_v49 = vpop.eup %5655 }
 0xab9   : > { %v4010_v27 = vadd.f32 %v7023_v18, %v3988_v62  ;;  %v3967_v11 = vmul.f32 %v5656_v49, %v6981_v52  ;;  %v3939_v63 = vadd.f32 1e-05, %v3923_v39 }
 0xaba   : > { %v3908_v14 = vpop.xlane.xlu1 %3907 }
 0xabb   : > { %4026 = vst [vmem:[%s5912_s28 + $0x48] sm:$0xff] %v4010_v27  ;;  %v3989_v23 = vmul.f32 %v7015_v6, %v3967_v11  ;;  %5663 = vrsqrt.f32 %v3939_v63  ;;  %v3924_v61 = vmul.f32 0.0078125, %v3908_v14 }
 0xabc   : > { %v5658_v17 = vpop.eup %5657 }
 0xabd   : > { %v4011_v38 = vadd.f32 %v7023_v18, %v3989_v23  ;;  %v3968_v32 = vmul.f32 %v5658_v17, %v6986_v34  ;;  %v3940_v55 = vadd.f32 1e-05, %v3924_v61 }
 0xabf   : > { %4027 = vst [vmem:[%s5912_s28 + $0x50] sm:$0xff] %v4011_v38  ;;  %v3990_v16 = vmul.f32 %v7015_v6, %v3968_v32  ;;  %5665 = vrsqrt.f32 %v3940_v55 }
 0xac0   : > { %v5660_v52 = vpop.eup %5659 }
 0xac1   : > { %v4012_v41 = vadd.f32 %v7023_v18, %v3990_v16  ;;  %v3969_v44 = vmul.f32 %v5660_v52, %v6991_v10 }
 0xac3   : > { %4028 = vst [vmem:[%s5912_s28 + $0x58] sm:$0xff] %v4012_v41  ;;  %v3991_v47 = vmul.f32 %v7015_v6, %v3969_v44 }
 0xac4   : > { %v5662_v40 = vpop.eup %5661 }
 0xac5   : > { %v4013_v3 = vadd.f32 %v7023_v18, %v3991_v47  ;;  %v3970_v34 = vmul.f32 %v5662_v40, %v6996_v42 }
 0xac7   : > { %4029 = vst [vmem:[%s5912_s28 + $0x60] sm:$0xff] %v4013_v3  ;;  %v3992_v59 = vmul.f32 %v7015_v6, %v3970_v34 }
 0xac8   : > { %v5664_v43 = vpop.eup %5663 }
 0xac9   : > { %v4014_v21 = vadd.f32 %v7023_v18, %v3992_v59  ;;  %v3971_v28 = vmul.f32 %v5664_v43, %v7001_v33 }
 0xacb   : > { %4030 = vst [vmem:[%s5912_s28 + $0x68] sm:$0xff] %v4014_v21  ;;  %v3993_v10 = vmul.f32 %v7015_v6, %v3971_v28 }
 0xacc   : > { %v5666_v48 = vpop.eup %5665 }
 0xacd   : > { %v4015_v51 = vadd.f32 %v7023_v18, %v3993_v10  ;;  %v3972_v56 = vmul.f32 %v5666_v48, %v7006_v45 }
 0xacf   : > { %4031 = vst [vmem:[%s5912_s28 + $0x70] sm:$0xff] %v4015_v51  ;;  %v3994_v19 = vmul.f32 %v7015_v6, %v3972_v56 }
 0xad1   : > { %v4016_v42 = vadd.f32 %v7023_v18, %v3994_v19 }
 0xad3   : > { %4032 = vst [vmem:[%s5912_s28 + $0x78] sm:$0xff] %v4016_v42 }
 0xad4 PF: > { %s7184_s15 = sld [smem:[#allocation9_spill]] }
 0xad5   : > { %s7185_s29 = sld [smem:[#allocation6_spill]] }
 0xad6   : > { %s7186_s30 = sld [smem:[#allocation7_spill]] }
 0xad7   : > { %s7188_s16 = sld [smem:[#allocation10_spill]] }
 0xad8   : > { %s7189_s17 = sld [smem:[#allocation11_spill]] }
 0xad9   : > { %s7190_s18 = sld [smem:[#allocation12_spill]] }
 0xada   : > { %s25_s19 = sadd.s32 1, %s7184_s15   ;;  %s7187_s15 = sld [smem:[#allocation8_spill]] }
 0xadb   : > { %p22_p10 = scmp.ge.s32.totalorder %s25_s19, 10  }
 0xadd   :  { %24 = sbr.rel (!%p22_p10) target bundleno = 14 (0xe), region = 156 }

</bundles_post_ra>
